<compile_context>
chip_gen: v5e
topology: v5e:2x2
jax: 0.10.0
libtpu: 0.0.40
codegen_flags: <defaults>
</compile_context>

<pallas_src>
import jax
import jax.numpy as jnp
from jax.experimental import pallas as pl
from jax.experimental.pallas import tpu as pltpu

_EPS = 1e-5
_MXU_DTYPE = jnp.float32   # set to jnp.bfloat16 on v6e/v7x (re-baseline the parity tolerance)
_LANES = 128


def _round_up(x, m):
    return (x + m - 1) // m * m


def _encoder_kernel(x_ref, w1_ref, g1_ref, bt1_ref, w2_ref, g2_ref, bt2_ref,
                    o_ref, pad1_ref, pad2_ref):
    f32 = jnp.float32
    x = x_ref[...].astype(f32)                       # (N, H, W, Cin), channels on lanes
    N, H, W, Cin = x.shape
    Hp, Wp = H // 2, W // 2

    # ---- MaxPool2d(2, stride=2): maxima of even/odd views; lane dim (Cin) never touched ----
    xw = x.reshape(N, H, Wp, 2, Cin)
    xw = jnp.maximum(xw[:, :, :, 0, :], xw[:, :, :, 1, :])      # (N, H, Wp, Cin)
    xh = xw.reshape(N, Hp, 2, Wp, Cin)
    pooled = jnp.maximum(xh[:, :, 0], xh[:, :, 1])              # (N, Hp, Wp, Cin)

    def conv_bn_relu(inp, pad_ref, w_ref, g_ref, bt_ref):
        """Conv2d(k=2, stride=1, pad=1, no bias) -> training-mode BN -> ReLU.

        inp: (n, hi, wi, c) channels-last.  Returns (cout, m_pad) lane-dense, where
        m_pad = round_up(n*ho*wo, 128); columns >= m are padding (garbage after ReLU).
        """
        n, hi, wi, c = inp.shape
        ho, wo = hi + 1, wi + 1
        m = n * ho * wo
        m_pad = _round_up(m, _LANES)
        cout = w_ref.shape[1]

        # Pad-1 staging: one full unmasked zero fill, then the interior write
        # (replaces four width-1 masked border stores).
        pad_ref[...] = jnp.zeros(pad_ref.shape, pad_ref.dtype)
        pad_ref[:, 1:hi + 1, 1:wi + 1, :] = inp

        # im2col: (m, 4c) patch matrix (channels-last keeps every reshape major-dims-only),
        # zero-padded to m_pad rows so all downstream work is lane-dense after the transpose.
        cols = []
        for kh in range(2):
            for kw in range(2):
                win = pad_ref[:, kh:kh + ho, kw:kw + wo, :]      # (n, ho, wo, c)
                cols.append(win.reshape(m, c))                   # lane dim (c) intact
        patches = jnp.concatenate(cols, axis=1)                  # (m, 4c), tap-major columns
        if m_pad > m:
            patches = jnp.concatenate(
                [patches, jnp.zeros((m_pad - m, 4 * c), f32)], axis=0)

        # One MXU matmul (K = 4c).  Conv bias intentionally omitted: a per-channel constant
        # added before training-mode BatchNorm cancels exactly in the mean subtraction
        # (it must be reinstated if eval-mode / running stats are ever used).
        y = jnp.dot(patches.astype(_MXU_DTYPE), w_ref[...].astype(_MXU_DTYPE),
                    preferred_element_type=f32)                  # (m_pad, cout)

        # Lane-dense orientation: channels on sublanes, padded m on the 128-lane axis.
        yt = jnp.transpose(y)                                    # (cout, m_pad)

        # Training-mode BatchNorm2d (biased var), masked two-pass statistics: padded columns
        # are exactly zero so the sum is exact; the variance pass masks them out explicitly.
        inv_m = 1.0 / m
        mean = jnp.sum(yt, axis=1, keepdims=True) * inv_m        # (cout, 1)
        centered = yt - mean
        if m_pad > m:
            lane = jax.lax.broadcasted_iota(jnp.int32, yt.shape, 1)
            centered = jnp.where(lane < m, centered, 0.0)
        var = jnp.sum(centered * centered, axis=1, keepdims=True) * inv_m
        scale = g_ref[...].astype(f32) * jax.lax.rsqrt(var + _EPS)
        shift = bt_ref[...].astype(f32) - mean * scale
        return jnp.maximum(yt * scale + shift, 0.0)              # (cout, m_pad)

    # conv block 1
    H1, W1 = Hp + 1, Wp + 1
    m1 = N * H1 * W1
    Cmid = w1_ref.shape[1]
    z1 = conv_bn_relu(pooled, pad1_ref, w1_ref, g1_ref, bt1_ref)     # (Cmid, m1_pad)
    # hand-off to conv 2: drop padded columns, back to channels-last 4D (lane dim Cmid intact)
    z1_nhwc = jnp.transpose(z1)[:m1, :].reshape(N, H1, W1, Cmid)

    # conv block 2: result is already the kernel's output layout (Cout, M2_pad)
    z2 = conv_bn_relu(z1_nhwc, pad2_ref, w2_ref, g2_ref, bt2_ref)
    o_ref[...] = z2.astype(o_ref.dtype)


def encoder_forward(x_nchw, params):
    """x_nchw: (N, Cin, H, W) float32 -> (N, Cout, H//2 + 2, W//2 + 2) float32."""
    w1, b1, g1, be1, w2, b2, g2, be2 = params
    del b1, b2  # conv biases cancel under training-mode BatchNorm (see kernel comment)
    N, Cin, H, W = x_nchw.shape
    assert H % 2 == 0 and W % 2 == 0, "MaxPool2d(2) floor semantics need cropping for odd sizes"
    Cmid = w1.shape[-1]
    Cout = w2.shape[-1]
    Hp, Wp = H // 2, W // 2
    H1, W1 = Hp + 1, Wp + 1
    Ho, Wo = H1 + 1, W1 + 1
    M2 = N * Ho * Wo
    M2_pad = _round_up(M2, _LANES)

    # Layout plumbing stays in the wrapper: channels-last input, (4*Cin, Cout) im2col weight
    # slabs (tap-major / channel-minor K), BN params as (C, 1) columns for the (C, M) layout.
    x_nhwc = jnp.transpose(x_nchw, (0, 2, 3, 1))
    w1_2d = w1.reshape(4 * Cin, Cmid)
    w2_2d = w2.reshape(4 * Cmid, Cout)
    col = lambda v: v.reshape(-1, 1)

    vmem = pl.BlockSpec(memory_space=pltpu.MemorySpace.VMEM)
    out2d = pl.pallas_call(
        _encoder_kernel,
        out_shape=jax.ShapeDtypeStruct((Cout, M2_pad), jnp.float32),
        in_specs=[vmem] * 7,
        out_specs=vmem,
        scratch_shapes=[
            pltpu.VMEM((N, Hp + 2, Wp + 2, Cin), jnp.float32),   # pad-1 staging, conv 1
            pltpu.VMEM((N, H1 + 2, W1 + 2, Cmid), jnp.float32),  # pad-1 staging, conv 2
        ],
    )(x_nhwc, w1_2d, col(g1), col(be1), w2_2d, col(g2), col(be2))

    # (Cout, M2_pad) -> drop lane padding -> NCHW
    return jnp.transpose(out2d[:, :M2].reshape(Cout, N, Ho, Wo), (1, 0, 2, 3))


def encoder_reference(x_nchw, params):
    """Pure-JAX reference (XLA convs, with conv bias, two-pass BN stats)."""
    w1, b1, g1, be1, w2, b2, g2, be2 = params
    x = jnp.transpose(x_nchw, (0, 2, 3, 1))
    N, H, W, C = x.shape
    pooled = jnp.max(x.reshape(N, H // 2, 2, W // 2, 2, C), axis=(2, 4))

    def conv(inp, w, b):
        y = jax.lax.conv_general_dilated(
            inp, w, window_strides=(1, 1), padding=((1, 1), (1, 1)),
            dimension_numbers=('NHWC', 'HWIO', 'NHWC'))
        return y + b

    def bn_relu(y, g, be):
        mean = jnp.mean(y, axis=(0, 1, 2), keepdims=True)
        var = jnp.mean((y - mean) ** 2, axis=(0, 1, 2), keepdims=True)
        return jnp.maximum((y - mean) * jax.lax.rsqrt(var + _EPS) * g + be, 0.0)

    y1 = bn_relu(conv(pooled, w1, b1), g1, be1)
    y2 = bn_relu(conv(y1, w2, b2), g2, be2)
    return jnp.transpose(y2, (0, 3, 1, 2))


def make_params(key, in_channels, out_channels):
    mid_channels = out_channels  # DoubleConvHelper default
    ks = jax.random.split(key, 8)
    w1 = 0.1 * jax.random.normal(ks[0], (2, 2, in_channels, mid_channels), jnp.float32)
    b1 = 0.1 * jax.random.normal(ks[1], (mid_channels,), jnp.float32)
    g1 = 1.0 + 0.1 * jax.random.normal(ks[2], (mid_channels,), jnp.float32)
    be1 = 0.1 * jax.random.normal(ks[3], (mid_channels,), jnp.float32)
    w2 = 0.1 * jax.random.normal(ks[4], (2, 2, mid_channels, out_channels), jnp.float32)
    b2 = 0.1 * jax.random.normal(ks[5], (out_channels,), jnp.float32)
    g2 = 1.0 + 0.1 * jax.random.normal(ks[6], (out_channels,), jnp.float32)
    be2 = 0.1 * jax.random.normal(ks[7], (out_channels,), jnp.float32)
    return (w1, b1, g1, be1, w2, b2, g2, be2)


if __name__ == "__main__":
    key = jax.random.PRNGKey(0)
    k_x, k_p = jax.random.split(key)

    N, Cin, H, W = 2, 4, 16, 16
    Cout = 8
    x = jax.random.normal(k_x, (N, Cin, H, W), jnp.float32)
    params = make_params(k_p, Cin, Cout)

    out = jax.block_until_ready(encoder_forward(x, params))
    assert out.shape == (N, Cout, H // 2 + 2, W // 2 + 2), out.shape

    ref = jax.block_until_ready(encoder_reference(x, params))
    assert jnp.allclose(out, ref, atol=1e-3, rtol=1e-3), float(jnp.max(jnp.abs(out - ref)))

    print("KERNEL_OK")
</pallas_src>

<mosaic_0001>
module attributes {stable_mosaic.version = 11 : i64} {
  func.func @_encoder_kernel(%arg0: memref<2x16x16x4xf32, #tpu.memory_space<vmem>>, %arg1: memref<16x8xf32, #tpu.memory_space<vmem>>, %arg2: memref<8x1xf32, #tpu.memory_space<vmem>>, %arg3: memref<8x1xf32, #tpu.memory_space<vmem>>, %arg4: memref<32x8xf32, #tpu.memory_space<vmem>>, %arg5: memref<8x1xf32, #tpu.memory_space<vmem>>, %arg6: memref<8x1xf32, #tpu.memory_space<vmem>>, %arg7: memref<8x256xf32, #tpu.memory_space<vmem>>, %arg8: memref<2x10x10x4xf32, #tpu.memory_space<vmem>>, %arg9: memref<2x11x11x8xf32, #tpu.memory_space<vmem>>) attributes {dimension_semantics = [], scalar_prefetch = 0 : i64, scratch_operands = 2 : i64, tpu.core_type = #tpu.core_type<tc>} {
    %c0 = arith.constant 0 : index
    %c0_0 = arith.constant 0 : index
    %c0_1 = arith.constant 0 : index
    %c0_2 = arith.constant 0 : index
    %0 = vector.load %arg0[%c0, %c0_0, %c0_1, %c0_2] : memref<2x16x16x4xf32, #tpu.memory_space<vmem>>, vector<2x16x16x4xf32>
    %1 = vector.shape_cast %0 : vector<2x16x16x4xf32> to vector<2x16x8x2x4xf32>
    %2 = vector.extract_strided_slice %1 {offsets = [0, 0, 0, 0, 0], sizes = [2, 16, 8, 1, 4], strides = [1, 1, 1, 1, 1]} : vector<2x16x8x2x4xf32> to vector<2x16x8x1x4xf32>
    %3 = vector.shape_cast %2 : vector<2x16x8x1x4xf32> to vector<2x16x8x4xf32>
    %4 = vector.extract_strided_slice %1 {offsets = [0, 0, 0, 1, 0], sizes = [2, 16, 8, 1, 4], strides = [1, 1, 1, 1, 1]} : vector<2x16x8x2x4xf32> to vector<2x16x8x1x4xf32>
    %5 = vector.shape_cast %4 : vector<2x16x8x1x4xf32> to vector<2x16x8x4xf32>
    %6 = arith.maximumf %3, %5 : vector<2x16x8x4xf32>
    %7 = vector.shape_cast %6 : vector<2x16x8x4xf32> to vector<2x8x2x8x4xf32>
    %8 = vector.extract_strided_slice %7 {offsets = [0, 0, 0, 0, 0], sizes = [2, 8, 1, 8, 4], strides = [1, 1, 1, 1, 1]} : vector<2x8x2x8x4xf32> to vector<2x8x1x8x4xf32>
    %9 = vector.shape_cast %8 : vector<2x8x1x8x4xf32> to vector<2x8x8x4xf32>
    %10 = vector.extract_strided_slice %7 {offsets = [0, 0, 1, 0, 0], sizes = [2, 8, 1, 8, 4], strides = [1, 1, 1, 1, 1]} : vector<2x8x2x8x4xf32> to vector<2x8x1x8x4xf32>
    %11 = vector.shape_cast %10 : vector<2x8x1x8x4xf32> to vector<2x8x8x4xf32>
    %12 = arith.maximumf %9, %11 : vector<2x8x8x4xf32>
    %cst = arith.constant 0.000000e+00 : f32
    %13 = vector.broadcast %cst : f32 to vector<2x10x10x4xf32>
    %c0_3 = arith.constant 0 : index
    %c0_4 = arith.constant 0 : index
    %c0_5 = arith.constant 0 : index
    %c0_6 = arith.constant 0 : index
    %14 = vector.load %arg8[%c0_3, %c0_4, %c0_5, %c0_6] : memref<2x10x10x4xf32, #tpu.memory_space<vmem>>, vector<2x10x10x4xf32>
    tpu.vector_store %arg8[%c0_3, %c0_4, %c0_5, %c0_6], %13 {strides = array<i32>} : memref<2x10x10x4xf32, #tpu.memory_space<vmem>>, vector<2x10x10x4xf32>,
    %c0_7 = arith.constant 0 : index
    %c1 = arith.constant 1 : index
    %c1_8 = arith.constant 1 : index
    %c0_9 = arith.constant 0 : index
    %15 = vector.load %arg8[%c0_7, %c1, %c1_8, %c0_9] : memref<2x10x10x4xf32, #tpu.memory_space<vmem>>, vector<2x8x8x4xf32>
    tpu.vector_store %arg8[%c0_7, %c1, %c1_8, %c0_9], %12 {strides = array<i32>} : memref<2x10x10x4xf32, #tpu.memory_space<vmem>>, vector<2x8x8x4xf32>,
    %c0_10 = arith.constant 0 : index
    %c0_11 = arith.constant 0 : index
    %c0_12 = arith.constant 0 : index
    %c0_13 = arith.constant 0 : index
    %16 = vector.load %arg8[%c0_10, %c0_11, %c0_12, %c0_13] : memref<2x10x10x4xf32, #tpu.memory_space<vmem>>, vector<2x9x9x4xf32>
    %17 = vector.shape_cast %16 : vector<2x9x9x4xf32> to vector<162x4xf32>
    %c0_14 = arith.constant 0 : index
    %c0_15 = arith.constant 0 : index
    %c1_16 = arith.constant 1 : index
    %c0_17 = arith.constant 0 : index
    %18 = vector.load %arg8[%c0_14, %c0_15, %c1_16, %c0_17] : memref<2x10x10x4xf32, #tpu.memory_space<vmem>>, vector<2x9x9x4xf32>
    %19 = vector.shape_cast %18 : vector<2x9x9x4xf32> to vector<162x4xf32>
    %c0_18 = arith.constant 0 : index
    %c1_19 = arith.constant 1 : index
    %c0_20 = arith.constant 0 : index
    %c0_21 = arith.constant 0 : index
    %20 = vector.load %arg8[%c0_18, %c1_19, %c0_20, %c0_21] : memref<2x10x10x4xf32, #tpu.memory_space<vmem>>, vector<2x9x9x4xf32>
    %21 = vector.shape_cast %20 : vector<2x9x9x4xf32> to vector<162x4xf32>
    %c0_22 = arith.constant 0 : index
    %c1_23 = arith.constant 1 : index
    %c1_24 = arith.constant 1 : index
    %c0_25 = arith.constant 0 : index
    %22 = vector.load %arg8[%c0_22, %c1_23, %c1_24, %c0_25] : memref<2x10x10x4xf32, #tpu.memory_space<vmem>>, vector<2x9x9x4xf32>
    %23 = vector.shape_cast %22 : vector<2x9x9x4xf32> to vector<162x4xf32>
    %24 = tpu.concatenate %17, %19, %21, %23 in 1 : vector<162x4xf32>, vector<162x4xf32>, vector<162x4xf32>, vector<162x4xf32> -> vector<162x16xf32>
    %cst_26 = arith.constant 0.000000e+00 : f32
    %25 = vector.broadcast %cst_26 : f32 to vector<94x16xf32>
    %26 = tpu.concatenate %24, %25 in 0 : vector<162x16xf32>, vector<94x16xf32> -> vector<256x16xf32>
    %c0_27 = arith.constant 0 : index
    %c0_28 = arith.constant 0 : index
    %27 = vector.load %arg1[%c0_27, %c0_28] : memref<16x8xf32, #tpu.memory_space<vmem>>, vector<16x8xf32>
    %cst_29 = arith.constant dense<0.000000e+00> : vector<256x8xf32>
    %28 = tpu.matmul %26, %27, %cst_29 {dimension_numbers = #tpu.dot_dimension_numbers<[1], [0], [0], [1], [0, 0, 1, 1], [], []>} : vector<256x16xf32>, vector<16x8xf32>, vector<256x8xf32> -> vector<256x8xf32>
    %29 = tpu.transpose %28, [1, 0] : vector<256x8xf32> -> vector<8x256xf32>
    %cst_30 = arith.constant dense<0.000000e+00> : vector<8xf32>
    %30 = vector.multi_reduction <add>, %29, %cst_30 [1] : vector<8x256xf32> to vector<8xf32>
    %31 = vector.shape_cast %30 : vector<8xf32> to vector<8x1xf32>
    %cst_31 = arith.constant 0.00617283955 : f32
    %32 = vector.broadcast %cst_31 : f32 to vector<8x1xf32>
    %33 = arith.mulf %31, %32 : vector<8x1xf32>
    %34 = vector.broadcast %33 : vector<8x1xf32> to vector<8x256xf32>
    %35 = arith.subf %29, %34 : vector<8x256xf32>
    %36 = tpu.iota {dimensions = array<i32: 1>} : vector<8x256xi32>
    %c162_i32 = arith.constant 162 : i32
    %37 = vector.broadcast %c162_i32 : i32 to vector<8x256xi32>
    %38 = arith.cmpi slt, %36, %37 : vector<8x256xi32>
    %cst_32 = arith.constant 0.000000e+00 : f32
    %39 = vector.broadcast %cst_32 : f32 to vector<8x256xf32>
    %40 = arith.select %38, %35, %39 : vector<8x256xi1>, vector<8x256xf32>
    %41 = arith.mulf %40, %40 : vector<8x256xf32>
    %cst_33 = arith.constant dense<0.000000e+00> : vector<8xf32>
    %42 = vector.multi_reduction <add>, %41, %cst_33 [1] : vector<8x256xf32> to vector<8xf32>
    %43 = vector.shape_cast %42 : vector<8xf32> to vector<8x1xf32>
    %cst_34 = arith.constant 0.00617283955 : f32
    %44 = vector.broadcast %cst_34 : f32 to vector<8x1xf32>
    %45 = arith.mulf %43, %44 : vector<8x1xf32>
    %c0_35 = arith.constant 0 : index
    %c0_36 = arith.constant 0 : index
    %46 = vector.load %arg2[%c0_35, %c0_36] : memref<8x1xf32, #tpu.memory_space<vmem>>, vector<8x1xf32>
    %cst_37 = arith.constant 9.99999974E-6 : f32
    %47 = vector.broadcast %cst_37 : f32 to vector<8x1xf32>
    %48 = arith.addf %45, %47 : vector<8x1xf32>
    %49 = math.rsqrt %48 : vector<8x1xf32>
    %50 = arith.mulf %46, %49 : vector<8x1xf32>
    %c0_38 = arith.constant 0 : index
    %c0_39 = arith.constant 0 : index
    %51 = vector.load %arg3[%c0_38, %c0_39] : memref<8x1xf32, #tpu.memory_space<vmem>>, vector<8x1xf32>
    %52 = arith.mulf %33, %50 : vector<8x1xf32>
    %53 = arith.subf %51, %52 : vector<8x1xf32>
    %54 = vector.broadcast %50 : vector<8x1xf32> to vector<8x256xf32>
    %55 = arith.mulf %29, %54 : vector<8x256xf32>
    %56 = vector.broadcast %53 : vector<8x1xf32> to vector<8x256xf32>
    %57 = arith.addf %55, %56 : vector<8x256xf32>
    %cst_40 = arith.constant 0.000000e+00 : f32
    %58 = vector.broadcast %cst_40 : f32 to vector<8x256xf32>
    %59 = arith.maximumf %57, %58 : vector<8x256xf32>
    %60 = tpu.transpose %59, [1, 0] : vector<8x256xf32> -> vector<256x8xf32>
    %61 = vector.extract_strided_slice %60 {offsets = [0, 0], sizes = [162, 8], strides = [1, 1]} : vector<256x8xf32> to vector<162x8xf32>
    %62 = vector.shape_cast %61 : vector<162x8xf32> to vector<2x9x9x8xf32>
    %cst_41 = arith.constant 0.000000e+00 : f32
    %63 = vector.broadcast %cst_41 : f32 to vector<2x11x11x8xf32>
    %c0_42 = arith.constant 0 : index
    %c0_43 = arith.constant 0 : index
    %c0_44 = arith.constant 0 : index
    %c0_45 = arith.constant 0 : index
    %64 = vector.load %arg9[%c0_42, %c0_43, %c0_44, %c0_45] : memref<2x11x11x8xf32, #tpu.memory_space<vmem>>, vector<2x11x11x8xf32>
    tpu.vector_store %arg9[%c0_42, %c0_43, %c0_44, %c0_45], %63 {strides = array<i32>} : memref<2x11x11x8xf32, #tpu.memory_space<vmem>>, vector<2x11x11x8xf32>,
    %c0_46 = arith.constant 0 : index
    %c1_47 = arith.constant 1 : index
    %c1_48 = arith.constant 1 : index
    %c0_49 = arith.constant 0 : index
    %65 = vector.load %arg9[%c0_46, %c1_47, %c1_48, %c0_49] : memref<2x11x11x8xf32, #tpu.memory_space<vmem>>, vector<2x9x9x8xf32>
    tpu.vector_store %arg9[%c0_46, %c1_47, %c1_48, %c0_49], %62 {strides = array<i32>} : memref<2x11x11x8xf32, #tpu.memory_space<vmem>>, vector<2x9x9x8xf32>,
    %c0_50 = arith.constant 0 : index
    %c0_51 = arith.constant 0 : index
    %c0_52 = arith.constant 0 : index
    %c0_53 = arith.constant 0 : index
    %66 = vector.load %arg9[%c0_50, %c0_51, %c0_52, %c0_53] : memref<2x11x11x8xf32, #tpu.memory_space<vmem>>, vector<2x10x10x8xf32>
    %67 = vector.shape_cast %66 : vector<2x10x10x8xf32> to vector<200x8xf32>
    %c0_54 = arith.constant 0 : index
    %c0_55 = arith.constant 0 : index
    %c1_56 = arith.constant 1 : index
    %c0_57 = arith.constant 0 : index
    %68 = vector.load %arg9[%c0_54, %c0_55, %c1_56, %c0_57] : memref<2x11x11x8xf32, #tpu.memory_space<vmem>>, vector<2x10x10x8xf32>
    %69 = vector.shape_cast %68 : vector<2x10x10x8xf32> to vector<200x8xf32>
    %c0_58 = arith.constant 0 : index
    %c1_59 = arith.constant 1 : index
    %c0_60 = arith.constant 0 : index
    %c0_61 = arith.constant 0 : index
    %70 = vector.load %arg9[%c0_58, %c1_59, %c0_60, %c0_61] : memref<2x11x11x8xf32, #tpu.memory_space<vmem>>, vector<2x10x10x8xf32>
    %71 = vector.shape_cast %70 : vector<2x10x10x8xf32> to vector<200x8xf32>
    %c0_62 = arith.constant 0 : index
    %c1_63 = arith.constant 1 : index
    %c1_64 = arith.constant 1 : index
    %c0_65 = arith.constant 0 : index
    %72 = vector.load %arg9[%c0_62, %c1_63, %c1_64, %c0_65] : memref<2x11x11x8xf32, #tpu.memory_space<vmem>>, vector<2x10x10x8xf32>
    %73 = vector.shape_cast %72 : vector<2x10x10x8xf32> to vector<200x8xf32>
    %74 = tpu.concatenate %67, %69, %71, %73 in 1 : vector<200x8xf32>, vector<200x8xf32>, vector<200x8xf32>, vector<200x8xf32> -> vector<200x32xf32>
    %cst_66 = arith.constant 0.000000e+00 : f32
    %75 = vector.broadcast %cst_66 : f32 to vector<56x32xf32>
    %76 = tpu.concatenate %74, %75 in 0 : vector<200x32xf32>, vector<56x32xf32> -> vector<256x32xf32>
    %c0_67 = arith.constant 0 : index
    %c0_68 = arith.constant 0 : index
    %77 = vector.load %arg4[%c0_67, %c0_68] : memref<32x8xf32, #tpu.memory_space<vmem>>, vector<32x8xf32>
    %cst_69 = arith.constant dense<0.000000e+00> : vector<256x8xf32>
    %78 = tpu.matmul %76, %77, %cst_69 {dimension_numbers = #tpu.dot_dimension_numbers<[1], [0], [0], [1], [0, 0, 1, 1], [], []>} : vector<256x32xf32>, vector<32x8xf32>, vector<256x8xf32> -> vector<256x8xf32>
    %79 = tpu.transpose %78, [1, 0] : vector<256x8xf32> -> vector<8x256xf32>
    %cst_70 = arith.constant dense<0.000000e+00> : vector<8xf32>
    %80 = vector.multi_reduction <add>, %79, %cst_70 [1] : vector<8x256xf32> to vector<8xf32>
    %81 = vector.shape_cast %80 : vector<8xf32> to vector<8x1xf32>
    %cst_71 = arith.constant 5.000000e-03 : f32
    %82 = vector.broadcast %cst_71 : f32 to vector<8x1xf32>
    %83 = arith.mulf %81, %82 : vector<8x1xf32>
    %84 = vector.broadcast %83 : vector<8x1xf32> to vector<8x256xf32>
    %85 = arith.subf %79, %84 : vector<8x256xf32>
    %86 = tpu.iota {dimensions = array<i32: 1>} : vector<8x256xi32>
    %c200_i32 = arith.constant 200 : i32
    %87 = vector.broadcast %c200_i32 : i32 to vector<8x256xi32>
    %88 = arith.cmpi slt, %86, %87 : vector<8x256xi32>
    %cst_72 = arith.constant 0.000000e+00 : f32
    %89 = vector.broadcast %cst_72 : f32 to vector<8x256xf32>
    %90 = arith.select %88, %85, %89 : vector<8x256xi1>, vector<8x256xf32>
    %91 = arith.mulf %90, %90 : vector<8x256xf32>
    %cst_73 = arith.constant dense<0.000000e+00> : vector<8xf32>
    %92 = vector.multi_reduction <add>, %91, %cst_73 [1] : vector<8x256xf32> to vector<8xf32>
    %93 = vector.shape_cast %92 : vector<8xf32> to vector<8x1xf32>
    %cst_74 = arith.constant 5.000000e-03 : f32
    %94 = vector.broadcast %cst_74 : f32 to vector<8x1xf32>
    %95 = arith.mulf %93, %94 : vector<8x1xf32>
    %c0_75 = arith.constant 0 : index
    %c0_76 = arith.constant 0 : index
    %96 = vector.load %arg5[%c0_75, %c0_76] : memref<8x1xf32, #tpu.memory_space<vmem>>, vector<8x1xf32>
    %cst_77 = arith.constant 9.99999974E-6 : f32
    %97 = vector.broadcast %cst_77 : f32 to vector<8x1xf32>
    %98 = arith.addf %95, %97 : vector<8x1xf32>
    %99 = math.rsqrt %98 : vector<8x1xf32>
    %100 = arith.mulf %96, %99 : vector<8x1xf32>
    %c0_78 = arith.constant 0 : index
    %c0_79 = arith.constant 0 : index
    %101 = vector.load %arg6[%c0_78, %c0_79] : memref<8x1xf32, #tpu.memory_space<vmem>>, vector<8x1xf32>
    %102 = arith.mulf %83, %100 : vector<8x1xf32>
    %103 = arith.subf %101, %102 : vector<8x1xf32>
    %104 = vector.broadcast %100 : vector<8x1xf32> to vector<8x256xf32>
    %105 = arith.mulf %79, %104 : vector<8x256xf32>
    %106 = vector.broadcast %103 : vector<8x1xf32> to vector<8x256xf32>
    %107 = arith.addf %105, %106 : vector<8x256xf32>
    %cst_80 = arith.constant 0.000000e+00 : f32
    %108 = vector.broadcast %cst_80 : f32 to vector<8x256xf32>
    %109 = arith.maximumf %107, %108 : vector<8x256xf32>
    %c0_81 = arith.constant 0 : index
    %c0_82 = arith.constant 0 : index
    %110 = vector.load %arg7[%c0_81, %c0_82] : memref<8x256xf32, #tpu.memory_space<vmem>>, vector<8x256xf32>
    tpu.vector_store %arg7[%c0_81, %c0_82], %109 {strides = array<i32>} : memref<8x256xf32, #tpu.memory_space<vmem>>, vector<8x256xf32>,
    return
  }
}

</mosaic_0001>

<bundles_post_ra>
// kernel: tpu_custom_call.1
= control target key start
LH: loop header
LB: loop body
LE: loop exit
PB: predicated region body
PF: predicated region fallthrough
CT: control target
= control target key end

     0   :  { %s12495_s0 = inlined_call_operand.vmem [shape: f32[2,16,16,4], index: 0, kind: input, shape index: {}]   ;;  %s12496_s1 = inlined_call_operand.vmem [shape: f32[16,8], index: 1, kind: input, shape index: {}]   ;;  %s12497_s2 = inlined_call_operand.vmem [shape: f32[8,1], index: 2, kind: input, shape index: {}]   ;;  %s12498_s3 = inlined_call_operand.vmem [shape: f32[8,1], index: 3, kind: input, shape index: {}]   ;;  %s12499_s4 = inlined_call_operand.vmem [shape: f32[32,8], index: 4, kind: input, shape index: {}]   ;;  %s12500_s5 = inlined_call_operand.vmem [shape: f32[8,1], index: 5, kind: input, shape index: {}]   ;;  %s12501_s6 = inlined_call_operand.vmem [shape: f32[8,1], index: 6, kind: input, shape index: {}]   ;;  %s12502_s7 = inlined_call_operand.hbm [shape: f32[8,256], index: 7, kind: output, shape index: {}]  }
   0x1   :  { %v7019_v0 = vld [vmem:[%s12495_s0] sm:$0xff]  ;;  %v7024_v1 = vld [vmem:[%s12495_s0 + $0x8] sm:$0xff]  ;;  %v7029_v2 = vld [vmem:[%s12495_s0 + $0x10] sm:$0xff] }
   0x2   :  { %v7034_v3 = vld [vmem:[%s12495_s0 + $0x18] sm:$0xff]  ;;  %v7039_v4 = vld [vmem:[%s12495_s0 + $0x20] sm:$0xff]  ;;  %v7044_v5 = vld [vmem:[%s12495_s0 + $0x28] sm:$0xff] }
   0x3   :  { %v7053_v10 = vld [vmem:[%s12495_s0 + $0x30] sm:$0xff]  ;;  %v7062_v15 = vld [vmem:[%s12495_s0 + $0x38] sm:$0xff]  ;;  %v7071_v20 = vld [vmem:[%s12495_s0 + $0x40] sm:$0xff] }
   0x4   :  { %v7076_v21 = vld [vmem:[%s12495_s0 + $0x48] sm:$0xff]  ;;  %v7085_v26 = vld [vmem:[%s12495_s0 + $0x50] sm:$0xff]  ;;  %v7094_v31 = vld [vmem:[%s12495_s0 + $0x58] sm:$0xff] }
   0x5   :  { %v7103_v36 = vld [vmem:[%s12495_s0 + $0x60] sm:$0xff]  ;;  %v7108_v37 = vld [vmem:[%s12495_s0 + $0x68] sm:$0xff]  ;;  %v7117_v42 = vld [vmem:[%s12495_s0 + $0x70] sm:$0xff] }
   0x6   :  { %v7126_v47 = vld [vmem:[%s12495_s0 + $0x78] sm:$0xff]  ;;  %v7135_v52 = vld [vmem:[%s12495_s0 + $0x80] sm:$0xff]  ;;  %v7140_v53 = vld [vmem:[%s12495_s0 + $0x88] sm:$0xff] }
   0x7   :  { %v7149_v58 = vld [vmem:[%s12495_s0 + $0x90] sm:$0xff]  ;;  %v7158_v63 = vld [vmem:[%s12495_s0 + $0x98] sm:$0xff]  ;;  %v7167_v60 = vld [vmem:[%s12495_s0 + $0xa0] sm:$0xff] }
   0x8   :  { %v7172_v62 = vld [vmem:[%s12495_s0 + $0xa8] sm:$0xff]  ;;  %v7181_v54 = vld [vmem:[%s12495_s0 + $0xb0] sm:$0xff]  ;;  %v7190_v57 = vld [vmem:[%s12495_s0 + $0xb8] sm:$0xff] }
   0x9   :  { %v7195_v55 = vld [vmem:[%s12495_s0 + $0xc0] sm:$0xff]  ;;  %v7204_v49 = vld [vmem:[%s12495_s0 + $0xc8] sm:$0xff]  ;;  %v7209_v61 = vld [vmem:[%s12495_s0 + $0xd0] sm:$0xff] }
   0xa   :  { %12 = vsyncpa [#allocation5], 0  ;;  %v7222_v43 = vld [vmem:[%s12495_s0 + $0xd8] sm:$0xff]  ;;  %v7231_v45 = vld [vmem:[%s12495_s0 + $0xe0] sm:$0xff]  ;;  %v12877_v59 = vrot.slane %v7019_v0, 6  ;;  %v12879_v48 = vrot.slane %v7024_v1, 2 }
   0xb   :  { %v7236_v44 = vld [vmem:[%s12495_s0 + $0xe8] sm:$0xff]  ;;  %v7245_v50 = vld [vmem:[%s12495_s0 + $0xf0] sm:$0xff]  ;;  %v7254_v56 = vld [vmem:[%s12495_s0 + $0xf8] sm:$0xff]  ;;  %vm1691_vm0 = vcmask 31744   ;;  %vm1693_vm1 = vcmask 25600   ;;  %vm1989_vm2 = vcmask 1041409  }
   0xc   :  { %v7263_v41 = vld [vmem:[%s12495_s0 + $0x100] sm:$0xff]  ;;  %v7268_v39 = vld [vmem:[%s12495_s0 + $0x108] sm:$0xff]  ;;  %v7277_v38 = vld [vmem:[%s12495_s0 + $0x110] sm:$0xff]  ;;  %v7539_v8 = vrot.slane %v12877_v59, 9  ;;  %vm1991_vm3 = vcmask 1042434   ;;  %vm1993_vm4 = vcmask 1043459  }
   0xd   :  { %v7286_v51 = vld [vmem:[%s12495_s0 + $0x118] sm:$0xff]  ;;  %v7295_v35 = vld [vmem:[%s12495_s0 + $0x120] sm:$0xff]  ;;  %v7300_v33 = vld [vmem:[%s12495_s0 + $0x128] sm:$0xff]  ;;  %vm1995_vm5 = vcmask 1044484   ;;  %vm1997_vm6 = vcmask 1045509   ;;  %vm1999_vm7 = vcmask 1046534  }
   0xe   :  { %v7309_v32 = vld [vmem:[%s12495_s0 + $0x130] sm:$0xff]  ;;  %v7318_v46 = vld [vmem:[%s12495_s0 + $0x138] sm:$0xff]  ;;  %v7327_v30 = vld [vmem:[%s12495_s0 + $0x140] sm:$0xff]  ;;  %12878 = vst [vmem:[#allocation24_spill] sm:$0xff] %v7539_v8  ;;  %vm2001_vm8 = vcmask 1047559   ;;  %s6970_s27 = smov 8  }
   0xf   :  { %v7332_v28 = vld [vmem:[%s12495_s0 + $0x148] sm:$0xff]  ;;  %v7341_v27 = vld [vmem:[%s12495_s0 + $0x150] sm:$0xff]  ;;  %v7350_v40 = vld [vmem:[%s12495_s0 + $0x158] sm:$0xff]  ;;  %s6971_s28 = smov 12   ;;  %vm3924_vm9 = vcmask 64512   ;;  %vm3946_vm10 = vcmask 97280  }
  0x10   :  { %v7359_v25 = vld [vmem:[%s12495_s0 + $0x160] sm:$0xff]  ;;  %v7364_v23 = vld [vmem:[%s12495_s0 + $0x168] sm:$0xff]  ;;  %v7373_v22 = vld [vmem:[%s12495_s0 + $0x170] sm:$0xff]  ;;  %vm3972_vm11 = vcmask 130048   ;;  %vm3968_vm12 = vcmask 1041408   ;;  %s6975_s24 = smov [#allocation4]  }
  0x11   :  { %12858 = vst [vmem:[#allocation7_spill] sm:$0xff] %v7373_v22  ;;  %v7382_v34 = vld [vmem:[%s12495_s0 + $0x178] sm:$0xff]  ;;  %v7391_v19 = vld [vmem:[%s12495_s0 + $0x180] sm:$0xff]  ;;  %v7396_v17 = vld [vmem:[%s12495_s0 + $0x188] sm:$0xff]  ;;  %s6545_s25 = sshll.u32 %s6975_s24, 4  ;;  %s6546_s25 = int_to_ptr.vmem [resolvable:$true] %s6545_s25 }
  0x12   :  { %12859 = vst [vmem:[#allocation8_spill] sm:$0xff] %v7382_v34  ;;  %v7405_v16 = vld [vmem:[%s12495_s0 + $0x190] sm:$0xff]  ;;  %v7414_v29 = vld [vmem:[%s12495_s0 + $0x198] sm:$0xff]  ;;  %v7423_v14 = vld [vmem:[%s12495_s0 + $0x1a0] sm:$0xff] }
  0x13   :  { %12860 = vst [vmem:[#allocation9_spill] sm:$0xff] %v7391_v19  ;;  %v7428_v12 = vld [vmem:[%s12495_s0 + $0x1a8] sm:$0xff]  ;;  %v7437_v11 = vld [vmem:[%s12495_s0 + $0x1b0] sm:$0xff]  ;;  %v7446_v24 = vld [vmem:[%s12495_s0 + $0x1b8] sm:$0xff]  ;;  %v12875_v19 = vrot.slane %v7019_v0, 4 }
  0x14   :  { %12861 = vst [vmem:[#allocation10_spill] sm:$0xff] %v7396_v17  ;;  %v7455_v9 = vld [vmem:[%s12495_s0 + $0x1c0] sm:$0xff]  ;;  %v7460_v7 = vld [vmem:[%s12495_s0 + $0x1c8] sm:$0xff]  ;;  %v7469_v6 = vld [vmem:[%s12495_s0 + $0x1d0] sm:$0xff] }
  0x15   :  { %12862 = vst [vmem:[#allocation11_spill] sm:$0xff] %v7405_v16  ;;  %v7478_v18 = vld [vmem:[%s12495_s0 + $0x1d8] sm:$0xff]  ;;  %v7492_v17 = vld [vmem:[%s12495_s0 + $0x1e8] sm:$0xff]  ;;  %v7544_v16 = vrot.slane %v12879_v48, 9  ;;  %v12889_v48 = vrot.slane %v7029_v2, 6 }
  0x16   :  { %12863 = vst [vmem:[#allocation12_spill] sm:$0xff] %v7414_v29  ;;  %v7487_v29 = vld [vmem:[%s12495_s0 + $0x1e0] sm:$0xff]  ;;  %v7510_v13 = vld [vmem:[%s12495_s0 + $0x1f8] sm:$0xff] }
  0x17   :  { %12864 = vst [vmem:[#allocation13_spill] sm:$0xff] %v7423_v14  ;;  %v7501_v14 = vld [vmem:[%s12495_s0 + $0x1f0] sm:$0xff] }
  0x18   :  { %12865 = vst [vmem:[#allocation14_spill] sm:$0xff] %v7428_v12  ;;  %v12873_v12 = vrot.slane %v7019_v0, 2 }
  0x19   :  { %12866 = vst [vmem:[#allocation15_spill] sm:$0xff] %v7437_v11  ;;  %v12881_v11 = vrot.slane %v7024_v1, 4 }
  0x1a   :  { %12867 = vst [vmem:[#allocation16_spill] sm:$0xff] %v7446_v24 }
  0x1b   :  { %12868 = vst [vmem:[#allocation17_spill] sm:$0xff] %v7455_v9  ;;  %v7548_v24 = vrot.slane %v12881_v11, 9  ;;  %v12887_v9 = vrot.slane %v7029_v2, 4  ;;  %v12899_v11 = vrot.slane %v7039_v4, 4 }
  0x1c   :  { %12869 = vst [vmem:[#allocation18_spill] sm:$0xff] %v7460_v7  ;;  %v7535_v7 = vrot.slane %v12875_v19, 9  ;;  %v12893_v19 = vrot.slane %v7034_v3, 4 }
  0x1d   :  { %12870 = vst [vmem:[#allocation19_spill] sm:$0xff] %v7469_v6  ;;  %v7561_v8 = vrot.slane %v12887_v9, 9  ;;  %v12905_v9 = vrot.slane %v7044_v5, 4 }
  0x1e   :  { %12871 = vst [vmem:[#allocation20_spill] sm:$0xff] %v7487_v29  ;;  %v7531_v29 = vrot.slane %v12873_v12, 9  ;;  %v12883_v12 = vrot.slane %v7024_v1, 6 }
  0x1f   :  { %12872 = vst [vmem:[#allocation21_spill] sm:$0xff] %v7510_v13 }
  0x20   :  { %12874 = vst [vmem:[#allocation22_spill] sm:$0xff] %v7531_v29  ;;  %v7552_v29 = vrot.slane %v12883_v12, 9 }
  0x21   :  { %12876 = vst [vmem:[#allocation23_spill] sm:$0xff] %v7535_v7  ;;  %v12885_v7 = vrot.slane %v7029_v2, 2 }
  0x22   :  { %12880 = vst [vmem:[#allocation25_spill] sm:$0xff] %v7544_v16  ;;  %v7565_v16 = vrot.slane %v12889_v48, 9 }
  0x23   :  { %12882 = vst [vmem:[#allocation26_spill] sm:$0xff] %v7548_v24  ;;  %v7557_v59 = vrot.slane %v12885_v7, 9  ;;  %v12891_v24 = vrot.slane %v7034_v3, 2  ;;  %v12895_v7 = vrot.slane %v7034_v3, 6 }
  0x24   :  { %12884 = vst [vmem:[#allocation27_spill] sm:$0xff] %v7552_v29  ;;  %v7574_v29 = vrot.slane %v12893_v19, 9  ;;  %v12911_v19 = vrot.slane %v7053_v10, 4 }
  0x25   :  { %12886 = vst [vmem:[#allocation28_spill] sm:$0xff] %v7557_v59  ;;  %v7570_v12 = vrot.slane %v12891_v24, 9  ;;  %v7578_v59 = vrot.slane %v12895_v7, 9  ;;  %v12901_v24 = vrot.slane %v7039_v4, 6 }
  0x26   :  { %12888 = vst [vmem:[#allocation29_spill] sm:$0xff] %v7561_v8  ;;  %v12897_v8 = vrot.slane %v7039_v4, 2 }
  0x27   :  { %12890 = vst [vmem:[#allocation30_spill] sm:$0xff] %v7565_v16  ;;  %v7587_v16 = vrot.slane %v12899_v11, 9  ;;  %v12917_v11 = vrot.slane %v7062_v15, 4 }
  0x28   :  { %12892 = vst [vmem:[#allocation31_spill] sm:$0xff] %v7570_v12  ;;  %v7583_v48 = vrot.slane %v12897_v8, 9  ;;  %v7591_v12 = vrot.slane %v12901_v24, 9  ;;  %v12907_v8 = vrot.slane %v7044_v5, 6 }
  0x29   :  { %12894 = vst [vmem:[#allocation32_spill] sm:$0xff] %v7574_v29  ;;  %v12903_v29 = vrot.slane %v7044_v5, 2 }
  0x2a   :  { %12896 = vst [vmem:[#allocation33_spill] sm:$0xff] %v7578_v59  ;;  %v7600_v59 = vrot.slane %v12905_v9, 9  ;;  %v12923_v9 = vrot.slane %v7071_v20, 4 }
  0x2b   :  { %12898 = vst [vmem:[#allocation34_spill] sm:$0xff] %v7583_v48  ;;  %v7596_v7 = vrot.slane %v12903_v29, 9  ;;  %v7604_v48 = vrot.slane %v12907_v8, 9  ;;  %v12913_v29 = vrot.slane %v7053_v10, 6 }
  0x2c   :  { %12900 = vst [vmem:[#allocation35_spill] sm:$0xff] %v7587_v16  ;;  %v12909_v16 = vrot.slane %v7053_v10, 2 }
  0x2d   :  { %12902 = vst [vmem:[#allocation36_spill] sm:$0xff] %v7591_v12  ;;  %v7613_v12 = vrot.slane %v12911_v19, 9  ;;  %v12929_v19 = vrot.slane %v7076_v21, 4 }
  0x2e   :  { %12904 = vst [vmem:[#allocation37_spill] sm:$0xff] %v7596_v7  ;;  %v7609_v24 = vrot.slane %v12909_v16, 9  ;;  %v7617_v7 = vrot.slane %v12913_v29, 9  ;;  %v12919_v16 = vrot.slane %v7062_v15, 6 }
  0x2f   :  { %12906 = vst [vmem:[#allocation38_spill] sm:$0xff] %v7600_v59  ;;  %v12915_v59 = vrot.slane %v7062_v15, 2 }
  0x30   :  { %12908 = vst [vmem:[#allocation39_spill] sm:$0xff] %v7604_v48  ;;  %v7626_v48 = vrot.slane %v12917_v11, 9  ;;  %v12935_v11 = vrot.slane %v7085_v26, 4 }
  0x31   :  { %12910 = vst [vmem:[#allocation40_spill] sm:$0xff] %v7609_v24  ;;  %v7622_v8 = vrot.slane %v12915_v59, 9  ;;  %v7630_v24 = vrot.slane %v12919_v16, 9  ;;  %v12925_v59 = vrot.slane %v7071_v20, 6 }
  0x32   :  { %12912 = vst [vmem:[#allocation41_spill] sm:$0xff] %v7613_v12  ;;  %v12921_v12 = vrot.slane %v7071_v20, 2 }
  0x33   :  { %12914 = vst [vmem:[#allocation42_spill] sm:$0xff] %v7617_v7  ;;  %v7639_v7 = vrot.slane %v12923_v9, 9  ;;  %v12941_v9 = vrot.slane %v7094_v31, 4 }
  0x34   :  { %12916 = vst [vmem:[#allocation43_spill] sm:$0xff] %v7622_v8  ;;  %v7635_v29 = vrot.slane %v12921_v12, 9  ;;  %v7643_v8 = vrot.slane %v12925_v59, 9  ;;  %v12931_v12 = vrot.slane %v7076_v21, 6 }
  0x35   :  { %12918 = vst [vmem:[#allocation44_spill] sm:$0xff] %v7626_v48  ;;  %v12927_v48 = vrot.slane %v7076_v21, 2 }
  0x36   :  { %12920 = vst [vmem:[#allocation45_spill] sm:$0xff] %v7630_v24  ;;  %v7652_v24 = vrot.slane %v12929_v19, 9  ;;  %v12947_v19 = vrot.slane %v7103_v36, 4 }
  0x37   :  { %12922 = vst [vmem:[#allocation46_spill] sm:$0xff] %v7635_v29  ;;  %v7648_v16 = vrot.slane %v12927_v48, 9  ;;  %v7656_v29 = vrot.slane %v12931_v12, 9  ;;  %v12937_v48 = vrot.slane %v7085_v26, 6 }
  0x38   :  { %12924 = vst [vmem:[#allocation47_spill] sm:$0xff] %v7639_v7  ;;  %v12933_v7 = vrot.slane %v7085_v26, 2 }
  0x39   :  { %12926 = vst [vmem:[#allocation48_spill] sm:$0xff] %v7643_v8  ;;  %v7665_v8 = vrot.slane %v12935_v11, 9  ;;  %v12953_v11 = vrot.slane %v7108_v37, 4 }
  0x3a   :  { %12928 = vst [vmem:[#allocation49_spill] sm:$0xff] %v7648_v16  ;;  %v7661_v59 = vrot.slane %v12933_v7, 9  ;;  %v7669_v16 = vrot.slane %v12937_v48, 9  ;;  %v12943_v7 = vrot.slane %v7094_v31, 6 }
  0x3b   :  { %12930 = vst [vmem:[#allocation50_spill] sm:$0xff] %v7652_v24  ;;  %v12939_v24 = vrot.slane %v7094_v31, 2 }
  0x3c   :  { %12932 = vst [vmem:[#allocation51_spill] sm:$0xff] %v7656_v29  ;;  %v7678_v29 = vrot.slane %v12941_v9, 9  ;;  %v12959_v9 = vrot.slane %v7117_v42, 4 }
  0x3d   :  { %12934 = vst [vmem:[#allocation52_spill] sm:$0xff] %v7661_v59  ;;  %v7674_v12 = vrot.slane %v12939_v24, 9  ;;  %v7682_v59 = vrot.slane %v12943_v7, 9  ;;  %v12949_v24 = vrot.slane %v7103_v36, 6 }
  0x3e   :  { %12936 = vst [vmem:[#allocation53_spill] sm:$0xff] %v7665_v8  ;;  %v12945_v8 = vrot.slane %v7103_v36, 2 }
  0x3f   :  { %12938 = vst [vmem:[#allocation54_spill] sm:$0xff] %v7669_v16  ;;  %v7691_v16 = vrot.slane %v12947_v19, 9  ;;  %v12965_v19 = vrot.slane %v7126_v47, 4 }
  0x40   :  { %12940 = vst [vmem:[#allocation55_spill] sm:$0xff] %v7674_v12  ;;  %v7687_v48 = vrot.slane %v12945_v8, 9  ;;  %v7695_v12 = vrot.slane %v12949_v24, 9  ;;  %v12955_v8 = vrot.slane %v7108_v37, 6 }
  0x41   :  { %12942 = vst [vmem:[#allocation56_spill] sm:$0xff] %v7678_v29  ;;  %v12951_v29 = vrot.slane %v7108_v37, 2 }
  0x42   :  { %12944 = vst [vmem:[#allocation57_spill] sm:$0xff] %v7682_v59  ;;  %v7704_v59 = vrot.slane %v12953_v11, 9  ;;  %v12971_v11 = vrot.slane %v7135_v52, 4 }
  0x43   :  { %12946 = vst [vmem:[#allocation58_spill] sm:$0xff] %v7687_v48  ;;  %v7700_v7 = vrot.slane %v12951_v29, 9  ;;  %v7708_v48 = vrot.slane %v12955_v8, 9  ;;  %v12961_v29 = vrot.slane %v7117_v42, 6 }
  0x44   :  { %12948 = vst [vmem:[#allocation59_spill] sm:$0xff] %v7691_v16  ;;  %v12957_v16 = vrot.slane %v7117_v42, 2 }
  0x45   :  { %12950 = vst [vmem:[#allocation60_spill] sm:$0xff] %v7695_v12  ;;  %v7717_v12 = vrot.slane %v12959_v9, 9  ;;  %v12977_v9 = vrot.slane %v7140_v53, 4 }
  0x46   :  { %12952 = vst [vmem:[#allocation61_spill] sm:$0xff] %v7700_v7  ;;  %v7713_v24 = vrot.slane %v12957_v16, 9  ;;  %v7721_v7 = vrot.slane %v12961_v29, 9  ;;  %v12967_v16 = vrot.slane %v7126_v47, 6 }
  0x47   :  { %12954 = vst [vmem:[#allocation62_spill] sm:$0xff] %v7704_v59  ;;  %v12963_v59 = vrot.slane %v7126_v47, 2 }
  0x48   :  { %12956 = vst [vmem:[#allocation63_spill] sm:$0xff] %v7708_v48  ;;  %v7730_v48 = vrot.slane %v12965_v19, 9  ;;  %v12983_v19 = vrot.slane %v7149_v58, 4 }
  0x49   :  { %12958 = vst [vmem:[#allocation64_spill] sm:$0xff] %v7713_v24  ;;  %v7726_v8 = vrot.slane %v12963_v59, 9  ;;  %v7734_v24 = vrot.slane %v12967_v16, 9  ;;  %v12973_v59 = vrot.slane %v7135_v52, 6 }
  0x4a   :  { %12960 = vst [vmem:[#allocation65_spill] sm:$0xff] %v7717_v12  ;;  %v12969_v12 = vrot.slane %v7135_v52, 2 }
  0x4b   :  { %12962 = vst [vmem:[#allocation66_spill] sm:$0xff] %v7721_v7  ;;  %v7743_v7 = vrot.slane %v12971_v11, 9  ;;  %v12989_v11 = vrot.slane %v7158_v63, 4 }
  0x4c   :  { %12964 = vst [vmem:[#allocation67_spill] sm:$0xff] %v7726_v8  ;;  %v7739_v29 = vrot.slane %v12969_v12, 9  ;;  %v7747_v8 = vrot.slane %v12973_v59, 9  ;;  %v12979_v12 = vrot.slane %v7140_v53, 6 }
  0x4d   :  { %12966 = vst [vmem:[#allocation68_spill] sm:$0xff] %v7730_v48  ;;  %v12975_v48 = vrot.slane %v7140_v53, 2 }
  0x4e   :  { %12968 = vst [vmem:[#allocation69_spill] sm:$0xff] %v7734_v24  ;;  %v7756_v24 = vrot.slane %v12977_v9, 9  ;;  %v12995_v9 = vrot.slane %v7167_v60, 4 }
  0x4f   :  { %12970 = vst [vmem:[#allocation70_spill] sm:$0xff] %v7739_v29  ;;  %v7752_v16 = vrot.slane %v12975_v48, 9  ;;  %v7760_v29 = vrot.slane %v12979_v12, 9  ;;  %v12985_v48 = vrot.slane %v7149_v58, 6 }
  0x50   :  { %12972 = vst [vmem:[#allocation71_spill] sm:$0xff] %v7743_v7  ;;  %v12981_v7 = vrot.slane %v7149_v58, 2 }
  0x51   :  { %12974 = vst [vmem:[#allocation72_spill] sm:$0xff] %v7747_v8  ;;  %v7769_v8 = vrot.slane %v12983_v19, 9  ;;  %v13001_v19 = vrot.slane %v7172_v62, 4 }
  0x52   :  { %12976 = vst [vmem:[#allocation73_spill] sm:$0xff] %v7752_v16  ;;  %v7765_v59 = vrot.slane %v12981_v7, 9  ;;  %v7773_v16 = vrot.slane %v12985_v48, 9  ;;  %v12991_v7 = vrot.slane %v7158_v63, 6 }
  0x53   :  { %12978 = vst [vmem:[#allocation74_spill] sm:$0xff] %v7756_v24  ;;  %v12987_v24 = vrot.slane %v7158_v63, 2 }
  0x54   :  { %12980 = vst [vmem:[#allocation75_spill] sm:$0xff] %v7760_v29  ;;  %v7782_v29 = vrot.slane %v12989_v11, 9  ;;  %v13007_v11 = vrot.slane %v7181_v54, 4 }
  0x55   :  { %12982 = vst [vmem:[#allocation76_spill] sm:$0xff] %v7765_v59  ;;  %v7778_v12 = vrot.slane %v12987_v24, 9  ;;  %v7786_v59 = vrot.slane %v12991_v7, 9  ;;  %v12997_v24 = vrot.slane %v7167_v60, 6 }
  0x56   :  { %12984 = vst [vmem:[#allocation77_spill] sm:$0xff] %v7769_v8  ;;  %v12993_v8 = vrot.slane %v7167_v60, 2 }
  0x57   :  { %12986 = vst [vmem:[#allocation78_spill] sm:$0xff] %v7773_v16  ;;  %v7795_v16 = vrot.slane %v12995_v9, 9  ;;  %v13013_v9 = vrot.slane %v7190_v57, 4 }
  0x58   :  { %12988 = vst [vmem:[#allocation79_spill] sm:$0xff] %v7778_v12  ;;  %v7791_v48 = vrot.slane %v12993_v8, 9  ;;  %v7799_v12 = vrot.slane %v12997_v24, 9  ;;  %v13003_v8 = vrot.slane %v7172_v62, 6 }
  0x59   :  { %12990 = vst [vmem:[#allocation80_spill] sm:$0xff] %v7782_v29  ;;  %v12999_v29 = vrot.slane %v7172_v62, 2 }
  0x5a   :  { %12992 = vst [vmem:[#allocation81_spill] sm:$0xff] %v7786_v59  ;;  %v7808_v59 = vrot.slane %v13001_v19, 9  ;;  %v13019_v19 = vrot.slane %v7195_v55, 4 }
  0x5b   :  { %12994 = vst [vmem:[#allocation82_spill] sm:$0xff] %v7791_v48  ;;  %v7804_v7 = vrot.slane %v12999_v29, 9  ;;  %v7812_v48 = vrot.slane %v13003_v8, 9  ;;  %v13009_v29 = vrot.slane %v7181_v54, 6 }
  0x5c   :  { %12996 = vst [vmem:[#allocation83_spill] sm:$0xff] %v7795_v16  ;;  %v13005_v16 = vrot.slane %v7181_v54, 2 }
  0x5d   :  { %12998 = vst [vmem:[#allocation84_spill] sm:$0xff] %v7799_v12  ;;  %v7821_v12 = vrot.slane %v13007_v11, 9  ;;  %v13025_v11 = vrot.slane %v7204_v49, 4 }
  0x5e   :  { %13000 = vst [vmem:[#allocation85_spill] sm:$0xff] %v7804_v7  ;;  %v7817_v24 = vrot.slane %v13005_v16, 9  ;;  %v7825_v7 = vrot.slane %v13009_v29, 9  ;;  %v13015_v16 = vrot.slane %v7190_v57, 6 }
  0x5f   :  { %13002 = vst [vmem:[#allocation86_spill] sm:$0xff] %v7808_v59  ;;  %v13011_v59 = vrot.slane %v7190_v57, 2 }
  0x60   :  { %13004 = vst [vmem:[#allocation87_spill] sm:$0xff] %v7812_v48  ;;  %v7834_v48 = vrot.slane %v13013_v9, 9  ;;  %v13031_v9 = vrot.slane %v7209_v61, 4 }
  0x61   :  { %13006 = vst [vmem:[#allocation88_spill] sm:$0xff] %v7817_v24  ;;  %v7830_v8 = vrot.slane %v13011_v59, 9  ;;  %v7838_v24 = vrot.slane %v13015_v16, 9  ;;  %v13021_v59 = vrot.slane %v7195_v55, 6 }
  0x62   :  { %13008 = vst [vmem:[#allocation89_spill] sm:$0xff] %v7821_v12  ;;  %v13017_v12 = vrot.slane %v7195_v55, 2 }
  0x63   :  { %13010 = vst [vmem:[#allocation90_spill] sm:$0xff] %v7825_v7  ;;  %v7847_v7 = vrot.slane %v13019_v19, 9  ;;  %v13037_v19 = vrot.slane %v7222_v43, 4 }
  0x64   :  { %13012 = vst [vmem:[#allocation91_spill] sm:$0xff] %v7830_v8  ;;  %v7843_v29 = vrot.slane %v13017_v12, 9  ;;  %v7851_v8 = vrot.slane %v13021_v59, 9  ;;  %v13027_v12 = vrot.slane %v7204_v49, 6 }
  0x65   :  { %13014 = vst [vmem:[#allocation92_spill] sm:$0xff] %v7834_v48  ;;  %v13023_v48 = vrot.slane %v7204_v49, 2 }
  0x66   :  { %13016 = vst [vmem:[#allocation93_spill] sm:$0xff] %v7838_v24  ;;  %v7860_v24 = vrot.slane %v13025_v11, 9  ;;  %v13043_v11 = vrot.slane %v7231_v45, 4 }
  0x67   :  { %13018 = vst [vmem:[#allocation94_spill] sm:$0xff] %v7843_v29  ;;  %v7856_v16 = vrot.slane %v13023_v48, 9  ;;  %v7864_v29 = vrot.slane %v13027_v12, 9  ;;  %v13033_v48 = vrot.slane %v7209_v61, 6 }
  0x68   :  { %13020 = vst [vmem:[#allocation95_spill] sm:$0xff] %v7847_v7  ;;  %v13029_v7 = vrot.slane %v7209_v61, 2 }
  0x69   :  { %13022 = vst [vmem:[#allocation96_spill] sm:$0xff] %v7851_v8  ;;  %v7873_v8 = vrot.slane %v13031_v9, 9  ;;  %v13049_v9 = vrot.slane %v7236_v44, 4 }
  0x6a   :  { %13024 = vst [vmem:[#allocation97_spill] sm:$0xff] %v7856_v16  ;;  %v7869_v59 = vrot.slane %v13029_v7, 9  ;;  %v7877_v16 = vrot.slane %v13033_v48, 9  ;;  %v13039_v7 = vrot.slane %v7222_v43, 6 }
  0x6b   :  { %13026 = vst [vmem:[#allocation98_spill] sm:$0xff] %v7860_v24  ;;  %v13035_v24 = vrot.slane %v7222_v43, 2 }
  0x6c   :  { %13028 = vst [vmem:[#allocation99_spill] sm:$0xff] %v7864_v29  ;;  %v7886_v29 = vrot.slane %v13037_v19, 9  ;;  %v13055_v19 = vrot.slane %v7245_v50, 4 }
  0x6d   :  { %13030 = vst [vmem:[#allocation100_spill] sm:$0xff] %v7869_v59  ;;  %v7882_v12 = vrot.slane %v13035_v24, 9  ;;  %v7890_v59 = vrot.slane %v13039_v7, 9  ;;  %v13045_v24 = vrot.slane %v7231_v45, 6 }
  0x6e   :  { %13032 = vst [vmem:[#allocation101_spill] sm:$0xff] %v7873_v8  ;;  %v13041_v8 = vrot.slane %v7231_v45, 2 }
  0x6f   :  { %13034 = vst [vmem:[#allocation102_spill] sm:$0xff] %v7877_v16  ;;  %v7899_v16 = vrot.slane %v13043_v11, 9  ;;  %v13061_v11 = vrot.slane %v7254_v56, 4 }
  0x70   :  { %13036 = vst [vmem:[#allocation103_spill] sm:$0xff] %v7882_v12  ;;  %v7895_v48 = vrot.slane %v13041_v8, 9  ;;  %v7903_v12 = vrot.slane %v13045_v24, 9  ;;  %v13051_v8 = vrot.slane %v7236_v44, 6 }
  0x71   :  { %13038 = vst [vmem:[#allocation104_spill] sm:$0xff] %v7886_v29  ;;  %v13047_v29 = vrot.slane %v7236_v44, 2 }
  0x72   :  { %13040 = vst [vmem:[#allocation105_spill] sm:$0xff] %v7890_v59  ;;  %v7912_v59 = vrot.slane %v13049_v9, 9  ;;  %v13067_v9 = vrot.slane %v7263_v41, 4 }
  0x73   :  { %13042 = vst [vmem:[#allocation106_spill] sm:$0xff] %v7895_v48  ;;  %v7908_v7 = vrot.slane %v13047_v29, 9  ;;  %v7916_v48 = vrot.slane %v13051_v8, 9  ;;  %v13057_v29 = vrot.slane %v7245_v50, 6 }
  0x74   :  { %13044 = vst [vmem:[#allocation107_spill] sm:$0xff] %v7899_v16  ;;  %v13053_v16 = vrot.slane %v7245_v50, 2 }
  0x75   :  { %13046 = vst [vmem:[#allocation108_spill] sm:$0xff] %v7903_v12  ;;  %v7925_v12 = vrot.slane %v13055_v19, 9  ;;  %v13073_v19 = vrot.slane %v7268_v39, 4 }
  0x76   :  { %13048 = vst [vmem:[#allocation109_spill] sm:$0xff] %v7908_v7  ;;  %v7921_v24 = vrot.slane %v13053_v16, 9  ;;  %v7929_v7 = vrot.slane %v13057_v29, 9  ;;  %v13063_v16 = vrot.slane %v7254_v56, 6 }
  0x77   :  { %13050 = vst [vmem:[#allocation110_spill] sm:$0xff] %v7912_v59  ;;  %v13059_v59 = vrot.slane %v7254_v56, 2 }
  0x78   :  { %13052 = vst [vmem:[#allocation111_spill] sm:$0xff] %v7916_v48  ;;  %v7938_v48 = vrot.slane %v13061_v11, 9  ;;  %v13079_v11 = vrot.slane %v7277_v38, 4 }
  0x79   :  { %13054 = vst [vmem:[#allocation112_spill] sm:$0xff] %v7921_v24  ;;  %v7934_v8 = vrot.slane %v13059_v59, 9  ;;  %v7942_v24 = vrot.slane %v13063_v16, 9  ;;  %v13069_v59 = vrot.slane %v7263_v41, 6 }
  0x7a   :  { %13056 = vst [vmem:[#allocation113_spill] sm:$0xff] %v7925_v12  ;;  %v13065_v12 = vrot.slane %v7263_v41, 2 }
  0x7b   :  { %13058 = vst [vmem:[#allocation114_spill] sm:$0xff] %v7929_v7  ;;  %v7951_v7 = vrot.slane %v13067_v9, 9  ;;  %v13085_v9 = vrot.slane %v7286_v51, 4 }
  0x7c   :  { %13060 = vst [vmem:[#allocation115_spill] sm:$0xff] %v7934_v8  ;;  %v7947_v29 = vrot.slane %v13065_v12, 9  ;;  %v7955_v8 = vrot.slane %v13069_v59, 9  ;;  %v13075_v12 = vrot.slane %v7268_v39, 6 }
  0x7d   :  { %13062 = vst [vmem:[#allocation116_spill] sm:$0xff] %v7938_v48  ;;  %v13071_v48 = vrot.slane %v7268_v39, 2 }
  0x7e   :  { %13064 = vst [vmem:[#allocation117_spill] sm:$0xff] %v7942_v24  ;;  %v7964_v24 = vrot.slane %v13073_v19, 9  ;;  %v13091_v19 = vrot.slane %v7295_v35, 4 }
  0x7f   :  { %13066 = vst [vmem:[#allocation118_spill] sm:$0xff] %v7947_v29  ;;  %v7960_v16 = vrot.slane %v13071_v48, 9  ;;  %v7968_v29 = vrot.slane %v13075_v12, 9  ;;  %v13081_v48 = vrot.slane %v7277_v38, 6 }
  0x80   :  { %13068 = vst [vmem:[#allocation119_spill] sm:$0xff] %v7951_v7  ;;  %v13077_v7 = vrot.slane %v7277_v38, 2 }
  0x81   :  { %13070 = vst [vmem:[#allocation120_spill] sm:$0xff] %v7955_v8  ;;  %v7977_v8 = vrot.slane %v13079_v11, 9  ;;  %v13097_v11 = vrot.slane %v7300_v33, 4 }
  0x82   :  { %13072 = vst [vmem:[#allocation121_spill] sm:$0xff] %v7960_v16  ;;  %v7973_v59 = vrot.slane %v13077_v7, 9  ;;  %v7981_v16 = vrot.slane %v13081_v48, 9  ;;  %v13087_v7 = vrot.slane %v7286_v51, 6 }
  0x83   :  { %13074 = vst [vmem:[#allocation122_spill] sm:$0xff] %v7964_v24  ;;  %v13083_v24 = vrot.slane %v7286_v51, 2 }
  0x84   :  { %13076 = vst [vmem:[#allocation123_spill] sm:$0xff] %v7968_v29  ;;  %v7990_v29 = vrot.slane %v13085_v9, 9  ;;  %v13103_v9 = vrot.slane %v7309_v32, 4 }
  0x85   :  { %13078 = vst [vmem:[#allocation124_spill] sm:$0xff] %v7973_v59  ;;  %v7986_v12 = vrot.slane %v13083_v24, 9  ;;  %v7994_v59 = vrot.slane %v13087_v7, 9  ;;  %v13093_v24 = vrot.slane %v7295_v35, 6 }
  0x86   :  { %13080 = vst [vmem:[#allocation125_spill] sm:$0xff] %v7977_v8  ;;  %v13089_v8 = vrot.slane %v7295_v35, 2 }
  0x87   :  { %13082 = vst [vmem:[#allocation126_spill] sm:$0xff] %v7981_v16  ;;  %v8003_v16 = vrot.slane %v13091_v19, 9  ;;  %v13109_v19 = vrot.slane %v7318_v46, 4 }
  0x88   :  { %13084 = vst [vmem:[#allocation127_spill] sm:$0xff] %v7986_v12  ;;  %v7999_v48 = vrot.slane %v13089_v8, 9  ;;  %v8007_v12 = vrot.slane %v13093_v24, 9  ;;  %v13099_v8 = vrot.slane %v7300_v33, 6 }
  0x89   :  { %13086 = vst [vmem:[#allocation128_spill] sm:$0xff] %v7990_v29  ;;  %v13095_v29 = vrot.slane %v7300_v33, 2 }
  0x8a   :  { %13088 = vst [vmem:[#allocation129_spill] sm:$0xff] %v7994_v59  ;;  %v8016_v59 = vrot.slane %v13097_v11, 9  ;;  %v13115_v11 = vrot.slane %v7327_v30, 4 }
  0x8b   :  { %13090 = vst [vmem:[#allocation130_spill] sm:$0xff] %v7999_v48  ;;  %v8012_v7 = vrot.slane %v13095_v29, 9  ;;  %v8020_v48 = vrot.slane %v13099_v8, 9  ;;  %v13105_v29 = vrot.slane %v7309_v32, 6 }
  0x8c   :  { %13092 = vst [vmem:[#allocation131_spill] sm:$0xff] %v8003_v16  ;;  %v13101_v16 = vrot.slane %v7309_v32, 2 }
  0x8d   :  { %13094 = vst [vmem:[#allocation132_spill] sm:$0xff] %v8007_v12  ;;  %v8029_v12 = vrot.slane %v13103_v9, 9  ;;  %v13121_v9 = vrot.slane %v7332_v28, 4 }
  0x8e   :  { %13096 = vst [vmem:[#allocation133_spill] sm:$0xff] %v8012_v7  ;;  %v8025_v24 = vrot.slane %v13101_v16, 9  ;;  %v8033_v7 = vrot.slane %v13105_v29, 9  ;;  %v13111_v16 = vrot.slane %v7318_v46, 6 }
  0x8f   :  { %13098 = vst [vmem:[#allocation134_spill] sm:$0xff] %v8016_v59  ;;  %v13107_v59 = vrot.slane %v7318_v46, 2 }
  0x90   :  { %13100 = vst [vmem:[#allocation135_spill] sm:$0xff] %v8020_v48  ;;  %v8042_v48 = vrot.slane %v13109_v19, 9  ;;  %v13127_v19 = vrot.slane %v7341_v27, 4 }
  0x91   :  { %13102 = vst [vmem:[#allocation136_spill] sm:$0xff] %v8025_v24  ;;  %v8038_v8 = vrot.slane %v13107_v59, 9  ;;  %v8046_v24 = vrot.slane %v13111_v16, 9  ;;  %v13117_v59 = vrot.slane %v7327_v30, 6 }
  0x92   :  { %13104 = vst [vmem:[#allocation137_spill] sm:$0xff] %v8029_v12  ;;  %v13113_v12 = vrot.slane %v7327_v30, 2 }
  0x93   :  { %13106 = vst [vmem:[#allocation138_spill] sm:$0xff] %v8033_v7  ;;  %v8055_v7 = vrot.slane %v13115_v11, 9  ;;  %v13133_v11 = vrot.slane %v7350_v40, 4 }
  0x94   :  { %13108 = vst [vmem:[#allocation139_spill] sm:$0xff] %v8038_v8  ;;  %v8051_v29 = vrot.slane %v13113_v12, 9  ;;  %v8059_v8 = vrot.slane %v13117_v59, 9  ;;  %v13123_v12 = vrot.slane %v7332_v28, 6 }
  0x95   :  { %13110 = vst [vmem:[#allocation140_spill] sm:$0xff] %v8042_v48  ;;  %v13119_v48 = vrot.slane %v7332_v28, 2 }
  0x96   :  { %13112 = vst [vmem:[#allocation141_spill] sm:$0xff] %v8046_v24  ;;  %v8068_v24 = vrot.slane %v13121_v9, 9  ;;  %v13139_v9 = vrot.slane %v7359_v25, 4 }
  0x97   :  { %13114 = vst [vmem:[#allocation142_spill] sm:$0xff] %v8051_v29  ;;  %v8064_v16 = vrot.slane %v13119_v48, 9  ;;  %v8072_v29 = vrot.slane %v13123_v12, 9  ;;  %v13129_v48 = vrot.slane %v7341_v27, 6 }
  0x98   :  { %13116 = vst [vmem:[#allocation143_spill] sm:$0xff] %v8055_v7  ;;  %v13125_v7 = vrot.slane %v7341_v27, 2 }
  0x99   :  { %13118 = vst [vmem:[#allocation144_spill] sm:$0xff] %v8059_v8  ;;  %v8081_v8 = vrot.slane %v13127_v19, 9  ;;  %v13145_v19 = vrot.slane %v7364_v23, 4 }
  0x9a   :  { %13120 = vst [vmem:[#allocation145_spill] sm:$0xff] %v8064_v16  ;;  %v8077_v59 = vrot.slane %v13125_v7, 9  ;;  %v8085_v16 = vrot.slane %v13129_v48, 9  ;;  %v13135_v7 = vrot.slane %v7350_v40, 6 }
  0x9b   :  { %13122 = vst [vmem:[#allocation146_spill] sm:$0xff] %v8068_v24  ;;  %v13131_v24 = vrot.slane %v7350_v40, 2 }
  0x9c   :  { %13124 = vst [vmem:[#allocation147_spill] sm:$0xff] %v8072_v29  ;;  %v8094_v29 = vrot.slane %v13133_v11, 9  ;;  %v13151_v11 = vrot.slane %v7373_v22, 4 }
  0x9d   :  { %13126 = vst [vmem:[#allocation148_spill] sm:$0xff] %v8077_v59  ;;  %v8090_v12 = vrot.slane %v13131_v24, 9  ;;  %v8098_v59 = vrot.slane %v13135_v7, 9  ;;  %v13141_v24 = vrot.slane %v7359_v25, 6 }
  0x9e   :  { %13128 = vst [vmem:[#allocation149_spill] sm:$0xff] %v8081_v8  ;;  %v13137_v8 = vrot.slane %v7359_v25, 2 }
  0x9f   :  { %13130 = vst [vmem:[#allocation150_spill] sm:$0xff] %v8085_v16  ;;  %v8107_v16 = vrot.slane %v13139_v9, 9  ;;  %v13157_v9 = vrot.slane %v7382_v34, 4 }
  0xa0   :  { %13132 = vst [vmem:[#allocation151_spill] sm:$0xff] %v8090_v12  ;;  %v8103_v48 = vrot.slane %v13137_v8, 9  ;;  %v8111_v12 = vrot.slane %v13141_v24, 9  ;;  %v13147_v8 = vrot.slane %v7364_v23, 6 }
  0xa1   :  { %13134 = vst [vmem:[#allocation152_spill] sm:$0xff] %v8094_v29  ;;  %v13143_v29 = vrot.slane %v7364_v23, 2 }
  0xa2   :  { %13136 = vst [vmem:[#allocation153_spill] sm:$0xff] %v8098_v59  ;;  %v8120_v59 = vrot.slane %v13145_v19, 9 }
  0xa3   :  { %13138 = vst [vmem:[#allocation154_spill] sm:$0xff] %v8103_v48  ;;  %v8116_v7 = vrot.slane %v13143_v29, 9  ;;  %v8124_v48 = vrot.slane %v13147_v8, 9  ;;  %v13153_v29 = vrot.slane %v7373_v22, 6 }
  0xa4   :  { %13140 = vst [vmem:[#allocation155_spill] sm:$0xff] %v8107_v16  ;;  %v13149_v16 = vrot.slane %v7373_v22, 2 }
  0xa5   :  { %13142 = vst [vmem:[#allocation156_spill] sm:$0xff] %v8111_v12  ;;  %v8133_v12 = vrot.slane %v13151_v11, 9  ;;  %v13161_v11 = vld [vmem:[#allocation9_spill] sm:$0xff] }
  0xa6   :  { %13144 = vst [vmem:[#allocation157_spill] sm:$0xff] %v8116_v7  ;;  %v8129_v24 = vrot.slane %v13149_v16, 9  ;;  %v8137_v7 = vrot.slane %v13153_v29, 9  ;;  %v13159_v16 = vrot.slane %v7382_v34, 6  ;;  %v13162_v22 = vrot.slane %v13161_v11, 2 }
  0xa7   :  { %13146 = vst [vmem:[#allocation158_spill] sm:$0xff] %v8120_v59  ;;  %v13155_v59 = vrot.slane %v7382_v34, 2  ;;  %v13164_v19 = vrot.slane %v13161_v11, 4 }
  0xa8   :  { %13148 = vst [vmem:[#allocation159_spill] sm:$0xff] %v8124_v48  ;;  %v8146_v48 = vrot.slane %v13157_v9, 9  ;;  %v8155_v29 = vrot.slane %v13162_v22, 9  ;;  %v13168_v9 = vld [vmem:[#allocation10_spill] sm:$0xff] }
  0xa9   :  { %13150 = vst [vmem:[#allocation160_spill] sm:$0xff] %v8129_v24  ;;  %v8142_v8 = vrot.slane %v13155_v59, 9  ;;  %v8150_v24 = vrot.slane %v13159_v16, 9  ;;  %v13166_v59 = vrot.slane %v13161_v11, 6  ;;  %v13169_v34 = vrot.slane %v13168_v9, 2 }
  0xaa   :  { %13152 = vst [vmem:[#allocation161_spill] sm:$0xff] %v8133_v12  ;;  %v13171_v12 = vrot.slane %v13168_v9, 4  ;;  %v13173_v22 = vrot.slane %v13168_v9, 6 }
  0xab   :  { %13154 = vst [vmem:[#allocation162_spill] sm:$0xff] %v8137_v7  ;;  %v8159_v7 = vrot.slane %v13164_v19, 9  ;;  %v8168_v16 = vrot.slane %v13169_v34, 9  ;;  %v13175_v19 = vld [vmem:[#allocation11_spill] sm:$0xff] }
  0xac   :  { %13156 = vst [vmem:[#allocation163_spill] sm:$0xff] %v8142_v8  ;;  %v8163_v8 = vrot.slane %v13166_v59, 9  ;;  %v13176_v11 = vrot.slane %v13175_v19, 2  ;;  %v13180_v34 = vrot.slane %v13175_v19, 6 }
  0xad   :  { %13158 = vst [vmem:[#allocation164_spill] sm:$0xff] %v8146_v48  ;;  %v13178_v48 = vrot.slane %v13175_v19, 4 }
  0xae   :  { %13160 = vst [vmem:[#allocation165_spill] sm:$0xff] %v8150_v24  ;;  %v8172_v24 = vrot.slane %v13171_v12, 9  ;;  %v8181_v59 = vrot.slane %v13176_v11, 9  ;;  %v13182_v12 = vld [vmem:[#allocation12_spill] sm:$0xff] }
  0xaf   :  { %13163 = vst [vmem:[#allocation166_spill] sm:$0xff] %v8155_v29  ;;  %v8176_v29 = vrot.slane %v13173_v22, 9  ;;  %v13183_v9 = vrot.slane %v13182_v12, 2  ;;  %v13187_v11 = vrot.slane %v13182_v12, 6 }
  0xb0   :  { %13165 = vst [vmem:[#allocation167_spill] sm:$0xff] %v8159_v7  ;;  %v13185_v7 = vrot.slane %v13182_v12, 4 }
  0xb1   :  { %13167 = vst [vmem:[#allocation168_spill] sm:$0xff] %v8163_v8  ;;  %v8185_v8 = vrot.slane %v13178_v48, 9  ;;  %v8194_v22 = vrot.slane %v13183_v9, 9  ;;  %v13189_v48 = vld [vmem:[#allocation13_spill] sm:$0xff] }
  0xb2   :  { %13170 = vst [vmem:[#allocation169_spill] sm:$0xff] %v8168_v16  ;;  %v8189_v16 = vrot.slane %v13180_v34, 9  ;;  %v13190_v19 = vrot.slane %v13189_v48, 2  ;;  %v13194_v9 = vrot.slane %v13189_v48, 6 }
  0xb3   :  { %13172 = vst [vmem:[#allocation170_spill] sm:$0xff] %v8172_v24  ;;  %v13192_v24 = vrot.slane %v13189_v48, 4 }
  0xb4   :  { %13174 = vst [vmem:[#allocation171_spill] sm:$0xff] %v8176_v29  ;;  %v8198_v29 = vrot.slane %v13185_v7, 9  ;;  %v8207_v34 = vrot.slane %v13190_v19, 9  ;;  %v13196_v7 = vld [vmem:[#allocation14_spill] sm:$0xff] }
  0xb5   :  { %13177 = vst [vmem:[#allocation172_spill] sm:$0xff] %v8181_v59  ;;  %v8202_v59 = vrot.slane %v13187_v11, 9  ;;  %v13197_v12 = vrot.slane %v13196_v7, 2  ;;  %v13201_v19 = vrot.slane %v13196_v7, 6 }
  0xb6   :  { %13179 = vst [vmem:[#allocation173_spill] sm:$0xff] %v8185_v8  ;;  %v13199_v8 = vrot.slane %v13196_v7, 4 }
  0xb7   :  { %13181 = vst [vmem:[#allocation174_spill] sm:$0xff] %v8189_v16  ;;  %v8211_v16 = vrot.slane %v13192_v24, 9  ;;  %v8220_v11 = vrot.slane %v13197_v12, 9  ;;  %v13203_v24 = vld [vmem:[#allocation15_spill] sm:$0xff] }
  0xb8   :  { %13184 = vst [vmem:[#allocation175_spill] sm:$0xff] %v8194_v22  ;;  %v8215_v22 = vrot.slane %v13194_v9, 9  ;;  %v13204_v48 = vrot.slane %v13203_v24, 2  ;;  %v13208_v12 = vrot.slane %v13203_v24, 6 }
  0xb9   :  { %13186 = vst [vmem:[#allocation176_spill] sm:$0xff] %v8198_v29  ;;  %v13206_v29 = vrot.slane %v13203_v24, 4 }
  0xba   :  { %13188 = vst [vmem:[#allocation177_spill] sm:$0xff] %v8202_v59  ;;  %v8224_v59 = vrot.slane %v13199_v8, 9  ;;  %v8233_v9 = vrot.slane %v13204_v48, 9  ;;  %v13210_v8 = vld [vmem:[#allocation16_spill] sm:$0xff] }
  0xbb   :  { %13191 = vst [vmem:[#allocation178_spill] sm:$0xff] %v8207_v34  ;;  %v8228_v34 = vrot.slane %v13201_v19, 9  ;;  %v13211_v7 = vrot.slane %v13210_v8, 2  ;;  %v13215_v48 = vrot.slane %v13210_v8, 6 }
  0xbc   :  { %13193 = vst [vmem:[#allocation179_spill] sm:$0xff] %v8211_v16  ;;  %v13213_v16 = vrot.slane %v13210_v8, 4 }
  0xbd   :  { %13195 = vst [vmem:[#allocation180_spill] sm:$0xff] %v8215_v22  ;;  %v8237_v22 = vrot.slane %v13206_v29, 9  ;;  %v8246_v19 = vrot.slane %v13211_v7, 9  ;;  %v13217_v29 = vld [vmem:[#allocation17_spill] sm:$0xff] }
  0xbe   :  { %13198 = vst [vmem:[#allocation181_spill] sm:$0xff] %v8220_v11  ;;  %v8241_v11 = vrot.slane %v13208_v12, 9  ;;  %v13218_v24 = vrot.slane %v13217_v29, 2  ;;  %v13222_v7 = vrot.slane %v13217_v29, 6 }
  0xbf   :  { %13200 = vst [vmem:[#allocation182_spill] sm:$0xff] %v8224_v59  ;;  %v13220_v59 = vrot.slane %v13217_v29, 4 }
  0xc0   :  { %13202 = vst [vmem:[#allocation183_spill] sm:$0xff] %v8228_v34  ;;  %v8250_v34 = vrot.slane %v13213_v16, 9  ;;  %v8259_v12 = vrot.slane %v13218_v24, 9  ;;  %v13224_v16 = vld [vmem:[#allocation18_spill] sm:$0xff] }
  0xc1   :  { %13205 = vst [vmem:[#allocation184_spill] sm:$0xff] %v8233_v9  ;;  %v8254_v9 = vrot.slane %v13215_v48, 9  ;;  %v13225_v8 = vrot.slane %v13224_v16, 2  ;;  %v13229_v24 = vrot.slane %v13224_v16, 6 }
  0xc2   :  { %13207 = vst [vmem:[#allocation185_spill] sm:$0xff] %v8237_v22  ;;  %v13227_v22 = vrot.slane %v13224_v16, 4 }
  0xc3   :  { %13209 = vst [vmem:[#allocation186_spill] sm:$0xff] %v8241_v11  ;;  %v8263_v11 = vrot.slane %v13220_v59, 9  ;;  %v8272_v48 = vrot.slane %v13225_v8, 9  ;;  %v13235_v8 = vrot.slane %v7469_v6, 6  ;;  %v13239_v59 = vrot.slane %v7478_v18, 4 }
  0xc4   :  { %13212 = vst [vmem:[#allocation187_spill] sm:$0xff] %v8246_v19  ;;  %v8267_v19 = vrot.slane %v13222_v7, 9 }
  0xc5   :  { %13214 = vst [vmem:[#allocation188_spill] sm:$0xff] %v8250_v34  ;;  %v13233_v34 = vrot.slane %v7469_v6, 4 }
  0xc6   :  { %13216 = vst [vmem:[#allocation189_spill] sm:$0xff] %v8254_v9  ;;  %v8276_v9 = vrot.slane %v13227_v22, 9 }
  0xc7   :  { %13219 = vst [vmem:[#allocation17_spill] sm:$0xff] %v8259_v12  ;;  %v8280_v12 = vrot.slane %v13229_v24, 9 }
  0xc8   :  { %13221 = vst [vmem:[#allocation190_spill] sm:$0xff] %v8263_v11  ;;  %v13231_v11 = vrot.slane %v7469_v6, 2 }
  0xc9   :  { %13223 = vst [vmem:[#allocation191_spill] sm:$0xff] %v8267_v19  ;;  %v8289_v19 = vrot.slane %v13233_v34, 9  ;;  %v13243_v34 = vld [vmem:[#allocation20_spill] sm:$0xff] }
  0xca   :  { %13226 = vst [vmem:[#allocation18_spill] sm:$0xff] %v8272_v48  ;;  %v8285_v7 = vrot.slane %v13231_v11, 9  ;;  %v8293_v48 = vrot.slane %v13235_v8, 9  ;;  %v13241_v11 = vrot.slane %v7478_v18, 6  ;;  %v13244_v6 = vrot.slane %v13243_v34, 2 }
  0xcb   :  { %13228 = vst [vmem:[#allocation192_spill] sm:$0xff] %v8276_v9  ;;  %v13237_v9 = vrot.slane %v7478_v18, 2  ;;  %v13246_v22 = vrot.slane %v13243_v34, 4 }
  0xcc   :  { %13230 = vst [vmem:[#allocation193_spill] sm:$0xff] %v8280_v12  ;;  %v8302_v12 = vrot.slane %v13239_v59, 9  ;;  %v8311_v8 = vrot.slane %v13244_v6, 9  ;;  %v13254_v6 = vrot.slane %v7492_v17, 6  ;;  %v13258_v59 = vrot.slane %v7501_v14, 4 }
  0xcd   :  { %13232 = vst [vmem:[#allocation194_spill] sm:$0xff] %v8285_v7  ;;  %v8298_v24 = vrot.slane %v13237_v9, 9  ;;  %v8306_v7 = vrot.slane %v13241_v11, 9  ;;  %v13248_v9 = vrot.slane %v13243_v34, 6 }
  0xce   :  { %13234 = vst [vmem:[#allocation195_spill] sm:$0xff] %v8289_v19  ;;  %v13252_v19 = vrot.slane %v7492_v17, 4 }
  0xcf   :  { %13236 = vst [vmem:[#allocation196_spill] sm:$0xff] %v8293_v48  ;;  %v8315_v48 = vrot.slane %v13246_v22, 9  ;;  %v13264_v22 = vrot.slane %v7510_v13, 4 }
  0xd0   :  { %13238 = vst [vmem:[#allocation197_spill] sm:$0xff] %v8298_v24  ;;  %v8319_v24 = vrot.slane %v13248_v9, 9 }
  0xd1   :  { %13240 = vst [vmem:[#allocation198_spill] sm:$0xff] %v8302_v12  ;;  %v13250_v12 = vrot.slane %v7492_v17, 2 }
  0xd2   :  { %13242 = vst [vmem:[#allocation199_spill] sm:$0xff] %v8306_v7  ;;  %v8328_v7 = vrot.slane %v13252_v19, 9  ;;  %v13270_v19 = vld [vmem:[#allocation22_spill] sm:$0xff] }
  0xd3   :  { %13245 = vst [vmem:[#allocation20_spill] sm:$0xff] %v8311_v8  ;;  %v8324_v11 = vrot.slane %v13250_v12, 9  ;;  %v8332_v8 = vrot.slane %v13254_v6, 9  ;;  %v13260_v12 = vrot.slane %v7501_v14, 6 }
  0xd4   :  { %13247 = vst [vmem:[#allocation200_spill] sm:$0xff] %v8315_v48  ;;  %v13256_v48 = vrot.slane %v7501_v14, 2 }
  0xd5   :  { %13249 = vst [vmem:[#allocation201_spill] sm:$0xff] %v8319_v24  ;;  %v8341_v24 = vrot.slane %v13258_v59, 9  ;;  %v6878_v59 = vld [vmem:[%s12495_s0] sm:$0xff] }
  0xd6   :  { %13251 = vst [vmem:[#allocation202_spill] sm:$0xff] %v8324_v11  ;;  %v8337_v9 = vrot.slane %v13256_v48, 9  ;;  %v8345_v11 = vrot.slane %v13260_v12, 9  ;;  %v13266_v48 = vrot.slane %v7510_v13, 6  ;;  %v13268_v12 = vrot.slane %v7019_v0, 9 }
  0xd7   :  { %13253 = vst [vmem:[#allocation203_spill] sm:$0xff] %v8328_v7  ;;  %v13262_v7 = vrot.slane %v7510_v13, 2 }
  0xd8   :  { %13255 = vst [vmem:[#allocation204_spill] sm:$0xff] %v8332_v8  ;;  %v8354_v8 = vrot.slane %v13264_v22, 9  ;;  %v13274_v22 = vrot.slane %v7019_v0, 4 }
  0xd9   :  { %13257 = vst [vmem:[#allocation205_spill] sm:$0xff] %v8337_v9  ;;  %v8350_v6 = vrot.slane %v13262_v7, 9  ;;  %v8358_v9 = vrot.slane %v13266_v48, 9  ;;  %v13271_v7 = vrot.slane %v7019_v0, 2  ;;  %v13276_v48 = vld [vmem:[#allocation24_spill] sm:$0xff] }
  0xda   :  { %13259 = vst [vmem:[#allocation206_spill] sm:$0xff] %v8341_v24  ;;  %v13273_v24 = vld [vmem:[#allocation23_spill] sm:$0xff] }
  0xdb   :  { %13261 = vst [vmem:[#allocation207_spill] sm:$0xff] %v8345_v11  ;;  %v8365_v11 = vmax.f32 %v6878_v59, %v13268_v12  ;;  %v6879_v59 = vld [vmem:[%s12495_s0 + $0x8] sm:$0xff]  ;;  %v13279_v12 = vrot.slane %v7024_v1, 9 }
  0xdc   :  { %13263 = vst [vmem:[#allocation208_spill] sm:$0xff] %v8350_v6  ;;  %v8370_v6 = vmax.f32 %v13271_v7, %v13270_v19  ;;  %v13281_v19 = vld [vmem:[#allocation25_spill] sm:$0xff]  ;;  %v13282_v7 = vrot.slane %v7024_v1, 2 }
  0xdd   :  { %13265 = vst [vmem:[#allocation209_spill] sm:$0xff] %v8354_v8  ;;  %v8375_v8 = vmax.f32 %v13274_v22, %v13273_v24  ;;  %v13284_v24 = vld [vmem:[#allocation26_spill] sm:$0xff]  ;;  %v13285_v22 = vrot.slane %v7024_v1, 4 }
  0xde   :  { %13267 = vst [vmem:[#allocation210_spill] sm:$0xff] %v8358_v9  ;;  %v13277_v9 = vrot.slane %v7019_v0, 6  ;;  %v13287_v0 = vld [vmem:[#allocation27_spill] sm:$0xff] }
  0xdf   :  { %13269 = vst [vmem:[#allocation211_spill] sm:$0xff] %v8365_v11  ;;  %v8387_v11 = vmax.f32 %v6879_v59, %v13279_v12  ;;  %v6880_v59 = vld [vmem:[%s12495_s0 + $0x10] sm:$0xff]  ;;  %v13290_v12 = vrot.slane %v7029_v2, 9 }
  0xe0   :  { %13272 = vst [vmem:[#allocation22_spill] sm:$0xff] %v8370_v6  ;;  %v8380_v13 = vmax.f32 %v13277_v9, %v13276_v48  ;;  %v8392_v6 = vmax.f32 %v13282_v7, %v13281_v19  ;;  %v13288_v9 = vrot.slane %v7024_v1, 6  ;;  %v13292_v19 = vld [vmem:[#allocation28_spill] sm:$0xff]  ;;  %v13293_v7 = vrot.slane %v7029_v2, 2  ;;  %v13298_v1 = vld [vmem:[#allocation30_spill] sm:$0xff] }
  0xe1   :  { %13275 = vst [vmem:[#allocation23_spill] sm:$0xff] %v8375_v8  ;;  %v8397_v8 = vmax.f32 %v13285_v22, %v13284_v24  ;;  %v13295_v24 = vld [vmem:[#allocation29_spill] sm:$0xff]  ;;  %v13296_v22 = vrot.slane %v7029_v2, 4 }
  0xe2   :  { %13278 = vst [vmem:[#allocation24_spill] sm:$0xff] %v8380_v13  ;;  %v8402_v48 = vmax.f32 %v13288_v9, %v13287_v0  ;;  %v13299_v0 = vrot.slane %v7029_v2, 6  ;;  %v13309_v2 = vld [vmem:[#allocation33_spill] sm:$0xff] }
  0xe3   :  { %13280 = vst [vmem:[#allocation212_spill] sm:$0xff] %v8387_v11  ;;  %v8409_v11 = vmax.f32 %v6880_v59, %v13290_v12  ;;  %v6881_v59 = vld [vmem:[%s12495_s0 + $0x18] sm:$0xff]  ;;  %v13301_v12 = vrot.slane %v7034_v3, 9 }
  0xe4   :  { %13283 = vst [vmem:[#allocation25_spill] sm:$0xff] %v8392_v6  ;;  %v8414_v6 = vmax.f32 %v13293_v7, %v13292_v19  ;;  %v8424_v9 = vmax.f32 %v13299_v0, %v13298_v1  ;;  %v13303_v19 = vld [vmem:[#allocation31_spill] sm:$0xff]  ;;  %v13304_v7 = vrot.slane %v7034_v3, 2  ;;  %v13310_v1 = vrot.slane %v7034_v3, 6 }
  0xe5   :  { %13286 = vst [vmem:[#allocation26_spill] sm:$0xff] %v8397_v8  ;;  %v8419_v8 = vmax.f32 %v13296_v22, %v13295_v24  ;;  %v13306_v24 = vld [vmem:[#allocation32_spill] sm:$0xff]  ;;  %v13307_v22 = vrot.slane %v7034_v3, 4 }
  0xe6   :  { %13289 = vst [vmem:[#allocation27_spill] sm:$0xff] %v8402_v48  ;;  %v8431_v48 = vmax.f32 %v6881_v59, %v13301_v12  ;;  %v8436_v13 = vmax.f32 %v13304_v7, %v13303_v19  ;;  %v8446_v0 = vmax.f32 %v13310_v1, %v13309_v2  ;;  %v6882_v59 = vld [vmem:[%s12495_s0 + $0x20] sm:$0xff]  ;;  %v13312_v12 = vrot.slane %v7039_v4, 9  ;;  %v13314_v19 = vld [vmem:[#allocation34_spill] sm:$0xff] }
  0xe7   :  { %13291 = vst [vmem:[#allocation213_spill] sm:$0xff] %v8409_v11  ;;  %v13315_v7 = vrot.slane %v7039_v4, 2  ;;  %v13320_v3 = vld [vmem:[#allocation36_spill] sm:$0xff]  ;;  %v13321_v2 = vrot.slane %v7039_v4, 6 }
  0xe8   :  { %13294 = vst [vmem:[#allocation28_spill] sm:$0xff] %v8414_v6 }
  0xe9   :  { %13297 = vst [vmem:[#allocation29_spill] sm:$0xff] %v8419_v8  ;;  %v8441_v8 = vmax.f32 %v13307_v22, %v13306_v24  ;;  %v13317_v24 = vld [vmem:[#allocation35_spill] sm:$0xff]  ;;  %v13318_v22 = vrot.slane %v7039_v4, 4  ;;  %v8468_v1 = vmax.f32 %v13321_v2, %v13320_v3  ;;  %v13332_v3 = vrot.slane %v7044_v5, 6 }
  0xea   :  { %13300 = vst [vmem:[#allocation30_spill] sm:$0xff] %v8424_v9  ;;  %v13331_v4 = vld [vmem:[#allocation39_spill] sm:$0xff] }
  0xeb   :  { %13302 = vst [vmem:[#allocation214_spill] sm:$0xff] %v8431_v48  ;;  %v8453_v48 = vmax.f32 %v6882_v59, %v13312_v12  ;;  %v6883_v59 = vld [vmem:[%s12495_s0 + $0x28] sm:$0xff]  ;;  %v13323_v12 = vrot.slane %v7044_v5, 9  ;;  %v8490_v2 = vmax.f32 %v13332_v3, %v13331_v4  ;;  %v13343_v4 = vrot.slane %v7053_v10, 6 }
  0xec   :  { %13305 = vst [vmem:[#allocation31_spill] sm:$0xff] %v8436_v13  ;;  %v8458_v13 = vmax.f32 %v13315_v7, %v13314_v19  ;;  %v13325_v19 = vld [vmem:[#allocation37_spill] sm:$0xff]  ;;  %v13326_v7 = vrot.slane %v7044_v5, 2 }
  0xed   :  { %13308 = vst [vmem:[#allocation32_spill] sm:$0xff] %v8441_v8  ;;  %v8463_v8 = vmax.f32 %v13318_v22, %v13317_v24  ;;  %v13328_v24 = vld [vmem:[#allocation38_spill] sm:$0xff]  ;;  %v13329_v22 = vrot.slane %v7044_v5, 4 }
  0xee   :  { %13311 = vst [vmem:[#allocation33_spill] sm:$0xff] %v8446_v0  ;;  %v13342_v5 = vld [vmem:[#allocation42_spill] sm:$0xff] }
  0xef   :  { %13313 = vst [vmem:[#allocation215_spill] sm:$0xff] %v8453_v48  ;;  %v8475_v48 = vmax.f32 %v6883_v59, %v13323_v12  ;;  %v6884_v59 = vld [vmem:[%s12495_s0 + $0x30] sm:$0xff]  ;;  %v13334_v12 = vrot.slane %v7053_v10, 9  ;;  %v8512_v3 = vmax.f32 %v13343_v4, %v13342_v5  ;;  %v13354_v5 = vrot.slane %v7062_v15, 6 }
  0xf0   :  { %13316 = vst [vmem:[#allocation34_spill] sm:$0xff] %v8458_v13  ;;  %v8480_v13 = vmax.f32 %v13326_v7, %v13325_v19  ;;  %v13336_v19 = vld [vmem:[#allocation40_spill] sm:$0xff]  ;;  %v13337_v7 = vrot.slane %v7053_v10, 2 }
  0xf1   :  { %13319 = vst [vmem:[#allocation35_spill] sm:$0xff] %v8463_v8  ;;  %v8485_v8 = vmax.f32 %v13329_v22, %v13328_v24  ;;  %v13339_v24 = vld [vmem:[#allocation41_spill] sm:$0xff]  ;;  %v13340_v22 = vrot.slane %v7053_v10, 4 }
  0xf2   :  { %13322 = vst [vmem:[#allocation36_spill] sm:$0xff] %v8468_v1  ;;  %v13353_v10 = vld [vmem:[#allocation45_spill] sm:$0xff] }
  0xf3   :  { %13324 = vst [vmem:[#allocation216_spill] sm:$0xff] %v8475_v48  ;;  %v8497_v48 = vmax.f32 %v6884_v59, %v13334_v12  ;;  %v6885_v59 = vld [vmem:[%s12495_s0 + $0x38] sm:$0xff]  ;;  %v13345_v12 = vrot.slane %v7062_v15, 9  ;;  %v8534_v4 = vmax.f32 %v13354_v5, %v13353_v10  ;;  %v13365_v10 = vrot.slane %v7071_v20, 6 }
  0xf4   :  { %13327 = vst [vmem:[#allocation37_spill] sm:$0xff] %v8480_v13  ;;  %v8502_v13 = vmax.f32 %v13337_v7, %v13336_v19  ;;  %v13347_v19 = vld [vmem:[#allocation43_spill] sm:$0xff]  ;;  %v13348_v7 = vrot.slane %v7062_v15, 2 }
  0xf5   :  { %13330 = vst [vmem:[#allocation38_spill] sm:$0xff] %v8485_v8  ;;  %v8507_v8 = vmax.f32 %v13340_v22, %v13339_v24  ;;  %v13350_v24 = vld [vmem:[#allocation44_spill] sm:$0xff]  ;;  %v13351_v22 = vrot.slane %v7062_v15, 4 }
  0xf6   :  { %13333 = vst [vmem:[#allocation39_spill] sm:$0xff] %v8490_v2  ;;  %v8519_v2 = vmax.f32 %v6885_v59, %v13345_v12  ;;  %v8524_v1 = vmax.f32 %v13348_v7, %v13347_v19  ;;  %v6886_v59 = vld [vmem:[%s12495_s0 + $0x40] sm:$0xff]  ;;  %v13356_v12 = vrot.slane %v7071_v20, 9  ;;  %v13358_v19 = vld [vmem:[#allocation46_spill] sm:$0xff]  ;;  %v13359_v7 = vrot.slane %v7071_v20, 2 }
  0xf7   :  { %13335 = vst [vmem:[#allocation217_spill] sm:$0xff] %v8497_v48  ;;  %v13364_v15 = vld [vmem:[#allocation48_spill] sm:$0xff] }
  0xf8   :  { %13338 = vst [vmem:[#allocation40_spill] sm:$0xff] %v8502_v13  ;;  %v8556_v5 = vmax.f32 %v13365_v10, %v13364_v15  ;;  %v13376_v15 = vrot.slane %v7076_v21, 6 }
  0xf9   :  { %13341 = vst [vmem:[#allocation41_spill] sm:$0xff] %v8507_v8  ;;  %v8529_v8 = vmax.f32 %v13351_v22, %v13350_v24  ;;  %v13361_v24 = vld [vmem:[#allocation47_spill] sm:$0xff]  ;;  %v13362_v22 = vrot.slane %v7071_v20, 4 }
  0xfa   :  { %13344 = vst [vmem:[#allocation42_spill] sm:$0xff] %v8512_v3  ;;  %v13375_v20 = vld [vmem:[#allocation51_spill] sm:$0xff] }
  0xfb   :  { %13346 = vst [vmem:[#allocation218_spill] sm:$0xff] %v8519_v2  ;;  %v8541_v2 = vmax.f32 %v6886_v59, %v13356_v12  ;;  %v6887_v59 = vld [vmem:[%s12495_s0 + $0x48] sm:$0xff]  ;;  %v13367_v12 = vrot.slane %v7076_v21, 9  ;;  %v8578_v10 = vmax.f32 %v13376_v15, %v13375_v20  ;;  %v13387_v20 = vrot.slane %v7085_v26, 6 }
  0xfc   :  { %13349 = vst [vmem:[#allocation43_spill] sm:$0xff] %v8524_v1  ;;  %v8546_v1 = vmax.f32 %v13359_v7, %v13358_v19  ;;  %v13369_v19 = vld [vmem:[#allocation49_spill] sm:$0xff]  ;;  %v13370_v7 = vrot.slane %v7076_v21, 2 }
  0xfd   :  { %13352 = vst [vmem:[#allocation44_spill] sm:$0xff] %v8529_v8  ;;  %v8551_v8 = vmax.f32 %v13362_v22, %v13361_v24  ;;  %v13372_v24 = vld [vmem:[#allocation50_spill] sm:$0xff]  ;;  %v13373_v22 = vrot.slane %v7076_v21, 4  ;;  %v14007_v6 = vld [vmem:[#allocation39_spill] sm:$0xff] }
  0xfe   :  { %13355 = vst [vmem:[#allocation45_spill] sm:$0xff] %v8534_v4  ;;  %v13386_v21 = vld [vmem:[#allocation54_spill] sm:$0xff] }
  0xff   :  { %13357 = vst [vmem:[#allocation219_spill] sm:$0xff] %v8541_v2  ;;  %v8563_v2 = vmax.f32 %v6887_v59, %v13367_v12  ;;  %v6888_v59 = vld [vmem:[%s12495_s0 + $0x50] sm:$0xff]  ;;  %v13378_v12 = vrot.slane %v7085_v26, 9  ;;  %v8600_v15 = vmax.f32 %v13387_v20, %v13386_v21  ;;  %v13398_v21 = vrot.slane %v7094_v31, 6 }
 0x100   :  { %13360 = vst [vmem:[#allocation46_spill] sm:$0xff] %v8546_v1  ;;  %v8568_v1 = vmax.f32 %v13370_v7, %v13369_v19  ;;  %v13380_v19 = vld [vmem:[#allocation52_spill] sm:$0xff]  ;;  %v13381_v7 = vrot.slane %v7085_v26, 2 }
 0x101   :  { %13363 = vst [vmem:[#allocation47_spill] sm:$0xff] %v8551_v8  ;;  %v8573_v8 = vmax.f32 %v13373_v22, %v13372_v24  ;;  %v13383_v24 = vld [vmem:[#allocation53_spill] sm:$0xff]  ;;  %v13384_v22 = vrot.slane %v7085_v26, 4 }
 0x102   :  { %13366 = vst [vmem:[#allocation48_spill] sm:$0xff] %v8556_v5  ;;  %v13397_v26 = vld [vmem:[#allocation57_spill] sm:$0xff] }
 0x103   :  { %13368 = vst [vmem:[#allocation220_spill] sm:$0xff] %v8563_v2  ;;  %v8585_v2 = vmax.f32 %v6888_v59, %v13378_v12  ;;  %v6889_v59 = vld [vmem:[%s12495_s0 + $0x58] sm:$0xff]  ;;  %v13389_v12 = vrot.slane %v7094_v31, 9  ;;  %v8622_v20 = vmax.f32 %v13398_v21, %v13397_v26  ;;  %v13409_v26 = vrot.slane %v7103_v36, 6 }
 0x104   :  { %13371 = vst [vmem:[#allocation49_spill] sm:$0xff] %v8568_v1  ;;  %v8590_v1 = vmax.f32 %v13381_v7, %v13380_v19  ;;  %v13391_v19 = vld [vmem:[#allocation55_spill] sm:$0xff]  ;;  %v13392_v7 = vrot.slane %v7094_v31, 2 }
 0x105   :  { %13374 = vst [vmem:[#allocation50_spill] sm:$0xff] %v8573_v8  ;;  %v8595_v8 = vmax.f32 %v13384_v22, %v13383_v24  ;;  %v13394_v24 = vld [vmem:[#allocation56_spill] sm:$0xff]  ;;  %v13395_v22 = vrot.slane %v7094_v31, 4 }
 0x106   :  { %13377 = vst [vmem:[#allocation51_spill] sm:$0xff] %v8578_v10  ;;  %v8607_v10 = vmax.f32 %v6889_v59, %v13389_v12  ;;  %v8612_v5 = vmax.f32 %v13392_v7, %v13391_v19  ;;  %v6890_v59 = vld [vmem:[%s12495_s0 + $0x60] sm:$0xff]  ;;  %v13400_v12 = vrot.slane %v7103_v36, 9  ;;  %v13402_v19 = vld [vmem:[#allocation58_spill] sm:$0xff]  ;;  %v13403_v7 = vrot.slane %v7103_v36, 2 }
 0x107   :  { %13379 = vst [vmem:[#allocation221_spill] sm:$0xff] %v8585_v2  ;;  %v13408_v31 = vld [vmem:[#allocation60_spill] sm:$0xff]  ;;  %v14009_v9 = vld [vmem:[#allocation46_spill] sm:$0xff]  ;;  %v14201_v2 = vld [vmem:[#allocation29_spill] sm:$0xff] }
 0x108   :  { %13382 = vst [vmem:[#allocation52_spill] sm:$0xff] %v8590_v1  ;;  %v8644_v21 = vmax.f32 %v13409_v26, %v13408_v31  ;;  %v13420_v31 = vrot.slane %v7108_v37, 6 }
 0x109   :  { %13385 = vst [vmem:[#allocation53_spill] sm:$0xff] %v8595_v8  ;;  %v8617_v8 = vmax.f32 %v13395_v22, %v13394_v24  ;;  %v13405_v24 = vld [vmem:[#allocation59_spill] sm:$0xff]  ;;  %v13406_v22 = vrot.slane %v7103_v36, 4 }
 0x10a   :  { %13388 = vst [vmem:[#allocation54_spill] sm:$0xff] %v8600_v15  ;;  %v13419_v36 = vld [vmem:[#allocation63_spill] sm:$0xff] }
 0x10b   :  { %13390 = vst [vmem:[#allocation222_spill] sm:$0xff] %v8607_v10  ;;  %v8629_v10 = vmax.f32 %v6890_v59, %v13400_v12  ;;  %v6891_v59 = vld [vmem:[%s12495_s0 + $0x68] sm:$0xff]  ;;  %v13411_v12 = vrot.slane %v7108_v37, 9  ;;  %v8666_v26 = vmax.f32 %v13420_v31, %v13419_v36  ;;  %v13431_v36 = vrot.slane %v7117_v42, 6 }
 0x10c   :  { %13393 = vst [vmem:[#allocation55_spill] sm:$0xff] %v8612_v5  ;;  %v8634_v5 = vmax.f32 %v13403_v7, %v13402_v19  ;;  %v13413_v19 = vld [vmem:[#allocation61_spill] sm:$0xff]  ;;  %v13414_v7 = vrot.slane %v7108_v37, 2 }
 0x10d   :  { %13396 = vst [vmem:[#allocation56_spill] sm:$0xff] %v8617_v8  ;;  %v8639_v8 = vmax.f32 %v13406_v22, %v13405_v24  ;;  %v13416_v24 = vld [vmem:[#allocation62_spill] sm:$0xff]  ;;  %v13417_v22 = vrot.slane %v7108_v37, 4  ;;  %v14019_v13 = vld [vmem:[#allocation51_spill] sm:$0xff] }
 0x10e   :  { %13399 = vst [vmem:[#allocation57_spill] sm:$0xff] %v8622_v20  ;;  %v13430_v37 = vld [vmem:[#allocation66_spill] sm:$0xff] }
 0x10f   :  { %13401 = vst [vmem:[#allocation223_spill] sm:$0xff] %v8629_v10  ;;  %v8651_v10 = vmax.f32 %v6891_v59, %v13411_v12  ;;  %v6892_v59 = vld [vmem:[%s12495_s0 + $0x70] sm:$0xff]  ;;  %v13422_v12 = vrot.slane %v7117_v42, 9  ;;  %v8688_v31 = vmax.f32 %v13431_v36, %v13430_v37  ;;  %v13442_v37 = vrot.slane %v7126_v47, 6 }
 0x110   :  { %13404 = vst [vmem:[#allocation58_spill] sm:$0xff] %v8634_v5  ;;  %v8656_v5 = vmax.f32 %v13414_v7, %v13413_v19  ;;  %v13424_v19 = vld [vmem:[#allocation64_spill] sm:$0xff]  ;;  %v13425_v7 = vrot.slane %v7117_v42, 2 }
 0x111   :  { %13407 = vst [vmem:[#allocation59_spill] sm:$0xff] %v8639_v8  ;;  %v8661_v8 = vmax.f32 %v13417_v22, %v13416_v24  ;;  %v13427_v24 = vld [vmem:[#allocation65_spill] sm:$0xff]  ;;  %v13428_v22 = vrot.slane %v7117_v42, 4 }
 0x112   :  { %13410 = vst [vmem:[#allocation60_spill] sm:$0xff] %v8644_v21  ;;  %v13441_v42 = vld [vmem:[#allocation69_spill] sm:$0xff] }
 0x113   :  { %13412 = vst [vmem:[#allocation224_spill] sm:$0xff] %v8651_v10  ;;  %v8673_v10 = vmax.f32 %v6892_v59, %v13422_v12  ;;  %v6893_v59 = vld [vmem:[%s12495_s0 + $0x78] sm:$0xff]  ;;  %v13433_v12 = vrot.slane %v7126_v47, 9  ;;  %v8710_v36 = vmax.f32 %v13442_v37, %v13441_v42  ;;  %v13453_v42 = vrot.slane %v7135_v52, 6 }
 0x114   :  { %13415 = vst [vmem:[#allocation61_spill] sm:$0xff] %v8656_v5  ;;  %v8678_v5 = vmax.f32 %v13425_v7, %v13424_v19  ;;  %v13435_v19 = vld [vmem:[#allocation67_spill] sm:$0xff]  ;;  %v13436_v7 = vrot.slane %v7126_v47, 2 }
 0x115   :  { %13418 = vst [vmem:[#allocation62_spill] sm:$0xff] %v8661_v8  ;;  %v8683_v8 = vmax.f32 %v13428_v22, %v13427_v24  ;;  %v13438_v24 = vld [vmem:[#allocation68_spill] sm:$0xff]  ;;  %v13439_v22 = vrot.slane %v7126_v47, 4 }
 0x116   :  { %13421 = vst [vmem:[#allocation63_spill] sm:$0xff] %v8666_v26  ;;  %v8695_v26 = vmax.f32 %v6893_v59, %v13433_v12  ;;  %v8700_v21 = vmax.f32 %v13436_v7, %v13435_v19  ;;  %v6894_v59 = vld [vmem:[%s12495_s0 + $0x80] sm:$0xff]  ;;  %v13444_v12 = vrot.slane %v7135_v52, 9  ;;  %v13446_v19 = vld [vmem:[#allocation70_spill] sm:$0xff]  ;;  %v13447_v7 = vrot.slane %v7135_v52, 2 }
 0x117   :  { %13423 = vst [vmem:[#allocation225_spill] sm:$0xff] %v8673_v10  ;;  %v13452_v47 = vld [vmem:[#allocation72_spill] sm:$0xff]  ;;  %v14021_v3 = vld [vmem:[#allocation58_spill] sm:$0xff] }
 0x118   :  { %13426 = vst [vmem:[#allocation64_spill] sm:$0xff] %v8678_v5  ;;  %v8732_v37 = vmax.f32 %v13453_v42, %v13452_v47  ;;  %v13464_v47 = vrot.slane %v7140_v53, 6 }
 0x119   :  { %13429 = vst [vmem:[#allocation65_spill] sm:$0xff] %v8683_v8  ;;  %v8705_v8 = vmax.f32 %v13439_v22, %v13438_v24  ;;  %v13449_v24 = vld [vmem:[#allocation71_spill] sm:$0xff]  ;;  %v13450_v22 = vrot.slane %v7135_v52, 4 }
 0x11a   :  { %13432 = vst [vmem:[#allocation66_spill] sm:$0xff] %v8688_v31  ;;  %v13463_v52 = vld [vmem:[#allocation75_spill] sm:$0xff] }
 0x11b   :  { %13434 = vst [vmem:[#allocation226_spill] sm:$0xff] %v8695_v26  ;;  %v8717_v26 = vmax.f32 %v6894_v59, %v13444_v12  ;;  %v6895_v59 = vld [vmem:[%s12495_s0 + $0x88] sm:$0xff]  ;;  %v13455_v12 = vrot.slane %v7140_v53, 9  ;;  %v8754_v42 = vmax.f32 %v13464_v47, %v13463_v52  ;;  %v13475_v52 = vrot.slane %v7149_v58, 6 }
 0x11c   :  { %13437 = vst [vmem:[#allocation67_spill] sm:$0xff] %v8700_v21  ;;  %v8722_v21 = vmax.f32 %v13447_v7, %v13446_v19  ;;  %v13457_v19 = vld [vmem:[#allocation73_spill] sm:$0xff]  ;;  %v13458_v7 = vrot.slane %v7140_v53, 2 }
 0x11d   :  { %13440 = vst [vmem:[#allocation68_spill] sm:$0xff] %v8705_v8  ;;  %v8727_v8 = vmax.f32 %v13450_v22, %v13449_v24  ;;  %v13460_v24 = vld [vmem:[#allocation74_spill] sm:$0xff]  ;;  %v13461_v22 = vrot.slane %v7140_v53, 4  ;;  %v14031_v1 = vld [vmem:[#allocation63_spill] sm:$0xff] }
 0x11e   :  { %13443 = vst [vmem:[#allocation69_spill] sm:$0xff] %v8710_v36  ;;  %v13474_v53 = vld [vmem:[#allocation78_spill] sm:$0xff] }
 0x11f   :  { %13445 = vst [vmem:[#allocation227_spill] sm:$0xff] %v8717_v26  ;;  %v8739_v26 = vmax.f32 %v6895_v59, %v13455_v12  ;;  %v6896_v59 = vld [vmem:[%s12495_s0 + $0x90] sm:$0xff]  ;;  %v13466_v12 = vrot.slane %v7149_v58, 9  ;;  %v8776_v47 = vmax.f32 %v13475_v52, %v13474_v53  ;;  %v13486_v53 = vrot.slane %v7158_v63, 6 }
 0x120   :  { %13448 = vst [vmem:[#allocation70_spill] sm:$0xff] %v8722_v21  ;;  %v8744_v21 = vmax.f32 %v13458_v7, %v13457_v19  ;;  %v13468_v19 = vld [vmem:[#allocation76_spill] sm:$0xff]  ;;  %v13469_v7 = vrot.slane %v7149_v58, 2 }
 0x121   :  { %13451 = vst [vmem:[#allocation71_spill] sm:$0xff] %v8727_v8  ;;  %v8749_v8 = vmax.f32 %v13461_v22, %v13460_v24  ;;  %v13471_v24 = vld [vmem:[#allocation77_spill] sm:$0xff]  ;;  %v13472_v22 = vrot.slane %v7149_v58, 4 }
 0x122   :  { %13454 = vst [vmem:[#allocation72_spill] sm:$0xff] %v8732_v37  ;;  %v13485_v58 = vld [vmem:[#allocation81_spill] sm:$0xff] }
 0x123   :  { %13456 = vst [vmem:[#allocation228_spill] sm:$0xff] %v8739_v26  ;;  %v8761_v26 = vmax.f32 %v6896_v59, %v13466_v12  ;;  %v6897_v59 = vld [vmem:[%s12495_s0 + $0x98] sm:$0xff]  ;;  %v13477_v12 = vrot.slane %v7158_v63, 9  ;;  %v8798_v52 = vmax.f32 %v13486_v53, %v13485_v58  ;;  %v13497_v58 = vrot.slane %v7167_v60, 6 }
 0x124   :  { %13459 = vst [vmem:[#allocation73_spill] sm:$0xff] %v8744_v21  ;;  %v8766_v21 = vmax.f32 %v13469_v7, %v13468_v19  ;;  %v13479_v19 = vld [vmem:[#allocation79_spill] sm:$0xff]  ;;  %v13480_v7 = vrot.slane %v7158_v63, 2 }
 0x125   :  { %13462 = vst [vmem:[#allocation74_spill] sm:$0xff] %v8749_v8  ;;  %v8771_v8 = vmax.f32 %v13472_v22, %v13471_v24  ;;  %v13482_v24 = vld [vmem:[#allocation80_spill] sm:$0xff]  ;;  %v13483_v22 = vrot.slane %v7158_v63, 4 }
 0x126   :  { %13465 = vst [vmem:[#allocation75_spill] sm:$0xff] %v8754_v42  ;;  %v8783_v42 = vmax.f32 %v6897_v59, %v13477_v12  ;;  %v8788_v37 = vmax.f32 %v13480_v7, %v13479_v19  ;;  %v6898_v59 = vld [vmem:[%s12495_s0 + $0xa0] sm:$0xff]  ;;  %v13488_v12 = vrot.slane %v7167_v60, 9  ;;  %v13490_v19 = vld [vmem:[#allocation82_spill] sm:$0xff]  ;;  %v13491_v7 = vrot.slane %v7167_v60, 2 }
 0x127   :  { %13467 = vst [vmem:[#allocation229_spill] sm:$0xff] %v8761_v26  ;;  %v13496_v63 = vld [vmem:[#allocation84_spill] sm:$0xff]  ;;  %v14033_v15 = vld [vmem:[#allocation70_spill] sm:$0xff] }
 0x128   :  { %13470 = vst [vmem:[#allocation76_spill] sm:$0xff] %v8766_v21  ;;  %v8820_v53 = vmax.f32 %v13497_v58, %v13496_v63  ;;  %v13508_v63 = vrot.slane %v7172_v62, 6 }
 0x129   :  { %13473 = vst [vmem:[#allocation77_spill] sm:$0xff] %v8771_v8  ;;  %v8793_v8 = vmax.f32 %v13483_v22, %v13482_v24  ;;  %v13493_v24 = vld [vmem:[#allocation83_spill] sm:$0xff]  ;;  %v13494_v22 = vrot.slane %v7167_v60, 4 }
 0x12a   :  { %13476 = vst [vmem:[#allocation78_spill] sm:$0xff] %v8776_v47  ;;  %v13507_v60 = vld [vmem:[#allocation87_spill] sm:$0xff] }
 0x12b   :  { %13478 = vst [vmem:[#allocation230_spill] sm:$0xff] %v8783_v42  ;;  %v8805_v42 = vmax.f32 %v6898_v59, %v13488_v12  ;;  %v6899_v59 = vld [vmem:[%s12495_s0 + $0xa8] sm:$0xff]  ;;  %v13499_v12 = vrot.slane %v7172_v62, 9  ;;  %v8842_v58 = vmax.f32 %v13508_v63, %v13507_v60  ;;  %v13519_v60 = vrot.slane %v7181_v54, 6 }
 0x12c   :  { %13481 = vst [vmem:[#allocation79_spill] sm:$0xff] %v8788_v37  ;;  %v8810_v37 = vmax.f32 %v13491_v7, %v13490_v19  ;;  %v13501_v19 = vld [vmem:[#allocation85_spill] sm:$0xff]  ;;  %v13502_v7 = vrot.slane %v7172_v62, 2 }
 0x12d   :  { %13484 = vst [vmem:[#allocation80_spill] sm:$0xff] %v8793_v8  ;;  %v8815_v8 = vmax.f32 %v13494_v22, %v13493_v24  ;;  %v13504_v24 = vld [vmem:[#allocation86_spill] sm:$0xff]  ;;  %v13505_v22 = vrot.slane %v7172_v62, 4  ;;  %v14043_v5 = vld [vmem:[#allocation75_spill] sm:$0xff] }
 0x12e   :  { %13487 = vst [vmem:[#allocation81_spill] sm:$0xff] %v8798_v52  ;;  %v13518_v62 = vld [vmem:[#allocation90_spill] sm:$0xff] }
 0x12f   :  { %13489 = vst [vmem:[#allocation231_spill] sm:$0xff] %v8805_v42  ;;  %v8827_v42 = vmax.f32 %v6899_v59, %v13499_v12  ;;  %v6900_v59 = vld [vmem:[%s12495_s0 + $0xb0] sm:$0xff]  ;;  %v13510_v12 = vrot.slane %v7181_v54, 9  ;;  %v8864_v63 = vmax.f32 %v13519_v60, %v13518_v62  ;;  %v13530_v62 = vrot.slane %v7190_v57, 6 }
 0x130   :  { %13492 = vst [vmem:[#allocation82_spill] sm:$0xff] %v8810_v37  ;;  %v8832_v37 = vmax.f32 %v13502_v7, %v13501_v19  ;;  %v13512_v19 = vld [vmem:[#allocation88_spill] sm:$0xff]  ;;  %v13513_v7 = vrot.slane %v7181_v54, 2 }
 0x131   :  { %13495 = vst [vmem:[#allocation83_spill] sm:$0xff] %v8815_v8  ;;  %v8837_v8 = vmax.f32 %v13505_v22, %v13504_v24  ;;  %v13515_v24 = vld [vmem:[#allocation89_spill] sm:$0xff]  ;;  %v13516_v22 = vrot.slane %v7181_v54, 4 }
 0x132   :  { %13498 = vst [vmem:[#allocation84_spill] sm:$0xff] %v8820_v53  ;;  %v13529_v54 = vld [vmem:[#allocation93_spill] sm:$0xff] }
 0x133   :  { %13500 = vst [vmem:[#allocation232_spill] sm:$0xff] %v8827_v42  ;;  %v8849_v42 = vmax.f32 %v6900_v59, %v13510_v12  ;;  %v6901_v59 = vld [vmem:[%s12495_s0 + $0xb8] sm:$0xff]  ;;  %v13521_v12 = vrot.slane %v7190_v57, 9  ;;  %v8886_v60 = vmax.f32 %v13530_v62, %v13529_v54  ;;  %v13541_v54 = vrot.slane %v7195_v55, 6 }
 0x134   :  { %13503 = vst [vmem:[#allocation85_spill] sm:$0xff] %v8832_v37  ;;  %v8854_v37 = vmax.f32 %v13513_v7, %v13512_v19  ;;  %v13523_v19 = vld [vmem:[#allocation91_spill] sm:$0xff]  ;;  %v13524_v7 = vrot.slane %v7190_v57, 2 }
 0x135   :  { %13506 = vst [vmem:[#allocation86_spill] sm:$0xff] %v8837_v8  ;;  %v8859_v8 = vmax.f32 %v13516_v22, %v13515_v24  ;;  %v13526_v24 = vld [vmem:[#allocation92_spill] sm:$0xff]  ;;  %v13527_v22 = vrot.slane %v7190_v57, 4 }
 0x136   :  { %13509 = vst [vmem:[#allocation87_spill] sm:$0xff] %v8842_v58  ;;  %v8871_v58 = vmax.f32 %v6901_v59, %v13521_v12  ;;  %v8876_v53 = vmax.f32 %v13524_v7, %v13523_v19  ;;  %v6902_v59 = vld [vmem:[%s12495_s0 + $0xc0] sm:$0xff]  ;;  %v13532_v12 = vrot.slane %v7195_v55, 9  ;;  %v13534_v19 = vld [vmem:[#allocation94_spill] sm:$0xff]  ;;  %v13535_v7 = vrot.slane %v7195_v55, 2 }
 0x137   :  { %13511 = vst [vmem:[#allocation233_spill] sm:$0xff] %v8849_v42  ;;  %v13540_v57 = vld [vmem:[#allocation96_spill] sm:$0xff]  ;;  %v14045_v31 = vld [vmem:[#allocation82_spill] sm:$0xff] }
 0x138   :  { %13514 = vst [vmem:[#allocation88_spill] sm:$0xff] %v8854_v37  ;;  %v8908_v62 = vmax.f32 %v13541_v54, %v13540_v57  ;;  %v13552_v57 = vrot.slane %v7204_v49, 6 }
 0x139   :  { %13517 = vst [vmem:[#allocation89_spill] sm:$0xff] %v8859_v8  ;;  %v8881_v8 = vmax.f32 %v13527_v22, %v13526_v24  ;;  %v13537_v24 = vld [vmem:[#allocation95_spill] sm:$0xff]  ;;  %v13538_v22 = vrot.slane %v7195_v55, 4  ;;  %v14048_v0 = vld [vmem:[#allocation84_spill] sm:$0xff] }
 0x13a   :  { %13520 = vst [vmem:[#allocation90_spill] sm:$0xff] %v8864_v63  ;;  %v13551_v55 = vld [vmem:[#allocation99_spill] sm:$0xff] }
 0x13b   :  { %13522 = vst [vmem:[#allocation234_spill] sm:$0xff] %v8871_v58  ;;  %v8893_v58 = vmax.f32 %v6902_v59, %v13532_v12  ;;  %v6903_v59 = vld [vmem:[%s12495_s0 + $0xc8] sm:$0xff]  ;;  %v13543_v12 = vrot.slane %v7204_v49, 9  ;;  %v8930_v54 = vmax.f32 %v13552_v57, %v13551_v55  ;;  %v13563_v55 = vrot.slane %v7209_v61, 6 }
 0x13c   :  { %13525 = vst [vmem:[#allocation91_spill] sm:$0xff] %v8876_v53  ;;  %v8898_v53 = vmax.f32 %v13535_v7, %v13534_v19  ;;  %v13545_v19 = vld [vmem:[#allocation97_spill] sm:$0xff]  ;;  %v13546_v7 = vrot.slane %v7204_v49, 2 }
 0x13d   :  { %13528 = vst [vmem:[#allocation92_spill] sm:$0xff] %v8881_v8  ;;  %v8903_v8 = vmax.f32 %v13538_v22, %v13537_v24  ;;  %v13548_v24 = vld [vmem:[#allocation98_spill] sm:$0xff]  ;;  %v13549_v22 = vrot.slane %v7204_v49, 4  ;;  %v14055_v21 = vld [vmem:[#allocation87_spill] sm:$0xff] }
 0x13e   :  { %13531 = vst [vmem:[#allocation93_spill] sm:$0xff] %v8886_v60  ;;  %v13562_v49 = vld [vmem:[#allocation102_spill] sm:$0xff] }
 0x13f   :  { %13533 = vst [vmem:[#allocation235_spill] sm:$0xff] %v8893_v58  ;;  %v8915_v58 = vmax.f32 %v6903_v59, %v13543_v12  ;;  %v6904_v59 = vld [vmem:[%s12495_s0 + $0xd0] sm:$0xff]  ;;  %v13554_v12 = vrot.slane %v7209_v61, 9  ;;  %v8952_v57 = vmax.f32 %v13563_v55, %v13562_v49  ;;  %v13574_v49 = vrot.slane %v7222_v43, 6 }
 0x140   :  { %13536 = vst [vmem:[#allocation94_spill] sm:$0xff] %v8898_v53  ;;  %v8920_v53 = vmax.f32 %v13546_v7, %v13545_v19  ;;  %v13556_v19 = vld [vmem:[#allocation100_spill] sm:$0xff]  ;;  %v13557_v7 = vrot.slane %v7209_v61, 2 }
 0x141   :  { %13539 = vst [vmem:[#allocation95_spill] sm:$0xff] %v8903_v8  ;;  %v8925_v8 = vmax.f32 %v13549_v22, %v13548_v24  ;;  %v13559_v24 = vld [vmem:[#allocation101_spill] sm:$0xff]  ;;  %v13560_v22 = vrot.slane %v7209_v61, 4 }
 0x142   :  { %13542 = vst [vmem:[#allocation96_spill] sm:$0xff] %v8908_v62  ;;  %v13573_v61 = vld [vmem:[#allocation105_spill] sm:$0xff] }
 0x143   :  { %13544 = vst [vmem:[#allocation236_spill] sm:$0xff] %v8915_v58  ;;  %v8937_v58 = vmax.f32 %v6904_v59, %v13554_v12  ;;  %v6905_v59 = vld [vmem:[%s12495_s0 + $0xd8] sm:$0xff]  ;;  %v13565_v12 = vrot.slane %v7222_v43, 9  ;;  %v8974_v55 = vmax.f32 %v13574_v49, %v13573_v61  ;;  %v13585_v61 = vrot.slane %v7231_v45, 6 }
 0x144   :  { %13547 = vst [vmem:[#allocation97_spill] sm:$0xff] %v8920_v53  ;;  %v8942_v53 = vmax.f32 %v13557_v7, %v13556_v19  ;;  %v13567_v19 = vld [vmem:[#allocation103_spill] sm:$0xff]  ;;  %v13568_v7 = vrot.slane %v7222_v43, 2 }
 0x145   :  { %13550 = vst [vmem:[#allocation98_spill] sm:$0xff] %v8925_v8  ;;  %v8947_v8 = vmax.f32 %v13560_v22, %v13559_v24  ;;  %v13570_v24 = vld [vmem:[#allocation104_spill] sm:$0xff]  ;;  %v13571_v22 = vrot.slane %v7222_v43, 4 }
 0x146   :  { %13553 = vst [vmem:[#allocation99_spill] sm:$0xff] %v8930_v54  ;;  %v8959_v54 = vmax.f32 %v6905_v59, %v13565_v12  ;;  %v8964_v62 = vmax.f32 %v13568_v7, %v13567_v19  ;;  %v6906_v59 = vld [vmem:[%s12495_s0 + $0xe0] sm:$0xff]  ;;  %v13576_v12 = vrot.slane %v7231_v45, 9  ;;  %v13578_v19 = vld [vmem:[#allocation106_spill] sm:$0xff]  ;;  %v13579_v7 = vrot.slane %v7231_v45, 2 }
 0x147   :  { %13555 = vst [vmem:[#allocation237_spill] sm:$0xff] %v8937_v58  ;;  %v13584_v43 = vld [vmem:[#allocation108_spill] sm:$0xff]  ;;  %v14057_v47 = vld [vmem:[#allocation94_spill] sm:$0xff]  ;;  %v14194_v58 = vld [vmem:[#allocation213_spill] sm:$0xff] }
 0x148   :  { %13558 = vst [vmem:[#allocation100_spill] sm:$0xff] %v8942_v53  ;;  %v8996_v49 = vmax.f32 %v13585_v61, %v13584_v43  ;;  %v13596_v43 = vrot.slane %v7236_v44, 6 }
 0x149   :  { %13561 = vst [vmem:[#allocation101_spill] sm:$0xff] %v8947_v8  ;;  %v8969_v8 = vmax.f32 %v13571_v22, %v13570_v24  ;;  %v13581_v24 = vld [vmem:[#allocation107_spill] sm:$0xff]  ;;  %v13582_v22 = vrot.slane %v7231_v45, 4  ;;  %v14060_v4 = vld [vmem:[#allocation96_spill] sm:$0xff] }
 0x14a   :  { %13564 = vst [vmem:[#allocation102_spill] sm:$0xff] %v8952_v57  ;;  %v13595_v45 = vld [vmem:[#allocation111_spill] sm:$0xff] }
 0x14b   :  { %13566 = vst [vmem:[#allocation238_spill] sm:$0xff] %v8959_v54  ;;  %v8981_v54 = vmax.f32 %v6906_v59, %v13576_v12  ;;  %v6907_v59 = vld [vmem:[%s12495_s0 + $0xe8] sm:$0xff]  ;;  %v13587_v12 = vrot.slane %v7236_v44, 9  ;;  %v9018_v61 = vmax.f32 %v13596_v43, %v13595_v45  ;;  %v13607_v45 = vrot.slane %v7245_v50, 6 }
 0x14c   :  { %13569 = vst [vmem:[#allocation103_spill] sm:$0xff] %v8964_v62  ;;  %v8986_v62 = vmax.f32 %v13579_v7, %v13578_v19  ;;  %v13589_v19 = vld [vmem:[#allocation109_spill] sm:$0xff]  ;;  %v13590_v7 = vrot.slane %v7236_v44, 2 }
 0x14d   :  { %13572 = vst [vmem:[#allocation104_spill] sm:$0xff] %v8969_v8  ;;  %v8991_v8 = vmax.f32 %v13582_v22, %v13581_v24  ;;  %v13592_v24 = vld [vmem:[#allocation110_spill] sm:$0xff]  ;;  %v13593_v22 = vrot.slane %v7236_v44, 4  ;;  %v14067_v37 = vld [vmem:[#allocation99_spill] sm:$0xff] }
 0x14e   :  { %13575 = vst [vmem:[#allocation105_spill] sm:$0xff] %v8974_v55  ;;  %v13606_v44 = vld [vmem:[#allocation114_spill] sm:$0xff] }
 0x14f   :  { %13577 = vst [vmem:[#allocation239_spill] sm:$0xff] %v8981_v54  ;;  %v9003_v54 = vmax.f32 %v6907_v59, %v13587_v12  ;;  %v6908_v59 = vld [vmem:[%s12495_s0 + $0xf0] sm:$0xff]  ;;  %v13598_v12 = vrot.slane %v7245_v50, 9  ;;  %v9040_v43 = vmax.f32 %v13607_v45, %v13606_v44  ;;  %v13618_v44 = vrot.slane %v7254_v56, 6 }
 0x150   :  { %13580 = vst [vmem:[#allocation106_spill] sm:$0xff] %v8986_v62  ;;  %v9008_v62 = vmax.f32 %v13590_v7, %v13589_v19  ;;  %v13600_v19 = vld [vmem:[#allocation112_spill] sm:$0xff]  ;;  %v13601_v7 = vrot.slane %v7245_v50, 2 }
 0x151   :  { %13583 = vst [vmem:[#allocation107_spill] sm:$0xff] %v8991_v8  ;;  %v9013_v8 = vmax.f32 %v13593_v22, %v13592_v24  ;;  %v13603_v24 = vld [vmem:[#allocation113_spill] sm:$0xff]  ;;  %v13604_v22 = vrot.slane %v7245_v50, 4 }
 0x152   :  { %13586 = vst [vmem:[#allocation108_spill] sm:$0xff] %v8996_v49  ;;  %v13617_v50 = vld [vmem:[#allocation117_spill] sm:$0xff] }
 0x153   :  { %13588 = vst [vmem:[#allocation240_spill] sm:$0xff] %v9003_v54  ;;  %v9025_v54 = vmax.f32 %v6908_v59, %v13598_v12  ;;  %v6909_v59 = vld [vmem:[%s12495_s0 + $0xf8] sm:$0xff]  ;;  %v13609_v12 = vrot.slane %v7254_v56, 9  ;;  %v9062_v45 = vmax.f32 %v13618_v44, %v13617_v50  ;;  %v13629_v50 = vrot.slane %v7263_v41, 6 }
 0x154   :  { %13591 = vst [vmem:[#allocation109_spill] sm:$0xff] %v9008_v62  ;;  %v9030_v62 = vmax.f32 %v13601_v7, %v13600_v19  ;;  %v13611_v19 = vld [vmem:[#allocation115_spill] sm:$0xff]  ;;  %v13612_v7 = vrot.slane %v7254_v56, 2 }
 0x155   :  { %13594 = vst [vmem:[#allocation110_spill] sm:$0xff] %v9013_v8  ;;  %v9035_v8 = vmax.f32 %v13604_v22, %v13603_v24  ;;  %v13614_v24 = vld [vmem:[#allocation116_spill] sm:$0xff]  ;;  %v13615_v22 = vrot.slane %v7254_v56, 4 }
 0x156   :  { %13597 = vst [vmem:[#allocation111_spill] sm:$0xff] %v9018_v61  ;;  %v9047_v61 = vmax.f32 %v6909_v59, %v13609_v12  ;;  %v9052_v49 = vmax.f32 %v13612_v7, %v13611_v19  ;;  %v6910_v59 = vld [vmem:[%s12495_s0 + $0x100] sm:$0xff]  ;;  %v13620_v12 = vrot.slane %v7263_v41, 9  ;;  %v13622_v19 = vld [vmem:[#allocation118_spill] sm:$0xff]  ;;  %v13623_v7 = vrot.slane %v7263_v41, 2 }
 0x157   :  { %13599 = vst [vmem:[#allocation241_spill] sm:$0xff] %v9025_v54  ;;  %v13628_v56 = vld [vmem:[#allocation120_spill] sm:$0xff]  ;;  %v14069_v63 = vld [vmem:[#allocation106_spill] sm:$0xff] }
 0x158   :  { %13602 = vst [vmem:[#allocation112_spill] sm:$0xff] %v9030_v62  ;;  %v9084_v44 = vmax.f32 %v13629_v50, %v13628_v56  ;;  %v13640_v56 = vrot.slane %v7268_v39, 6 }
 0x159   :  { %13605 = vst [vmem:[#allocation113_spill] sm:$0xff] %v9035_v8  ;;  %v9057_v8 = vmax.f32 %v13615_v22, %v13614_v24  ;;  %v13625_v24 = vld [vmem:[#allocation119_spill] sm:$0xff]  ;;  %v13626_v22 = vrot.slane %v7263_v41, 4  ;;  %v14072_v20 = vld [vmem:[#allocation108_spill] sm:$0xff] }
 0x15a   :  { %13608 = vst [vmem:[#allocation114_spill] sm:$0xff] %v9040_v43  ;;  %v13639_v41 = vld [vmem:[#allocation123_spill] sm:$0xff] }
 0x15b   :  { %13610 = vst [vmem:[#allocation242_spill] sm:$0xff] %v9047_v61  ;;  %v9069_v61 = vmax.f32 %v6910_v59, %v13620_v12  ;;  %v6911_v59 = vld [vmem:[%s12495_s0 + $0x108] sm:$0xff]  ;;  %v13631_v12 = vrot.slane %v7268_v39, 9  ;;  %v9106_v50 = vmax.f32 %v13640_v56, %v13639_v41  ;;  %v13651_v41 = vrot.slane %v7277_v38, 6 }
 0x15c   :  { %13613 = vst [vmem:[#allocation115_spill] sm:$0xff] %v9052_v49  ;;  %v9074_v49 = vmax.f32 %v13623_v7, %v13622_v19  ;;  %v13633_v19 = vld [vmem:[#allocation121_spill] sm:$0xff]  ;;  %v13634_v7 = vrot.slane %v7268_v39, 2 }
 0x15d   :  { %13616 = vst [vmem:[#allocation116_spill] sm:$0xff] %v9057_v8  ;;  %v9079_v8 = vmax.f32 %v13626_v22, %v13625_v24  ;;  %v13636_v24 = vld [vmem:[#allocation122_spill] sm:$0xff]  ;;  %v13637_v22 = vrot.slane %v7268_v39, 4  ;;  %v14079_v53 = vld [vmem:[#allocation111_spill] sm:$0xff] }
 0x15e   :  { %13619 = vst [vmem:[#allocation117_spill] sm:$0xff] %v9062_v45  ;;  %v13650_v39 = vld [vmem:[#allocation126_spill] sm:$0xff] }
 0x15f   :  { %13621 = vst [vmem:[#allocation243_spill] sm:$0xff] %v9069_v61  ;;  %v9091_v61 = vmax.f32 %v6911_v59, %v13631_v12  ;;  %v6912_v59 = vld [vmem:[%s12495_s0 + $0x110] sm:$0xff]  ;;  %v13642_v12 = vrot.slane %v7277_v38, 9  ;;  %v9128_v56 = vmax.f32 %v13651_v41, %v13650_v39  ;;  %v13662_v39 = vrot.slane %v7286_v51, 6 }
 0x160   :  { %13624 = vst [vmem:[#allocation118_spill] sm:$0xff] %v9074_v49  ;;  %v9096_v49 = vmax.f32 %v13634_v7, %v13633_v19  ;;  %v13644_v19 = vld [vmem:[#allocation124_spill] sm:$0xff]  ;;  %v13645_v7 = vrot.slane %v7277_v38, 2 }
 0x161   :  { %13627 = vst [vmem:[#allocation119_spill] sm:$0xff] %v9079_v8  ;;  %v9101_v8 = vmax.f32 %v13637_v22, %v13636_v24  ;;  %v13647_v24 = vld [vmem:[#allocation125_spill] sm:$0xff]  ;;  %v13648_v22 = vrot.slane %v7277_v38, 4 }
 0x162   :  { %13630 = vst [vmem:[#allocation120_spill] sm:$0xff] %v9084_v44  ;;  %v13661_v38 = vld [vmem:[#allocation129_spill] sm:$0xff] }
 0x163   :  { %13632 = vst [vmem:[#allocation244_spill] sm:$0xff] %v9091_v61  ;;  %v9113_v61 = vmax.f32 %v6912_v59, %v13642_v12  ;;  %v6913_v59 = vld [vmem:[%s12495_s0 + $0x118] sm:$0xff]  ;;  %v13653_v12 = vrot.slane %v7286_v51, 9  ;;  %v9150_v41 = vmax.f32 %v13662_v39, %v13661_v38  ;;  %v13673_v38 = vrot.slane %v7295_v35, 6 }
 0x164   :  { %13635 = vst [vmem:[#allocation121_spill] sm:$0xff] %v9096_v49  ;;  %v9118_v49 = vmax.f32 %v13645_v7, %v13644_v19  ;;  %v13655_v19 = vld [vmem:[#allocation127_spill] sm:$0xff]  ;;  %v13656_v7 = vrot.slane %v7286_v51, 2 }
 0x165   :  { %13638 = vst [vmem:[#allocation122_spill] sm:$0xff] %v9101_v8  ;;  %v9123_v8 = vmax.f32 %v13648_v22, %v13647_v24  ;;  %v13658_v24 = vld [vmem:[#allocation128_spill] sm:$0xff]  ;;  %v13659_v22 = vrot.slane %v7286_v51, 4 }
 0x166   :  { %13641 = vst [vmem:[#allocation123_spill] sm:$0xff] %v9106_v50  ;;  %v9135_v50 = vmax.f32 %v6913_v59, %v13653_v12  ;;  %v9140_v44 = vmax.f32 %v13656_v7, %v13655_v19  ;;  %v6914_v59 = vld [vmem:[%s12495_s0 + $0x120] sm:$0xff]  ;;  %v13664_v12 = vrot.slane %v7295_v35, 9  ;;  %v13666_v19 = vld [vmem:[#allocation130_spill] sm:$0xff]  ;;  %v13667_v7 = vrot.slane %v7295_v35, 2 }
 0x167   :  { %13643 = vst [vmem:[#allocation245_spill] sm:$0xff] %v9113_v61  ;;  %v13672_v51 = vld [vmem:[#allocation132_spill] sm:$0xff]  ;;  %v14081_v57 = vld [vmem:[#allocation118_spill] sm:$0xff] }
 0x168   :  { %13646 = vst [vmem:[#allocation124_spill] sm:$0xff] %v9118_v49  ;;  %v9172_v39 = vmax.f32 %v13673_v38, %v13672_v51  ;;  %v13684_v51 = vrot.slane %v7300_v33, 6 }
 0x169   :  { %13649 = vst [vmem:[#allocation125_spill] sm:$0xff] %v9123_v8  ;;  %v9145_v8 = vmax.f32 %v13659_v22, %v13658_v24  ;;  %v13669_v24 = vld [vmem:[#allocation131_spill] sm:$0xff]  ;;  %v13670_v22 = vrot.slane %v7295_v35, 4  ;;  %v14084_v36 = vld [vmem:[#allocation120_spill] sm:$0xff] }
 0x16a   :  { %13652 = vst [vmem:[#allocation126_spill] sm:$0xff] %v9128_v56  ;;  %v13683_v35 = vld [vmem:[#allocation135_spill] sm:$0xff] }
 0x16b   :  { %13654 = vst [vmem:[#allocation246_spill] sm:$0xff] %v9135_v50  ;;  %v9157_v50 = vmax.f32 %v6914_v59, %v13664_v12  ;;  %v6915_v59 = vld [vmem:[%s12495_s0 + $0x128] sm:$0xff]  ;;  %v13675_v12 = vrot.slane %v7300_v33, 9  ;;  %v9194_v38 = vmax.f32 %v13684_v51, %v13683_v35  ;;  %v13695_v35 = vrot.slane %v7309_v32, 6 }
 0x16c   :  { %13657 = vst [vmem:[#allocation127_spill] sm:$0xff] %v9140_v44  ;;  %v9162_v44 = vmax.f32 %v13667_v7, %v13666_v19  ;;  %v13677_v19 = vld [vmem:[#allocation133_spill] sm:$0xff]  ;;  %v13678_v7 = vrot.slane %v7300_v33, 2 }
 0x16d   :  { %13660 = vst [vmem:[#allocation128_spill] sm:$0xff] %v9145_v8  ;;  %v9167_v8 = vmax.f32 %v13670_v22, %v13669_v24  ;;  %v13680_v24 = vld [vmem:[#allocation134_spill] sm:$0xff]  ;;  %v13681_v22 = vrot.slane %v7300_v33, 4  ;;  %v14091_v62 = vld [vmem:[#allocation123_spill] sm:$0xff] }
 0x16e   :  { %13663 = vst [vmem:[#allocation129_spill] sm:$0xff] %v9150_v41  ;;  %v13694_v33 = vld [vmem:[#allocation138_spill] sm:$0xff] }
 0x16f   :  { %13665 = vst [vmem:[#allocation247_spill] sm:$0xff] %v9157_v50  ;;  %v9179_v50 = vmax.f32 %v6915_v59, %v13675_v12  ;;  %v6916_v59 = vld [vmem:[%s12495_s0 + $0x130] sm:$0xff]  ;;  %v13686_v12 = vrot.slane %v7309_v32, 9  ;;  %v9216_v51 = vmax.f32 %v13695_v35, %v13694_v33  ;;  %v13706_v33 = vrot.slane %v7318_v46, 6 }
 0x170   :  { %13668 = vst [vmem:[#allocation130_spill] sm:$0xff] %v9162_v44  ;;  %v9184_v44 = vmax.f32 %v13678_v7, %v13677_v19  ;;  %v13688_v19 = vld [vmem:[#allocation136_spill] sm:$0xff]  ;;  %v13689_v7 = vrot.slane %v7309_v32, 2 }
 0x171   :  { %13671 = vst [vmem:[#allocation131_spill] sm:$0xff] %v9167_v8  ;;  %v9189_v8 = vmax.f32 %v13681_v22, %v13680_v24  ;;  %v13691_v24 = vld [vmem:[#allocation137_spill] sm:$0xff]  ;;  %v13692_v22 = vrot.slane %v7309_v32, 4 }
 0x172   :  { %13674 = vst [vmem:[#allocation132_spill] sm:$0xff] %v9172_v39  ;;  %v13705_v32 = vld [vmem:[#allocation141_spill] sm:$0xff] }
 0x173   :  { %13676 = vst [vmem:[#allocation248_spill] sm:$0xff] %v9179_v50  ;;  %v9201_v50 = vmax.f32 %v6916_v59, %v13686_v12  ;;  %v6917_v59 = vld [vmem:[%s12495_s0 + $0x138] sm:$0xff]  ;;  %v13697_v12 = vrot.slane %v7318_v46, 9  ;;  %v9238_v35 = vmax.f32 %v13706_v33, %v13705_v32  ;;  %v13717_v32 = vrot.slane %v7327_v30, 6 }
 0x174   :  { %13679 = vst [vmem:[#allocation133_spill] sm:$0xff] %v9184_v44  ;;  %v9206_v44 = vmax.f32 %v13689_v7, %v13688_v19  ;;  %v13699_v19 = vld [vmem:[#allocation139_spill] sm:$0xff]  ;;  %v13700_v7 = vrot.slane %v7318_v46, 2 }
 0x175   :  { %13682 = vst [vmem:[#allocation134_spill] sm:$0xff] %v9189_v8  ;;  %v9211_v8 = vmax.f32 %v13692_v22, %v13691_v24  ;;  %v13702_v24 = vld [vmem:[#allocation140_spill] sm:$0xff]  ;;  %v13703_v22 = vrot.slane %v7318_v46, 4 }
 0x176   :  { %13685 = vst [vmem:[#allocation135_spill] sm:$0xff] %v9194_v38  ;;  %v9223_v38 = vmax.f32 %v6917_v59, %v13697_v12  ;;  %v9228_v39 = vmax.f32 %v13700_v7, %v13699_v19  ;;  %v6918_v59 = vld [vmem:[%s12495_s0 + $0x140] sm:$0xff]  ;;  %v13708_v12 = vrot.slane %v7327_v30, 9  ;;  %v13710_v19 = vld [vmem:[#allocation142_spill] sm:$0xff]  ;;  %v13711_v7 = vrot.slane %v7327_v30, 2 }
 0x177   :  { %13687 = vst [vmem:[#allocation249_spill] sm:$0xff] %v9201_v50  ;;  %v13716_v46 = vld [vmem:[#allocation144_spill] sm:$0xff]  ;;  %v14093_v43 = vld [vmem:[#allocation130_spill] sm:$0xff]  ;;  %v12798_v50 = vmov 0.0  }
 0x178   :  { %13690 = vst [vmem:[#allocation136_spill] sm:$0xff] %v9206_v44  ;;  %v9260_v33 = vmax.f32 %v13717_v32, %v13716_v46  ;;  %v13728_v46 = vrot.slane %v7332_v28, 6  ;;  %v14197_v44 = vld [vmem:[#allocation28_spill] sm:$0xff] }
 0x179   :  { %13693 = vst [vmem:[#allocation137_spill] sm:$0xff] %v9211_v8  ;;  %v9233_v8 = vmax.f32 %v13703_v22, %v13702_v24  ;;  %v13713_v24 = vld [vmem:[#allocation143_spill] sm:$0xff]  ;;  %v13714_v22 = vrot.slane %v7327_v30, 4  ;;  %v14096_v52 = vld [vmem:[#allocation132_spill] sm:$0xff] }
 0x17a   :  { %13696 = vst [vmem:[#allocation138_spill] sm:$0xff] %v9216_v51  ;;  %v13727_v30 = vld [vmem:[#allocation147_spill] sm:$0xff] }
 0x17b   :  { %13698 = vst [vmem:[#allocation250_spill] sm:$0xff] %v9223_v38  ;;  %v9245_v38 = vmax.f32 %v6918_v59, %v13708_v12  ;;  %v6919_v59 = vld [vmem:[%s12495_s0 + $0x148] sm:$0xff]  ;;  %v13719_v12 = vrot.slane %v7332_v28, 9  ;;  %v9282_v32 = vmax.f32 %v13728_v46, %v13727_v30  ;;  %v13739_v30 = vrot.slane %v7341_v27, 6  ;;  %v14200_v51 = vld [vmem:[#allocation23_spill] sm:$0xff] }
 0x17c   :  { %13701 = vst [vmem:[#allocation139_spill] sm:$0xff] %v9228_v39  ;;  %v9250_v39 = vmax.f32 %v13711_v7, %v13710_v19  ;;  %v13721_v19 = vld [vmem:[#allocation145_spill] sm:$0xff]  ;;  %v13722_v7 = vrot.slane %v7332_v28, 2  ;;  %v14202_v10 = vmax.f32 %v14200_v51, %v14201_v2  ;;  %v14213_v2 = vld [vmem:[#allocation26_spill] sm:$0xff] }
 0x17d   :  { %13704 = vst [vmem:[#allocation140_spill] sm:$0xff] %v9233_v8  ;;  %v9255_v8 = vmax.f32 %v13714_v22, %v13713_v24  ;;  %v13724_v24 = vld [vmem:[#allocation146_spill] sm:$0xff]  ;;  %v13725_v22 = vrot.slane %v7332_v28, 4  ;;  %v14103_v49 = vld [vmem:[#allocation135_spill] sm:$0xff] }
 0x17e   :  { %13707 = vst [vmem:[#allocation141_spill] sm:$0xff] %v9238_v35  ;;  %v13738_v28 = vld [vmem:[#allocation150_spill] sm:$0xff]  ;;  %v10039_v26 = vperm.slane %v14202_v10, 0  ;;  %v14214_v10 = vld [vmem:[#allocation32_spill] sm:$0xff] }
 0x17f   :  { %13709 = vst [vmem:[#allocation251_spill] sm:$0xff] %v9245_v38  ;;  %v9267_v38 = vmax.f32 %v6919_v59, %v13719_v12  ;;  %v6920_v59 = vld [vmem:[%s12495_s0 + $0x150] sm:$0xff]  ;;  %v13730_v12 = vrot.slane %v7341_v27, 9  ;;  %v9304_v46 = vmax.f32 %v13739_v30, %v13738_v28  ;;  %v13750_v28 = vrot.slane %v7350_v40, 6 }
 0x180   :  { %13712 = vst [vmem:[#allocation142_spill] sm:$0xff] %v9250_v39  ;;  %v9272_v39 = vmax.f32 %v13722_v7, %v13721_v19  ;;  %v13732_v19 = vld [vmem:[#allocation148_spill] sm:$0xff]  ;;  %v13733_v7 = vrot.slane %v7341_v27, 2  ;;  %v14215_v51 = vmax.f32 %v14213_v2, %v14214_v10  ;;  %v14224_v2 = vld [vmem:[#allocation35_spill] sm:$0xff]  ;;  %v14225_v10 = vld [vmem:[#allocation41_spill] sm:$0xff] }
 0x181   :  { %13715 = vst [vmem:[#allocation143_spill] sm:$0xff] %v9255_v8  ;;  %v9277_v8 = vmax.f32 %v13725_v22, %v13724_v24  ;;  %v13735_v24 = vld [vmem:[#allocation149_spill] sm:$0xff]  ;;  %v13736_v22 = vrot.slane %v7341_v27, 4 }
 0x182   :  { %13718 = vst [vmem:[#allocation144_spill] sm:$0xff] %v9260_v33  ;;  %v13749_v27 = vld [vmem:[#allocation153_spill] sm:$0xff] }
 0x183   :  { %13720 = vst [vmem:[#allocation252_spill] sm:$0xff] %v9267_v38  ;;  %v9289_v38 = vmax.f32 %v6920_v59, %v13730_v12  ;;  %v6921_v59 = vld [vmem:[%s12495_s0 + $0x158] sm:$0xff]  ;;  %v13741_v12 = vrot.slane %v7350_v40, 9  ;;  %v9326_v30 = vmax.f32 %v13750_v28, %v13749_v27  ;;  %v13761_v27 = vrot.slane %v7359_v25, 6 }
 0x184   :  { %13723 = vst [vmem:[#allocation145_spill] sm:$0xff] %v9272_v39  ;;  %v9294_v39 = vmax.f32 %v13733_v7, %v13732_v19  ;;  %v13743_v19 = vld [vmem:[#allocation151_spill] sm:$0xff]  ;;  %v13744_v7 = vrot.slane %v7350_v40, 2 }
 0x185   :  { %13726 = vst [vmem:[#allocation146_spill] sm:$0xff] %v9277_v8  ;;  %v9299_v8 = vmax.f32 %v13736_v22, %v13735_v24  ;;  %v13746_v24 = vld [vmem:[#allocation152_spill] sm:$0xff]  ;;  %v13747_v22 = vrot.slane %v7350_v40, 4 }
 0x186   :  { %13729 = vst [vmem:[#allocation147_spill] sm:$0xff] %v9282_v32  ;;  %v9311_v32 = vmax.f32 %v6921_v59, %v13741_v12  ;;  %v9316_v33 = vmax.f32 %v13744_v7, %v13743_v19  ;;  %v6922_v59 = vld [vmem:[%s12495_s0 + $0x160] sm:$0xff]  ;;  %v13752_v12 = vrot.slane %v7359_v25, 9  ;;  %v13754_v19 = vld [vmem:[#allocation154_spill] sm:$0xff]  ;;  %v13755_v7 = vrot.slane %v7359_v25, 2 }
 0x187   :  { %13731 = vst [vmem:[#allocation253_spill] sm:$0xff] %v9289_v38  ;;  %v13760_v40 = vld [vmem:[#allocation156_spill] sm:$0xff] }
 0x188   :  { %13734 = vst [vmem:[#allocation148_spill] sm:$0xff] %v9294_v39  ;;  %v9348_v28 = vmax.f32 %v13761_v27, %v13760_v40  ;;  %v13772_v40 = vrot.slane %v7364_v23, 6 }
 0x189   :  { %13737 = vst [vmem:[#allocation149_spill] sm:$0xff] %v9299_v8  ;;  %v9321_v8 = vmax.f32 %v13747_v22, %v13746_v24  ;;  %v13757_v24 = vld [vmem:[#allocation155_spill] sm:$0xff]  ;;  %v13758_v22 = vrot.slane %v7359_v25, 4 }
 0x18a   :  { %13740 = vst [vmem:[#allocation150_spill] sm:$0xff] %v9304_v46  ;;  %v13771_v25 = vld [vmem:[#allocation159_spill] sm:$0xff]  ;;  %v14204_v46 = vld [vmem:[#allocation30_spill] sm:$0xff] }
 0x18b   :  { %13742 = vst [vmem:[#allocation254_spill] sm:$0xff] %v9311_v32  ;;  %v9333_v32 = vmax.f32 %v6922_v59, %v13752_v12  ;;  %v6923_v59 = vld [vmem:[%s12495_s0 + $0x168] sm:$0xff]  ;;  %v13763_v12 = vrot.slane %v7364_v23, 9  ;;  %v9370_v27 = vmax.f32 %v13772_v40, %v13771_v25 }
 0x18c   :  { %13745 = vst [vmem:[#allocation151_spill] sm:$0xff] %v9316_v33  ;;  %v9338_v33 = vmax.f32 %v13755_v7, %v13754_v19  ;;  %v13765_v19 = vld [vmem:[#allocation157_spill] sm:$0xff]  ;;  %v13766_v7 = vrot.slane %v7364_v23, 2 }
 0x18d   :  { %13748 = vst [vmem:[#allocation152_spill] sm:$0xff] %v9321_v8  ;;  %v9343_v8 = vmax.f32 %v13758_v22, %v13757_v24  ;;  %v13768_v24 = vld [vmem:[#allocation158_spill] sm:$0xff]  ;;  %v13769_v22 = vrot.slane %v7364_v23, 4 }
 0x18e   :  { %13751 = vst [vmem:[#allocation153_spill] sm:$0xff] %v9326_v30  ;;  %v13783_v23 = vld [vmem:[#allocation162_spill] sm:$0xff] }
 0x18f   :  { %13753 = vst [vmem:[#allocation255_spill] sm:$0xff] %v9333_v32  ;;  %v9355_v32 = vmax.f32 %v6923_v59, %v13763_v12  ;;  %v6924_v59 = vld [vmem:[%s12495_s0 + $0x170] sm:$0xff]  ;;  %v13774_v12 = vld [vmem:[#allocation7_spill] sm:$0xff] }
 0x190   :  { %13756 = vst [vmem:[#allocation154_spill] sm:$0xff] %v9338_v33  ;;  %v9360_v33 = vmax.f32 %v13766_v7, %v13765_v19  ;;  %v13777_v19 = vld [vmem:[#allocation160_spill] sm:$0xff]  ;;  %v13778_v7 = vrot.slane %v13774_v12, 2  ;;  %v13784_v25 = vrot.slane %v13774_v12, 6 }
 0x191   :  { %13759 = vst [vmem:[#allocation155_spill] sm:$0xff] %v9343_v8  ;;  %v9365_v8 = vmax.f32 %v13769_v22, %v13768_v24  ;;  %v13780_v24 = vld [vmem:[#allocation161_spill] sm:$0xff]  ;;  %v13781_v22 = vrot.slane %v13774_v12, 4 }
 0x192   :  { %13762 = vst [vmem:[#allocation156_spill] sm:$0xff] %v9348_v28  ;;  %v9392_v40 = vmax.f32 %v13784_v25, %v13783_v23 }
 0x193   :  { %13764 = vst [vmem:[#allocation256_spill] sm:$0xff] %v9355_v32  ;;  %v13775_v32 = vrot.slane %v13774_v12, 9  ;;  %v13795_v12 = vld [vmem:[#allocation165_spill] sm:$0xff] }
 0x194   :  { %13767 = vst [vmem:[#allocation157_spill] sm:$0xff] %v9360_v33  ;;  %v9382_v33 = vmax.f32 %v13778_v7, %v13777_v19  ;;  %v13789_v19 = vld [vmem:[#allocation163_spill] sm:$0xff] }
 0x195   :  { %13770 = vst [vmem:[#allocation158_spill] sm:$0xff] %v9365_v8  ;;  %v9377_v28 = vmax.f32 %v6924_v59, %v13775_v32  ;;  %v9387_v8 = vmax.f32 %v13781_v22, %v13780_v24  ;;  %v6925_v32 = vld [vmem:[%s12495_s0 + $0x178] sm:$0xff]  ;;  %v13786_v59 = vld [vmem:[#allocation8_spill] sm:$0xff] }
 0x196   :  { %13773 = vst [vmem:[#allocation159_spill] sm:$0xff] %v9370_v27  ;;  %v13787_v27 = vrot.slane %v13786_v59, 9  ;;  %v13790_v7 = vrot.slane %v13786_v59, 2  ;;  %v13792_v24 = vld [vmem:[#allocation164_spill] sm:$0xff]  ;;  %v13793_v22 = vrot.slane %v13786_v59, 4  ;;  %v13796_v23 = vrot.slane %v13786_v59, 6 }
 0x197   :  { %13776 = vst [vmem:[#allocation7_spill] sm:$0xff] %v9377_v28  ;;  %v13807_v59 = vld [vmem:[#allocation168_spill] sm:$0xff] }
 0x198   :  { %13779 = vst [vmem:[#allocation160_spill] sm:$0xff] %v9382_v33  ;;  %v9399_v28 = vmax.f32 %v6925_v32, %v13787_v27  ;;  %v9404_v33 = vmax.f32 %v13790_v7, %v13789_v19  ;;  %v9414_v25 = vmax.f32 %v13796_v23, %v13795_v12  ;;  %v6926_v27 = vld [vmem:[%s12495_s0 + $0x180] sm:$0xff]  ;;  %v13798_v32 = vld [vmem:[#allocation9_spill] sm:$0xff]  ;;  %v13801_v19 = vld [vmem:[#allocation166_spill] sm:$0xff] }
 0x199   :  { %13782 = vst [vmem:[#allocation161_spill] sm:$0xff] %v9387_v8  ;;  %v9409_v8 = vmax.f32 %v13793_v22, %v13792_v24  ;;  %v13802_v7 = vrot.slane %v13798_v32, 2  ;;  %v13804_v24 = vld [vmem:[#allocation167_spill] sm:$0xff]  ;;  %v13805_v22 = vrot.slane %v13798_v32, 4  ;;  %v13808_v12 = vrot.slane %v13798_v32, 6 }
 0x19a   :  { %13785 = vst [vmem:[#allocation162_spill] sm:$0xff] %v9392_v40 }
 0x19b   :  { %13788 = vst [vmem:[#allocation8_spill] sm:$0xff] %v9399_v28  ;;  %v13799_v28 = vrot.slane %v13798_v32, 9  ;;  %v9436_v23 = vmax.f32 %v13808_v12, %v13807_v59  ;;  %v13819_v32 = vld [vmem:[#allocation171_spill] sm:$0xff] }
 0x19c   :  { %13791 = vst [vmem:[#allocation163_spill] sm:$0xff] %v9404_v33  ;;  %v9426_v33 = vmax.f32 %v13802_v7, %v13801_v19  ;;  %v13813_v19 = vld [vmem:[#allocation169_spill] sm:$0xff] }
 0x19d   :  { %13794 = vst [vmem:[#allocation164_spill] sm:$0xff] %v9409_v8  ;;  %v9421_v40 = vmax.f32 %v6926_v27, %v13799_v28  ;;  %v9431_v8 = vmax.f32 %v13805_v22, %v13804_v24  ;;  %v6927_v28 = vld [vmem:[%s12495_s0 + $0x188] sm:$0xff]  ;;  %v13810_v27 = vld [vmem:[#allocation10_spill] sm:$0xff] }
 0x19e   :  { %13797 = vst [vmem:[#allocation165_spill] sm:$0xff] %v9414_v25  ;;  %v13814_v7 = vrot.slane %v13810_v27, 2  ;;  %v13816_v24 = vld [vmem:[#allocation170_spill] sm:$0xff]  ;;  %v13817_v22 = vrot.slane %v13810_v27, 4  ;;  %v13820_v59 = vrot.slane %v13810_v27, 6 }
 0x19f   :  { %13800 = vst [vmem:[#allocation9_spill] sm:$0xff] %v9421_v40  ;;  %v13811_v40 = vrot.slane %v13810_v27, 9  ;;  %v13831_v27 = vld [vmem:[#allocation174_spill] sm:$0xff] }
 0x1a0   :  { %13803 = vst [vmem:[#allocation166_spill] sm:$0xff] %v9426_v33  ;;  %v9448_v33 = vmax.f32 %v13814_v7, %v13813_v19  ;;  %v9458_v12 = vmax.f32 %v13820_v59, %v13819_v32  ;;  %v13825_v19 = vld [vmem:[#allocation172_spill] sm:$0xff] }
 0x1a1   :  { %13806 = vst [vmem:[#allocation167_spill] sm:$0xff] %v9431_v8  ;;  %v9443_v25 = vmax.f32 %v6927_v28, %v13811_v40  ;;  %v9453_v8 = vmax.f32 %v13817_v22, %v13816_v24  ;;  %v6928_v40 = vld [vmem:[%s12495_s0 + $0x190] sm:$0xff]  ;;  %v13822_v28 = vld [vmem:[#allocation11_spill] sm:$0xff]  ;;  %v13828_v24 = vld [vmem:[#allocation173_spill] sm:$0xff] }
 0x1a2   :  { %13809 = vst [vmem:[#allocation168_spill] sm:$0xff] %v9436_v23  ;;  %v13826_v7 = vrot.slane %v13822_v28, 2  ;;  %v13829_v22 = vrot.slane %v13822_v28, 4  ;;  %v13832_v32 = vrot.slane %v13822_v28, 6 }
 0x1a3   :  { %13812 = vst [vmem:[#allocation10_spill] sm:$0xff] %v9443_v25  ;;  %v13823_v25 = vrot.slane %v13822_v28, 9  ;;  %v13843_v28 = vld [vmem:[#allocation177_spill] sm:$0xff] }
 0x1a4   :  { %13815 = vst [vmem:[#allocation169_spill] sm:$0xff] %v9448_v33  ;;  %v9470_v33 = vmax.f32 %v13826_v7, %v13825_v19  ;;  %v9480_v59 = vmax.f32 %v13832_v32, %v13831_v27  ;;  %v13837_v19 = vld [vmem:[#allocation175_spill] sm:$0xff] }
 0x1a5   :  { %13818 = vst [vmem:[#allocation170_spill] sm:$0xff] %v9453_v8  ;;  %v9465_v23 = vmax.f32 %v6928_v40, %v13823_v25  ;;  %v9475_v8 = vmax.f32 %v13829_v22, %v13828_v24  ;;  %v6929_v25 = vld [vmem:[%s12495_s0 + $0x198] sm:$0xff]  ;;  %v13834_v40 = vld [vmem:[#allocation12_spill] sm:$0xff] }
 0x1a6   :  { %13821 = vst [vmem:[#allocation171_spill] sm:$0xff] %v9458_v12  ;;  %v13835_v12 = vrot.slane %v13834_v40, 9  ;;  %v13838_v7 = vrot.slane %v13834_v40, 2  ;;  %v13840_v24 = vld [vmem:[#allocation176_spill] sm:$0xff]  ;;  %v13841_v22 = vrot.slane %v13834_v40, 4  ;;  %v13844_v27 = vrot.slane %v13834_v40, 6 }
 0x1a7   :  { %13824 = vst [vmem:[#allocation11_spill] sm:$0xff] %v9465_v23  ;;  %v13855_v40 = vld [vmem:[#allocation180_spill] sm:$0xff] }
 0x1a8   :  { %13827 = vst [vmem:[#allocation172_spill] sm:$0xff] %v9470_v33  ;;  %v9487_v23 = vmax.f32 %v6929_v25, %v13835_v12  ;;  %v9492_v33 = vmax.f32 %v13838_v7, %v13837_v19  ;;  %v9502_v32 = vmax.f32 %v13844_v27, %v13843_v28  ;;  %v6930_v12 = vld [vmem:[%s12495_s0 + $0x1a0] sm:$0xff]  ;;  %v13846_v25 = vld [vmem:[#allocation13_spill] sm:$0xff]  ;;  %v13849_v19 = vld [vmem:[#allocation178_spill] sm:$0xff] }
 0x1a9   :  { %13830 = vst [vmem:[#allocation173_spill] sm:$0xff] %v9475_v8  ;;  %v9497_v8 = vmax.f32 %v13841_v22, %v13840_v24  ;;  %v13850_v7 = vrot.slane %v13846_v25, 2  ;;  %v13852_v24 = vld [vmem:[#allocation179_spill] sm:$0xff]  ;;  %v13853_v22 = vrot.slane %v13846_v25, 4  ;;  %v13856_v28 = vrot.slane %v13846_v25, 6  ;;  %v14139_v45 = vld [vmem:[#allocation168_spill] sm:$0xff] }
 0x1aa   :  { %13833 = vst [vmem:[#allocation174_spill] sm:$0xff] %v9480_v59 }
 0x1ab   :  { %13836 = vst [vmem:[#allocation12_spill] sm:$0xff] %v9487_v23  ;;  %v13847_v23 = vrot.slane %v13846_v25, 9  ;;  %v9524_v27 = vmax.f32 %v13856_v28, %v13855_v40  ;;  %v13867_v25 = vld [vmem:[#allocation183_spill] sm:$0xff] }
 0x1ac   :  { %13839 = vst [vmem:[#allocation175_spill] sm:$0xff] %v9492_v33  ;;  %v9514_v33 = vmax.f32 %v13850_v7, %v13849_v19  ;;  %v13861_v19 = vld [vmem:[#allocation181_spill] sm:$0xff] }
 0x1ad   :  { %13842 = vst [vmem:[#allocation176_spill] sm:$0xff] %v9497_v8  ;;  %v9509_v59 = vmax.f32 %v6930_v12, %v13847_v23  ;;  %v9519_v8 = vmax.f32 %v13853_v22, %v13852_v24  ;;  %v6931_v23 = vld [vmem:[%s12495_s0 + $0x1a8] sm:$0xff]  ;;  %v13858_v12 = vld [vmem:[#allocation14_spill] sm:$0xff]  ;;  %v14147_v56 = vld [vmem:[#allocation171_spill] sm:$0xff] }
 0x1ae   :  { %13845 = vst [vmem:[#allocation177_spill] sm:$0xff] %v9502_v32  ;;  %v13862_v7 = vrot.slane %v13858_v12, 2  ;;  %v13864_v24 = vld [vmem:[#allocation182_spill] sm:$0xff]  ;;  %v13865_v22 = vrot.slane %v13858_v12, 4  ;;  %v13868_v40 = vrot.slane %v13858_v12, 6 }
 0x1af   :  { %13848 = vst [vmem:[#allocation13_spill] sm:$0xff] %v9509_v59  ;;  %v13859_v59 = vrot.slane %v13858_v12, 9  ;;  %v13879_v12 = vld [vmem:[#allocation186_spill] sm:$0xff] }
 0x1b0   :  { %13851 = vst [vmem:[#allocation178_spill] sm:$0xff] %v9514_v33  ;;  %v9536_v33 = vmax.f32 %v13862_v7, %v13861_v19  ;;  %v9546_v28 = vmax.f32 %v13868_v40, %v13867_v25  ;;  %v13873_v19 = vld [vmem:[#allocation184_spill] sm:$0xff] }
 0x1b1   :  { %13854 = vst [vmem:[#allocation179_spill] sm:$0xff] %v9519_v8  ;;  %v9531_v32 = vmax.f32 %v6931_v23, %v13859_v59  ;;  %v9541_v8 = vmax.f32 %v13865_v22, %v13864_v24  ;;  %v6932_v59 = vld [vmem:[%s12495_s0 + $0x1b0] sm:$0xff]  ;;  %v13870_v23 = vld [vmem:[#allocation15_spill] sm:$0xff]  ;;  %v13876_v24 = vld [vmem:[#allocation185_spill] sm:$0xff] }
 0x1b2   :  { %13857 = vst [vmem:[#allocation180_spill] sm:$0xff] %v9524_v27  ;;  %v13874_v7 = vrot.slane %v13870_v23, 2  ;;  %v13877_v22 = vrot.slane %v13870_v23, 4  ;;  %v13880_v25 = vrot.slane %v13870_v23, 6 }
 0x1b3   :  { %13860 = vst [vmem:[#allocation14_spill] sm:$0xff] %v9531_v32  ;;  %v13871_v32 = vrot.slane %v13870_v23, 9  ;;  %v13891_v23 = vld [vmem:[#allocation189_spill] sm:$0xff] }
 0x1b4   :  { %13863 = vst [vmem:[#allocation181_spill] sm:$0xff] %v9536_v33  ;;  %v9558_v33 = vmax.f32 %v13874_v7, %v13873_v19  ;;  %v9568_v40 = vmax.f32 %v13880_v25, %v13879_v12  ;;  %v13885_v19 = vld [vmem:[#allocation187_spill] sm:$0xff] }
 0x1b5   :  { %13866 = vst [vmem:[#allocation182_spill] sm:$0xff] %v9541_v8  ;;  %v9553_v27 = vmax.f32 %v6932_v59, %v13871_v32  ;;  %v9563_v8 = vmax.f32 %v13877_v22, %v13876_v24  ;;  %v6933_v32 = vld [vmem:[%s12495_s0 + $0x1b8] sm:$0xff]  ;;  %v13882_v59 = vld [vmem:[#allocation16_spill] sm:$0xff] }
 0x1b6   :  { %13869 = vst [vmem:[#allocation183_spill] sm:$0xff] %v9546_v28  ;;  %v13883_v28 = vrot.slane %v13882_v59, 9  ;;  %v13886_v7 = vrot.slane %v13882_v59, 2  ;;  %v13888_v24 = vld [vmem:[#allocation188_spill] sm:$0xff]  ;;  %v13889_v22 = vrot.slane %v13882_v59, 4  ;;  %v13892_v12 = vrot.slane %v13882_v59, 6 }
 0x1b7   :  { %13872 = vst [vmem:[#allocation15_spill] sm:$0xff] %v9553_v27  ;;  %v13902_v59 = vld [vmem:[#allocation191_spill] sm:$0xff] }
 0x1b8   :  { %13875 = vst [vmem:[#allocation184_spill] sm:$0xff] %v9558_v33  ;;  %v9575_v27 = vmax.f32 %v6933_v32, %v13883_v28  ;;  %v9580_v33 = vmax.f32 %v13886_v7, %v13885_v19  ;;  %v9590_v25 = vmax.f32 %v13892_v12, %v13891_v23  ;;  %v6934_v28 = vld [vmem:[%s12495_s0 + $0x1c0] sm:$0xff]  ;;  %v13894_v32 = vrot.slane %v13217_v29, 9  ;;  %v13896_v19 = vld [vmem:[#allocation17_spill] sm:$0xff] }
 0x1b9   :  { %13878 = vst [vmem:[#allocation185_spill] sm:$0xff] %v9563_v8  ;;  %v9585_v8 = vmax.f32 %v13889_v22, %v13888_v24  ;;  %v13897_v7 = vrot.slane %v13217_v29, 2  ;;  %v13899_v24 = vld [vmem:[#allocation190_spill] sm:$0xff]  ;;  %v13900_v22 = vrot.slane %v13217_v29, 4  ;;  %v13903_v23 = vrot.slane %v13217_v29, 6  ;;  %v13913_v29 = vld [vmem:[#allocation193_spill] sm:$0xff] }
 0x1ba   :  { %13881 = vst [vmem:[#allocation186_spill] sm:$0xff] %v9568_v40 }
 0x1bb   :  { %13884 = vst [vmem:[#allocation16_spill] sm:$0xff] %v9575_v27  ;;  %v9597_v27 = vmax.f32 %v6934_v28, %v13894_v32  ;;  %v9612_v12 = vmax.f32 %v13903_v23, %v13902_v59  ;;  %v6935_v28 = vld [vmem:[%s12495_s0 + $0x1c8] sm:$0xff]  ;;  %v13905_v32 = vrot.slane %v13224_v16, 9  ;;  %v13914_v59 = vrot.slane %v13224_v16, 6 }
 0x1bc   :  { %13887 = vst [vmem:[#allocation187_spill] sm:$0xff] %v9580_v33  ;;  %v9602_v33 = vmax.f32 %v13897_v7, %v13896_v19  ;;  %v13907_v19 = vld [vmem:[#allocation18_spill] sm:$0xff]  ;;  %v13908_v7 = vrot.slane %v13224_v16, 2 }
 0x1bd   :  { %13890 = vst [vmem:[#allocation188_spill] sm:$0xff] %v9585_v8  ;;  %v9607_v8 = vmax.f32 %v13900_v22, %v13899_v24  ;;  %v13910_v24 = vld [vmem:[#allocation192_spill] sm:$0xff]  ;;  %v13911_v22 = vrot.slane %v13224_v16, 4  ;;  %v9634_v23 = vmax.f32 %v13914_v59, %v13913_v29 }
 0x1be   :  { %13893 = vst [vmem:[#allocation189_spill] sm:$0xff] %v9590_v25  ;;  %v13925_v16 = vld [vmem:[#allocation196_spill] sm:$0xff] }
 0x1bf   :  { %13895 = vst [vmem:[#allocation257_spill] sm:$0xff] %v9597_v27  ;;  %v9619_v27 = vmax.f32 %v6935_v28, %v13905_v32  ;;  %v6936_v28 = vld [vmem:[%s12495_s0 + $0x1d0] sm:$0xff]  ;;  %v13916_v32 = vld [vmem:[#allocation19_spill] sm:$0xff] }
 0x1c0   :  { %13898 = vst [vmem:[#allocation17_spill] sm:$0xff] %v9602_v33  ;;  %v9624_v33 = vmax.f32 %v13908_v7, %v13907_v19  ;;  %v13919_v19 = vld [vmem:[#allocation194_spill] sm:$0xff]  ;;  %v13920_v7 = vrot.slane %v13916_v32, 2  ;;  %v13926_v29 = vrot.slane %v13916_v32, 6 }
 0x1c1   :  { %13901 = vst [vmem:[#allocation190_spill] sm:$0xff] %v9607_v8  ;;  %v9629_v8 = vmax.f32 %v13911_v22, %v13910_v24  ;;  %v13922_v24 = vld [vmem:[#allocation195_spill] sm:$0xff]  ;;  %v13923_v22 = vrot.slane %v13916_v32, 4 }
 0x1c2   :  { %13904 = vst [vmem:[#allocation191_spill] sm:$0xff] %v9612_v12  ;;  %v9656_v59 = vmax.f32 %v13926_v29, %v13925_v16  ;;  %v13937_v16 = vrot.slane %v7478_v18, 6 }
 0x1c3   :  { %13906 = vst [vmem:[#allocation258_spill] sm:$0xff] %v9619_v27  ;;  %v13917_v27 = vrot.slane %v13916_v32, 9  ;;  %v13936_v32 = vld [vmem:[#allocation199_spill] sm:$0xff] }
 0x1c4   :  { %13909 = vst [vmem:[#allocation18_spill] sm:$0xff] %v9624_v33  ;;  %v9646_v33 = vmax.f32 %v13920_v7, %v13919_v19  ;;  %v13930_v19 = vld [vmem:[#allocation197_spill] sm:$0xff]  ;;  %v13931_v7 = vrot.slane %v7478_v18, 2  ;;  %v9678_v29 = vmax.f32 %v13937_v16, %v13936_v32  ;;  %v13948_v32 = vrot.slane %v13243_v34, 6 }
 0x1c5   :  { %13912 = vst [vmem:[#allocation192_spill] sm:$0xff] %v9629_v8  ;;  %v9641_v12 = vmax.f32 %v6936_v28, %v13917_v27  ;;  %v9651_v8 = vmax.f32 %v13923_v22, %v13922_v24  ;;  %v6937_v27 = vld [vmem:[%s12495_s0 + $0x1d8] sm:$0xff]  ;;  %v13928_v28 = vrot.slane %v7478_v18, 9  ;;  %v13933_v24 = vld [vmem:[#allocation198_spill] sm:$0xff]  ;;  %v13934_v22 = vrot.slane %v7478_v18, 4  ;;  %v13947_v18 = vld [vmem:[#allocation201_spill] sm:$0xff] }
 0x1c6   :  { %13915 = vst [vmem:[#allocation193_spill] sm:$0xff] %v9634_v23  ;;  %v9700_v16 = vmax.f32 %v13948_v32, %v13947_v18  ;;  %v13959_v18 = vrot.slane %v7492_v17, 6 }
 0x1c7   :  { %13918 = vst [vmem:[#allocation19_spill] sm:$0xff] %v9641_v12  ;;  %v9663_v23 = vmax.f32 %v6937_v27, %v13928_v28  ;;  %v6938_v27 = vld [vmem:[%s12495_s0 + $0x1e0] sm:$0xff]  ;;  %v13939_v28 = vrot.slane %v13243_v34, 9 }
 0x1c8   :  { %13921 = vst [vmem:[#allocation194_spill] sm:$0xff] %v9646_v33  ;;  %v9668_v33 = vmax.f32 %v13931_v7, %v13930_v19  ;;  %v13941_v19 = vld [vmem:[#allocation20_spill] sm:$0xff]  ;;  %v13942_v7 = vrot.slane %v13243_v34, 2 }
 0x1c9   :  { %13924 = vst [vmem:[#allocation195_spill] sm:$0xff] %v9651_v8  ;;  %v9673_v8 = vmax.f32 %v13934_v22, %v13933_v24  ;;  %v13944_v24 = vld [vmem:[#allocation200_spill] sm:$0xff]  ;;  %v13945_v22 = vrot.slane %v13243_v34, 4 }
 0x1ca   :  { %13927 = vst [vmem:[#allocation196_spill] sm:$0xff] %v9656_v59  ;;  %v13958_v34 = vld [vmem:[#allocation204_spill] sm:$0xff]  ;;  %v14044_v59 = vld [vmem:[#allocation231_spill] sm:$0xff] }
 0x1cb   :  { %13929 = vst [vmem:[#allocation259_spill] sm:$0xff] %v9663_v23  ;;  %v9685_v23 = vmax.f32 %v6938_v27, %v13939_v28  ;;  %v6939_v27 = vld [vmem:[%s12495_s0 + $0x1e8] sm:$0xff]  ;;  %v13950_v28 = vrot.slane %v7492_v17, 9  ;;  %v9722_v32 = vmax.f32 %v13959_v18, %v13958_v34  ;;  %v13970_v34 = vrot.slane %v7501_v14, 6  ;;  %v14024_v12 = vld [vmem:[#allocation60_spill] sm:$0xff] }
 0x1cc   :  { %13932 = vst [vmem:[#allocation197_spill] sm:$0xff] %v9668_v33  ;;  %v9690_v33 = vmax.f32 %v13942_v7, %v13941_v19  ;;  %v13952_v19 = vld [vmem:[#allocation202_spill] sm:$0xff]  ;;  %v13953_v7 = vrot.slane %v7492_v17, 2 }
 0x1cd   :  { %13935 = vst [vmem:[#allocation198_spill] sm:$0xff] %v9673_v8  ;;  %v9695_v8 = vmax.f32 %v13945_v22, %v13944_v24  ;;  %v13955_v24 = vld [vmem:[#allocation203_spill] sm:$0xff]  ;;  %v13956_v22 = vrot.slane %v7492_v17, 4 }
 0x1ce   :  { %13938 = vst [vmem:[#allocation199_spill] sm:$0xff] %v9678_v29  ;;  %v13969_v17 = vld [vmem:[#allocation207_spill] sm:$0xff] }
 0x1cf   :  { %13940 = vst [vmem:[#allocation260_spill] sm:$0xff] %v9685_v23  ;;  %v9707_v23 = vmax.f32 %v6939_v27, %v13950_v28  ;;  %v6940_v27 = vld [vmem:[%s12495_s0 + $0x1f0] sm:$0xff]  ;;  %v13961_v28 = vrot.slane %v7501_v14, 9  ;;  %v9744_v18 = vmax.f32 %v13970_v34, %v13969_v17  ;;  %v14020_v29 = vld [vmem:[#allocation223_spill] sm:$0xff] }
 0x1d0   :  { %13943 = vst [vmem:[#allocation20_spill] sm:$0xff] %v9690_v33  ;;  %v9712_v33 = vmax.f32 %v13953_v7, %v13952_v19  ;;  %v13963_v19 = vld [vmem:[#allocation205_spill] sm:$0xff]  ;;  %v13964_v7 = vrot.slane %v7501_v14, 2 }
 0x1d1   :  { %13946 = vst [vmem:[#allocation200_spill] sm:$0xff] %v9695_v8  ;;  %v9717_v8 = vmax.f32 %v13956_v22, %v13955_v24  ;;  %v13966_v24 = vld [vmem:[#allocation206_spill] sm:$0xff]  ;;  %v13967_v22 = vrot.slane %v7501_v14, 4 }
 0x1d2   :  { %13949 = vst [vmem:[#allocation201_spill] sm:$0xff] %v9700_v16  ;;  %v13981_v14 = vld [vmem:[#allocation210_spill] sm:$0xff] }
 0x1d3   :  { %13951 = vst [vmem:[#allocation261_spill] sm:$0xff] %v9707_v23  ;;  %v9729_v23 = vmax.f32 %v6940_v27, %v13961_v28  ;;  %v6941_v27 = vld [vmem:[%s12495_s0 + $0x1f8] sm:$0xff]  ;;  %v13972_v28 = vld [vmem:[#allocation21_spill] sm:$0xff]  ;;  %s6969_s0 = smov 4  }
 0x1d4   :  { %13954 = vst [vmem:[#allocation202_spill] sm:$0xff] %v9712_v33  ;;  %v9734_v33 = vmax.f32 %v13964_v7, %v13963_v19  ;;  %v13975_v19 = vld [vmem:[#allocation208_spill] sm:$0xff]  ;;  %v13976_v7 = vrot.slane %v13972_v28, 2  ;;  %v13982_v17 = vrot.slane %v13972_v28, 6 }
 0x1d5   :  { %13957 = vst [vmem:[#allocation203_spill] sm:$0xff] %v9717_v8  ;;  %v9739_v8 = vmax.f32 %v13967_v22, %v13966_v24  ;;  %v13978_v24 = vld [vmem:[#allocation209_spill] sm:$0xff]  ;;  %v13979_v22 = vrot.slane %v13972_v28, 4 }
 0x1d6   :  { %13960 = vst [vmem:[#allocation204_spill] sm:$0xff] %v9722_v32  ;;  %v13973_v32 = vrot.slane %v13972_v28, 9  ;;  %v9766_v34 = vmax.f32 %v13982_v17, %v13981_v14  ;;  %v14068_v28 = vld [vmem:[#allocation239_spill] sm:$0xff]  ;;  %v14179_v42 = vld [vmem:[#allocation260_spill] sm:$0xff] }
 0x1d7   :  { %13962 = vst [vmem:[#allocation262_spill] sm:$0xff] %v9729_v23  ;;  %v13995_v23 = vld [vmem:[#allocation27_spill] sm:$0xff]  ;;  %v14181_v40 = vld [vmem:[#allocation20_spill] sm:$0xff] }
 0x1d8   :  { %13965 = vst [vmem:[#allocation205_spill] sm:$0xff] %v9734_v33  ;;  %v9751_v16 = vmax.f32 %v6941_v27, %v13973_v32  ;;  %v9756_v33 = vmax.f32 %v13976_v7, %v13975_v19  ;;  %v13985_v32 = vld [vmem:[#allocation22_spill] sm:$0xff]  ;;  %v13988_v7 = vld [vmem:[#allocation24_spill] sm:$0xff]  ;;  %v13996_v27 = vld [vmem:[#allocation215_spill] sm:$0xff] }
 0x1d9   :  { %13968 = vst [vmem:[#allocation206_spill] sm:$0xff] %v9739_v8  ;;  %v9761_v8 = vmax.f32 %v13979_v22, %v13978_v24  ;;  %v13997_v19 = vld [vmem:[#allocation34_spill] sm:$0xff]  ;;  %v14000_v22 = vld [vmem:[#allocation36_spill] sm:$0xff]  ;;  %v14056_v24 = vld [vmem:[#allocation235_spill] sm:$0xff]  ;;  %v14198_v48 = vmax.f32 %v13985_v32, %v14197_v44  ;;  %v14205_v60 = vmax.f32 %v13988_v7, %v14204_v46 }
 0x1da   :  { %13971 = vst [vmem:[#allocation207_spill] sm:$0xff] %v9744_v18  ;;  %v13984_v18 = vld [vmem:[#allocation211_spill] sm:$0xff]  ;;  %v14183_v61 = vld [vmem:[#allocation200_spill] sm:$0xff]  ;;  %v14185_v30 = vld [vmem:[#allocation201_spill] sm:$0xff] }
 0x1db   :  { %13974 = vst [vmem:[#allocation21_spill] sm:$0xff] %v9751_v16  ;;  %v14008_v16 = vld [vmem:[#allocation219_spill] sm:$0xff]  ;;  %v14187_v11 = vld [vmem:[#allocation261_spill] sm:$0xff]  ;;  %v14195_v41 = vmax.f32 %v13984_v18, %v14194_v58  ;;  %v10034_v39 = vperm.slane %v14198_v48, 0  ;;  %v10044_v58 = vperm.slane %v14205_v60, 0  ;;  %v14207_v18 = vld [vmem:[#allocation214_spill] sm:$0xff] }
 0x1dc   :  { %13977 = vst [vmem:[#allocation208_spill] sm:$0xff] %v9756_v33  ;;  %v14032_v33 = vld [vmem:[#allocation227_spill] sm:$0xff]  ;;  %v14209_v48 = vld [vmem:[#allocation25_spill] sm:$0xff] }
 0x1dd   :  { %13980 = vst [vmem:[#allocation209_spill] sm:$0xff] %v9761_v8  ;;  %v14012_v8 = vld [vmem:[#allocation48_spill] sm:$0xff]  ;;  %v14080_v14 = vld [vmem:[#allocation243_spill] sm:$0xff]  ;;  %v10027_v54 = vperm.slane %v14195_v41, 0  ;;  %v14217_v60 = vld [vmem:[#allocation33_spill] sm:$0xff] }
 0x1de   :  { %13983 = vst [vmem:[#allocation210_spill] sm:$0xff] %v9766_v34  ;;  %v14036_v34 = vld [vmem:[#allocation72_spill] sm:$0xff]  ;;  %v14092_v17 = vld [vmem:[#allocation247_spill] sm:$0xff]  ;;  %v14218_v46 = vmax.f32 %v13995_v23, %v14217_v60  ;;  %v14228_v23 = vld [vmem:[#allocation42_spill] sm:$0xff] }
 0x1df   :  { %v14180_v55 = vld [vmem:[#allocation205_spill] sm:$0xff]  ;;  %14196 = vst [vmem:[#allocation211_spill] sm:$0xff] %v10027_v54  ;;  %v14206_v41 = vld [vmem:[#allocation212_spill] sm:$0xff]  ;;  %v14210_v44 = vld [vmem:[#allocation31_spill] sm:$0xff]  ;;  %v14229_v60 = vmax.f32 %v14000_v22, %v14228_v23 }
 0x1e0   :  { %1692 = vst.msk [vmem:[#allocation2] sm:$0xff] %vm1691_vm0, %v12798_v50  ;;  %v14208_v54 = vmax.f32 %v14206_v41, %v14207_v18  ;;  %v14211_v32 = vmax.f32 %v14209_v48, %v14210_v44  ;;  %v10066_v7 = vperm.slane %v14218_v46, 0  ;;  %v14222_v48 = vld [vmem:[#allocation40_spill] sm:$0xff]  ;;  %v14242_v22 = vld [vmem:[#allocation45_spill] sm:$0xff] }
 0x1e1   :  { %v14184_v35 = vld [vmem:[#allocation207_spill] sm:$0xff]  ;;  %14199 = vst [vmem:[#allocation22_spill] sm:$0xff] %v10034_v39  ;;  %v14223_v44 = vmax.f32 %v13997_v19, %v14222_v48  ;;  %v10088_v46 = vperm.slane %v14229_v60, 0  ;;  %v14234_v19 = vld [vmem:[#allocation37_spill] sm:$0xff]  ;;  %v14243_v23 = vmax.f32 %v14007_v6, %v14242_v22  ;;  %v14252_v6 = vld [vmem:[#allocation54_spill] sm:$0xff] }
 0x1e2   :  { %v14186_v38 = vld [vmem:[#allocation21_spill] sm:$0xff]  ;;  %14203 = vst [vmem:[#allocation24_spill] sm:$0xff] %v10039_v26  ;;  %v10049_v25 = vperm.slane %v14208_v54, 0  ;;  %v10056_v39 = vperm.slane %v14211_v32, 0  ;;  %v10061_v26 = vperm.slane %v14215_v51, 0  ;;  %v14226_v51 = vmax.f32 %v14224_v2, %v14225_v10  ;;  %v14235_v48 = vld [vmem:[#allocation43_spill] sm:$0xff] }
 0x1e3   :  { %1694 = vst.msk [vmem:[#allocation2 + $0x8] sm:$0x3] %vm1693_vm1, %v12798_v50  ;;  %v14220_v54 = vld [vmem:[#allocation217_spill] sm:$0xff]  ;;  %v10078_v32 = vperm.slane %v14223_v44, 0  ;;  %v14236_v44 = vmax.f32 %v14234_v19, %v14235_v48  ;;  %v14238_v2 = vld [vmem:[#allocation38_spill] sm:$0xff]  ;;  %v14239_v10 = vld [vmem:[#allocation44_spill] sm:$0xff]  ;;  %v14253_v22 = vmax.f32 %v14012_v8, %v14252_v6 }
 0x1e4   :  { %14212 = vst [vmem:[#allocation27_spill] sm:$0xff] %v10056_v39  ;;  %v14221_v41 = vmax.f32 %v13996_v27, %v14220_v54  ;;  %v14230_v27 = vld [vmem:[#allocation216_spill] sm:$0xff]  ;;  %v14231_v54 = vld [vmem:[#allocation218_spill] sm:$0xff]  ;;  %v10110_v60 = vperm.slane %v14243_v23, 0  ;;  %v14266_v8 = vld [vmem:[#allocation57_spill] sm:$0xff] }
 0x1e5   :  { %14216 = vst [vmem:[#allocation215_spill] sm:$0xff] %v10061_v26  ;;  %v10083_v26 = vperm.slane %v14226_v51, 0  ;;  %v10100_v39 = vperm.slane %v14236_v44, 0  ;;  %v14240_v51 = vmax.f32 %v14238_v2, %v14239_v10  ;;  %v14247_v19 = vld [vmem:[#allocation52_spill] sm:$0xff]  ;;  %v14249_v2 = vld [vmem:[#allocation47_spill] sm:$0xff]  ;;  %v14250_v10 = vld [vmem:[#allocation53_spill] sm:$0xff]  ;;  %v14267_v6 = vmax.f32 %v14019_v13, %v14266_v8 }
 0x1e6   :  { %14219 = vst [vmem:[#allocation34_spill] sm:$0xff] %v10066_v7  ;;  %v10071_v18 = vperm.slane %v14221_v41, 0  ;;  %v14232_v41 = vmax.f32 %v14230_v27, %v14231_v54  ;;  %v14245_v27 = vld [vmem:[#allocation221_spill] sm:$0xff]  ;;  %v14248_v48 = vmax.f32 %v14009_v9, %v14247_v19  ;;  %v10132_v23 = vperm.slane %v14253_v22, 0  ;;  %v14259_v19 = vld [vmem:[#allocation55_spill] sm:$0xff]  ;;  %v14276_v13 = vld [vmem:[#allocation66_spill] sm:$0xff] }
 0x1e7   :  { %1695 = vst.msk [vmem:[#allocation2 + $0x10] sm:$0xff] %vm1691_vm0, %v12798_v50  ;;  %v14246_v54 = vmax.f32 %v14008_v16, %v14245_v27  ;;  %v14254_v16 = vld [vmem:[#allocation220_spill] sm:$0xff]  ;;  %v14255_v27 = vld [vmem:[#allocation222_spill] sm:$0xff]  ;;  %v14258_v9 = vld [vmem:[#allocation49_spill] sm:$0xff]  ;;  %v10154_v22 = vperm.slane %v14267_v6, 0  ;;  %v14277_v8 = vmax.f32 %v14024_v12, %v14276_v13 }
 0x1e8   :  { %14227 = vst [vmem:[#allocation36_spill] sm:$0xff] %v10083_v26  ;;  %v10093_v7 = vperm.slane %v14232_v41, 0  ;;  %v10105_v26 = vperm.slane %v14240_v51, 0  ;;  %v10122_v44 = vperm.slane %v14248_v48, 0  ;;  %v14251_v51 = vmax.f32 %v14249_v2, %v14250_v10  ;;  %v14262_v2 = vld [vmem:[#allocation50_spill] sm:$0xff]  ;;  %v14263_v10 = vld [vmem:[#allocation56_spill] sm:$0xff] }
 0x1e9   :  { %1696 = vst.msk [vmem:[#allocation2 + $0x18] sm:$0x3] %vm1693_vm1, %v12798_v50  ;;  %v10115_v41 = vperm.slane %v14246_v54, 0  ;;  %v14256_v54 = vmax.f32 %v14254_v16, %v14255_v27  ;;  %v14260_v48 = vmax.f32 %v14258_v9, %v14259_v19  ;;  %v14269_v16 = vld [vmem:[#allocation225_spill] sm:$0xff]  ;;  %v14271_v9 = vld [vmem:[#allocation64_spill] sm:$0xff]  ;;  %v10176_v6 = vperm.slane %v14277_v8, 0 }
 0x1ea   :  { %14233 = vst [vmem:[#allocation39_spill] sm:$0xff] %v10093_v7  ;;  %v14270_v27 = vmax.f32 %v14020_v29, %v14269_v16  ;;  %v14272_v19 = vmax.f32 %v14021_v3, %v14271_v9  ;;  %v14278_v29 = vld [vmem:[#allocation224_spill] sm:$0xff]  ;;  %v14279_v16 = vld [vmem:[#allocation226_spill] sm:$0xff]  ;;  %v14281_v3 = vld [vmem:[#allocation61_spill] sm:$0xff] }
 0x1eb   :  { %14237 = vst [vmem:[#allocation219_spill] sm:$0xff] %v10100_v39  ;;  %v10144_v39 = vperm.slane %v14260_v48, 0  ;;  %v14282_v9 = vld [vmem:[#allocation67_spill] sm:$0xff]  ;;  %v14288_v12 = vld [vmem:[#allocation69_spill] sm:$0xff] }
 0x1ec   :  { %14241 = vst [vmem:[#allocation46_spill] sm:$0xff] %v10105_v26  ;;  %v10127_v26 = vperm.slane %v14251_v51, 0  ;;  %v14264_v51 = vmax.f32 %v14262_v2, %v14263_v10  ;;  %v10166_v48 = vperm.slane %v14272_v19, 0  ;;  %v14273_v2 = vld [vmem:[#allocation59_spill] sm:$0xff]  ;;  %v14274_v10 = vld [vmem:[#allocation65_spill] sm:$0xff]  ;;  %v14283_v19 = vmax.f32 %v14281_v3, %v14282_v9  ;;  %v14293_v3 = vld [vmem:[#allocation76_spill] sm:$0xff] }
 0x1ed   :  { %14244 = vst [vmem:[#allocation48_spill] sm:$0xff] %v10110_v60  ;;  %v10137_v60 = vperm.slane %v14256_v54, 0  ;;  %v10159_v54 = vperm.slane %v14270_v27, 0  ;;  %v14280_v27 = vmax.f32 %v14278_v29, %v14279_v16  ;;  %v14289_v13 = vmax.f32 %v14031_v1, %v14288_v12  ;;  %v14291_v29 = vld [vmem:[#allocation229_spill] sm:$0xff]  ;;  %v14300_v1 = vld [vmem:[#allocation78_spill] sm:$0xff] }
 0x1ee   :  { %1697 = vst.msk [vmem:[#allocation2 + $0x20] sm:$0xff] %vm1691_vm0, %v12798_v50  ;;  %v10149_v7 = vperm.slane %v14264_v51, 0  ;;  %v14275_v51 = vmax.f32 %v14273_v2, %v14274_v10  ;;  %v14284_v2 = vld [vmem:[#allocation62_spill] sm:$0xff]  ;;  %v14285_v10 = vld [vmem:[#allocation68_spill] sm:$0xff]  ;;  %v14292_v16 = vmax.f32 %v14032_v33, %v14291_v29  ;;  %v14294_v9 = vmax.f32 %v14033_v15, %v14293_v3  ;;  %v14305_v15 = vld [vmem:[#allocation73_spill] sm:$0xff] }
 0x1ef   :  { %14257 = vst [vmem:[#allocation51_spill] sm:$0xff] %v10137_v60  ;;  %v10198_v8 = vperm.slane %v14289_v13, 0  ;;  %v14301_v12 = vmax.f32 %v14036_v34, %v14300_v1  ;;  %v14302_v33 = vld [vmem:[#allocation228_spill] sm:$0xff]  ;;  %v14303_v29 = vld [vmem:[#allocation230_spill] sm:$0xff]  ;;  %v14306_v3 = vld [vmem:[#allocation79_spill] sm:$0xff] }
 0x1f0   :  { %1698 = vst.msk [vmem:[#allocation2 + $0x28] sm:$0x3] %vm1693_vm1, %v12798_v50  ;;  %v14313_v34 = vld [vmem:[#allocation81_spill] sm:$0xff] }
 0x1f1   :  { %14261 = vst [vmem:[#allocation223_spill] sm:$0xff] %v10144_v39  ;;  %v10188_v39 = vperm.slane %v14283_v19, 0  ;;  %v10210_v19 = vperm.slane %v14294_v9, 0  ;;  %v10220_v13 = vperm.slane %v14301_v12, 0  ;;  %v14307_v9 = vmax.f32 %v14305_v15, %v14306_v3  ;;  %v14318_v15 = vld [vmem:[#allocation88_spill] sm:$0xff] }
 0x1f2   :  { %14265 = vst [vmem:[#allocation58_spill] sm:$0xff] %v10149_v7  ;;  %v10171_v7 = vperm.slane %v14275_v51, 0  ;;  %v14286_v51 = vmax.f32 %v14284_v2, %v14285_v10  ;;  %v14296_v2 = vld [vmem:[#allocation71_spill] sm:$0xff]  ;;  %v14297_v10 = vld [vmem:[#allocation77_spill] sm:$0xff]  ;;  %v14314_v1 = vmax.f32 %v14043_v5, %v14313_v34  ;;  %v14319_v3 = vmax.f32 %v14045_v31, %v14318_v15  ;;  %v14324_v5 = vld [vmem:[#allocation90_spill] sm:$0xff] }
 0x1f3   :  { %14268 = vst [vmem:[#allocation60_spill] sm:$0xff] %v10154_v22  ;;  %v10181_v22 = vperm.slane %v14280_v27, 0  ;;  %v10203_v27 = vperm.slane %v14292_v16, 0  ;;  %v14304_v16 = vmax.f32 %v14302_v33, %v14303_v29  ;;  %v14316_v33 = vld [vmem:[#allocation233_spill] sm:$0xff]  ;;  %v14325_v34 = vmax.f32 %v14048_v0, %v14324_v5  ;;  %v14331_v15 = vld [vmem:[#allocation91_spill] sm:$0xff] }
 0x1f4   :  { %1699 = vst.msk [vmem:[#allocation2 + $0x30] sm:$0xff] %vm1691_vm0, %v12798_v50  ;;  %v10193_v60 = vperm.slane %v14286_v51, 0  ;;  %v14298_v51 = vmax.f32 %v14296_v2, %v14297_v10  ;;  %v14309_v2 = vld [vmem:[#allocation74_spill] sm:$0xff]  ;;  %v14310_v10 = vld [vmem:[#allocation80_spill] sm:$0xff]  ;;  %v10242_v12 = vperm.slane %v14314_v1, 0  ;;  %v14317_v29 = vmax.f32 %v14044_v59, %v14316_v33  ;;  %v14330_v31 = vld [vmem:[#allocation85_spill] sm:$0xff] }
 0x1f5   :  { %1700 = vst.msk [vmem:[#allocation2 + $0x38] sm:$0x3] %vm1693_vm1, %v12798_v50  ;;  %v10264_v1 = vperm.slane %v14325_v34, 0  ;;  %v14326_v59 = vld [vmem:[#allocation232_spill] sm:$0xff]  ;;  %v14327_v33 = vld [vmem:[#allocation234_spill] sm:$0xff]  ;;  %v14338_v0 = vld [vmem:[#allocation93_spill] sm:$0xff] }
 0x1f6   :  { %14287 = vst [vmem:[#allocation63_spill] sm:$0xff] %v10193_v60  ;;  %v10215_v60 = vperm.slane %v14298_v51, 0  ;;  %v14311_v51 = vmax.f32 %v14309_v2, %v14310_v10  ;;  %v14320_v2 = vld [vmem:[#allocation83_spill] sm:$0xff]  ;;  %v14321_v10 = vld [vmem:[#allocation89_spill] sm:$0xff]  ;;  %v14339_v5 = vmax.f32 %v14055_v21, %v14338_v0  ;;  %v14348_v21 = vld [vmem:[#allocation102_spill] sm:$0xff] }
 0x1f7   :  { %14290 = vst [vmem:[#allocation227_spill] sm:$0xff] %v10198_v8  ;;  %v10225_v8 = vperm.slane %v14304_v16, 0  ;;  %v10247_v16 = vperm.slane %v14317_v29, 0  ;;  %v14328_v29 = vmax.f32 %v14326_v59, %v14327_v33  ;;  %v14341_v59 = vld [vmem:[#allocation237_spill] sm:$0xff]  ;;  %v14349_v0 = vmax.f32 %v14060_v4, %v14348_v21 }
 0x1f8   :  { %1701 = vst.msk [vmem:[#allocation2 + $0x40] sm:$0xff] %vm1691_vm0, %v12798_v50  ;;  %v10286_v34 = vperm.slane %v14339_v5, 0  ;;  %v14342_v33 = vmax.f32 %v14056_v24, %v14341_v59  ;;  %v14350_v24 = vld [vmem:[#allocation236_spill] sm:$0xff]  ;;  %v14351_v59 = vld [vmem:[#allocation238_spill] sm:$0xff]  ;;  %v14362_v4 = vld [vmem:[#allocation105_spill] sm:$0xff] }
 0x1f9   :  { %14295 = vst [vmem:[#allocation70_spill] sm:$0xff] %v10210_v19  ;;  %v10232_v19 = vperm.slane %v14307_v9, 0  ;;  %v10254_v9 = vperm.slane %v14319_v3, 0  ;;  %v14332_v3 = vmax.f32 %v14330_v31, %v14331_v15  ;;  %v14343_v31 = vld [vmem:[#allocation100_spill] sm:$0xff]  ;;  %v10308_v5 = vperm.slane %v14349_v0, 0 }
 0x1fa   :  { %14299 = vst [vmem:[#allocation72_spill] sm:$0xff] %v10215_v60  ;;  %v10237_v60 = vperm.slane %v14311_v51, 0  ;;  %v14322_v51 = vmax.f32 %v14320_v2, %v14321_v10  ;;  %v14334_v2 = vld [vmem:[#allocation86_spill] sm:$0xff]  ;;  %v14335_v10 = vld [vmem:[#allocation92_spill] sm:$0xff]  ;;  %v14344_v15 = vmax.f32 %v14057_v47, %v14343_v31  ;;  %v14354_v47 = vld [vmem:[#allocation97_spill] sm:$0xff]  ;;  %v14363_v21 = vmax.f32 %v14067_v37, %v14362_v4 }
 0x1fb   :  { %1702 = vst.msk [vmem:[#allocation2 + $0x48] sm:$0x3] %vm1693_vm1, %v12798_v50  ;;  %v14355_v31 = vld [vmem:[#allocation103_spill] sm:$0xff]  ;;  %v14372_v37 = vld [vmem:[#allocation114_spill] sm:$0xff] }
 0x1fc   :  { %14308 = vst [vmem:[#allocation75_spill] sm:$0xff] %v10232_v19  ;;  %v10276_v19 = vperm.slane %v14332_v3, 0  ;;  %v10298_v3 = vperm.slane %v14344_v15, 0  ;;  %v14356_v15 = vmax.f32 %v14354_v47, %v14355_v31  ;;  %v10330_v0 = vperm.slane %v14363_v21, 0  ;;  %v14367_v47 = vld [vmem:[#allocation112_spill] sm:$0xff] }
 0x1fd   :  { %14312 = vst [vmem:[#allocation231_spill] sm:$0xff] %v10237_v60  ;;  %v10259_v60 = vperm.slane %v14322_v51, 0  ;;  %v14336_v51 = vmax.f32 %v14334_v2, %v14335_v10  ;;  %v14345_v2 = vld [vmem:[#allocation95_spill] sm:$0xff]  ;;  %v14346_v10 = vld [vmem:[#allocation101_spill] sm:$0xff]  ;;  %v14368_v31 = vmax.f32 %v14069_v63, %v14367_v47  ;;  %v14373_v4 = vmax.f32 %v14072_v20, %v14372_v37 }
 0x1fe   :  { %14315 = vst [vmem:[#allocation82_spill] sm:$0xff] %v10242_v12  ;;  %v10269_v12 = vperm.slane %v14328_v29, 0  ;;  %v10291_v29 = vperm.slane %v14342_v33, 0  ;;  %v14352_v33 = vmax.f32 %v14350_v24, %v14351_v59  ;;  %v14365_v24 = vld [vmem:[#allocation241_spill] sm:$0xff]  ;;  %v14378_v47 = vld [vmem:[#allocation115_spill] sm:$0xff] }
 0x1ff   :  { %1703 = vst.msk [vmem:[#allocation2 + $0x50] sm:$0xff] %vm1691_vm0, %v12798_v50  ;;  %v14366_v59 = vmax.f32 %v14068_v28, %v14365_v24  ;;  %v10352_v21 = vperm.slane %v14373_v4, 0  ;;  %v14374_v28 = vld [vmem:[#allocation240_spill] sm:$0xff]  ;;  %v14375_v24 = vld [vmem:[#allocation242_spill] sm:$0xff]  ;;  %v14377_v63 = vld [vmem:[#allocation109_spill] sm:$0xff] }
 0x200   :  { %14323 = vst [vmem:[#allocation84_spill] sm:$0xff] %v10259_v60  ;;  %v10281_v60 = vperm.slane %v14336_v51, 0  ;;  %v14347_v51 = vmax.f32 %v14345_v2, %v14346_v10  ;;  %v14358_v2 = vld [vmem:[#allocation98_spill] sm:$0xff]  ;;  %v14359_v10 = vld [vmem:[#allocation104_spill] sm:$0xff]  ;;  %v14384_v20 = vld [vmem:[#allocation117_spill] sm:$0xff] }
 0x201   :  { %14329 = vst [vmem:[#allocation87_spill] sm:$0xff] %v10269_v12  ;;  %v14385_v37 = vmax.f32 %v14079_v53, %v14384_v20  ;;  %v14396_v53 = vld [vmem:[#allocation126_spill] sm:$0xff] }
 0x202   :  { %1704 = vst.msk [vmem:[#allocation2 + $0x58] sm:$0x3] %vm1693_vm1, %v12798_v50  ;;  %v14397_v20 = vmax.f32 %v14084_v36, %v14396_v53  ;;  %v14410_v36 = vld [vmem:[#allocation129_spill] sm:$0xff] }
 0x203   :  { %14333 = vst [vmem:[#allocation235_spill] sm:$0xff] %v10276_v19  ;;  %v10320_v19 = vperm.slane %v14356_v15, 0  ;;  %v10342_v15 = vperm.slane %v14368_v31, 0  ;;  %v14379_v31 = vmax.f32 %v14377_v63, %v14378_v47  ;;  %v10374_v4 = vperm.slane %v14385_v37, 0  ;;  %v14389_v63 = vld [vmem:[#allocation124_spill] sm:$0xff] }
 0x204   :  { %14337 = vst [vmem:[#allocation94_spill] sm:$0xff] %v10281_v60  ;;  %v10303_v60 = vperm.slane %v14347_v51, 0  ;;  %v14360_v51 = vmax.f32 %v14358_v2, %v14359_v10  ;;  %v14369_v2 = vld [vmem:[#allocation107_spill] sm:$0xff]  ;;  %v14370_v10 = vld [vmem:[#allocation113_spill] sm:$0xff]  ;;  %v14390_v47 = vmax.f32 %v14081_v57, %v14389_v63  ;;  %v10396_v37 = vperm.slane %v14397_v20, 0 }
 0x205   :  { %14340 = vst [vmem:[#allocation96_spill] sm:$0xff] %v10286_v34  ;;  %v10313_v34 = vperm.slane %v14352_v33, 0  ;;  %v10335_v33 = vperm.slane %v14366_v59, 0  ;;  %v14376_v59 = vmax.f32 %v14374_v28, %v14375_v24  ;;  %v14387_v28 = vld [vmem:[#allocation245_spill] sm:$0xff]  ;;  %v14403_v63 = vld [vmem:[#allocation127_spill] sm:$0xff]  ;;  %v14411_v53 = vmax.f32 %v14091_v62, %v14410_v36  ;;  %v14421_v62 = vld [vmem:[#allocation138_spill] sm:$0xff] }
 0x206   :  { %1705 = vst.msk [vmem:[#allocation2 + $0x60] sm:$0xff] %vm1691_vm0, %v12798_v50  ;;  %v10325_v12 = vperm.slane %v14360_v51, 0  ;;  %v14371_v51 = vmax.f32 %v14369_v2, %v14370_v10  ;;  %v14380_v2 = vld [vmem:[#allocation110_spill] sm:$0xff]  ;;  %v14381_v10 = vld [vmem:[#allocation116_spill] sm:$0xff]  ;;  %v14388_v24 = vmax.f32 %v14080_v14, %v14387_v28  ;;  %v14402_v57 = vld [vmem:[#allocation121_spill] sm:$0xff]  ;;  %v14422_v36 = vmax.f32 %v14096_v52, %v14421_v62 }
 0x207   :  { %14353 = vst [vmem:[#allocation99_spill] sm:$0xff] %v10313_v34  ;;  %v14398_v14 = vld [vmem:[#allocation244_spill] sm:$0xff]  ;;  %v14399_v28 = vld [vmem:[#allocation246_spill] sm:$0xff]  ;;  %v10418_v20 = vperm.slane %v14411_v53, 0  ;;  %v14436_v52 = vld [vmem:[#allocation141_spill] sm:$0xff] }
 0x208   :  { %1706 = vst.msk [vmem:[#allocation2 + $0x68] sm:$0x3] %vm1693_vm1, %v12798_v50  ;;  %v10440_v53 = vperm.slane %v14422_v36, 0  ;;  %v14437_v62 = vmax.f32 %v14103_v49, %v14436_v52  ;;  %v14449_v49 = vld [vmem:[#allocation144_spill] sm:$0xff]  ;;  %v14450_v52 = vld [vmem:[#allocation150_spill] sm:$0xff] }
 0x209   :  { %14357 = vst [vmem:[#allocation239_spill] sm:$0xff] %v10320_v19  ;;  %v10364_v19 = vperm.slane %v14379_v31, 0  ;;  %v10386_v31 = vperm.slane %v14390_v47, 0  ;;  %v14404_v47 = vmax.f32 %v14402_v57, %v14403_v63  ;;  %v14415_v57 = vld [vmem:[#allocation136_spill] sm:$0xff] }
 0x20a   :  { %14361 = vst [vmem:[#allocation106_spill] sm:$0xff] %v10325_v12  ;;  %v10347_v12 = vperm.slane %v14371_v51, 0  ;;  %v14382_v51 = vmax.f32 %v14380_v2, %v14381_v10  ;;  %v14392_v2 = vld [vmem:[#allocation119_spill] sm:$0xff]  ;;  %v14393_v10 = vld [vmem:[#allocation125_spill] sm:$0xff]  ;;  %v14416_v63 = vmax.f32 %v14093_v43, %v14415_v57  ;;  %v10462_v36 = vperm.slane %v14437_v62, 0 }
 0x20b   :  { %14364 = vst [vmem:[#allocation108_spill] sm:$0xff] %v10330_v0  ;;  %v10357_v0 = vperm.slane %v14376_v59, 0  ;;  %v10379_v59 = vperm.slane %v14388_v24, 0  ;;  %v14400_v24 = vmax.f32 %v14398_v14, %v14399_v28  ;;  %v14413_v14 = vld [vmem:[#allocation249_spill] sm:$0xff]  ;;  %v14429_v57 = vld [vmem:[#allocation139_spill] sm:$0xff]  ;;  %v14451_v62 = vmax.f32 %v14449_v49, %v14450_v52 }
 0x20c   :  { %1707 = vst.msk [vmem:[#allocation2 + $0x70] sm:$0xff] %vm1691_vm0, %v12798_v50  ;;  %v10369_v34 = vperm.slane %v14382_v51, 0  ;;  %v14394_v51 = vmax.f32 %v14392_v2, %v14393_v10  ;;  %v14406_v2 = vld [vmem:[#allocation122_spill] sm:$0xff]  ;;  %v14407_v10 = vld [vmem:[#allocation128_spill] sm:$0xff]  ;;  %v14414_v28 = vmax.f32 %v14092_v17, %v14413_v14  ;;  %v14428_v43 = vld [vmem:[#allocation133_spill] sm:$0xff] }
 0x20d   :  { %1708 = vst.msk [vmem:[#allocation2 + $0x78] sm:$0x3] %vm1693_vm1, %v12798_v50  ;;  %v14424_v17 = vld [vmem:[#allocation248_spill] sm:$0xff]  ;;  %v14425_v14 = vld [vmem:[#allocation250_spill] sm:$0xff]  ;;  %v14465_v49 = vld [vmem:[#allocation147_spill] sm:$0xff] }
 0x20e   :  { %14383 = vst [vmem:[#allocation111_spill] sm:$0xff] %v10369_v34  ;;  %v10391_v34 = vperm.slane %v14394_v51, 0  ;;  %v14408_v51 = vmax.f32 %v14406_v2, %v14407_v10  ;;  %v14417_v2 = vld [vmem:[#allocation131_spill] sm:$0xff]  ;;  %v14418_v10 = vld [vmem:[#allocation137_spill] sm:$0xff] }
 0x20f   :  { %14386 = vst [vmem:[#allocation243_spill] sm:$0xff] %v10374_v4  ;;  %v10401_v4 = vperm.slane %v14400_v24, 0  ;;  %v10423_v24 = vperm.slane %v14414_v28, 0  ;;  %v14426_v28 = vmax.f32 %v14424_v17, %v14425_v14  ;;  %v14439_v17 = vld [vmem:[#allocation251_spill] sm:$0xff]  ;;  %v14440_v14 = vld [vmem:[#allocation253_spill] sm:$0xff] }
 0x210   :  { %1709 = vst.msk [vmem:[#allocation2 + $0x80] sm:$0xff] %vm1691_vm0, %v12798_v50  ;;  %v14466_v52 = vld [vmem:[#allocation153_spill] sm:$0xff] }
 0x211   :  { %14391 = vst [vmem:[#allocation118_spill] sm:$0xff] %v10386_v31  ;;  %v10408_v31 = vperm.slane %v14404_v47, 0  ;;  %v10430_v47 = vperm.slane %v14416_v63, 0  ;;  %v14430_v63 = vmax.f32 %v14428_v43, %v14429_v57  ;;  %v14442_v43 = vld [vmem:[#allocation142_spill] sm:$0xff]  ;;  %v14443_v57 = vld [vmem:[#allocation148_spill] sm:$0xff] }
 0x212   :  { %14395 = vst [vmem:[#allocation120_spill] sm:$0xff] %v10391_v34  ;;  %v10413_v34 = vperm.slane %v14408_v51, 0  ;;  %v14419_v51 = vmax.f32 %v14417_v2, %v14418_v10  ;;  %v14432_v2 = vld [vmem:[#allocation134_spill] sm:$0xff]  ;;  %v14433_v10 = vld [vmem:[#allocation140_spill] sm:$0xff] }
 0x213   :  { %14401 = vst [vmem:[#allocation123_spill] sm:$0xff] %v10401_v4 }
 0x214   :  { %1710 = vst.msk [vmem:[#allocation2 + $0x88] sm:$0x3] %vm1693_vm1, %v12798_v50 }
 0x215   :  { %14405 = vst [vmem:[#allocation247_spill] sm:$0xff] %v10408_v31  ;;  %v10452_v31 = vperm.slane %v14430_v63, 0  ;;  %v14444_v63 = vmax.f32 %v14442_v43, %v14443_v57  ;;  %v14457_v43 = vld [vmem:[#allocation145_spill] sm:$0xff]  ;;  %v14458_v57 = vld [vmem:[#allocation151_spill] sm:$0xff] }
 0x216   :  { %14409 = vst [vmem:[#allocation130_spill] sm:$0xff] %v10413_v34  ;;  %v10435_v34 = vperm.slane %v14419_v51, 0  ;;  %v14434_v51 = vmax.f32 %v14432_v2, %v14433_v10  ;;  %v14445_v2 = vld [vmem:[#allocation143_spill] sm:$0xff]  ;;  %v14446_v10 = vld [vmem:[#allocation149_spill] sm:$0xff] }
 0x217   :  { %14412 = vst [vmem:[#allocation132_spill] sm:$0xff] %v10418_v20  ;;  %v10445_v20 = vperm.slane %v14426_v28, 0  ;;  %v14441_v28 = vmax.f32 %v14439_v17, %v14440_v14  ;;  %v14453_v17 = vld [vmem:[#allocation252_spill] sm:$0xff]  ;;  %v14454_v14 = vld [vmem:[#allocation254_spill] sm:$0xff] }
 0x218   :  { %1713 = vst.msk [vmem:[#allocation2 + $0xa0] sm:$0xff] %vm1691_vm0, %v12798_v50 }
 0x219   :  { %14420 = vst [vmem:[#allocation135_spill] sm:$0xff] %v10435_v34  ;;  %v10457_v34 = vperm.slane %v14434_v51, 0  ;;  %v14447_v51 = vmax.f32 %v14445_v2, %v14446_v10  ;;  %v14461_v2 = vld [vmem:[#allocation146_spill] sm:$0xff]  ;;  %v14462_v10 = vld [vmem:[#allocation152_spill] sm:$0xff] }
 0x21a   :  { %14423 = vst [vmem:[#allocation168_spill] sm:$0xff] %v10440_v53 }
 0x21b   :  { %14427 = vst [vmem:[#allocation171_spill] sm:$0xff] %v10445_v20  ;;  %v10467_v20 = vperm.slane %v14441_v28, 0  ;;  %v14455_v28 = vmax.f32 %v14453_v17, %v14454_v14  ;;  %v14469_v17 = vld [vmem:[#allocation255_spill] sm:$0xff] }
 0x21c   :  { %1714 = vst.msk [vmem:[#allocation2 + $0xa8] sm:$0x3] %vm1693_vm1, %v12798_v50  ;;  %v14470_v14 = vld [vmem:[#allocation7_spill] sm:$0xff] }
 0x21d   :  { %14431 = vst [vmem:[#allocation260_spill] sm:$0xff] %v10452_v31  ;;  %v10474_v31 = vperm.slane %v14444_v63, 0  ;;  %v10489_v53 = vperm.slane %v14455_v28, 0  ;;  %v14459_v63 = vmax.f32 %v14457_v43, %v14458_v57  ;;  %v14471_v28 = vmax.f32 %v14469_v17, %v14470_v14  ;;  %v14473_v43 = vld [vmem:[#allocation154_spill] sm:$0xff]  ;;  %v14474_v57 = vld [vmem:[#allocation160_spill] sm:$0xff] }
 0x21e   :  { %14435 = vst [vmem:[#allocation205_spill] sm:$0xff] %v10457_v34  ;;  %v10479_v34 = vperm.slane %v14447_v51, 0  ;;  %v14463_v51 = vmax.f32 %v14461_v2, %v14462_v10  ;;  %v14477_v2 = vld [vmem:[#allocation155_spill] sm:$0xff]  ;;  %v14478_v10 = vld [vmem:[#allocation161_spill] sm:$0xff]  ;;  %v14485_v17 = vld [vmem:[#allocation256_spill] sm:$0xff] }
 0x21f   :  { %14438 = vst [vmem:[#allocation20_spill] sm:$0xff] %v10462_v36  ;;  %v10484_v36 = vperm.slane %v14451_v62, 0  ;;  %v10496_v4 = vperm.slane %v14459_v63, 0  ;;  %v14467_v62 = vmax.f32 %v14465_v49, %v14466_v52  ;;  %v14475_v63 = vmax.f32 %v14473_v43, %v14474_v57  ;;  %v14481_v49 = vld [vmem:[#allocation156_spill] sm:$0xff]  ;;  %v14482_v52 = vld [vmem:[#allocation162_spill] sm:$0xff]  ;;  %v14489_v43 = vld [vmem:[#allocation157_spill] sm:$0xff] }
 0x220   :  { %1715 = vst.msk [vmem:[#allocation2 + $0xb0] sm:$0xff] %vm1691_vm0, %v12798_v50  ;;  %v14486_v14 = vld [vmem:[#allocation8_spill] sm:$0xff]  ;;  %v14490_v57 = vld [vmem:[#allocation163_spill] sm:$0xff] }
 0x221   :  { %14448 = vst [vmem:[#allocation200_spill] sm:$0xff] %v10479_v34  ;;  %v10501_v34 = vperm.slane %v14463_v51, 0  ;;  %v14479_v51 = vmax.f32 %v14477_v2, %v14478_v10  ;;  %v14493_v2 = vld [vmem:[#allocation158_spill] sm:$0xff]  ;;  %v14494_v10 = vld [vmem:[#allocation164_spill] sm:$0xff] }
 0x222   :  { %14452 = vst [vmem:[#allocation207_spill] sm:$0xff] %v10484_v36  ;;  %v10506_v36 = vperm.slane %v14467_v62, 0  ;;  %v14483_v62 = vmax.f32 %v14481_v49, %v14482_v52  ;;  %v14497_v49 = vld [vmem:[#allocation159_spill] sm:$0xff]  ;;  %v14498_v52 = vld [vmem:[#allocation165_spill] sm:$0xff] }
 0x223   :  { %14456 = vst [vmem:[#allocation201_spill] sm:$0xff] %v10489_v53  ;;  %v10511_v53 = vperm.slane %v14471_v28, 0  ;;  %v14487_v28 = vmax.f32 %v14485_v17, %v14486_v14  ;;  %v14501_v17 = vld [vmem:[#allocation9_spill] sm:$0xff]  ;;  %v14502_v14 = vld [vmem:[#allocation11_spill] sm:$0xff] }
 0x224   :  { %1716 = vst.msk [vmem:[#allocation2 + $0xb8] sm:$0x3] %vm1693_vm1, %v12798_v50 }
 0x225   :  { %14460 = vst [vmem:[#allocation21_spill] sm:$0xff] %v10496_v4  ;;  %v10518_v4 = vperm.slane %v14475_v63, 0  ;;  %v14491_v63 = vmax.f32 %v14489_v43, %v14490_v57  ;;  %v14504_v43 = vld [vmem:[#allocation166_spill] sm:$0xff]  ;;  %v14505_v57 = vld [vmem:[#allocation172_spill] sm:$0xff] }
 0x226   :  { %14464 = vst [vmem:[#allocation261_spill] sm:$0xff] %v10501_v34  ;;  %v10523_v34 = vperm.slane %v14479_v51, 0  ;;  %v14495_v51 = vmax.f32 %v14493_v2, %v14494_v10  ;;  %v14508_v2 = vld [vmem:[#allocation167_spill] sm:$0xff]  ;;  %v14509_v10 = vld [vmem:[#allocation173_spill] sm:$0xff] }
 0x227   :  { %14468 = vst [vmem:[#allocation213_spill] sm:$0xff] %v10506_v36  ;;  %v10528_v36 = vperm.slane %v14483_v62, 0  ;;  %v14499_v62 = vmax.f32 %v14497_v49, %v14498_v52  ;;  %v14512_v49 = vld [vmem:[#allocation174_spill] sm:$0xff] }
 0x228   :  { %14472 = vst [vmem:[#allocation28_spill] sm:$0xff] %v10511_v53  ;;  %v10533_v53 = vperm.slane %v14487_v28, 0  ;;  %v14503_v28 = vmax.f32 %v14501_v17, %v14502_v14  ;;  %v14513_v52 = vmax.f32 %v14139_v45, %v14512_v49  ;;  %v14514_v17 = vld [vmem:[#allocation10_spill] sm:$0xff]  ;;  %v14515_v14 = vld [vmem:[#allocation12_spill] sm:$0xff]  ;;  %v14526_v45 = vld [vmem:[#allocation177_spill] sm:$0xff] }
 0x229   :  { %1717 = vst.msk [vmem:[#allocation2 + $0xc0] sm:$0xff] %vm1691_vm0, %v12798_v50  ;;  %v14527_v49 = vmax.f32 %v14147_v56, %v14526_v45  ;;  %v14541_v56 = vld [vmem:[#allocation180_spill] sm:$0xff]  ;;  %v14542_v45 = vld [vmem:[#allocation186_spill] sm:$0xff] }
 0x22a   :  { %14476 = vst [vmem:[#allocation23_spill] sm:$0xff] %v10518_v4  ;;  %v10540_v4 = vperm.slane %v14491_v63, 0  ;;  %v14506_v63 = vmax.f32 %v14504_v43, %v14505_v57  ;;  %v14518_v43 = vld [vmem:[#allocation169_spill] sm:$0xff]  ;;  %v14519_v57 = vld [vmem:[#allocation175_spill] sm:$0xff] }
 0x22b   :  { %14480 = vst [vmem:[#allocation29_spill] sm:$0xff] %v10523_v34  ;;  %v10545_v34 = vperm.slane %v14495_v51, 0  ;;  %v14510_v51 = vmax.f32 %v14508_v2, %v14509_v10  ;;  %v14522_v2 = vld [vmem:[#allocation170_spill] sm:$0xff]  ;;  %v14523_v10 = vld [vmem:[#allocation176_spill] sm:$0xff] }
 0x22c   :  { %14484 = vst [vmem:[#allocation30_spill] sm:$0xff] %v10528_v36  ;;  %v10550_v36 = vperm.slane %v14499_v62, 0  ;;  %v10572_v62 = vperm.slane %v14513_v52, 0  ;;  %v10594_v52 = vperm.slane %v14527_v49, 0  ;;  %v14543_v49 = vmax.f32 %v14541_v56, %v14542_v45  ;;  %v14557_v56 = vld [vmem:[#allocation183_spill] sm:$0xff]  ;;  %v14558_v45 = vld [vmem:[#allocation189_spill] sm:$0xff] }
 0x22d   :  { %14488 = vst [vmem:[#allocation212_spill] sm:$0xff] %v10533_v53  ;;  %v10555_v53 = vperm.slane %v14503_v28, 0  ;;  %v14516_v28 = vmax.f32 %v14514_v17, %v14515_v14  ;;  %v14529_v17 = vld [vmem:[#allocation13_spill] sm:$0xff]  ;;  %v14530_v14 = vld [vmem:[#allocation15_spill] sm:$0xff] }
 0x22e   :  { %1718 = vst.msk [vmem:[#allocation2 + $0xc8] sm:$0x3] %vm1693_vm1, %v12798_v50 }
 0x22f   :  { %14492 = vst [vmem:[#allocation214_spill] sm:$0xff] %v10540_v4  ;;  %v10562_v4 = vperm.slane %v14506_v63, 0  ;;  %v14520_v63 = vmax.f32 %v14518_v43, %v14519_v57  ;;  %v14533_v43 = vld [vmem:[#allocation178_spill] sm:$0xff]  ;;  %v14534_v57 = vld [vmem:[#allocation184_spill] sm:$0xff] }
 0x230   :  { %14496 = vst [vmem:[#allocation25_spill] sm:$0xff] %v10545_v34  ;;  %v10567_v34 = vperm.slane %v14510_v51, 0  ;;  %v14524_v51 = vmax.f32 %v14522_v2, %v14523_v10  ;;  %v14537_v2 = vld [vmem:[#allocation179_spill] sm:$0xff]  ;;  %v14538_v10 = vld [vmem:[#allocation185_spill] sm:$0xff] }
 0x231   :  { %14500 = vst [vmem:[#allocation31_spill] sm:$0xff] %v10550_v36  ;;  %v10577_v36 = vperm.slane %v14516_v28, 0  ;;  %v14531_v28 = vmax.f32 %v14529_v17, %v14530_v14  ;;  %v14545_v17 = vld [vmem:[#allocation14_spill] sm:$0xff]  ;;  %v14546_v14 = vld [vmem:[#allocation16_spill] sm:$0xff] }
 0x232   :  { %1719 = vst.msk [vmem:[#allocation2 + $0xd0] sm:$0xff] %vm1691_vm0, %v12798_v50 }
 0x233   :  { %14507 = vst [vmem:[#allocation26_spill] sm:$0xff] %v10562_v4  ;;  %v10584_v4 = vperm.slane %v14520_v63, 0  ;;  %v14535_v63 = vmax.f32 %v14533_v43, %v14534_v57  ;;  %v14549_v43 = vld [vmem:[#allocation181_spill] sm:$0xff]  ;;  %v14550_v57 = vld [vmem:[#allocation187_spill] sm:$0xff] }
 0x234   :  { %14511 = vst [vmem:[#allocation32_spill] sm:$0xff] %v10567_v34  ;;  %v10589_v34 = vperm.slane %v14524_v51, 0  ;;  %v14539_v51 = vmax.f32 %v14537_v2, %v14538_v10  ;;  %v14553_v2 = vld [vmem:[#allocation182_spill] sm:$0xff]  ;;  %v14554_v10 = vld [vmem:[#allocation188_spill] sm:$0xff] }
 0x235   :  { %14517 = vst [vmem:[#allocation33_spill] sm:$0xff] %v10577_v36  ;;  %v10599_v36 = vperm.slane %v14531_v28, 0  ;;  %v14547_v28 = vmax.f32 %v14545_v17, %v14546_v14  ;;  %v14561_v17 = vld [vmem:[#allocation257_spill] sm:$0xff]  ;;  %v14562_v14 = vld [vmem:[#allocation19_spill] sm:$0xff] }
 0x236   :  { %1720 = vst.msk [vmem:[#allocation2 + $0xd8] sm:$0x3] %vm1693_vm1, %v12798_v50 }
 0x237   :  { %14521 = vst [vmem:[#allocation217_spill] sm:$0xff] %v10584_v4  ;;  %v10606_v4 = vperm.slane %v14535_v63, 0  ;;  %v14551_v63 = vmax.f32 %v14549_v43, %v14550_v57  ;;  %v14565_v43 = vld [vmem:[#allocation17_spill] sm:$0xff]  ;;  %v14566_v57 = vld [vmem:[#allocation194_spill] sm:$0xff] }
 0x238   :  { %14525 = vst [vmem:[#allocation40_spill] sm:$0xff] %v10589_v34  ;;  %v10611_v34 = vperm.slane %v14539_v51, 0  ;;  %v14555_v51 = vmax.f32 %v14553_v2, %v14554_v10  ;;  %v14569_v2 = vld [vmem:[#allocation190_spill] sm:$0xff]  ;;  %v14570_v10 = vld [vmem:[#allocation195_spill] sm:$0xff] }
 0x239   :  { %14528 = vst [vmem:[#allocation35_spill] sm:$0xff] %v10594_v52  ;;  %v10616_v52 = vperm.slane %v14543_v49, 0  ;;  %v14559_v49 = vmax.f32 %v14557_v56, %v14558_v45  ;;  %v14573_v56 = vld [vmem:[#allocation191_spill] sm:$0xff]  ;;  %v14574_v45 = vld [vmem:[#allocation196_spill] sm:$0xff] }
 0x23a   :  { %14532 = vst [vmem:[#allocation41_spill] sm:$0xff] %v10599_v36  ;;  %v10621_v36 = vperm.slane %v14547_v28, 0  ;;  %v14563_v28 = vmax.f32 %v14561_v17, %v14562_v14  ;;  %v14577_v17 = vld [vmem:[#allocation258_spill] sm:$0xff]  ;;  %v14578_v14 = vld [vmem:[#allocation259_spill] sm:$0xff] }
 0x23b   :  { %1721 = vst.msk [vmem:[#allocation2 + $0xe0] sm:$0xff] %vm1691_vm0, %v12798_v50 }
 0x23c   :  { %14536 = vst [vmem:[#allocation42_spill] sm:$0xff] %v10606_v4  ;;  %v10628_v4 = vperm.slane %v14551_v63, 0  ;;  %v14567_v63 = vmax.f32 %v14565_v43, %v14566_v57  ;;  %v14580_v43 = vld [vmem:[#allocation18_spill] sm:$0xff]  ;;  %v14581_v57 = vld [vmem:[#allocation197_spill] sm:$0xff] }
 0x23d   :  { %14540 = vst [vmem:[#allocation216_spill] sm:$0xff] %v10611_v34  ;;  %v10633_v34 = vperm.slane %v14555_v51, 0  ;;  %v14571_v51 = vmax.f32 %v14569_v2, %v14570_v10  ;;  %v14583_v2 = vld [vmem:[#allocation192_spill] sm:$0xff]  ;;  %v14584_v10 = vld [vmem:[#allocation198_spill] sm:$0xff] }
 0x23e   :  { %14544 = vst [vmem:[#allocation218_spill] sm:$0xff] %v10616_v52  ;;  %v10638_v52 = vperm.slane %v14559_v49, 0  ;;  %v14575_v49 = vmax.f32 %v14573_v56, %v14574_v45  ;;  %v14586_v56 = vld [vmem:[#allocation193_spill] sm:$0xff]  ;;  %v14587_v45 = vld [vmem:[#allocation199_spill] sm:$0xff] }
 0x23f   :  { %14548 = vst [vmem:[#allocation37_spill] sm:$0xff] %v10621_v36  ;;  %v10643_v36 = vperm.slane %v14563_v28, 0  ;;  %v14579_v28 = vmax.f32 %v14577_v17, %v14578_v14  ;;  %v14589_v17 = vld [vmem:[#allocation262_spill] sm:$0xff] }
 0x240   :  { %1722 = vst.msk [vmem:[#allocation2 + $0xe8] sm:$0x3] %vm1693_vm1, %v12798_v50  ;;  %v14590_v14 = vmax.f32 %v14179_v42, %v14589_v17  ;;  %v14595_v42 = vmax.f32 %v14187_v11, %v14186_v38  ;;  %v14605_v11 = vld [vmem:[#allocation211_spill] sm:$0xff]  ;;  %v14606_v38 = vld [vmem:[#allocation22_spill] sm:$0xff] }
 0x241   :  { %14552 = vst [vmem:[#allocation43_spill] sm:$0xff] %v10628_v4  ;;  %v10650_v4 = vperm.slane %v14567_v63, 0  ;;  %v14582_v63 = vmax.f32 %v14580_v43, %v14581_v57  ;;  %v14591_v43 = vmax.f32 %v14181_v40, %v14180_v55  ;;  %v14596_v55 = vld [vmem:[#allocation202_spill] sm:$0xff]  ;;  %v14597_v40 = vld [vmem:[#allocation208_spill] sm:$0xff] }
 0x242   :  { %14556 = vst [vmem:[#allocation38_spill] sm:$0xff] %v10633_v34  ;;  %v10655_v34 = vperm.slane %v14571_v51, 0  ;;  %v14585_v51 = vmax.f32 %v14583_v2, %v14584_v10 }
 0x243   :  { %14560 = vst [vmem:[#allocation44_spill] sm:$0xff] %v10638_v52  ;;  %v10660_v52 = vperm.slane %v14575_v49, 0  ;;  %v14588_v49 = vmax.f32 %v14586_v56, %v14587_v45  ;;  %v10694_v57 = vperm.slane %v14591_v43, 0  ;;  %v10709_v45 = vperm.slane %v14595_v42, 0 }
 0x244   :  { %14564 = vst [vmem:[#allocation45_spill] sm:$0xff] %v10643_v36  ;;  %v10665_v36 = vperm.slane %v14579_v28, 0  ;;  %v10687_v28 = vperm.slane %v14590_v14, 0  ;;  %v14600_v14 = vld [vmem:[#allocation209_spill] sm:$0xff]  ;;  %v1990_v42 = vsel %vm1989_vm2, %v14606_v38, %v14605_v11 }
 0x245   :  { %1723 = vst.msk [vmem:[#allocation2 + $0xf0] sm:$0xff] %vm1691_vm0, %v12798_v50 }
 0x246   :  { %14568 = vst [vmem:[#allocation221_spill] sm:$0xff] %v10650_v4  ;;  %v10672_v4 = vperm.slane %v14582_v63, 0  ;;  %v14592_v63 = vld [vmem:[#allocation206_spill] sm:$0xff] }
 0x247   :  { %14572 = vst [vmem:[#allocation52_spill] sm:$0xff] %v10655_v34  ;;  %v10677_v34 = vperm.slane %v14585_v51, 0  ;;  %v14593_v2 = vmax.f32 %v14183_v61, %v14592_v63  ;;  %v14594_v51 = vmax.f32 %v14185_v30, %v14184_v35  ;;  %v14599_v61 = vld [vmem:[#allocation203_spill] sm:$0xff]  ;;  %v14602_v35 = vld [vmem:[#allocation204_spill] sm:$0xff]  ;;  %v14603_v30 = vld [vmem:[#allocation210_spill] sm:$0xff] }
 0x248   :  { %14576 = vst [vmem:[#allocation47_spill] sm:$0xff] %v10660_v52  ;;  %v10682_v52 = vperm.slane %v14588_v49, 0  ;;  %v14598_v49 = vmax.f32 %v14596_v55, %v14597_v40  ;;  %v14601_v43 = vmax.f32 %v14599_v61, %v14600_v14  ;;  %v14607_v55 = vld [vmem:[#allocation24_spill] sm:$0xff]  ;;  %v2003_v61 = vsel %vm1989_vm2, %v10078_v32, %v10071_v18 }
 0x249   :  { %1724 = vst.msk [vmem:[#allocation2 + $0xf8] sm:$0x3] %vm1693_vm1, %v12798_v50  ;;  %v10699_v10 = vperm.slane %v14593_v2, 0  ;;  %v10704_v56 = vperm.slane %v14594_v51, 0  ;;  %v14604_v2 = vmax.f32 %v14602_v35, %v14603_v30  ;;  %v1992_v40 = vsel %vm1991_vm3, %v14607_v55, %v1990_v42  ;;  %v14608_v30 = vld [vmem:[#allocation36_spill] sm:$0xff]  ;;  %v14612_v42 = vld [vmem:[#allocation51_spill] sm:$0xff] }
 0x24a   :  { %1725 = vst.msk [vmem:[#allocation2 + $0x100] sm:$0xff] %vm1691_vm0, %v12798_v50  ;;  %v10716_v17 = vperm.slane %v14598_v49, 0  ;;  %v10721_v63 = vperm.slane %v14601_v43, 0  ;;  %v1994_v49 = vsel %vm1993_vm4, %v10044_v58, %v1992_v40  ;;  %v2010_v14 = vsel %vm1989_vm2, %v10122_v44, %v10115_v41  ;;  %v10760_v41 = vld [vmem:[#allocation2] sm:$0xff]  ;;  %v14609_v44 = vld [vmem:[#allocation27_spill] sm:$0xff] }
 0x24b   :  { %1726 = vst.msk [vmem:[#allocation2 + $0x108] sm:$0x3] %vm1693_vm1, %v12798_v50  ;;  %v10726_v51 = vperm.slane %v14604_v2, 0  ;;  %v2017_v43 = vsel %vm1989_vm2, %v10166_v48, %v10159_v54  ;;  %v1996_v35 = vsel %vm1995_vm5, %v10049_v25, %v1994_v49  ;;  %v2004_v58 = vsel %vm1991_vm3, %v14608_v30, %v2003_v61  ;;  %v14614_v40 = vld [vmem:[#allocation219_spill] sm:$0xff]  ;;  %v14617_v30 = vld [vmem:[#allocation58_spill] sm:$0xff] }
 0x24c   :  { %1727 = vst.msk [vmem:[#allocation2 + $0x110] sm:$0xff] %vm1691_vm0, %v12798_v50  ;;  %v2011_v18 = vsel %vm1991_vm3, %v10127_v26, %v2010_v14  ;;  %v2018_v32 = vsel %vm1991_vm3, %v10171_v7, %v2017_v43  ;;  %v1998_v54 = vsel %vm1997_vm6, %v14609_v44, %v1996_v35  ;;  %v2005_v48 = vsel %vm1993_vm4, %v10088_v46, %v2004_v58  ;;  %v14610_v26 = vld [vmem:[#allocation215_spill] sm:$0xff]  ;;  %v14616_v35 = vld [vmem:[#allocation46_spill] sm:$0xff] }
 0x24d   :  { %1728 = vst.msk [vmem:[#allocation2 + $0x118] sm:$0x3] %vm1693_vm1, %v12798_v50  ;;  %v2012_v25 = vsel %vm1993_vm4, %v10132_v23, %v2011_v18  ;;  %v2019_v2 = vsel %vm1993_vm4, %v10176_v6, %v2018_v32  ;;  %v2000_v11 = vsel %vm1999_vm7, %v14610_v26, %v1998_v54  ;;  %v14611_v7 = vld [vmem:[#allocation39_spill] sm:$0xff]  ;;  %v14613_v23 = vld [vmem:[#allocation34_spill] sm:$0xff] }
 0x24e   :  { %1729 = vst.msk [vmem:[#allocation2 + $0x120] sm:$0xff] %vm1691_vm0, %v12798_v50  ;;  %v2006_v38 = vsel %vm1995_vm5, %v14611_v7, %v2005_v48  ;;  %v2013_v55 = vsel %vm1995_vm5, %v14612_v42, %v2012_v25  ;;  %v2020_v46 = vsel %vm1995_vm5, %v10181_v22, %v2019_v2  ;;  %v2002_v6 = vsel %vm2001_vm8, %v14613_v23, %v2000_v11  ;;  %v14615_v61 = vld [vmem:[#allocation223_spill] sm:$0xff]  ;;  %v14619_v44 = vld [vmem:[#allocation70_spill] sm:$0xff]  ;;  %v14620_v48 = vld [vmem:[#allocation48_spill] sm:$0xff] }
 0x24f   :  { %1730 = vst.msk [vmem:[#allocation2 + $0x128] sm:$0x3] %vm1693_vm1, %v12798_v50  ;;  %v2007_v49 = vsel %vm1997_vm6, %v14614_v40, %v2006_v38  ;;  %v2014_v14 = vsel %vm1997_vm6, %v14615_v61, %v2013_v55  ;;  %v2021_v43 = vsel %vm1997_vm6, %v10188_v39, %v2020_v46  ;;  %v14618_v18 = vld [vmem:[#allocation63_spill] sm:$0xff]  ;;  %v2024_v54 = vsel %vm1989_vm2, %v14619_v44, %v10203_v27  ;;  %v14621_v25 = vld [vmem:[#allocation60_spill] sm:$0xff]  ;;  %v14633_v44 = vld [vmem:[#allocation106_spill] sm:$0xff] }
 0x250   :  { %2933 = vst [vmem:[#allocation1] ss:$9 sm:$0xff] %v10760_v41  ;;  %v2008_v22 = vsel %vm1999_vm7, %v14616_v35, %v2007_v49  ;;  %v2015_v58 = vsel %vm1999_vm7, %v14617_v30, %v2014_v14  ;;  %v2022_v32 = vsel %vm1999_vm7, %v14618_v18, %v2021_v43  ;;  %v14622_v26 = vld [vmem:[#allocation227_spill] sm:$0xff]  ;;  %v14623_v7 = vld [vmem:[#allocation72_spill] sm:$0xff]  ;;  %v2031_v42 = vsel %vm1989_vm2, %v10254_v9, %v10247_v16  ;;  %v14632_v18 = vld [vmem:[#allocation94_spill] sm:$0xff] }
 0x251   :  { %1711 = vst.msk [vmem:[#allocation2 + $0x90] sm:$0xff] %vm1691_vm0, %v12798_v50  ;;  %v2009_v39 = vsel %vm2001_vm8, %v14620_v48, %v2008_v22  ;;  %v2016_v2 = vsel %vm2001_vm8, %v14621_v25, %v2015_v58  ;;  %v2023_v11 = vsel %vm2001_vm8, %v14622_v26, %v2022_v32  ;;  %v2025_v38 = vsel %vm1991_vm3, %v14623_v7, %v2024_v54  ;;  %v14625_v9 = vld [vmem:[#allocation75_spill] sm:$0xff] }
 0x252   :  { %1712 = vst.msk [vmem:[#allocation2 + $0x98] sm:$0x3] %vm1693_vm1, %v12798_v50  ;;  %v2026_v27 = vsel %vm1993_vm4, %v10220_v13, %v2025_v38  ;;  %v2038_v55 = vsel %vm1989_vm2, %v10298_v3, %v10291_v29  ;;  %v2045_v46 = vsel %vm1989_vm2, %v10342_v15, %v10335_v33  ;;  %v14628_v61 = vld [vmem:[#allocation99_spill] sm:$0xff] }
 0x253   :  { %2125 = vst.msk [vmem:[#allocation2 + $0x11] sm:$0xff] %vm1691_vm0, %v2002_v6  ;;  %v2027_v23 = vsel %vm1995_vm5, %v10225_v8, %v2026_v27  ;;  %v14624_v6 = vld [vmem:[#allocation84_spill] sm:$0xff]  ;;  %v2039_v40 = vsel %vm1991_vm3, %v10303_v60, %v2038_v55  ;;  %v2046_v16 = vsel %vm1991_vm3, %v10347_v12, %v2045_v46  ;;  %v14626_v60 = vld [vmem:[#allocation231_spill] sm:$0xff]  ;;  %v2066_v46 = vsel %vm1989_vm2, %v10474_v31, %v10467_v20 }
 0x254   :  { %1731 = vst.msk [vmem:[#allocation2 + $0x130] sm:$0xff] %vm1691_vm0, %v12798_v50  ;;  %v2032_v13 = vsel %vm1991_vm3, %v14624_v6, %v2031_v42  ;;  %v2028_v29 = vsel %vm1997_vm6, %v14625_v9, %v2027_v23  ;;  %v2040_v8 = vsel %vm1993_vm4, %v10308_v5, %v2039_v40  ;;  %v2047_v33 = vsel %vm1993_vm4, %v10352_v21, %v2046_v16  ;;  %v14627_v12 = vld [vmem:[#allocation87_spill] sm:$0xff]  ;;  %v14629_v5 = vld [vmem:[#allocation82_spill] sm:$0xff]  ;;  %v14639_v27 = vld [vmem:[#allocation120_spill] sm:$0xff] }
 0x255   :  { %2126 = vst.msk [vmem:[#allocation2 + $0x21] sm:$0xff] %vm1691_vm0, %v2009_v39  ;;  %v2033_v3 = vsel %vm1993_vm4, %v10264_v1, %v2032_v13  ;;  %v2029_v15 = vsel %vm1999_vm7, %v14626_v60, %v2028_v29  ;;  %v2041_v14 = vsel %vm1995_vm5, %v14628_v61, %v2040_v8  ;;  %v2048_v1 = vsel %vm1995_vm5, %v10357_v0, %v2047_v33  ;;  %v14630_v43 = vld [vmem:[#allocation235_spill] sm:$0xff]  ;;  %v14635_v39 = vld [vmem:[#allocation118_spill] sm:$0xff]  ;;  %v14640_v23 = vld [vmem:[#allocation28_spill] sm:$0xff] }
 0x256   :  { %2127 = vst.msk [vmem:[#allocation2 + $0x31] sm:$0xff] %vm1691_vm0, %v2016_v2  ;;  %v2034_v49 = vsel %vm1995_vm5, %v14627_v12, %v2033_v3  ;;  %v2030_v21 = vsel %vm2001_vm8, %v14629_v5, %v2029_v15  ;;  %v14631_v22 = vld [vmem:[#allocation239_spill] sm:$0xff]  ;;  %v2049_v58 = vsel %vm1997_vm6, %v10364_v19, %v2048_v1  ;;  %v2052_v25 = vsel %vm1989_vm2, %v14635_v39, %v10379_v59  ;;  %v14636_v2 = vld [vmem:[#allocation96_spill] sm:$0xff]  ;;  %v14649_v12 = vld [vmem:[#allocation30_spill] sm:$0xff] }
 0x257   :  { %2128 = vst.msk [vmem:[#allocation2 + $0x41] sm:$0xff] %vm1691_vm0, %v2023_v11  ;;  %v2035_v35 = vsel %vm1997_vm6, %v14630_v43, %v2034_v49  ;;  %v2042_v30 = vsel %vm1997_vm6, %v14631_v22, %v2041_v14  ;;  %v14634_v54 = vld [vmem:[#allocation111_spill] sm:$0xff]  ;;  %v14637_v11 = vld [vmem:[#allocation108_spill] sm:$0xff]  ;;  %v2053_v42 = vsel %vm1991_vm3, %v14639_v27, %v2052_v25  ;;  %v2059_v59 = vsel %vm1989_vm2, %v10430_v47, %v10423_v24  ;;  %v14645_v24 = vld [vmem:[#allocation29_spill] sm:$0xff] }
 0x258   :  { %1732 = vst.msk [vmem:[#allocation2 + $0x138] sm:$0x3] %vm1693_vm1, %v12798_v50  ;;  %v2036_v32 = vsel %vm1999_vm7, %v14632_v18, %v2035_v35  ;;  %v2043_v0 = vsel %vm1999_vm7, %v14633_v44, %v2042_v30  ;;  %v2050_v48 = vsel %vm1999_vm7, %v14634_v54, %v2049_v58  ;;  %v14638_v7 = vld [vmem:[#allocation243_spill] sm:$0xff]  ;;  %v2054_v55 = vsel %vm1993_vm4, %v10396_v37, %v2053_v42  ;;  %v14644_v29 = vld [vmem:[#allocation200_spill] sm:$0xff]  ;;  %v14650_v61 = vld [vmem:[#allocation130_spill] sm:$0xff] }
 0x259   :  { %2129 = vst.msk [vmem:[#allocation2 + $0x51] sm:$0xff] %vm1691_vm0, %v2030_v21  ;;  %v2037_v26 = vsel %vm2001_vm8, %v14636_v2, %v2036_v32  ;;  %v2044_v19 = vsel %vm2001_vm8, %v14637_v11, %v2043_v0  ;;  %v2051_v38 = vsel %vm2001_vm8, %v14638_v7, %v2050_v48  ;;  %v14641_v6 = vld [vmem:[#allocation23_spill] sm:$0xff]  ;;  %v2067_v3 = vsel %vm1991_vm3, %v14644_v29, %v2066_v46  ;;  %v14647_v8 = vld [vmem:[#allocation168_spill] sm:$0xff]  ;;  %v14652_v21 = vld [vmem:[#allocation201_spill] sm:$0xff] }
 0x25a   :  { %v2073_v13 = vsel %vm1989_vm2, %v14641_v6, %v14640_v23  ;;  %2130 = vst.msk [vmem:[#allocation2 + $0x61] sm:$0xff] %vm1691_vm0, %v2037_v26  ;;  %v14642_v40 = vld [vmem:[#allocation123_spill] sm:$0xff]  ;;  %v14653_v35 = vld [vmem:[#allocation212_spill] sm:$0xff]  ;;  %v14656_v44 = vld [vmem:[#allocation21_spill] sm:$0xff]  ;;  %vm4494_vm1 = vcmask 59392  }
 0x25b   :  { %v2055_v16 = vsel %vm1995_vm5, %v14642_v40, %v2054_v55  ;;  %v14643_v9 = vld [vmem:[#allocation135_spill] sm:$0xff]  ;;  %v2074_v47 = vsel %vm1991_vm3, %v14645_v24, %v2073_v13  ;;  %2131 = vst.msk [vmem:[#allocation2 + $0x71] sm:$0xff] %vm1691_vm0, %v2044_v19  ;;  %v14654_v30 = vld [vmem:[#allocation132_spill] sm:$0xff]  ;;  %v14657_v54 = vld [vmem:[#allocation214_spill] sm:$0xff]  ;;  %v2101_v24 = vsel %vm1989_vm2, %v10694_v57, %v10687_v28 }
 0x25c   :  { %v2060_v37 = vsel %vm1991_vm3, %v14643_v9, %v2059_v59  ;;  %v14646_v31 = vld [vmem:[#allocation247_spill] sm:$0xff]  ;;  %v2075_v49 = vsel %vm1993_vm4, %v14649_v12, %v2074_v47  ;;  %2132 = vst.msk [vmem:[#allocation2 + $0x81] sm:$0xff] %vm1691_vm0, %v2051_v38  ;;  %v14655_v18 = vld [vmem:[#allocation260_spill] sm:$0xff]  ;;  %v14658_v39 = vld [vmem:[#allocation205_spill] sm:$0xff] }
 0x25d   :  { %v2056_v20 = vsel %vm1997_vm6, %v14646_v31, %v2055_v16  ;;  %v2061_v33 = vsel %vm1993_vm4, %v14647_v8, %v2060_v37  ;;  %v14648_v60 = vld [vmem:[#allocation207_spill] sm:$0xff]  ;;  %v2076_v22 = vsel %vm1995_vm5, %v14653_v35, %v2075_v49  ;;  %v14659_v2 = vld [vmem:[#allocation261_spill] sm:$0xff]  ;;  %v14661_v7 = vld [vmem:[#allocation26_spill] sm:$0xff]  ;;  %4493 = vst.msk [vmem:[#allocation3] sm:$0xff] %vm3924_vm9, %v12798_v50 }
 0x25e   :  { %v2068_v15 = vsel %vm1993_vm4, %v14648_v60, %v2067_v3  ;;  %v2057_v14 = vsel %vm1999_vm7, %v14650_v61, %v2056_v20  ;;  %v14651_v1 = vld [vmem:[#allocation171_spill] sm:$0xff]  ;;  %v2077_v48 = vsel %vm1997_vm6, %v14657_v54, %v2076_v22  ;;  %v14660_v11 = vld [vmem:[#allocation25_spill] sm:$0xff]  ;;  %v2080_v38 = vsel %vm1989_vm2, %v14661_v7, %v10555_v53  ;;  %v14662_v27 = vld [vmem:[#allocation20_spill] sm:$0xff]  ;;  %4496 = vst.msk [vmem:[#allocation3 + $0x10] sm:$0xff] %vm3924_vm9, %v12798_v50 }
 0x25f   :  { %v2062_v5 = vsel %vm1995_vm5, %v14651_v1, %v2061_v33  ;;  %v2069_v43 = vsel %vm1995_vm5, %v14652_v21, %v2068_v15  ;;  %v2058_v58 = vsel %vm2001_vm8, %v14654_v30, %v2057_v14  ;;  %v2078_v19 = vsel %vm1999_vm7, %v14660_v11, %v2077_v48  ;;  %v14663_v55 = vld [vmem:[#allocation213_spill] sm:$0xff]  ;;  %v14664_v46 = vld [vmem:[#allocation31_spill] sm:$0xff]  ;;  %v14665_v6 = vld [vmem:[#allocation32_spill] sm:$0xff]  ;;  %4498 = vst.msk [vmem:[#allocation3 + $0x20] sm:$0xff] %vm3924_vm9, %v12798_v50 }
 0x260   :  { %v2063_v32 = vsel %vm1997_vm6, %v14655_v18, %v2062_v5  ;;  %v2070_v0 = vsel %vm1997_vm6, %v14656_v44, %v2069_v43  ;;  %2133 = vst.msk [vmem:[#allocation2 + $0xb1] sm:$0xff] %vm1691_vm0, %v2058_v58  ;;  %v2079_v23 = vsel %vm2001_vm8, %v14664_v46, %v2078_v19  ;;  %v2081_v13 = vsel %vm1991_vm3, %v14665_v6, %v2080_v38  ;;  %v14666_v16 = vld [vmem:[#allocation41_spill] sm:$0xff]  ;;  %v14667_v9 = vld [vmem:[#allocation42_spill] sm:$0xff]  ;;  %v14671_v20 = vld [vmem:[#allocation216_spill] sm:$0xff] }
 0x261   :  { %v2064_v25 = vsel %vm1999_vm7, %v14658_v39, %v2063_v32  ;;  %v2071_v26 = vsel %vm1999_vm7, %v14659_v2, %v2070_v0  ;;  %v2082_v40 = vsel %vm1993_vm4, %v10572_v62, %v2081_v13  ;;  %v2087_v53 = vsel %vm1989_vm2, %v14667_v9, %v14666_v16  ;;  %v14668_v37 = vld [vmem:[#allocation45_spill] sm:$0xff]  ;;  %v14672_v8 = vld [vmem:[#allocation52_spill] sm:$0xff]  ;;  %v14674_v28 = vld [vmem:[#allocation218_spill] sm:$0xff]  ;;  %2136 = vst.msk [vmem:[#allocation2 + $0xe1] sm:$0xff] %vm1691_vm0, %v2079_v23 }
 0x262   :  { %v2065_v42 = vsel %vm2001_vm8, %v14662_v27, %v2064_v25  ;;  %v2072_v59 = vsel %vm2001_vm8, %v14663_v55, %v2071_v26  ;;  %v14669_v29 = vld [vmem:[#allocation221_spill] sm:$0xff]  ;;  %v2088_v62 = vsel %vm1991_vm3, %v14671_v20, %v2087_v53  ;;  %v2102_v60 = vsel %vm1991_vm3, %v10699_v10, %v2101_v24  ;;  %v14675_v49 = vld [vmem:[#allocation47_spill] sm:$0xff]  ;;  %v14676_v1 = vld [vmem:[#allocation40_spill] sm:$0xff]  ;;  %4500 = vst.msk [vmem:[#allocation3 + $0x30] sm:$0xff] %vm3924_vm9, %v12798_v50 }
 0x263   :  { %v2094_v3 = vsel %vm1989_vm2, %v14669_v29, %v14668_v37  ;;  %2134 = vst.msk [vmem:[#allocation2 + $0xc1] sm:$0xff] %vm1691_vm0, %v2065_v42  ;;  %v14670_v47 = vld [vmem:[#allocation33_spill] sm:$0xff]  ;;  %v2089_v57 = vsel %vm1993_vm4, %v14674_v28, %v2088_v62  ;;  %v2103_v14 = vsel %vm1993_vm4, %v10704_v56, %v2102_v60  ;;  %v14678_v22 = vld [vmem:[#allocation35_spill] sm:$0xff]  ;;  %v14680_v44 = vld [vmem:[#allocation38_spill] sm:$0xff]  ;;  %v2213_v39 = vrot.slane %v10760_v41, 1 }
 0x264   :  { %v2083_v31 = vsel %vm1995_vm5, %v14670_v47, %v2082_v40  ;;  %v2095_v33 = vsel %vm1991_vm3, %v14672_v8, %v2094_v3  ;;  %2135 = vst.msk [vmem:[#allocation2 + $0xd1] sm:$0xff] %vm1691_vm0, %v2072_v59  ;;  %v14673_v15 = vld [vmem:[#allocation217_spill] sm:$0xff]  ;;  %v2104_v35 = vsel %vm1995_vm5, %v10709_v45, %v2103_v14  ;;  %v14679_v58 = vld [vmem:[#allocation43_spill] sm:$0xff]  ;;  %v14681_v54 = vld [vmem:[#allocation44_spill] sm:$0xff]  ;;  %v2216_v25 = vrot.slane %v10760_v41, 4 }
 0x265   :  { %v2084_v12 = vsel %vm1997_vm6, %v14673_v15, %v2083_v31  ;;  %v2096_v61 = vsel %vm1993_vm4, %v14675_v49, %v2095_v33  ;;  %v14677_v10 = vld [vmem:[#allocation37_spill] sm:$0xff]  ;;  %v2105_v32 = vsel %vm1997_vm6, %v10716_v17, %v2104_v35  ;;  %2935 = vst [vmem:[#allocation1 + $0x1] ss:$9 sm:$0xff] %v2213_v39  ;;  %v2219_v2 = vrot.slane %v10760_v41, 7  ;;  %v2143_v26 = vld [vmem:[#allocation2 + $0x10] sm:$0xff] }
 0x266   :  { %v2085_v5 = vsel %vm1999_vm7, %v14676_v1, %v2084_v12  ;;  %v2090_v21 = vsel %vm1995_vm5, %v14677_v10, %v2089_v57  ;;  %v2097_v43 = vsel %vm1995_vm5, %v10665_v36, %v2096_v61  ;;  %v2106_v45 = vsel %vm1999_vm7, %v10721_v63, %v2105_v32  ;;  %2941 = vst [vmem:[#allocation1 + $0x4] ss:$9 sm:$0xff] %v2216_v25  ;;  %v2142_v11 = vld [vmem:[#allocation2 + $0x8] sm:$0x1]  ;;  %v2144_v23 = vld [vmem:[#allocation2 + $0x18] sm:$0x1] }
 0x267   :  { %v2086_v30 = vsel %vm2001_vm8, %v14678_v22, %v2085_v5  ;;  %v2091_v56 = vsel %vm1997_vm6, %v14679_v58, %v2090_v21  ;;  %v2098_v18 = vsel %vm1997_vm6, %v10672_v4, %v2097_v43  ;;  %v2107_v17 = vsel %vm2001_vm8, %v10726_v51, %v2106_v45  ;;  %2947 = vst [vmem:[#allocation1 + $0x7] ss:$9 sm:$0xff] %v2219_v2  ;;  %v2147_v29 = vld [vmem:[#allocation2 + $0x30] sm:$0xff]  ;;  %v2146_v24 = vld [vmem:[#allocation2 + $0x28] sm:$0x1]  ;;  %v2149_v15 = vld [vmem:[#allocation2 + $0x40] sm:$0xff] }
 0x268   :  { %v2092_v0 = vsel %vm1999_vm7, %v14680_v44, %v2091_v56  ;;  %v2099_v36 = vsel %vm1999_vm7, %v10677_v34, %v2098_v18  ;;  %2137 = vst.msk [vmem:[#allocation2 + $0xf1] sm:$0xff] %vm1691_vm0, %v2086_v30  ;;  %v2214_v34 = vrot.slane %v10760_v41, 2  ;;  %v2215_v63 = vrot.slane %v10760_v41, 3  ;;  %v2148_v57 = vld [vmem:[#allocation2 + $0x38] sm:$0x1]  ;;  %v2151_v21 = vld [vmem:[#allocation2 + $0x50] sm:$0xff] }
 0x269   :  { %v2093_v48 = vsel %vm2001_vm8, %v14681_v54, %v2092_v0  ;;  %v2100_v4 = vsel %vm2001_vm8, %v10682_v52, %v2099_v36  ;;  %2140 = vst.msk [vmem:[#allocation2 + $0x121] sm:$0xff] %vm1691_vm0, %v2107_v17  ;;  %v2217_v52 = vrot.slane %v10760_v41, 5  ;;  %v2218_v51 = vrot.slane %v10760_v41, 6  ;;  %v2145_v41 = vld [vmem:[#allocation2 + $0x20] sm:$0xff]  ;;  %v2150_v22 = vld [vmem:[#allocation2 + $0x48] sm:$0x1] }
 0x26a   :  { %2138 = vst.msk [vmem:[#allocation2 + $0x101] sm:$0xff] %vm1691_vm0, %v2093_v48  ;;  %v2220_v19 = vrot.slane %v2143_v26, 1  ;;  %v2221_v7 = vrot.slane %v2143_v26, 2  ;;  %v2222_v27 = vrot.slane %v2143_v26, 3  ;;  %v2223_v42 = vrot.slane %v2143_v26, 4  ;;  %v2153_v36 = vld [vmem:[#allocation2 + $0x60] sm:$0xff] }
 0x26b   :  { %2139 = vst.msk [vmem:[#allocation2 + $0x111] sm:$0xff] %vm1691_vm0, %v2100_v4  ;;  %v2224_v55 = vrot.slane %v2143_v26, 5  ;;  %v2225_v59 = vrot.slane %v2143_v26, 6  ;;  %v2226_v46 = vrot.slane %v2143_v26, 7  ;;  %v2227_v6 = vrot.slane %v2145_v41, 1  ;;  %v2155_v2 = vld [vmem:[#allocation2 + $0x70] sm:$0xff] }
 0x26c   :  { %2937 = vst [vmem:[#allocation1 + $0x2] ss:$9 sm:$0xff] %v2214_v34  ;;  %v2228_v40 = vrot.slane %v2145_v41, 2  ;;  %v2229_v16 = vrot.slane %v2145_v41, 3  ;;  %v2230_v9 = vrot.slane %v2145_v41, 4  ;;  %v2231_v53 = vrot.slane %v2145_v41, 5 }
 0x26d   :  { %2939 = vst [vmem:[#allocation1 + $0x3] ss:$9 sm:$0xff] %v2215_v63  ;;  %v2232_v37 = vrot.slane %v2145_v41, 6  ;;  %v2233_v3 = vrot.slane %v2145_v41, 7  ;;  %v2234_v31 = vrot.slane %v2147_v29, 1  ;;  %v2235_v20 = vrot.slane %v2147_v29, 2 }
 0x26e   :  { %2943 = vst [vmem:[#allocation1 + $0x5] ss:$9 sm:$0xff] %v2217_v52  ;;  %v2236_v62 = vrot.slane %v2147_v29, 3  ;;  %v2237_v8 = vrot.slane %v2147_v29, 4  ;;  %v2238_v33 = vrot.slane %v2147_v29, 5  ;;  %v2239_v60 = vrot.slane %v2147_v29, 6 }
 0x26f   :  { %2945 = vst [vmem:[#allocation1 + $0x6] ss:$9 sm:$0xff] %v2218_v51  ;;  %v2240_v12 = vrot.slane %v2147_v29, 7  ;;  %v2241_v49 = vrot.slane %v2149_v15, 1  ;;  %v2242_v61 = vrot.slane %v2149_v15, 2  ;;  %v2243_v14 = vrot.slane %v2149_v15, 3 }
 0x270   :  { %v2244_v1 = vrot.slane %v2149_v15, 4  ;;  %v2245_v5 = vrot.slane %v2149_v15, 5  ;;  %v2246_v10 = vrot.slane %v2149_v15, 6  ;;  %v2247_v43 = vrot.slane %v2149_v15, 7  ;;  %v2152_v54 = vld [vmem:[#allocation2 + $0x58] sm:$0x1] }
 0x271   :  { %v2248_v30 = vrot.slane %v2151_v21, 1  ;;  %v2249_v58 = vrot.slane %v2151_v21, 2  ;;  %v2250_v56 = vrot.slane %v2151_v21, 3  ;;  %v2251_v18 = vrot.slane %v2151_v21, 4  ;;  %v2154_v51 = vld [vmem:[#allocation2 + $0x68] sm:$0x1] }
 0x272   :  { %v2252_v32 = vrot.slane %v2151_v21, 5  ;;  %v2253_v44 = vrot.slane %v2151_v21, 6  ;;  %v2254_v45 = vrot.slane %v2151_v21, 7  ;;  %v2255_v48 = vrot.slane %v2153_v36, 1  ;;  %4502 = vst.msk [vmem:[#allocation3 + $0x40] sm:$0xff] %vm3924_vm9, %v12798_v50 }
 0x273   :  { %v2256_v4 = vrot.slane %v2153_v36, 2  ;;  %v2257_v17 = vrot.slane %v2153_v36, 3  ;;  %v2258_v39 = vrot.slane %v2153_v36, 4  ;;  %v2259_v34 = vrot.slane %v2153_v36, 5  ;;  %4504 = vst.msk [vmem:[#allocation3 + $0x50] sm:$0xff] %vm3924_vm9, %v12798_v50 }
 0x274   :  { %v2260_v25 = vrot.slane %v2153_v36, 6  ;;  %v2261_v52 = vrot.slane %v2153_v36, 7  ;;  %4506 = vst.msk [vmem:[#allocation3 + $0x60] sm:$0xff] %vm3924_vm9, %v12798_v50  ;;  %vm4781_vm2 = vcmask 57344   ;;  %vm6205_vm3 = vcmask 195584  }
 0x275   :  { %4508 = vst.msk [vmem:[#allocation3 + $0x70] sm:$0xff] %vm3924_vm9, %v12798_v50  ;;  %vm6235_vm4 = vcmask 261120  }
 0x276   :  { %v11010_v38 = vld [vmem:[#allocation1] sm:$0xff]  ;;  %4510 = vst.msk [vmem:[#allocation3 + $0x80] sm:$0xff] %vm3924_vm9, %v12798_v50 }
 0x277   :  { %2949 = vst [vmem:[#allocation1] ss:$9 sm:$0xff] %v2142_v11  ;;  %v2263_v11 = vrot.slane %v2155_v2, 2 }
 0x278   :  { %2950 = vst [vmem:[#allocation1 + $0x1] ss:$9 sm:$0xff] %v2143_v26  ;;  %v2262_v26 = vrot.slane %v2155_v2, 1 }
 0x279   :  { %2951 = vst [vmem:[#allocation1 + $0x2] ss:$9 sm:$0xff] %v2220_v19  ;;  %v2264_v19 = vrot.slane %v2155_v2, 3 }
 0x27a   :  { %2952 = vst [vmem:[#allocation1 + $0x3] ss:$9 sm:$0xff] %v2221_v7  ;;  %v2265_v7 = vrot.slane %v2155_v2, 4 }
 0x27b   :  { %2953 = vst [vmem:[#allocation1 + $0x4] ss:$9 sm:$0xff] %v2222_v27 }
 0x27c   :  { %2954 = vst [vmem:[#allocation1 + $0x5] ss:$9 sm:$0xff] %v2223_v42  ;;  %v2266_v42 = vrot.slane %v2155_v2, 5 }
 0x27d   :  { %2955 = vst [vmem:[#allocation1 + $0x6] ss:$9 sm:$0xff] %v2224_v55  ;;  %v2267_v55 = vrot.slane %v2155_v2, 6 }
 0x27e   :  { %2956 = vst [vmem:[#allocation1 + $0x7] ss:$9 sm:$0xff] %v2225_v59  ;;  %v2268_v59 = vrot.slane %v2155_v2, 7 }
 0x27f   :  { %4512 = vst.msk [vmem:[#allocation3 + $0x90] sm:$0xff] %vm3924_vm9, %v12798_v50 }
 0x280   :  { %4514 = vst.msk [vmem:[#allocation3 + $0xa0] sm:$0xff] %vm3924_vm9, %v12798_v50 }
 0x281   :  { %4516 = vst.msk [vmem:[#allocation3 + $0xb0] sm:$0xff] %vm3924_vm9, %v12798_v50 }
 0x282   :  { %4518 = vst.msk [vmem:[#allocation3 + $0xc0] sm:$0xff] %vm3924_vm9, %v12798_v50 }
 0x283   :  { %4520 = vst.msk [vmem:[#allocation3 + $0xd0] sm:$0xff] %vm3924_vm9, %v12798_v50 }
 0x284   :  { %4522 = vst.msk [vmem:[#allocation3 + $0xe0] sm:$0xff] %vm3924_vm9, %v12798_v50 }
 0x285   :  { %v11012_v13 = vld [vmem:[#allocation1] sm:$0xff]  ;;  %4524 = vst.msk [vmem:[#allocation3 + $0xf0] sm:$0xff] %vm3924_vm9, %v12798_v50 }
 0x286   :  { %2958 = vst [vmem:[#allocation1] ss:$9 sm:$0xff] %v2226_v46  ;;  %v2157_v46 = vld [vmem:[#allocation2 + $0x80] sm:$0xff] }
 0x287   :  { %2959 = vst [vmem:[#allocation1 + $0x1] ss:$9 sm:$0xff] %v2144_v23  ;;  %v2269_v23 = vrot.slane %v2157_v46, 1 }
 0x288   :  { %2960 = vst [vmem:[#allocation1 + $0x2] ss:$9 sm:$0xff] %v2145_v41  ;;  %v2156_v41 = vld [vmem:[#allocation2 + $0x78] sm:$0x1] }
 0x289   :  { %2961 = vst [vmem:[#allocation1 + $0x3] ss:$9 sm:$0xff] %v2227_v6  ;;  %v2270_v6 = vrot.slane %v2157_v46, 2 }
 0x28a   :  { %2962 = vst [vmem:[#allocation1 + $0x4] ss:$9 sm:$0xff] %v2228_v40  ;;  %v2271_v40 = vrot.slane %v2157_v46, 3 }
 0x28b   :  { %2963 = vst [vmem:[#allocation1 + $0x5] ss:$9 sm:$0xff] %v2229_v16 }
 0x28c   :  { %2964 = vst [vmem:[#allocation1 + $0x6] ss:$9 sm:$0xff] %v2230_v9  ;;  %v2272_v9 = vrot.slane %v2157_v46, 4 }
 0x28d   :  { %2965 = vst [vmem:[#allocation1 + $0x7] ss:$9 sm:$0xff] %v2231_v53  ;;  %v2273_v53 = vrot.slane %v2157_v46, 5 }
 0x28e   :  { %4526 = vst.msk [vmem:[#allocation3 + $0x100] sm:$0xff] %vm3924_vm9, %v12798_v50 }
 0x28f   :  { %4528 = vst.msk [vmem:[#allocation3 + $0x110] sm:$0xff] %vm3924_vm9, %v12798_v50 }
 0x290   :  { %4530 = vst.msk [vmem:[#allocation3 + $0x120] sm:$0xff] %vm3924_vm9, %v12798_v50 }
 0x291   :  { %4532 = vst.msk [vmem:[#allocation3 + $0x130] sm:$0xff] %vm3924_vm9, %v12798_v50 }
 0x292   :  { %4534 = vst.msk [vmem:[#allocation3 + $0x140] sm:$0xff] %vm3924_vm9, %v12798_v50 }
 0x293   :  { %4536 = vst.msk [vmem:[#allocation3 + $0x150] sm:$0xff] %vm3924_vm9, %v12798_v50 }
 0x294   :  { %v11014_v47 = vld [vmem:[#allocation1] sm:$0xff]  ;;  %4495 = vst.msk [vmem:[#allocation3 + $0x8] sm:$0x7] %vm4494_vm1, %v12798_v50 }
 0x295   :  { %2967 = vst [vmem:[#allocation1] ss:$9 sm:$0xff] %v2232_v37  ;;  %v2274_v37 = vrot.slane %v2157_v46, 6 }
 0x296   :  { %2968 = vst [vmem:[#allocation1 + $0x1] ss:$9 sm:$0xff] %v2233_v3  ;;  %v2159_v3 = vld [vmem:[#allocation2 + $0xa0] sm:$0xff] }
 0x297   :  { %2969 = vst [vmem:[#allocation1 + $0x2] ss:$9 sm:$0xff] %v2146_v24  ;;  %v2158_v24 = vld [vmem:[#allocation2 + $0x88] sm:$0x1] }
 0x298   :  { %2970 = vst [vmem:[#allocation1 + $0x3] ss:$9 sm:$0xff] %v2147_v29  ;;  %v2275_v29 = vrot.slane %v2157_v46, 7 }
 0x299   :  { %2971 = vst [vmem:[#allocation1 + $0x4] ss:$9 sm:$0xff] %v2234_v31  ;;  %v2276_v31 = vrot.slane %v2159_v3, 1 }
 0x29a   :  { %2972 = vst [vmem:[#allocation1 + $0x5] ss:$9 sm:$0xff] %v2235_v20  ;;  %v2277_v20 = vrot.slane %v2159_v3, 2 }
 0x29b   :  { %2973 = vst [vmem:[#allocation1 + $0x6] ss:$9 sm:$0xff] %v2236_v62 }
 0x29c   :  { %2974 = vst [vmem:[#allocation1 + $0x7] ss:$9 sm:$0xff] %v2237_v8  ;;  %v2278_v8 = vrot.slane %v2159_v3, 3 }
 0x29d   :  { %4497 = vst.msk [vmem:[#allocation3 + $0x18] sm:$0x7] %vm4494_vm1, %v12798_v50 }
 0x29e   :  { %4499 = vst.msk [vmem:[#allocation3 + $0x28] sm:$0x7] %vm4494_vm1, %v12798_v50 }
 0x29f   :  { %4501 = vst.msk [vmem:[#allocation3 + $0x38] sm:$0x7] %vm4494_vm1, %v12798_v50 }
 0x2a0   :  { %4503 = vst.msk [vmem:[#allocation3 + $0x48] sm:$0x7] %vm4494_vm1, %v12798_v50 }
 0x2a1   :  { %4505 = vst.msk [vmem:[#allocation3 + $0x58] sm:$0x7] %vm4494_vm1, %v12798_v50 }
 0x2a2   :  { %4507 = vst.msk [vmem:[#allocation3 + $0x68] sm:$0x7] %vm4494_vm1, %v12798_v50 }
 0x2a3   :  { %v11016_v28 = vld [vmem:[#allocation1] sm:$0xff]  ;;  %4509 = vst.msk [vmem:[#allocation3 + $0x78] sm:$0x7] %vm4494_vm1, %v12798_v50 }
 0x2a4   :  { %2976 = vst [vmem:[#allocation1] ss:$9 sm:$0xff] %v2238_v33  ;;  %v2279_v33 = vrot.slane %v2159_v3, 4 }
 0x2a5   :  { %2977 = vst [vmem:[#allocation1 + $0x1] ss:$9 sm:$0xff] %v2239_v60  ;;  %v2280_v60 = vrot.slane %v2159_v3, 5 }
 0x2a6   :  { %2978 = vst [vmem:[#allocation1 + $0x2] ss:$9 sm:$0xff] %v2240_v12  ;;  %v2161_v12 = vld [vmem:[#allocation2 + $0xb0] sm:$0xff] }
 0x2a7   :  { %2979 = vst [vmem:[#allocation1 + $0x3] ss:$9 sm:$0xff] %v2148_v57  ;;  %v2282_v57 = vrot.slane %v2159_v3, 7 }
 0x2a8   :  { %2980 = vst [vmem:[#allocation1 + $0x4] ss:$9 sm:$0xff] %v2149_v15  ;;  %v2281_v15 = vrot.slane %v2159_v3, 6 }
 0x2a9   :  { %2981 = vst [vmem:[#allocation1 + $0x5] ss:$9 sm:$0xff] %v2241_v49  ;;  %v2160_v49 = vld [vmem:[#allocation2 + $0xa8] sm:$0x1] }
 0x2aa   :  { %2982 = vst [vmem:[#allocation1 + $0x6] ss:$9 sm:$0xff] %v2242_v61  ;;  %v2283_v61 = vrot.slane %v2161_v12, 1 }
 0x2ab   :  { %2983 = vst [vmem:[#allocation1 + $0x7] ss:$9 sm:$0xff] %v2243_v14 }
 0x2ac   :  { %4511 = vst.msk [vmem:[#allocation3 + $0x88] sm:$0x7] %vm4494_vm1, %v12798_v50 }
 0x2ad   :  { %4513 = vst.msk [vmem:[#allocation3 + $0x98] sm:$0x7] %vm4494_vm1, %v12798_v50 }
 0x2ae   :  { %4515 = vst.msk [vmem:[#allocation3 + $0xa8] sm:$0x7] %vm4494_vm1, %v12798_v50 }
 0x2af   :  { %4517 = vst.msk [vmem:[#allocation3 + $0xb8] sm:$0x7] %vm4494_vm1, %v12798_v50 }
 0x2b0   :  { %4519 = vst.msk [vmem:[#allocation3 + $0xc8] sm:$0x7] %vm4494_vm1, %v12798_v50 }
 0x2b1   :  { %4521 = vst.msk [vmem:[#allocation3 + $0xd8] sm:$0x7] %vm4494_vm1, %v12798_v50 }
 0x2b2   :  { %v11018_v35 = vld [vmem:[#allocation1] sm:$0xff]  ;;  %4523 = vst.msk [vmem:[#allocation3 + $0xe8] sm:$0x7] %vm4494_vm1, %v12798_v50 }
 0x2b3   :  { %2985 = vst [vmem:[#allocation1] ss:$9 sm:$0xff] %v2244_v1  ;;  %v2284_v1 = vrot.slane %v2161_v12, 2 }
 0x2b4   :  { %2986 = vst [vmem:[#allocation1 + $0x1] ss:$9 sm:$0xff] %v2245_v5  ;;  %v2285_v5 = vrot.slane %v2161_v12, 3 }
 0x2b5   :  { %2987 = vst [vmem:[#allocation1 + $0x2] ss:$9 sm:$0xff] %v2246_v10  ;;  %v2286_v10 = vrot.slane %v2161_v12, 4 }
 0x2b6   :  { %2988 = vst [vmem:[#allocation1 + $0x3] ss:$9 sm:$0xff] %v2247_v43  ;;  %v2288_v43 = vrot.slane %v2161_v12, 6 }
 0x2b7   :  { %2989 = vst [vmem:[#allocation1 + $0x4] ss:$9 sm:$0xff] %v2150_v22  ;;  %v2163_v22 = vld [vmem:[#allocation2 + $0xc0] sm:$0xff] }
 0x2b8   :  { %2990 = vst [vmem:[#allocation1 + $0x5] ss:$9 sm:$0xff] %v2151_v21  ;;  %v2287_v21 = vrot.slane %v2161_v12, 5 }
 0x2b9   :  { %2991 = vst [vmem:[#allocation1 + $0x6] ss:$9 sm:$0xff] %v2248_v30  ;;  %v2289_v30 = vrot.slane %v2161_v12, 7 }
 0x2ba   :  { %2992 = vst [vmem:[#allocation1 + $0x7] ss:$9 sm:$0xff] %v2249_v58  ;;  %v2162_v58 = vld [vmem:[#allocation2 + $0xb8] sm:$0x1] }
 0x2bb   :  { %4525 = vst.msk [vmem:[#allocation3 + $0xf8] sm:$0x7] %vm4494_vm1, %v12798_v50 }
 0x2bc   :  { %4527 = vst.msk [vmem:[#allocation3 + $0x108] sm:$0x7] %vm4494_vm1, %v12798_v50 }
 0x2bd   :  { %4529 = vst.msk [vmem:[#allocation3 + $0x118] sm:$0x7] %vm4494_vm1, %v12798_v50 }
 0x2be   :  { %4531 = vst.msk [vmem:[#allocation3 + $0x128] sm:$0x7] %vm4494_vm1, %v12798_v50 }
 0x2bf   :  { %4533 = vst.msk [vmem:[#allocation3 + $0x138] sm:$0x7] %vm4494_vm1, %v12798_v50 }
 0x2c0   :  { %4535 = vst.msk [vmem:[#allocation3 + $0x148] sm:$0x7] %vm4494_vm1, %v12798_v50 }
 0x2c1   :  { %v11020_v0 = vld [vmem:[#allocation1] sm:$0xff]  ;;  %4537 = vst.msk [vmem:[#allocation3 + $0x158] sm:$0x7] %vm4494_vm1, %v12798_v50 }
 0x2c2   :  { %2994 = vst [vmem:[#allocation1] ss:$9 sm:$0xff] %v2250_v56 }
 0x2c3   :  { %2995 = vst [vmem:[#allocation1 + $0x1] ss:$9 sm:$0xff] %v2251_v18  ;;  %v2290_v18 = vrot.slane %v2163_v22, 1 }
 0x2c4   :  { %2996 = vst [vmem:[#allocation1 + $0x2] ss:$9 sm:$0xff] %v2252_v32  ;;  %v2291_v32 = vrot.slane %v2163_v22, 2 }
 0x2c5   :  { %2997 = vst [vmem:[#allocation1 + $0x3] ss:$9 sm:$0xff] %v2253_v44  ;;  %v2292_v44 = vrot.slane %v2163_v22, 3 }
 0x2c6   :  { %2998 = vst [vmem:[#allocation1 + $0x4] ss:$9 sm:$0xff] %v2254_v45  ;;  %v2294_v45 = vrot.slane %v2163_v22, 5 }
 0x2c7   :  { %2999 = vst [vmem:[#allocation1 + $0x5] ss:$9 sm:$0xff] %v2152_v54  ;;  %v2295_v54 = vrot.slane %v2163_v22, 6 }
 0x2c8   :  { %3000 = vst [vmem:[#allocation1 + $0x6] ss:$9 sm:$0xff] %v2153_v36  ;;  %v2293_v36 = vrot.slane %v2163_v22, 4 }
 0x2c9   :  { %3001 = vst [vmem:[#allocation1 + $0x7] ss:$9 sm:$0xff] %v2255_v48  ;;  %v2165_v48 = vld [vmem:[#allocation2 + $0xd0] sm:$0xff] }
 0x2d0   :  { %v11022_v63 = vld [vmem:[#allocation1] sm:$0xff] }
 0x2d1   :  { %3003 = vst [vmem:[#allocation1] ss:$9 sm:$0xff] %v2256_v4  ;;  %v2296_v4 = vrot.slane %v2163_v22, 7 }
 0x2d2   :  { %3004 = vst [vmem:[#allocation1 + $0x1] ss:$9 sm:$0xff] %v2257_v17 }
 0x2d3   :  { %3005 = vst [vmem:[#allocation1 + $0x2] ss:$9 sm:$0xff] %v2258_v39  ;;  %v2164_v39 = vld [vmem:[#allocation2 + $0xc8] sm:$0x1] }
 0x2d4   :  { %3006 = vst [vmem:[#allocation1 + $0x3] ss:$9 sm:$0xff] %v2259_v34  ;;  %v2297_v34 = vrot.slane %v2165_v48, 1 }
 0x2d5   :  { %3007 = vst [vmem:[#allocation1 + $0x4] ss:$9 sm:$0xff] %v2260_v25  ;;  %v2298_v25 = vrot.slane %v2165_v48, 2 }
 0x2d6   :  { %3008 = vst [vmem:[#allocation1 + $0x5] ss:$9 sm:$0xff] %v2261_v52  ;;  %v2299_v52 = vrot.slane %v2165_v48, 3 }
 0x2d7   :  { %3009 = vst [vmem:[#allocation1 + $0x6] ss:$9 sm:$0xff] %v2154_v51  ;;  %v2300_v51 = vrot.slane %v2165_v48, 4 }
 0x2d8   :  { %3010 = vst [vmem:[#allocation1 + $0x7] ss:$9 sm:$0xff] %v2155_v2  ;;  %v2301_v2 = vrot.slane %v2165_v48, 5 }
 0x2df   :  { %v11024_v27 = vld [vmem:[#allocation1] sm:$0xff] }
 0x2e0   :  { %3012 = vst [vmem:[#allocation1] ss:$9 sm:$0xff] %v2262_v26  ;;  %v2302_v26 = vrot.slane %v2165_v48, 6 }
 0x2e1   :  { %3013 = vst [vmem:[#allocation1 + $0x1] ss:$9 sm:$0xff] %v2263_v11  ;;  %v2167_v11 = vld [vmem:[#allocation2 + $0xe0] sm:$0xff] }
 0x2e2   :  { %3014 = vst [vmem:[#allocation1 + $0x2] ss:$9 sm:$0xff] %v2264_v19  ;;  %v2303_v19 = vrot.slane %v2165_v48, 7 }
 0x2e3   :  { %3015 = vst [vmem:[#allocation1 + $0x3] ss:$9 sm:$0xff] %v2265_v7 }
 0x2e4   :  { %3016 = vst [vmem:[#allocation1 + $0x4] ss:$9 sm:$0xff] %v2266_v42  ;;  %v2166_v42 = vld [vmem:[#allocation2 + $0xd8] sm:$0x1] }
 0x2e5   :  { %3017 = vst [vmem:[#allocation1 + $0x5] ss:$9 sm:$0xff] %v2267_v55  ;;  %v2304_v55 = vrot.slane %v2167_v11, 1 }
 0x2e6   :  { %3018 = vst [vmem:[#allocation1 + $0x6] ss:$9 sm:$0xff] %v2268_v59  ;;  %v2305_v59 = vrot.slane %v2167_v11, 2 }
 0x2e7   :  { %3019 = vst [vmem:[#allocation1 + $0x7] ss:$9 sm:$0xff] %v2156_v41  ;;  %v2306_v41 = vrot.slane %v2167_v11, 3 }
 0x2ee   :  { %v11026_v16 = vld [vmem:[#allocation1] sm:$0xff] }
 0x2ef   :  { %3021 = vst [vmem:[#allocation1] ss:$9 sm:$0xff] %v2157_v46  ;;  %v2307_v46 = vrot.slane %v2167_v11, 4 }
 0x2f0   :  { %3022 = vst [vmem:[#allocation1 + $0x1] ss:$9 sm:$0xff] %v2269_v23  ;;  %v2308_v23 = vrot.slane %v2167_v11, 5 }
 0x2f1   :  { %3023 = vst [vmem:[#allocation1 + $0x2] ss:$9 sm:$0xff] %v2270_v6  ;;  %v2309_v6 = vrot.slane %v2167_v11, 6 }
 0x2f2   :  { %3024 = vst [vmem:[#allocation1 + $0x3] ss:$9 sm:$0xff] %v2271_v40 }
 0x2f3   :  { %3025 = vst [vmem:[#allocation1 + $0x4] ss:$9 sm:$0xff] %v2272_v9  ;;  %v2169_v9 = vld [vmem:[#allocation2 + $0xf0] sm:$0xff] }
 0x2f4   :  { %3026 = vst [vmem:[#allocation1 + $0x5] ss:$9 sm:$0xff] %v2273_v53  ;;  %v2310_v53 = vrot.slane %v2167_v11, 7 }
 0x2f5   :  { %3027 = vst [vmem:[#allocation1 + $0x6] ss:$9 sm:$0xff] %v2274_v37  ;;  %v2168_v37 = vld [vmem:[#allocation2 + $0xe8] sm:$0x1] }
 0x2f6   :  { %3028 = vst [vmem:[#allocation1 + $0x7] ss:$9 sm:$0xff] %v2275_v29  ;;  %v2311_v29 = vrot.slane %v2169_v9, 1 }
 0x2fd   :  { %v11028_v62 = vld [vmem:[#allocation1] sm:$0xff] }
 0x2fe   :  { %3030 = vst [vmem:[#allocation1] ss:$9 sm:$0xff] %v2158_v24  ;;  %v2313_v24 = vrot.slane %v2169_v9, 3 }
 0x2ff   :  { %3031 = vst [vmem:[#allocation1 + $0x1] ss:$9 sm:$0xff] %v2159_v3  ;;  %v2312_v3 = vrot.slane %v2169_v9, 2 }
 0x300   :  { %3032 = vst [vmem:[#allocation1 + $0x2] ss:$9 sm:$0xff] %v2276_v31  ;;  %v2314_v31 = vrot.slane %v2169_v9, 4 }
 0x301   :  { %3033 = vst [vmem:[#allocation1 + $0x3] ss:$9 sm:$0xff] %v2277_v20  ;;  %v2315_v20 = vrot.slane %v2169_v9, 5 }
 0x302   :  { %3034 = vst [vmem:[#allocation1 + $0x4] ss:$9 sm:$0xff] %v2278_v8 }
 0x303   :  { %3035 = vst [vmem:[#allocation1 + $0x5] ss:$9 sm:$0xff] %v2279_v33  ;;  %v2316_v33 = vrot.slane %v2169_v9, 6 }
 0x304   :  { %3036 = vst [vmem:[#allocation1 + $0x6] ss:$9 sm:$0xff] %v2280_v60  ;;  %v2317_v60 = vrot.slane %v2169_v9, 7 }
 0x305   :  { %3037 = vst [vmem:[#allocation1 + $0x7] ss:$9 sm:$0xff] %v2281_v15  ;;  %v2170_v15 = vld [vmem:[#allocation2 + $0xf8] sm:$0x1] }
 0x30c   :  { %v11030_v14 = vld [vmem:[#allocation1] sm:$0xff] }
 0x30d   :  { %3039 = vst [vmem:[#allocation1] ss:$9 sm:$0xff] %v2282_v57 }
 0x30e   :  { %3040 = vst [vmem:[#allocation1 + $0x1] ss:$9 sm:$0xff] %v2160_v49 }
 0x30f   :  { %3041 = vst [vmem:[#allocation1 + $0x2] ss:$9 sm:$0xff] %v2161_v12  ;;  %v2171_v12 = vld [vmem:[#allocation2 + $0x100] sm:$0xff] }
 0x310   :  { %3042 = vst [vmem:[#allocation1 + $0x3] ss:$9 sm:$0xff] %v2283_v61  ;;  %v2318_v57 = vrot.slane %v2171_v12, 1  ;;  %v2319_v49 = vrot.slane %v2171_v12, 2  ;;  %v2320_v61 = vrot.slane %v2171_v12, 3 }
 0x311   :  { %3043 = vst [vmem:[#allocation1 + $0x4] ss:$9 sm:$0xff] %v2284_v1  ;;  %v2321_v1 = vrot.slane %v2171_v12, 4 }
 0x312   :  { %3044 = vst [vmem:[#allocation1 + $0x5] ss:$9 sm:$0xff] %v2285_v5 }
 0x313   :  { %3045 = vst [vmem:[#allocation1 + $0x6] ss:$9 sm:$0xff] %v2286_v10  ;;  %v2322_v10 = vrot.slane %v2171_v12, 5 }
 0x314   :  { %3046 = vst [vmem:[#allocation1 + $0x7] ss:$9 sm:$0xff] %v2287_v21  ;;  %v2323_v21 = vrot.slane %v2171_v12, 6 }
 0x31b   :  { %v11032_v56 = vld [vmem:[#allocation1] sm:$0xff] }
 0x31c   :  { %3048 = vst [vmem:[#allocation1] ss:$9 sm:$0xff] %v2288_v43  ;;  %v2324_v43 = vrot.slane %v2171_v12, 7 }
 0x31d   :  { %3049 = vst [vmem:[#allocation1 + $0x1] ss:$9 sm:$0xff] %v2289_v30  ;;  %v2173_v30 = vld [vmem:[#allocation2 + $0x110] sm:$0xff] }
 0x31e   :  { %3050 = vst [vmem:[#allocation1 + $0x2] ss:$9 sm:$0xff] %v2162_v58  ;;  %v2325_v58 = vrot.slane %v2173_v30, 1 }
 0x31f   :  { %3051 = vst [vmem:[#allocation1 + $0x3] ss:$9 sm:$0xff] %v2163_v22  ;;  %v2172_v22 = vld [vmem:[#allocation2 + $0x108] sm:$0x1] }
 0x320   :  { %3052 = vst [vmem:[#allocation1 + $0x4] ss:$9 sm:$0xff] %v2290_v18  ;;  %v2326_v18 = vrot.slane %v2173_v30, 2 }
 0x321   :  { %3053 = vst [vmem:[#allocation1 + $0x5] ss:$9 sm:$0xff] %v2291_v32  ;;  %v2327_v32 = vrot.slane %v2173_v30, 3 }
 0x322   :  { %3054 = vst [vmem:[#allocation1 + $0x6] ss:$9 sm:$0xff] %v2292_v44 }
 0x323   :  { %3055 = vst [vmem:[#allocation1 + $0x7] ss:$9 sm:$0xff] %v2293_v36  ;;  %v2328_v36 = vrot.slane %v2173_v30, 4 }
 0x32a   :  { %v11034_v17 = vld [vmem:[#allocation1] sm:$0xff] }
 0x32b   :  { %3057 = vst [vmem:[#allocation1] ss:$9 sm:$0xff] %v2294_v45  ;;  %v2329_v45 = vrot.slane %v2173_v30, 5 }
 0x32c   :  { %3058 = vst [vmem:[#allocation1 + $0x1] ss:$9 sm:$0xff] %v2295_v54  ;;  %v2330_v54 = vrot.slane %v2173_v30, 6 }
 0x32d   :  { %3059 = vst [vmem:[#allocation1 + $0x2] ss:$9 sm:$0xff] %v2296_v4  ;;  %v2175_v4 = vld [vmem:[#allocation2 + $0x120] sm:$0xff] }
 0x32e   :  { %3060 = vst [vmem:[#allocation1 + $0x3] ss:$9 sm:$0xff] %v2164_v39  ;;  %v2174_v39 = vld [vmem:[#allocation2 + $0x118] sm:$0x1] }
 0x32f   :  { %3061 = vst [vmem:[#allocation1 + $0x4] ss:$9 sm:$0xff] %v2165_v48  ;;  %v2331_v48 = vrot.slane %v2173_v30, 7 }
 0x330   :  { %3062 = vst [vmem:[#allocation1 + $0x5] ss:$9 sm:$0xff] %v2297_v34  ;;  %v2332_v34 = vrot.slane %v2175_v4, 1 }
 0x331   :  { %3063 = vst [vmem:[#allocation1 + $0x6] ss:$9 sm:$0xff] %v2298_v25  ;;  %v2333_v25 = vrot.slane %v2175_v4, 2 }
 0x332   :  { %3064 = vst [vmem:[#allocation1 + $0x7] ss:$9 sm:$0xff] %v2299_v52 }
 0x339   :  { %v11036_v7 = vld [vmem:[#allocation1] sm:$0xff] }
 0x33a   :  { %3066 = vst [vmem:[#allocation1] ss:$9 sm:$0xff] %v2300_v51  ;;  %v2334_v51 = vrot.slane %v2175_v4, 3 }
 0x33b   :  { %3067 = vst [vmem:[#allocation1 + $0x1] ss:$9 sm:$0xff] %v2301_v2  ;;  %v2335_v2 = vrot.slane %v2175_v4, 4 }
 0x33c   :  { %3068 = vst [vmem:[#allocation1 + $0x2] ss:$9 sm:$0xff] %v2302_v26  ;;  %v2336_v26 = vrot.slane %v2175_v4, 5 }
 0x33d   :  { %3069 = vst [vmem:[#allocation1 + $0x3] ss:$9 sm:$0xff] %v2303_v19  ;;  %v2338_v19 = vrot.slane %v2175_v4, 7 }
 0x33e   :  { %3070 = vst [vmem:[#allocation1 + $0x4] ss:$9 sm:$0xff] %v2166_v42  ;;  %v2176_v42 = vld [vmem:[#allocation2 + $0x128] sm:$0x1] }
 0x33f   :  { %3071 = vst [vmem:[#allocation1 + $0x5] ss:$9 sm:$0xff] %v2167_v11  ;;  %v2337_v11 = vrot.slane %v2175_v4, 6 }
 0x340   :  { %3072 = vst [vmem:[#allocation1 + $0x6] ss:$9 sm:$0xff] %v2304_v55 }
 0x341   :  { %3073 = vst [vmem:[#allocation1 + $0x7] ss:$9 sm:$0xff] %v2305_v59  ;;  %v2339_v59 = vld [vmem:[#allocation2 + $0x1] sm:$0xff] }
 0x348   :  { %v11038_v40 = vld [vmem:[#allocation1] sm:$0xff] }
 0x349   :  { %3075 = vst [vmem:[#allocation1] ss:$9 sm:$0xff] %v2306_v41  ;;  %v2411_v41 = vrot.slane %v2339_v59, 1 }
 0x34a   :  { %3076 = vst [vmem:[#allocation1 + $0x1] ss:$9 sm:$0xff] %v2307_v46  ;;  %v2412_v46 = vrot.slane %v2339_v59, 2 }
 0x34b   :  { %3077 = vst [vmem:[#allocation1 + $0x2] ss:$9 sm:$0xff] %v2308_v23  ;;  %v2413_v23 = vrot.slane %v2339_v59, 3 }
 0x34c   :  { %3078 = vst [vmem:[#allocation1 + $0x3] ss:$9 sm:$0xff] %v2309_v6 }
 0x34d   :  { %3079 = vst [vmem:[#allocation1 + $0x4] ss:$9 sm:$0xff] %v2310_v53  ;;  %v2415_v53 = vrot.slane %v2339_v59, 5 }
 0x34e   :  { %3080 = vst [vmem:[#allocation1 + $0x5] ss:$9 sm:$0xff] %v2168_v37  ;;  %v2416_v37 = vrot.slane %v2339_v59, 6 }
 0x34f   :  { %3081 = vst [vmem:[#allocation1 + $0x6] ss:$9 sm:$0xff] %v2169_v9  ;;  %v2414_v9 = vrot.slane %v2339_v59, 4 }
 0x350   :  { %3082 = vst [vmem:[#allocation1 + $0x7] ss:$9 sm:$0xff] %v2311_v29  ;;  %v2417_v29 = vrot.slane %v2339_v59, 7 }
 0x357   :  { %v11040_v8 = vld [vmem:[#allocation1] sm:$0xff] }
 0x358   :  { %3084 = vst [vmem:[#allocation1] ss:$9 sm:$0xff] %v2312_v3  ;;  %v2341_v3 = vld [vmem:[#allocation2 + $0x11] sm:$0xff] }
 0x359   :  { %3085 = vst [vmem:[#allocation1 + $0x1] ss:$9 sm:$0xff] %v2313_v24  ;;  %v2340_v24 = vld [vmem:[#allocation2 + $0x9] sm:$0x1] }
 0x35a   :  { %3086 = vst [vmem:[#allocation1 + $0x2] ss:$9 sm:$0xff] %v2314_v31  ;;  %v2418_v31 = vrot.slane %v2341_v3, 1 }
 0x35b   :  { %3087 = vst [vmem:[#allocation1 + $0x3] ss:$9 sm:$0xff] %v2315_v20 }
 0x35c   :  { %3088 = vst [vmem:[#allocation1 + $0x4] ss:$9 sm:$0xff] %v2316_v33  ;;  %v2419_v33 = vrot.slane %v2341_v3, 2 }
 0x35d   :  { %3089 = vst [vmem:[#allocation1 + $0x5] ss:$9 sm:$0xff] %v2317_v60  ;;  %v2420_v60 = vrot.slane %v2341_v3, 3 }
 0x35e   :  { %3090 = vst [vmem:[#allocation1 + $0x6] ss:$9 sm:$0xff] %v2170_v15  ;;  %v2421_v15 = vrot.slane %v2341_v3, 4 }
 0x35f   :  { %3091 = vst [vmem:[#allocation1 + $0x7] ss:$9 sm:$0xff] %v2171_v12  ;;  %v2422_v12 = vrot.slane %v2341_v3, 5 }
 0x366   :  { %v11042_v5 = vld [vmem:[#allocation1] sm:$0xff] }
 0x367   :  { %3093 = vst [vmem:[#allocation1] ss:$9 sm:$0xff] %v2318_v57  ;;  %v2423_v57 = vrot.slane %v2341_v3, 6 }
 0x368   :  { %3094 = vst [vmem:[#allocation1 + $0x1] ss:$9 sm:$0xff] %v2319_v49  ;;  %v2343_v49 = vld [vmem:[#allocation2 + $0x21] sm:$0xff] }
 0x369   :  { %3095 = vst [vmem:[#allocation1 + $0x2] ss:$9 sm:$0xff] %v2320_v61  ;;  %v2424_v61 = vrot.slane %v2341_v3, 7 }
 0x36a   :  { %3096 = vst [vmem:[#allocation1 + $0x3] ss:$9 sm:$0xff] %v2321_v1  ;;  %v2342_v1 = vld [vmem:[#allocation2 + $0x19] sm:$0x1] }
 0x36b   :  { %3097 = vst [vmem:[#allocation1 + $0x4] ss:$9 sm:$0xff] %v2322_v10  ;;  %v2425_v10 = vrot.slane %v2343_v49, 1 }
 0x36c   :  { %3098 = vst [vmem:[#allocation1 + $0x5] ss:$9 sm:$0xff] %v2323_v21 }
 0x36d   :  { %3099 = vst [vmem:[#allocation1 + $0x6] ss:$9 sm:$0xff] %v2324_v43  ;;  %v2426_v43 = vrot.slane %v2343_v49, 2 }
 0x36e   :  { %3100 = vst [vmem:[#allocation1 + $0x7] ss:$9 sm:$0xff] %v2172_v22  ;;  %v2427_v22 = vrot.slane %v2343_v49, 3 }
 0x375   :  { %v11044_v44 = vld [vmem:[#allocation1] sm:$0xff] }
 0x376   :  { %3102 = vst [vmem:[#allocation1] ss:$9 sm:$0xff] %v2173_v30  ;;  %v2428_v30 = vrot.slane %v2343_v49, 4 }
 0x377   :  { %3103 = vst [vmem:[#allocation1 + $0x1] ss:$9 sm:$0xff] %v2325_v58  ;;  %v2429_v58 = vrot.slane %v2343_v49, 5 }
 0x378   :  { %3104 = vst [vmem:[#allocation1 + $0x2] ss:$9 sm:$0xff] %v2326_v18  ;;  %v2430_v18 = vrot.slane %v2343_v49, 6 }
 0x379   :  { %3105 = vst [vmem:[#allocation1 + $0x3] ss:$9 sm:$0xff] %v2327_v32  ;;  %v2345_v32 = vld [vmem:[#allocation2 + $0x31] sm:$0xff] }
 0x37a   :  { %3106 = vst [vmem:[#allocation1 + $0x4] ss:$9 sm:$0xff] %v2328_v36  ;;  %v2431_v36 = vrot.slane %v2343_v49, 7 }
 0x37b   :  { %3107 = vst [vmem:[#allocation1 + $0x5] ss:$9 sm:$0xff] %v2329_v45 }
 0x37c   :  { %3108 = vst [vmem:[#allocation1 + $0x6] ss:$9 sm:$0xff] %v2330_v54  ;;  %v2344_v54 = vld [vmem:[#allocation2 + $0x29] sm:$0x1] }
 0x37d   :  { %3109 = vst [vmem:[#allocation1 + $0x7] ss:$9 sm:$0xff] %v2331_v48  ;;  %v2432_v48 = vrot.slane %v2345_v32, 1 }
 0x384   :  { %v11046_v52 = vld [vmem:[#allocation1] sm:$0xff] }
 0x385   :  { %3111 = vst [vmem:[#allocation1] ss:$9 sm:$0xff] %v2174_v39  ;;  %v2434_v39 = vrot.slane %v2345_v32, 3 }
 0x386   :  { %3112 = vst [vmem:[#allocation1 + $0x1] ss:$9 sm:$0xff] %v2175_v4  ;;  %v2433_v4 = vrot.slane %v2345_v32, 2 }
 0x387   :  { %3113 = vst [vmem:[#allocation1 + $0x2] ss:$9 sm:$0xff] %v2332_v34  ;;  %v2435_v34 = vrot.slane %v2345_v32, 4 }
 0x388   :  { %3114 = vst [vmem:[#allocation1 + $0x3] ss:$9 sm:$0xff] %v2333_v25  ;;  %v2436_v25 = vrot.slane %v2345_v32, 5 }
 0x389   :  { %3115 = vst [vmem:[#allocation1 + $0x4] ss:$9 sm:$0xff] %v2334_v51  ;;  %v2437_v51 = vrot.slane %v2345_v32, 6 }
 0x38a   :  { %3116 = vst [vmem:[#allocation1 + $0x5] ss:$9 sm:$0xff] %v2335_v2  ;;  %v2347_v2 = vld [vmem:[#allocation2 + $0x41] sm:$0xff] }
 0x38b   :  { %3117 = vst [vmem:[#allocation1 + $0x6] ss:$9 sm:$0xff] %v2336_v26  ;;  %v2438_v26 = vrot.slane %v2345_v32, 7 }
 0x38c   :  { %3118 = vst [vmem:[#allocation1 + $0x7] ss:$9 sm:$0xff] %v2337_v11 }
 0x393   :  { %v11048_v55 = vld [vmem:[#allocation1] sm:$0xff] }
 0x394   :  { %3120 = vst [vmem:[#allocation1] ss:$9 sm:$0xff] %v2338_v19  ;;  %v2346_v19 = vld [vmem:[#allocation2 + $0x39] sm:$0x1] }
 0x395   :  { %3121 = vst [vmem:[#allocation1 + $0x1] ss:$9 sm:$0xff] %v2176_v42  ;;  %v2439_v42 = vrot.slane %v2347_v2, 1 }
 0x39c   :  { %v11050_v6 = vld [vmem:[#allocation1] sm:$0xff] }
 0x39d   :  { %3144 = vst [vmem:[#allocation1] ss:$9 sm:$0xff] %v2339_v59  ;;  %v2440_v59 = vrot.slane %v2347_v2, 2 }
 0x39e   :  { %3146 = vst [vmem:[#allocation1 + $0x1] ss:$9 sm:$0xff] %v2411_v41  ;;  %v2441_v41 = vrot.slane %v2347_v2, 3 }
 0x39f   :  { %3148 = vst [vmem:[#allocation1 + $0x2] ss:$9 sm:$0xff] %v2412_v46  ;;  %v2442_v46 = vrot.slane %v2347_v2, 4 }
 0x3a0   :  { %3150 = vst [vmem:[#allocation1 + $0x3] ss:$9 sm:$0xff] %v2413_v23  ;;  %v2443_v23 = vrot.slane %v2347_v2, 5 }
 0x3a1   :  { %3152 = vst [vmem:[#allocation1 + $0x4] ss:$9 sm:$0xff] %v2414_v9  ;;  %v2444_v9 = vrot.slane %v2347_v2, 6 }
 0x3a2   :  { %3154 = vst [vmem:[#allocation1 + $0x5] ss:$9 sm:$0xff] %v2415_v53 }
 0x3a3   :  { %3156 = vst [vmem:[#allocation1 + $0x6] ss:$9 sm:$0xff] %v2416_v37  ;;  %v2349_v37 = vld [vmem:[#allocation2 + $0x51] sm:$0xff] }
 0x3a4   :  { %3158 = vst [vmem:[#allocation1 + $0x7] ss:$9 sm:$0xff] %v2417_v29  ;;  %v2445_v29 = vrot.slane %v2347_v2, 7 }
 0x3ab   :  { %v3159_v20 = vld [vmem:[#allocation1] sm:$0xff] }
 0x3ac   :  { %3334 = vrot.lane.b32.xlu0 %v3159_v20, %s6969_s0  ;;  %3160 = vst [vmem:[#allocation1] ss:$9 sm:$0xff] %v2340_v24  ;;  %v2446_v24 = vrot.slane %v2349_v37, 1  ;;  %v2448_v20 = vrot.slane %v2349_v37, 3 }
 0x3ad   :  { %3161 = vst [vmem:[#allocation1 + $0x1] ss:$9 sm:$0xff] %v2341_v3  ;;  %v2348_v3 = vld [vmem:[#allocation2 + $0x49] sm:$0x1] }
 0x3ae   :  { %3162 = vst [vmem:[#allocation1 + $0x2] ss:$9 sm:$0xff] %v2418_v31  ;;  %v2447_v31 = vrot.slane %v2349_v37, 2 }
 0x3af   :  { %3163 = vst [vmem:[#allocation1 + $0x3] ss:$9 sm:$0xff] %v2419_v33  ;;  %v2449_v33 = vrot.slane %v2349_v37, 4 }
 0x3b0   :  { %3164 = vst [vmem:[#allocation1 + $0x4] ss:$9 sm:$0xff] %v2420_v60  ;;  %v2450_v60 = vrot.slane %v2349_v37, 5 }
 0x3b1   :  { %3165 = vst [vmem:[#allocation1 + $0x5] ss:$9 sm:$0xff] %v2421_v15  ;;  %v2451_v15 = vrot.slane %v2349_v37, 6 }
 0x3b2   :  { %3166 = vst [vmem:[#allocation1 + $0x6] ss:$9 sm:$0xff] %v2422_v12 }
 0x3b3   :  { %3167 = vst [vmem:[#allocation1 + $0x7] ss:$9 sm:$0xff] %v2423_v57  ;;  %v2351_v57 = vld [vmem:[#allocation2 + $0x61] sm:$0xff] }
 0x3ba   :  { %v3168_v21 = vld [vmem:[#allocation1] sm:$0xff] }
 0x3bb   :  { %3169 = vst [vmem:[#allocation1] ss:$9 sm:$0xff] %v2424_v61  ;;  %3336 = vrot.lane.b32.xlu1 %v3168_v21, %s6969_s0  ;;  %v2350_v61 = vld [vmem:[#allocation2 + $0x59] sm:$0x1]  ;;  %v2455_v21 = vrot.slane %v2351_v57, 3 }
 0x3bc   :  { %3170 = vst [vmem:[#allocation1 + $0x1] ss:$9 sm:$0xff] %v2342_v1  ;;  %v2453_v1 = vrot.slane %v2351_v57, 1 }
 0x3bd   :  { %3171 = vst [vmem:[#allocation1 + $0x2] ss:$9 sm:$0xff] %v2343_v49  ;;  %v2452_v49 = vrot.slane %v2349_v37, 7 }
 0x3be   :  { %3172 = vst [vmem:[#allocation1 + $0x3] ss:$9 sm:$0xff] %v2425_v10  ;;  %v2454_v10 = vrot.slane %v2351_v57, 2 }
 0x3bf   :  { %3173 = vst [vmem:[#allocation1 + $0x4] ss:$9 sm:$0xff] %v2426_v43  ;;  %v2456_v43 = vrot.slane %v2351_v57, 4 }
 0x3c0   :  { %3174 = vst [vmem:[#allocation1 + $0x5] ss:$9 sm:$0xff] %v2427_v22  ;;  %v2457_v22 = vrot.slane %v2351_v57, 5 }
 0x3c1   :  { %3175 = vst [vmem:[#allocation1 + $0x6] ss:$9 sm:$0xff] %v2428_v30 }
 0x3c2   :  { %3176 = vst [vmem:[#allocation1 + $0x7] ss:$9 sm:$0xff] %v2429_v58  ;;  %v2458_v58 = vrot.slane %v2351_v57, 6 }
 0x3c9   :  { %v3177_v45 = vld [vmem:[#allocation1] sm:$0xff] }
 0x3ca   :  { %3338 = vrot.lane.b32.xlu0 %v3177_v45, %s6969_s0  ;;  %3178 = vst [vmem:[#allocation1] ss:$9 sm:$0xff] %v2430_v18  ;;  %v2459_v18 = vrot.slane %v2351_v57, 7 }
 0x3cb   :  { %3179 = vst [vmem:[#allocation1 + $0x1] ss:$9 sm:$0xff] %v2431_v36  ;;  %v2353_v36 = vld [vmem:[#allocation2 + $0x71] sm:$0xff] }
 0x3cc   :  { %3180 = vst [vmem:[#allocation1 + $0x2] ss:$9 sm:$0xff] %v2344_v54  ;;  %v2460_v45 = vrot.slane %v2353_v36, 1  ;;  %v2461_v54 = vrot.slane %v2353_v36, 2 }
 0x3cd   :  { %3181 = vst [vmem:[#allocation1 + $0x3] ss:$9 sm:$0xff] %v2345_v32  ;;  %v2352_v32 = vld [vmem:[#allocation2 + $0x69] sm:$0x1] }
 0x3ce   :  { %3182 = vst [vmem:[#allocation1 + $0x4] ss:$9 sm:$0xff] %v2432_v48  ;;  %v2462_v48 = vrot.slane %v2353_v36, 3 }
 0x3cf   :  { %3183 = vst [vmem:[#allocation1 + $0x5] ss:$9 sm:$0xff] %v2433_v4  ;;  %v2463_v4 = vrot.slane %v2353_v36, 4 }
 0x3d0   :  { %3184 = vst [vmem:[#allocation1 + $0x6] ss:$9 sm:$0xff] %v2434_v39 }
 0x3d1   :  { %3185 = vst [vmem:[#allocation1 + $0x7] ss:$9 sm:$0xff] %v2435_v34  ;;  %v2464_v34 = vrot.slane %v2353_v36, 5 }
 0x3d8   :  { %v3186_v11 = vld [vmem:[#allocation1] sm:$0xff] }
 0x3d9   :  { %3340 = vrot.lane.b32.xlu0 %v3186_v11, %s6969_s0  ;;  %3187 = vst [vmem:[#allocation1] ss:$9 sm:$0xff] %v2436_v25  ;;  %v2465_v25 = vrot.slane %v2353_v36, 6 }
 0x3da   :  { %3188 = vst [vmem:[#allocation1 + $0x1] ss:$9 sm:$0xff] %v2437_v51  ;;  %v2466_v51 = vrot.slane %v2353_v36, 7 }
 0x3db   :  { %3189 = vst [vmem:[#allocation1 + $0x2] ss:$9 sm:$0xff] %v2438_v26  ;;  %v2355_v26 = vld [vmem:[#allocation2 + $0x81] sm:$0xff] }
 0x3dc   :  { %3190 = vst [vmem:[#allocation1 + $0x3] ss:$9 sm:$0xff] %v2346_v19  ;;  %v2467_v11 = vrot.slane %v2355_v26, 1  ;;  %v2468_v19 = vrot.slane %v2355_v26, 2 }
 0x3dd   :  { %3191 = vst [vmem:[#allocation1 + $0x4] ss:$9 sm:$0xff] %v2347_v2  ;;  %v2354_v2 = vld [vmem:[#allocation2 + $0x79] sm:$0x1] }
 0x3de   :  { %3192 = vst [vmem:[#allocation1 + $0x5] ss:$9 sm:$0xff] %v2439_v42  ;;  %v2469_v42 = vrot.slane %v2355_v26, 3 }
 0x3df   :  { %3193 = vst [vmem:[#allocation1 + $0x6] ss:$9 sm:$0xff] %v2440_v59 }
 0x3e0   :  { %3194 = vst [vmem:[#allocation1 + $0x7] ss:$9 sm:$0xff] %v2441_v41  ;;  %v2470_v41 = vrot.slane %v2355_v26, 4 }
 0x3e7   :  { %v3195_v53 = vld [vmem:[#allocation1] sm:$0xff] }
 0x3e8   :  { %3342 = vrot.lane.b32.xlu0 %v3195_v53, %s6969_s0  ;;  %3196 = vst [vmem:[#allocation1] ss:$9 sm:$0xff] %v2442_v46  ;;  %v2471_v46 = vrot.slane %v2355_v26, 5  ;;  %v2357_v53 = vld [vmem:[#allocation2 + $0xa1] sm:$0xff] }
 0x3e9   :  { %3197 = vst [vmem:[#allocation1 + $0x1] ss:$9 sm:$0xff] %v2443_v23  ;;  %v2472_v23 = vrot.slane %v2355_v26, 6 }
 0x3ea   :  { %3198 = vst [vmem:[#allocation1 + $0x2] ss:$9 sm:$0xff] %v2444_v9  ;;  %v2473_v9 = vrot.slane %v2355_v26, 7 }
 0x3eb   :  { %3199 = vst [vmem:[#allocation1 + $0x3] ss:$9 sm:$0xff] %v2445_v29  ;;  %v2474_v29 = vrot.slane %v2357_v53, 1 }
 0x3ec   :  { %3200 = vst [vmem:[#allocation1 + $0x4] ss:$9 sm:$0xff] %v2348_v3  ;;  %v2475_v3 = vrot.slane %v2357_v53, 2 }
 0x3ed   :  { %3201 = vst [vmem:[#allocation1 + $0x5] ss:$9 sm:$0xff] %v2349_v37  ;;  %v2356_v37 = vld [vmem:[#allocation2 + $0x89] sm:$0x1] }
 0x3ee   :  { %3202 = vst [vmem:[#allocation1 + $0x6] ss:$9 sm:$0xff] %v2446_v24 }
 0x3ef   :  { %3203 = vst [vmem:[#allocation1 + $0x7] ss:$9 sm:$0xff] %v2447_v31  ;;  %v2476_v31 = vrot.slane %v2357_v53, 3 }
 0x3f6   :  { %v11057_v12 = vld [vmem:[#allocation1] sm:$0xff] }
 0x3f7   :  { %3205 = vst [vmem:[#allocation1] ss:$9 sm:$0xff] %v2448_v20  ;;  %v2477_v20 = vrot.slane %v2357_v53, 4 }
 0x3f8   :  { %3206 = vst [vmem:[#allocation1 + $0x1] ss:$9 sm:$0xff] %v2449_v33  ;;  %v2478_v33 = vrot.slane %v2357_v53, 5 }
 0x3f9   :  { %3207 = vst [vmem:[#allocation1 + $0x2] ss:$9 sm:$0xff] %v2450_v60  ;;  %v2479_v60 = vrot.slane %v2357_v53, 6 }
 0x3fa   :  { %3208 = vst [vmem:[#allocation1 + $0x3] ss:$9 sm:$0xff] %v2451_v15  ;;  %v2359_v15 = vld [vmem:[#allocation2 + $0xb1] sm:$0xff] }
 0x3fb   :  { %3209 = vst [vmem:[#allocation1 + $0x4] ss:$9 sm:$0xff] %v2452_v49  ;;  %v2358_v49 = vld [vmem:[#allocation2 + $0xa9] sm:$0x1] }
 0x3fc   :  { %3210 = vst [vmem:[#allocation1 + $0x5] ss:$9 sm:$0xff] %v2350_v61  ;;  %v2481_v61 = vrot.slane %v2359_v15, 1 }
 0x3fd   :  { %3211 = vst [vmem:[#allocation1 + $0x6] ss:$9 sm:$0xff] %v2351_v57  ;;  %v2480_v57 = vrot.slane %v2357_v53, 7 }
 0x3fe   :  { %3212 = vst [vmem:[#allocation1 + $0x7] ss:$9 sm:$0xff] %v2453_v1 }
 0x405   :  { %v11059_v30 = vld [vmem:[#allocation1] sm:$0xff] }
 0x406   :  { %3214 = vst [vmem:[#allocation1] ss:$9 sm:$0xff] %v2454_v10  ;;  %v2482_v10 = vrot.slane %v2359_v15, 2 }
 0x407   :  { %3215 = vst [vmem:[#allocation1 + $0x1] ss:$9 sm:$0xff] %v2455_v21  ;;  %v2483_v21 = vrot.slane %v2359_v15, 3 }
 0x408   :  { %3216 = vst [vmem:[#allocation1 + $0x2] ss:$9 sm:$0xff] %v2456_v43  ;;  %v2484_v43 = vrot.slane %v2359_v15, 4 }
 0x409   :  { %3217 = vst [vmem:[#allocation1 + $0x3] ss:$9 sm:$0xff] %v2457_v22  ;;  %v2485_v22 = vrot.slane %v2359_v15, 5 }
 0x40a   :  { %3218 = vst [vmem:[#allocation1 + $0x4] ss:$9 sm:$0xff] %v2458_v58  ;;  %v2486_v58 = vrot.slane %v2359_v15, 6 }
 0x40b   :  { %3219 = vst [vmem:[#allocation1 + $0x5] ss:$9 sm:$0xff] %v2459_v18  ;;  %v2361_v18 = vld [vmem:[#allocation2 + $0xc1] sm:$0xff] }
 0x40c   :  { %3220 = vst [vmem:[#allocation1 + $0x6] ss:$9 sm:$0xff] %v2352_v32  ;;  %v2487_v32 = vrot.slane %v2359_v15, 7 }
 0x40d   :  { %3221 = vst [vmem:[#allocation1 + $0x7] ss:$9 sm:$0xff] %v2353_v36  ;;  %v2360_v36 = vld [vmem:[#allocation2 + $0xb9] sm:$0x1] }
 0x414   :  { %v11061_v39 = vld [vmem:[#allocation1] sm:$0xff] }
 0x415   :  { %3223 = vst [vmem:[#allocation1] ss:$9 sm:$0xff] %v2460_v45 }
 0x416   :  { %3224 = vst [vmem:[#allocation1 + $0x1] ss:$9 sm:$0xff] %v2461_v54  ;;  %v2488_v54 = vrot.slane %v2361_v18, 1 }
 0x417   :  { %3225 = vst [vmem:[#allocation1 + $0x2] ss:$9 sm:$0xff] %v2462_v48  ;;  %v2489_v48 = vrot.slane %v2361_v18, 2 }
 0x418   :  { %3226 = vst [vmem:[#allocation1 + $0x3] ss:$9 sm:$0xff] %v2463_v4  ;;  %v2490_v4 = vrot.slane %v2361_v18, 3 }
 0x419   :  { %3227 = vst [vmem:[#allocation1 + $0x4] ss:$9 sm:$0xff] %v2464_v34  ;;  %v2491_v34 = vrot.slane %v2361_v18, 4 }
 0x41a   :  { %3228 = vst [vmem:[#allocation1 + $0x5] ss:$9 sm:$0xff] %v2465_v25  ;;  %v2492_v25 = vrot.slane %v2361_v18, 5 }
 0x41b   :  { %3229 = vst [vmem:[#allocation1 + $0x6] ss:$9 sm:$0xff] %v2466_v51  ;;  %v2493_v51 = vrot.slane %v2361_v18, 6 }
 0x41c   :  { %3230 = vst [vmem:[#allocation1 + $0x7] ss:$9 sm:$0xff] %v2354_v2  ;;  %v2363_v2 = vld [vmem:[#allocation2 + $0xd1] sm:$0xff] }
 0x423   :  { %v11063_v59 = vld [vmem:[#allocation1] sm:$0xff] }
 0x424   :  { %3232 = vst [vmem:[#allocation1] ss:$9 sm:$0xff] %v2355_v26  ;;  %v2494_v26 = vrot.slane %v2361_v18, 7 }
 0x425   :  { %3233 = vst [vmem:[#allocation1 + $0x1] ss:$9 sm:$0xff] %v2467_v11 }
 0x426   :  { %3234 = vst [vmem:[#allocation1 + $0x2] ss:$9 sm:$0xff] %v2468_v19  ;;  %v2362_v19 = vld [vmem:[#allocation2 + $0xc9] sm:$0x1] }
 0x427   :  { %3235 = vst [vmem:[#allocation1 + $0x3] ss:$9 sm:$0xff] %v2469_v42  ;;  %v2495_v42 = vrot.slane %v2363_v2, 1 }
 0x428   :  { %3236 = vst [vmem:[#allocation1 + $0x4] ss:$9 sm:$0xff] %v2470_v41  ;;  %v2496_v41 = vrot.slane %v2363_v2, 2 }
 0x429   :  { %3237 = vst [vmem:[#allocation1 + $0x5] ss:$9 sm:$0xff] %v2471_v46  ;;  %v2497_v46 = vrot.slane %v2363_v2, 3 }
 0x42a   :  { %3238 = vst [vmem:[#allocation1 + $0x6] ss:$9 sm:$0xff] %v2472_v23  ;;  %v2498_v23 = vrot.slane %v2363_v2, 4 }
 0x42b   :  { %3239 = vst [vmem:[#allocation1 + $0x7] ss:$9 sm:$0xff] %v2473_v9  ;;  %v2499_v9 = vrot.slane %v2363_v2, 5 }
 0x432   :  { %v11065_v24 = vld [vmem:[#allocation1] sm:$0xff] }
 0x433   :  { %3241 = vst [vmem:[#allocation1] ss:$9 sm:$0xff] %v2356_v37  ;;  %v2365_v37 = vld [vmem:[#allocation2 + $0xe1] sm:$0xff] }
 0x434   :  { %3242 = vst [vmem:[#allocation1 + $0x1] ss:$9 sm:$0xff] %v2357_v53  ;;  %v2500_v53 = vrot.slane %v2363_v2, 6 }
 0x435   :  { %3243 = vst [vmem:[#allocation1 + $0x2] ss:$9 sm:$0xff] %v2474_v29  ;;  %v2501_v29 = vrot.slane %v2363_v2, 7 }
 0x436   :  { %3244 = vst [vmem:[#allocation1 + $0x3] ss:$9 sm:$0xff] %v2475_v3 }
 0x437   :  { %3245 = vst [vmem:[#allocation1 + $0x4] ss:$9 sm:$0xff] %v2476_v31  ;;  %v2364_v31 = vld [vmem:[#allocation2 + $0xd9] sm:$0x1] }
 0x438   :  { %3246 = vst [vmem:[#allocation1 + $0x5] ss:$9 sm:$0xff] %v2477_v20  ;;  %v2502_v20 = vrot.slane %v2365_v37, 1 }
 0x439   :  { %3247 = vst [vmem:[#allocation1 + $0x6] ss:$9 sm:$0xff] %v2478_v33  ;;  %v2503_v33 = vrot.slane %v2365_v37, 2 }
 0x43a   :  { %3248 = vst [vmem:[#allocation1 + $0x7] ss:$9 sm:$0xff] %v2479_v60  ;;  %v2504_v60 = vrot.slane %v2365_v37, 3 }
 0x441   :  { %v11067_v1 = vld [vmem:[#allocation1] sm:$0xff] }
 0x442   :  { %3250 = vst [vmem:[#allocation1] ss:$9 sm:$0xff] %v2480_v57  ;;  %v2506_v57 = vrot.slane %v2365_v37, 5 }
 0x443   :  { %3251 = vst [vmem:[#allocation1 + $0x1] ss:$9 sm:$0xff] %v2358_v49  ;;  %v2507_v49 = vrot.slane %v2365_v37, 6 }
 0x444   :  { %3252 = vst [vmem:[#allocation1 + $0x2] ss:$9 sm:$0xff] %v2359_v15  ;;  %v2505_v15 = vrot.slane %v2365_v37, 4 }
 0x445   :  { %3253 = vst [vmem:[#allocation1 + $0x3] ss:$9 sm:$0xff] %v2481_v61 }
 0x446   :  { %3254 = vst [vmem:[#allocation1 + $0x4] ss:$9 sm:$0xff] %v2482_v10  ;;  %v2367_v10 = vld [vmem:[#allocation2 + $0xf1] sm:$0xff] }
 0x447   :  { %3255 = vst [vmem:[#allocation1 + $0x5] ss:$9 sm:$0xff] %v2483_v21  ;;  %v2508_v21 = vrot.slane %v2365_v37, 7 }
 0x448   :  { %3256 = vst [vmem:[#allocation1 + $0x6] ss:$9 sm:$0xff] %v2484_v43  ;;  %v2366_v43 = vld [vmem:[#allocation2 + $0xe9] sm:$0x1] }
 0x449   :  { %3257 = vst [vmem:[#allocation1 + $0x7] ss:$9 sm:$0xff] %v2485_v22  ;;  %v2509_v22 = vrot.slane %v2367_v10, 1 }
 0x450   :  { %v11069_v45 = vld [vmem:[#allocation1] sm:$0xff] }
 0x451   :  { %3259 = vst [vmem:[#allocation1] ss:$9 sm:$0xff] %v2486_v58  ;;  %v2510_v58 = vrot.slane %v2367_v10, 2 }
 0x452   :  { %3260 = vst [vmem:[#allocation1 + $0x1] ss:$9 sm:$0xff] %v2487_v32  ;;  %v2512_v32 = vrot.slane %v2367_v10, 4 }
 0x453   :  { %3261 = vst [vmem:[#allocation1 + $0x2] ss:$9 sm:$0xff] %v2360_v36  ;;  %v2513_v36 = vrot.slane %v2367_v10, 5 }
 0x454   :  { %3262 = vst [vmem:[#allocation1 + $0x3] ss:$9 sm:$0xff] %v2361_v18  ;;  %v2511_v18 = vrot.slane %v2367_v10, 3 }
 0x455   :  { %3263 = vst [vmem:[#allocation1 + $0x4] ss:$9 sm:$0xff] %v2488_v54 }
 0x456   :  { %3264 = vst [vmem:[#allocation1 + $0x5] ss:$9 sm:$0xff] %v2489_v48  ;;  %v2514_v48 = vrot.slane %v2367_v10, 6 }
 0x457   :  { %3265 = vst [vmem:[#allocation1 + $0x6] ss:$9 sm:$0xff] %v2490_v4  ;;  %v2515_v4 = vrot.slane %v2367_v10, 7 }
 0x458   :  { %3266 = vst [vmem:[#allocation1 + $0x7] ss:$9 sm:$0xff] %v2491_v34  ;;  %v2368_v34 = vld [vmem:[#allocation2 + $0xf9] sm:$0x1] }
 0x45f   :  { %v11071_v11 = vld [vmem:[#allocation1] sm:$0xff] }
 0x460   :  { %3268 = vst [vmem:[#allocation1] ss:$9 sm:$0xff] %v2492_v25  ;;  %v2369_v25 = vld [vmem:[#allocation2 + $0x101] sm:$0xff] }
 0x461   :  { %3269 = vst [vmem:[#allocation1 + $0x1] ss:$9 sm:$0xff] %v2493_v51  ;;  %v2516_v51 = vrot.slane %v2369_v25, 1 }
 0x462   :  { %3270 = vst [vmem:[#allocation1 + $0x2] ss:$9 sm:$0xff] %v2494_v26  ;;  %v2518_v26 = vrot.slane %v2369_v25, 3 }
 0x463   :  { %3271 = vst [vmem:[#allocation1 + $0x3] ss:$9 sm:$0xff] %v2362_v19  ;;  %v2519_v19 = vrot.slane %v2369_v25, 4 }
 0x464   :  { %3272 = vst [vmem:[#allocation1 + $0x4] ss:$9 sm:$0xff] %v2363_v2  ;;  %v2517_v2 = vrot.slane %v2369_v25, 2 }
 0x465   :  { %3273 = vst [vmem:[#allocation1 + $0x5] ss:$9 sm:$0xff] %v2495_v42 }
 0x466   :  { %3274 = vst [vmem:[#allocation1 + $0x6] ss:$9 sm:$0xff] %v2496_v41  ;;  %v2520_v41 = vrot.slane %v2369_v25, 5 }
 0x467   :  { %3275 = vst [vmem:[#allocation1 + $0x7] ss:$9 sm:$0xff] %v2497_v46  ;;  %v2521_v46 = vrot.slane %v2369_v25, 6 }
 0x46e   :  { %v11073_v3 = vld [vmem:[#allocation1] sm:$0xff] }
 0x46f   :  { %3277 = vst [vmem:[#allocation1] ss:$9 sm:$0xff] %v2498_v23  ;;  %v2522_v23 = vrot.slane %v2369_v25, 7 }
 0x470   :  { %3278 = vst [vmem:[#allocation1 + $0x1] ss:$9 sm:$0xff] %v2499_v9  ;;  %v2370_v9 = vld [vmem:[#allocation2 + $0x109] sm:$0x1] }
 0x471   :  { %3279 = vst [vmem:[#allocation1 + $0x2] ss:$9 sm:$0xff] %v2500_v53  ;;  %v2371_v53 = vld [vmem:[#allocation2 + $0x111] sm:$0xff] }
 0x472   :  { %3280 = vst [vmem:[#allocation1 + $0x3] ss:$9 sm:$0xff] %v2501_v29  ;;  %v2524_v29 = vrot.slane %v2371_v53, 2 }
 0x473   :  { %3281 = vst [vmem:[#allocation1 + $0x4] ss:$9 sm:$0xff] %v2364_v31  ;;  %v2525_v31 = vrot.slane %v2371_v53, 3 }
 0x474   :  { %3282 = vst [vmem:[#allocation1 + $0x5] ss:$9 sm:$0xff] %v2365_v37  ;;  %v2523_v37 = vrot.slane %v2371_v53, 1 }
 0x475   :  { %3283 = vst [vmem:[#allocation1 + $0x6] ss:$9 sm:$0xff] %v2502_v20 }
 0x476   :  { %3284 = vst [vmem:[#allocation1 + $0x7] ss:$9 sm:$0xff] %v2503_v33  ;;  %v2526_v33 = vrot.slane %v2371_v53, 4 }
 0x47d   :  { %v11075_v61 = vld [vmem:[#allocation1] sm:$0xff] }
 0x47e   :  { %3286 = vst [vmem:[#allocation1] ss:$9 sm:$0xff] %v2504_v60  ;;  %v2527_v60 = vrot.slane %v2371_v53, 5 }
 0x47f   :  { %3287 = vst [vmem:[#allocation1 + $0x1] ss:$9 sm:$0xff] %v2505_v15  ;;  %v2528_v15 = vrot.slane %v2371_v53, 6 }
 0x480   :  { %3288 = vst [vmem:[#allocation1 + $0x2] ss:$9 sm:$0xff] %v2506_v57  ;;  %v2529_v57 = vrot.slane %v2371_v53, 7 }
 0x481   :  { %3289 = vst [vmem:[#allocation1 + $0x3] ss:$9 sm:$0xff] %v2507_v49  ;;  %v2373_v49 = vld [vmem:[#allocation2 + $0x121] sm:$0xff] }
 0x482   :  { %3290 = vst [vmem:[#allocation1 + $0x4] ss:$9 sm:$0xff] %v2508_v21  ;;  %v2530_v21 = vrot.slane %v2373_v49, 1 }
 0x483   :  { %3291 = vst [vmem:[#allocation1 + $0x5] ss:$9 sm:$0xff] %v2366_v43  ;;  %v2531_v43 = vrot.slane %v2373_v49, 2 }
 0x484   :  { %3292 = vst [vmem:[#allocation1 + $0x6] ss:$9 sm:$0xff] %v2367_v10  ;;  %v2372_v10 = vld [vmem:[#allocation2 + $0x119] sm:$0x1] }
 0x485   :  { %3293 = vst [vmem:[#allocation1 + $0x7] ss:$9 sm:$0xff] %v2509_v22 }
 0x48c   :  { %v11077_v54 = vld [vmem:[#allocation1] sm:$0xff] }
 0x48d   :  { %3295 = vst [vmem:[#allocation1] ss:$9 sm:$0xff] %v2510_v58  ;;  %v2532_v58 = vrot.slane %v2373_v49, 3 }
 0x48e   :  { %3296 = vst [vmem:[#allocation1 + $0x1] ss:$9 sm:$0xff] %v2511_v18  ;;  %v2533_v18 = vrot.slane %v2373_v49, 4 }
 0x48f   :  { %3297 = vst [vmem:[#allocation1 + $0x2] ss:$9 sm:$0xff] %v2512_v32  ;;  %v2534_v32 = vrot.slane %v2373_v49, 5 }
 0x490   :  { %3298 = vst [vmem:[#allocation1 + $0x3] ss:$9 sm:$0xff] %v2513_v36  ;;  %v2535_v36 = vrot.slane %v2373_v49, 6 }
 0x491   :  { %3299 = vst [vmem:[#allocation1 + $0x4] ss:$9 sm:$0xff] %v2514_v48  ;;  %v2536_v48 = vrot.slane %v2373_v49, 7 }
 0x492   :  { %3300 = vst [vmem:[#allocation1 + $0x5] ss:$9 sm:$0xff] %v2515_v4  ;;  %v2374_v4 = vld [vmem:[#allocation2 + $0x129] sm:$0x1] }
 0x493   :  { %3301 = vst [vmem:[#allocation1 + $0x6] ss:$9 sm:$0xff] %v2368_v34 }
 0x494   :  { %3302 = vst [vmem:[#allocation1 + $0x7] ss:$9 sm:$0xff] %v2369_v25  ;;  %v2537_v25 = vld [vmem:[#allocation2 + $0x10] sm:$0xff] }
 0x49b   :  { %v11079_v42 = vld [vmem:[#allocation1] sm:$0xff] }
 0x49c   :  { %3304 = vst [vmem:[#allocation1] ss:$9 sm:$0xff] %v2516_v51  ;;  %v2609_v51 = vrot.slane %v2537_v25, 1 }
 0x49d   :  { %3305 = vst [vmem:[#allocation1 + $0x1] ss:$9 sm:$0xff] %v2517_v2  ;;  %v2610_v2 = vrot.slane %v2537_v25, 2 }
 0x49e   :  { %3306 = vst [vmem:[#allocation1 + $0x2] ss:$9 sm:$0xff] %v2518_v26  ;;  %v2611_v26 = vrot.slane %v2537_v25, 3 }
 0x49f   :  { %3307 = vst [vmem:[#allocation1 + $0x3] ss:$9 sm:$0xff] %v2519_v19 }
 0x4a0   :  { %3308 = vst [vmem:[#allocation1 + $0x4] ss:$9 sm:$0xff] %v2520_v41  ;;  %v2612_v41 = vrot.slane %v2537_v25, 4 }
 0x4a1   :  { %3309 = vst [vmem:[#allocation1 + $0x5] ss:$9 sm:$0xff] %v2521_v46  ;;  %v2613_v46 = vrot.slane %v2537_v25, 5 }
 0x4a2   :  { %3310 = vst [vmem:[#allocation1 + $0x6] ss:$9 sm:$0xff] %v2522_v23  ;;  %v2614_v23 = vrot.slane %v2537_v25, 6 }
 0x4a3   :  { %3311 = vst [vmem:[#allocation1 + $0x7] ss:$9 sm:$0xff] %v2370_v9  ;;  %v2615_v9 = vrot.slane %v2537_v25, 7 }
 0x4aa   :  { %v11081_v20 = vld [vmem:[#allocation1] sm:$0xff] }
 0x4ab   :  { %3313 = vst [vmem:[#allocation1] ss:$9 sm:$0xff] %v2371_v53  ;;  %v2539_v53 = vld [vmem:[#allocation2 + $0x20] sm:$0xff] }
 0x4ac   :  { %3314 = vst [vmem:[#allocation1 + $0x1] ss:$9 sm:$0xff] %v2523_v37  ;;  %v2538_v37 = vld [vmem:[#allocation2 + $0x18] sm:$0x1] }
 0x4ad   :  { %3315 = vst [vmem:[#allocation1 + $0x2] ss:$9 sm:$0xff] %v2524_v29  ;;  %v2616_v29 = vrot.slane %v2539_v53, 1 }
 0x4ae   :  { %3316 = vst [vmem:[#allocation1 + $0x3] ss:$9 sm:$0xff] %v2525_v31 }
 0x4af   :  { %3317 = vst [vmem:[#allocation1 + $0x4] ss:$9 sm:$0xff] %v2526_v33  ;;  %v2617_v33 = vrot.slane %v2539_v53, 2 }
 0x4b0   :  { %3318 = vst [vmem:[#allocation1 + $0x5] ss:$9 sm:$0xff] %v2527_v60  ;;  %v2618_v60 = vrot.slane %v2539_v53, 3 }
 0x4b1   :  { %3319 = vst [vmem:[#allocation1 + $0x6] ss:$9 sm:$0xff] %v2528_v15  ;;  %v2619_v15 = vrot.slane %v2539_v53, 4 }
 0x4b2   :  { %3320 = vst [vmem:[#allocation1 + $0x7] ss:$9 sm:$0xff] %v2529_v57  ;;  %v2620_v57 = vrot.slane %v2539_v53, 5 }
 0x4b9   :  { %v11083_v22 = vld [vmem:[#allocation1] sm:$0xff] }
 0x4ba   :  { %3322 = vst [vmem:[#allocation1] ss:$9 sm:$0xff] %v2372_v10  ;;  %v2541_v10 = vld [vmem:[#allocation2 + $0x30] sm:$0xff] }
 0x4bb   :  { %3323 = vst [vmem:[#allocation1 + $0x1] ss:$9 sm:$0xff] %v2373_v49  ;;  %v2621_v49 = vrot.slane %v2539_v53, 6 }
 0x4bc   :  { %3324 = vst [vmem:[#allocation1 + $0x2] ss:$9 sm:$0xff] %v2530_v21  ;;  %v2622_v21 = vrot.slane %v2539_v53, 7 }
 0x4bd   :  { %3325 = vst [vmem:[#allocation1 + $0x3] ss:$9 sm:$0xff] %v2531_v43  ;;  %v2540_v43 = vld [vmem:[#allocation2 + $0x28] sm:$0x1] }
 0x4be   :  { %3326 = vst [vmem:[#allocation1 + $0x4] ss:$9 sm:$0xff] %v2532_v58  ;;  %v2623_v58 = vrot.slane %v2541_v10, 1 }
 0x4bf   :  { %3327 = vst [vmem:[#allocation1 + $0x5] ss:$9 sm:$0xff] %v2533_v18 }
 0x4c0   :  { %3328 = vst [vmem:[#allocation1 + $0x6] ss:$9 sm:$0xff] %v2534_v32  ;;  %v2624_v32 = vrot.slane %v2541_v10, 2 }
 0x4c1   :  { %3329 = vst [vmem:[#allocation1 + $0x7] ss:$9 sm:$0xff] %v2535_v36  ;;  %v2625_v36 = vrot.slane %v2541_v10, 3 }
 0x4c8   :  { %v11085_v34 = vld [vmem:[#allocation1] sm:$0xff] }
 0x4c9   :  { %3331 = vst [vmem:[#allocation1] ss:$9 sm:$0xff] %v2536_v48  ;;  %v2626_v48 = vrot.slane %v2541_v10, 4 }
 0x4ca   :  { %3332 = vst [vmem:[#allocation1 + $0x1] ss:$9 sm:$0xff] %v2374_v4  ;;  %v2627_v4 = vrot.slane %v2541_v10, 5 }
 0x4d1   :  { %v11087_v19 = vld [vmem:[#allocation1] sm:$0xff] }
 0x4d2   :  { %3397 = vst [vmem:[#allocation1] ss:$9 sm:$0xff] %v2537_v25  ;;  %v2543_v25 = vld [vmem:[#allocation2 + $0x40] sm:$0xff] }
 0x4d3   :  { %3399 = vst [vmem:[#allocation1 + $0x1] ss:$9 sm:$0xff] %v2609_v51  ;;  %v2629_v51 = vrot.slane %v2541_v10, 7 }
 0x4d4   :  { %3401 = vst [vmem:[#allocation1 + $0x2] ss:$9 sm:$0xff] %v2610_v2 }
 0x4d5   :  { %3403 = vst [vmem:[#allocation1 + $0x3] ss:$9 sm:$0xff] %v2611_v26  ;;  %v2542_v26 = vld [vmem:[#allocation2 + $0x38] sm:$0x1] }
 0x4d6   :  { %3405 = vst [vmem:[#allocation1 + $0x4] ss:$9 sm:$0xff] %v2612_v41  ;;  %v2630_v41 = vrot.slane %v2543_v25, 1 }
 0x4d7   :  { %3407 = vst [vmem:[#allocation1 + $0x5] ss:$9 sm:$0xff] %v2613_v46  ;;  %v2632_v46 = vrot.slane %v2543_v25, 3 }
 0x4d8   :  { %3409 = vst [vmem:[#allocation1 + $0x6] ss:$9 sm:$0xff] %v2614_v23  ;;  %v2633_v23 = vrot.slane %v2543_v25, 4 }
 0x4d9   :  { %3411 = vst [vmem:[#allocation1 + $0x7] ss:$9 sm:$0xff] %v2615_v9  ;;  %v2635_v9 = vrot.slane %v2543_v25, 6 }
 0x4e0   :  { %v3412_v31 = vld [vmem:[#allocation1] sm:$0xff] }
 0x4e1   :  { %3587 = vrot.lane.b32.xlu0 %v3412_v31, %s6970_s27  ;;  %3413 = vst [vmem:[#allocation1] ss:$9 sm:$0xff] %v2538_v37  ;;  %v2636_v37 = vrot.slane %v2543_v25, 7  ;;  %v2544_v31 = vld [vmem:[#allocation2 + $0x48] sm:$0x1] }
 0x4e2   :  { %3414 = vst [vmem:[#allocation1 + $0x1] ss:$9 sm:$0xff] %v2539_v53  ;;  %v2545_v53 = vld [vmem:[#allocation2 + $0x50] sm:$0xff] }
 0x4e3   :  { %3415 = vst [vmem:[#allocation1 + $0x2] ss:$9 sm:$0xff] %v2616_v29 }
 0x4e4   :  { %3416 = vst [vmem:[#allocation1 + $0x3] ss:$9 sm:$0xff] %v2617_v33  ;;  %v2637_v33 = vrot.slane %v2545_v53, 1 }
 0x4e5   :  { %3417 = vst [vmem:[#allocation1 + $0x4] ss:$9 sm:$0xff] %v2618_v60  ;;  %v2638_v60 = vrot.slane %v2545_v53, 2 }
 0x4e6   :  { %3418 = vst [vmem:[#allocation1 + $0x5] ss:$9 sm:$0xff] %v2619_v15  ;;  %v2639_v15 = vrot.slane %v2545_v53, 3 }
 0x4e7   :  { %3419 = vst [vmem:[#allocation1 + $0x6] ss:$9 sm:$0xff] %v2620_v57  ;;  %v2640_v57 = vrot.slane %v2545_v53, 4 }
 0x4e8   :  { %3420 = vst [vmem:[#allocation1 + $0x7] ss:$9 sm:$0xff] %v2621_v49  ;;  %v2641_v49 = vrot.slane %v2545_v53, 5 }
 0x4e9   :  { %3344 = vrot.lane.b32.xlu0 %v11057_v12, %s6969_s0  ;;  %v2628_v12 = vrot.slane %v2541_v10, 6 }
 0x4ef   :  { %v3421_v18 = vld [vmem:[#allocation1] sm:$0xff] }
 0x4f0   :  { %3422 = vst [vmem:[#allocation1] ss:$9 sm:$0xff] %v2622_v21  ;;  %3589 = vrot.lane.b32.xlu2 %v3421_v18, %s6970_s27  ;;  %v2546_v18 = vld [vmem:[#allocation2 + $0x58] sm:$0x1] }
 0x4f1   :  { %3423 = vst [vmem:[#allocation1 + $0x1] ss:$9 sm:$0xff] %v2540_v43  ;;  %3346 = vrot.lane.b32.xlu0 %v11059_v30, %s6969_s0  ;;  %v2631_v30 = vrot.slane %v2543_v25, 2  ;;  %v2547_v43 = vld [vmem:[#allocation2 + $0x60] sm:$0xff] }
 0x4f2   :  { %3424 = vst [vmem:[#allocation1 + $0x2] ss:$9 sm:$0xff] %v2541_v10  ;;  %v2642_v10 = vrot.slane %v2545_v53, 6 }
 0x4f3   :  { %3425 = vst [vmem:[#allocation1 + $0x3] ss:$9 sm:$0xff] %v2623_v58  ;;  %v2643_v58 = vrot.slane %v2545_v53, 7 }
 0x4f4   :  { %3426 = vst [vmem:[#allocation1 + $0x4] ss:$9 sm:$0xff] %v2624_v32  ;;  %v2644_v32 = vrot.slane %v2547_v43, 1 }
 0x4f5   :  { %3427 = vst [vmem:[#allocation1 + $0x5] ss:$9 sm:$0xff] %v2625_v36  ;;  %v2645_v36 = vrot.slane %v2547_v43, 2 }
 0x4f6   :  { %3428 = vst [vmem:[#allocation1 + $0x6] ss:$9 sm:$0xff] %v2626_v48  ;;  %v2646_v48 = vrot.slane %v2547_v43, 3 }
 0x4f7   :  { %3429 = vst [vmem:[#allocation1 + $0x7] ss:$9 sm:$0xff] %v2627_v4  ;;  %v2647_v4 = vrot.slane %v2547_v43, 4 }
 0x4f9   :  { %3368 = vrot.lane.b32.xlu0 %v11081_v20, %s6969_s0  ;;  %v2634_v20 = vrot.slane %v2543_v25, 5 }
 0x4fe   :  { %v3430_v2 = vld [vmem:[#allocation1] sm:$0xff] }
 0x4ff   :  { %3591 = vrot.lane.b32.xlu1 %v3430_v2, %s6970_s27  ;;  %3431 = vst [vmem:[#allocation1] ss:$9 sm:$0xff] %v2628_v12  ;;  %v2648_v12 = vrot.slane %v2547_v43, 5  ;;  %v2549_v2 = vld [vmem:[#allocation2 + $0x70] sm:$0xff] }
 0x500   :  { %3432 = vst [vmem:[#allocation1 + $0x1] ss:$9 sm:$0xff] %v2629_v51 }
 0x501   :  { %3433 = vst [vmem:[#allocation1 + $0x2] ss:$9 sm:$0xff] %v2542_v26  ;;  %v2650_v26 = vrot.slane %v2547_v43, 7 }
 0x502   :  { %3434 = vst [vmem:[#allocation1 + $0x3] ss:$9 sm:$0xff] %v2543_v25  ;;  %v2649_v25 = vrot.slane %v2547_v43, 6 }
 0x503   :  { %3435 = vst [vmem:[#allocation1 + $0x4] ss:$9 sm:$0xff] %v2630_v41  ;;  %v2548_v41 = vld [vmem:[#allocation2 + $0x68] sm:$0x1] }
 0x504   :  { %3436 = vst [vmem:[#allocation1 + $0x5] ss:$9 sm:$0xff] %v2631_v30  ;;  %v2651_v30 = vrot.slane %v2549_v2, 1 }
 0x505   :  { %3437 = vst [vmem:[#allocation1 + $0x6] ss:$9 sm:$0xff] %v2632_v46  ;;  %v2652_v46 = vrot.slane %v2549_v2, 2 }
 0x506   :  { %3438 = vst [vmem:[#allocation1 + $0x7] ss:$9 sm:$0xff] %v2633_v23  ;;  %v2653_v23 = vrot.slane %v2549_v2, 3 }
 0x50d   :  { %v3439_v29 = vld [vmem:[#allocation1] sm:$0xff] }
 0x50e   :  { %3593 = vrot.lane.b32.xlu1 %v3439_v29, %s6970_s27  ;;  %3440 = vst [vmem:[#allocation1] ss:$9 sm:$0xff] %v2634_v20  ;;  %v2654_v20 = vrot.slane %v2549_v2, 4  ;;  %v2657_v29 = vrot.slane %v2549_v2, 7 }
 0x50f   :  { %3441 = vst [vmem:[#allocation1 + $0x1] ss:$9 sm:$0xff] %v2635_v9  ;;  %v2655_v9 = vrot.slane %v2549_v2, 5 }
 0x510   :  { %3442 = vst [vmem:[#allocation1 + $0x2] ss:$9 sm:$0xff] %v2636_v37  ;;  %v2656_v37 = vrot.slane %v2549_v2, 6 }
 0x511   :  { %3443 = vst [vmem:[#allocation1 + $0x3] ss:$9 sm:$0xff] %v2544_v31  ;;  %v2550_v31 = vld [vmem:[#allocation2 + $0x78] sm:$0x1] }
 0x512   :  { %3444 = vst [vmem:[#allocation1 + $0x4] ss:$9 sm:$0xff] %v2545_v53 }
 0x513   :  { %3445 = vst [vmem:[#allocation1 + $0x5] ss:$9 sm:$0xff] %v2637_v33  ;;  %v2551_v33 = vld [vmem:[#allocation2 + $0x80] sm:$0xff] }
 0x514   :  { %3446 = vst [vmem:[#allocation1 + $0x6] ss:$9 sm:$0xff] %v2638_v60  ;;  %v2658_v60 = vrot.slane %v2551_v33, 1 }
 0x515   :  { %3447 = vst [vmem:[#allocation1 + $0x7] ss:$9 sm:$0xff] %v2639_v15  ;;  %v2659_v15 = vrot.slane %v2551_v33, 2 }
 0x51c   :  { %v3448_v21 = vld [vmem:[#allocation1] sm:$0xff] }
 0x51d   :  { %3595 = vrot.lane.b32.xlu1 %v3448_v21, %s6970_s27  ;;  %3449 = vst [vmem:[#allocation1] ss:$9 sm:$0xff] %v2640_v57  ;;  %v2660_v57 = vrot.slane %v2551_v33, 3  ;;  %v2662_v21 = vrot.slane %v2551_v33, 5 }
 0x51e   :  { %3450 = vst [vmem:[#allocation1 + $0x1] ss:$9 sm:$0xff] %v2641_v49  ;;  %v2661_v49 = vrot.slane %v2551_v33, 4 }
 0x51f   :  { %3451 = vst [vmem:[#allocation1 + $0x2] ss:$9 sm:$0xff] %v2642_v10 }
 0x520   :  { %3452 = vst [vmem:[#allocation1 + $0x3] ss:$9 sm:$0xff] %v2643_v58  ;;  %v2664_v58 = vrot.slane %v2551_v33, 7 }
 0x521   :  { %3453 = vst [vmem:[#allocation1 + $0x4] ss:$9 sm:$0xff] %v2546_v18  ;;  %v2552_v18 = vld [vmem:[#allocation2 + $0x88] sm:$0x1] }
 0x522   :  { %3454 = vst [vmem:[#allocation1 + $0x5] ss:$9 sm:$0xff] %v2547_v43  ;;  %v2663_v43 = vrot.slane %v2551_v33, 6 }
 0x523   :  { %3455 = vst [vmem:[#allocation1 + $0x6] ss:$9 sm:$0xff] %v2644_v32  ;;  %v2553_v32 = vld [vmem:[#allocation2 + $0x90] sm:$0xff] }
 0x524   :  { %3456 = vst [vmem:[#allocation1 + $0x7] ss:$9 sm:$0xff] %v2645_v36  ;;  %v2665_v36 = vrot.slane %v2553_v32, 1 }
 0x52b   :  { %v11100_v51 = vld [vmem:[#allocation1] sm:$0xff] }
 0x52c   :  { %3458 = vst [vmem:[#allocation1] ss:$9 sm:$0xff] %v2646_v48  ;;  %v2666_v48 = vrot.slane %v2553_v32, 2 }
 0x52d   :  { %3459 = vst [vmem:[#allocation1 + $0x1] ss:$9 sm:$0xff] %v2647_v4  ;;  %v2667_v4 = vrot.slane %v2553_v32, 3 }
 0x52e   :  { %3460 = vst [vmem:[#allocation1 + $0x2] ss:$9 sm:$0xff] %v2648_v12 }
 0x52f   :  { %3461 = vst [vmem:[#allocation1 + $0x3] ss:$9 sm:$0xff] %v2649_v25  ;;  %v2668_v25 = vrot.slane %v2553_v32, 4 }
 0x530   :  { %3462 = vst [vmem:[#allocation1 + $0x4] ss:$9 sm:$0xff] %v2650_v26  ;;  %v2670_v26 = vrot.slane %v2553_v32, 6 }
 0x531   :  { %3463 = vst [vmem:[#allocation1 + $0x5] ss:$9 sm:$0xff] %v2548_v41  ;;  %v2671_v41 = vrot.slane %v2553_v32, 7 }
 0x532   :  { %3464 = vst [vmem:[#allocation1 + $0x6] ss:$9 sm:$0xff] %v2549_v2  ;;  %v2669_v2 = vrot.slane %v2553_v32, 5 }
 0x533   :  { %3465 = vst [vmem:[#allocation1 + $0x7] ss:$9 sm:$0xff] %v2651_v30  ;;  %v2554_v30 = vld [vmem:[#allocation2 + $0x98] sm:$0x1] }
 0x53a   :  { %v11102_v53 = vld [vmem:[#allocation1] sm:$0xff] }
 0x53b   :  { %3467 = vst [vmem:[#allocation1] ss:$9 sm:$0xff] %v2652_v46 }
 0x53c   :  { %3468 = vst [vmem:[#allocation1 + $0x1] ss:$9 sm:$0xff] %v2653_v23 }
 0x53d   :  { %3469 = vst [vmem:[#allocation1 + $0x2] ss:$9 sm:$0xff] %v2654_v20 }
 0x53e   :  { %3470 = vst [vmem:[#allocation1 + $0x3] ss:$9 sm:$0xff] %v2655_v9 }
 0x53f   :  { %3471 = vst [vmem:[#allocation1 + $0x4] ss:$9 sm:$0xff] %v2656_v37 }
 0x540   :  { %3472 = vst [vmem:[#allocation1 + $0x5] ss:$9 sm:$0xff] %v2657_v29 }
 0x541   :  { %3473 = vst [vmem:[#allocation1 + $0x6] ss:$9 sm:$0xff] %v2550_v31 }
 0x542   :  { %3474 = vst [vmem:[#allocation1 + $0x7] ss:$9 sm:$0xff] %v2551_v33 }
 0x549   :  { %v3475_v10 = vld [vmem:[#allocation1] sm:$0xff] }
 0x54a   :  { %3476 = vst [vmem:[#allocation1] ss:$9 sm:$0xff] %v2658_v60  ;;  %3601 = vrot.lane.b32.xlu0 %v3475_v10, %s6970_s27  ;;  %v2556_v60 = vld [vmem:[#allocation2 + $0xb8] sm:$0x1] }
 0x54b   :  { %3477 = vst [vmem:[#allocation1 + $0x1] ss:$9 sm:$0xff] %v2659_v15 }
 0x54c   :  { %3478 = vst [vmem:[#allocation1 + $0x2] ss:$9 sm:$0xff] %v2660_v57 }
 0x54d   :  { %3479 = vst [vmem:[#allocation1 + $0x3] ss:$9 sm:$0xff] %v2661_v49 }
 0x54e   :  { %3480 = vst [vmem:[#allocation1 + $0x4] ss:$9 sm:$0xff] %v2662_v21 }
 0x54f   :  { %3481 = vst [vmem:[#allocation1 + $0x5] ss:$9 sm:$0xff] %v2663_v43 }
 0x550   :  { %3482 = vst [vmem:[#allocation1 + $0x6] ss:$9 sm:$0xff] %v2664_v58 }
 0x551   :  { %3483 = vst [vmem:[#allocation1 + $0x7] ss:$9 sm:$0xff] %v2552_v18 }
 0x552   :  { %3370 = vrot.lane.b32.xlu0 %v11083_v22, %s6969_s0  ;;  %v2555_v22 = vld [vmem:[#allocation2 + $0xb0] sm:$0xff] }
 0x553   :  { %v2672_v46 = vrot.slane %v2555_v22, 1  ;;  %v2673_v23 = vrot.slane %v2555_v22, 2  ;;  %v2674_v9 = vrot.slane %v2555_v22, 3  ;;  %v2675_v37 = vrot.slane %v2555_v22, 4 }
 0x554   :  { %v2676_v29 = vrot.slane %v2555_v22, 5  ;;  %v2677_v31 = vrot.slane %v2555_v22, 6  ;;  %v2678_v33 = vrot.slane %v2555_v22, 7 }
 0x558   :  { %v3484_v12 = vld [vmem:[#allocation1] sm:$0xff] }
 0x559   :  { %3485 = vst [vmem:[#allocation1] ss:$9 sm:$0xff] %v2553_v32  ;;  %v2558_v32 = vld [vmem:[#allocation2 + $0xc8] sm:$0x1] }
 0x55a   :  { %3486 = vst [vmem:[#allocation1 + $0x1] ss:$9 sm:$0xff] %v2665_v36  ;;  %3603 = vrot.lane.b32.xlu0 %v3484_v12, %s6970_s27 }
 0x55b   :  { %3487 = vst [vmem:[#allocation1 + $0x2] ss:$9 sm:$0xff] %v2666_v48 }
 0x55c   :  { %3488 = vst [vmem:[#allocation1 + $0x3] ss:$9 sm:$0xff] %v2667_v4 }
 0x55d   :  { %3489 = vst [vmem:[#allocation1 + $0x4] ss:$9 sm:$0xff] %v2668_v25 }
 0x55e   :  { %3490 = vst [vmem:[#allocation1 + $0x5] ss:$9 sm:$0xff] %v2669_v2 }
 0x55f   :  { %3491 = vst [vmem:[#allocation1 + $0x6] ss:$9 sm:$0xff] %v2670_v26 }
 0x560   :  { %3492 = vst [vmem:[#allocation1 + $0x7] ss:$9 sm:$0xff] %v2671_v41  ;;  %v2561_v41 = vld [vmem:[#allocation2 + $0xe0] sm:$0xff] }
 0x562   :  { %3372 = vrot.lane.b32.xlu0 %v11085_v34, %s6969_s0  ;;  %v2557_v34 = vld [vmem:[#allocation2 + $0xc0] sm:$0xff] }
 0x563   :  { %v2679_v15 = vrot.slane %v2557_v34, 1  ;;  %v2680_v49 = vrot.slane %v2557_v34, 2  ;;  %v2681_v10 = vrot.slane %v2557_v34, 3  ;;  %v2682_v21 = vrot.slane %v2557_v34, 4 }
 0x564   :  { %v2683_v43 = vrot.slane %v2557_v34, 5  ;;  %v2684_v58 = vrot.slane %v2557_v34, 6  ;;  %v2685_v18 = vrot.slane %v2557_v34, 7 }
 0x567   :  { %v3493_v20 = vld [vmem:[#allocation1] sm:$0xff] }
 0x568   :  { %3494 = vst [vmem:[#allocation1] ss:$9 sm:$0xff] %v2554_v30 }
 0x569   :  { %3495 = vst [vmem:[#allocation1 + $0x1] ss:$9 sm:$0xff] %v2555_v22 }
 0x56a   :  { %3496 = vst [vmem:[#allocation1 + $0x2] ss:$9 sm:$0xff] %v2672_v46  ;;  %3605 = vrot.lane.b32.xlu0 %v3493_v20, %s6970_s27  ;;  %v2560_v46 = vld [vmem:[#allocation2 + $0xd8] sm:$0x1]  ;;  %v2694_v20 = vrot.slane %v2561_v41, 2 }
 0x56b   :  { %3497 = vst [vmem:[#allocation1 + $0x3] ss:$9 sm:$0xff] %v2673_v23  ;;  %v2693_v23 = vrot.slane %v2561_v41, 1 }
 0x56c   :  { %3498 = vst [vmem:[#allocation1 + $0x4] ss:$9 sm:$0xff] %v2674_v9  ;;  %v2695_v9 = vrot.slane %v2561_v41, 3 }
 0x56d   :  { %3499 = vst [vmem:[#allocation1 + $0x5] ss:$9 sm:$0xff] %v2675_v37  ;;  %v2696_v37 = vrot.slane %v2561_v41, 4 }
 0x56e   :  { %3500 = vst [vmem:[#allocation1 + $0x6] ss:$9 sm:$0xff] %v2676_v29  ;;  %v2697_v29 = vrot.slane %v2561_v41, 5 }
 0x56f   :  { %3501 = vst [vmem:[#allocation1 + $0x7] ss:$9 sm:$0xff] %v2677_v31  ;;  %v2698_v31 = vrot.slane %v2561_v41, 6 }
 0x572   :  { %3374 = vrot.lane.b32.xlu0 %v11087_v19, %s6969_s0  ;;  %v2559_v19 = vld [vmem:[#allocation2 + $0xd0] sm:$0xff] }
 0x573   :  { %v2686_v48 = vrot.slane %v2559_v19, 1  ;;  %v2687_v4 = vrot.slane %v2559_v19, 2  ;;  %v2688_v12 = vrot.slane %v2559_v19, 3  ;;  %v2689_v25 = vrot.slane %v2559_v19, 4 }
 0x574   :  { %v2690_v2 = vrot.slane %v2559_v19, 5  ;;  %v2691_v26 = vrot.slane %v2559_v19, 6  ;;  %v2692_v22 = vrot.slane %v2559_v19, 7 }
 0x576   :  { %v11113_v57 = vld [vmem:[#allocation1] sm:$0xff] }
 0x577   :  { %3503 = vst [vmem:[#allocation1] ss:$9 sm:$0xff] %v2678_v33  ;;  %v2699_v33 = vrot.slane %v2561_v41, 7 }
 0x578   :  { %3504 = vst [vmem:[#allocation1 + $0x1] ss:$9 sm:$0xff] %v2556_v60 }
 0x579   :  { %3505 = vst [vmem:[#allocation1 + $0x2] ss:$9 sm:$0xff] %v2557_v34  ;;  %v2563_v34 = vld [vmem:[#allocation2 + $0xf0] sm:$0xff] }
 0x57a   :  { %3506 = vst [vmem:[#allocation1 + $0x3] ss:$9 sm:$0xff] %v2679_v15  ;;  %v2562_v15 = vld [vmem:[#allocation2 + $0xe8] sm:$0x1] }
 0x57b   :  { %3507 = vst [vmem:[#allocation1 + $0x4] ss:$9 sm:$0xff] %v2680_v49  ;;  %v2700_v49 = vrot.slane %v2563_v34, 1 }
 0x57c   :  { %3508 = vst [vmem:[#allocation1 + $0x5] ss:$9 sm:$0xff] %v2681_v10  ;;  %v2701_v10 = vrot.slane %v2563_v34, 2 }
 0x57d   :  { %3509 = vst [vmem:[#allocation1 + $0x6] ss:$9 sm:$0xff] %v2682_v21  ;;  %v2702_v21 = vrot.slane %v2563_v34, 3 }
 0x57e   :  { %3510 = vst [vmem:[#allocation1 + $0x7] ss:$9 sm:$0xff] %v2683_v43  ;;  %v2703_v43 = vrot.slane %v2563_v34, 4 }
 0x585   :  { %v11115_v36 = vld [vmem:[#allocation1] sm:$0xff] }
 0x586   :  { %3512 = vst [vmem:[#allocation1] ss:$9 sm:$0xff] %v2684_v58  ;;  %v2704_v58 = vrot.slane %v2563_v34, 5 }
 0x587   :  { %3513 = vst [vmem:[#allocation1 + $0x1] ss:$9 sm:$0xff] %v2685_v18 }
 0x588   :  { %3514 = vst [vmem:[#allocation1 + $0x2] ss:$9 sm:$0xff] %v2558_v32  ;;  %v2565_v32 = vld [vmem:[#allocation2 + $0x100] sm:$0xff] }
 0x589   :  { %3515 = vst [vmem:[#allocation1 + $0x3] ss:$9 sm:$0xff] %v2559_v19  ;;  %v2705_v19 = vrot.slane %v2563_v34, 6 }
 0x58a   :  { %3516 = vst [vmem:[#allocation1 + $0x4] ss:$9 sm:$0xff] %v2686_v48  ;;  %v2706_v48 = vrot.slane %v2563_v34, 7 }
 0x58b   :  { %3517 = vst [vmem:[#allocation1 + $0x5] ss:$9 sm:$0xff] %v2687_v4  ;;  %v2564_v4 = vld [vmem:[#allocation2 + $0xf8] sm:$0x1] }
 0x58c   :  { %3518 = vst [vmem:[#allocation1 + $0x6] ss:$9 sm:$0xff] %v2688_v12  ;;  %v2707_v12 = vrot.slane %v2565_v32, 1 }
 0x58d   :  { %3519 = vst [vmem:[#allocation1 + $0x7] ss:$9 sm:$0xff] %v2689_v25  ;;  %v2708_v25 = vrot.slane %v2565_v32, 2 }
 0x594   :  { %v11117_v30 = vld [vmem:[#allocation1] sm:$0xff] }
 0x595   :  { %3521 = vst [vmem:[#allocation1] ss:$9 sm:$0xff] %v2690_v2  ;;  %v2709_v2 = vrot.slane %v2565_v32, 3 }
 0x596   :  { %3522 = vst [vmem:[#allocation1 + $0x1] ss:$9 sm:$0xff] %v2691_v26  ;;  %v2710_v26 = vrot.slane %v2565_v32, 4 }
 0x597   :  { %3523 = vst [vmem:[#allocation1 + $0x2] ss:$9 sm:$0xff] %v2692_v22 }
 0x598   :  { %3524 = vst [vmem:[#allocation1 + $0x3] ss:$9 sm:$0xff] %v2560_v46  ;;  %v2712_v46 = vrot.slane %v2565_v32, 6 }
 0x599   :  { %3525 = vst [vmem:[#allocation1 + $0x4] ss:$9 sm:$0xff] %v2561_v41  ;;  %v2711_v41 = vrot.slane %v2565_v32, 5 }
 0x59a   :  { %3526 = vst [vmem:[#allocation1 + $0x5] ss:$9 sm:$0xff] %v2693_v23  ;;  %v2713_v23 = vrot.slane %v2565_v32, 7 }
 0x59b   :  { %3527 = vst [vmem:[#allocation1 + $0x6] ss:$9 sm:$0xff] %v2694_v20  ;;  %v2566_v20 = vld [vmem:[#allocation2 + $0x108] sm:$0x1] }
 0x59c   :  { %3528 = vst [vmem:[#allocation1 + $0x7] ss:$9 sm:$0xff] %v2695_v9  ;;  %v2567_v9 = vld [vmem:[#allocation2 + $0x110] sm:$0xff] }
 0x5a3   :  { %v11119_v60 = vld [vmem:[#allocation1] sm:$0xff] }
 0x5a4   :  { %3530 = vst [vmem:[#allocation1] ss:$9 sm:$0xff] %v2696_v37  ;;  %v2714_v37 = vrot.slane %v2567_v9, 1 }
 0x5a5   :  { %3531 = vst [vmem:[#allocation1 + $0x1] ss:$9 sm:$0xff] %v2697_v29  ;;  %v2715_v29 = vrot.slane %v2567_v9, 2 }
 0x5a6   :  { %3532 = vst [vmem:[#allocation1 + $0x2] ss:$9 sm:$0xff] %v2698_v31  ;;  %v2716_v31 = vrot.slane %v2567_v9, 3 }
 0x5a7   :  { %3533 = vst [vmem:[#allocation1 + $0x3] ss:$9 sm:$0xff] %v2699_v33 }
 0x5a8   :  { %3534 = vst [vmem:[#allocation1 + $0x4] ss:$9 sm:$0xff] %v2562_v15  ;;  %v2718_v15 = vrot.slane %v2567_v9, 5 }
 0x5a9   :  { %3535 = vst [vmem:[#allocation1 + $0x5] ss:$9 sm:$0xff] %v2563_v34  ;;  %v2717_v34 = vrot.slane %v2567_v9, 4 }
 0x5aa   :  { %3536 = vst [vmem:[#allocation1 + $0x6] ss:$9 sm:$0xff] %v2700_v49  ;;  %v2719_v49 = vrot.slane %v2567_v9, 6 }
 0x5ab   :  { %3537 = vst [vmem:[#allocation1 + $0x7] ss:$9 sm:$0xff] %v2701_v10  ;;  %v2720_v10 = vrot.slane %v2567_v9, 7 }
 0x5b2   :  { %v11121_v18 = vld [vmem:[#allocation1] sm:$0xff] }
 0x5b3   :  { %3539 = vst [vmem:[#allocation1] ss:$9 sm:$0xff] %v2702_v21  ;;  %v2568_v21 = vld [vmem:[#allocation2 + $0x118] sm:$0x1] }
 0x5b4   :  { %3540 = vst [vmem:[#allocation1 + $0x1] ss:$9 sm:$0xff] %v2703_v43  ;;  %v2569_v43 = vld [vmem:[#allocation2 + $0x120] sm:$0xff] }
 0x5b5   :  { %3541 = vst [vmem:[#allocation1 + $0x2] ss:$9 sm:$0xff] %v2704_v58  ;;  %v2721_v58 = vrot.slane %v2569_v43, 1 }
 0x5b6   :  { %3542 = vst [vmem:[#allocation1 + $0x3] ss:$9 sm:$0xff] %v2705_v19  ;;  %v2722_v19 = vrot.slane %v2569_v43, 2 }
 0x5b7   :  { %3543 = vst [vmem:[#allocation1 + $0x4] ss:$9 sm:$0xff] %v2706_v48  ;;  %v2723_v48 = vrot.slane %v2569_v43, 3 }
 0x5b8   :  { %3544 = vst [vmem:[#allocation1 + $0x5] ss:$9 sm:$0xff] %v2564_v4  ;;  %v2724_v4 = vrot.slane %v2569_v43, 4 }
 0x5b9   :  { %3545 = vst [vmem:[#allocation1 + $0x6] ss:$9 sm:$0xff] %v2565_v32 }
 0x5ba   :  { %3546 = vst [vmem:[#allocation1 + $0x7] ss:$9 sm:$0xff] %v2707_v12  ;;  %v2725_v12 = vrot.slane %v2569_v43, 5 }
 0x5c1   :  { %v11123_v22 = vld [vmem:[#allocation1] sm:$0xff] }
 0x5c2   :  { %3548 = vst [vmem:[#allocation1] ss:$9 sm:$0xff] %v2708_v25  ;;  %v2726_v25 = vrot.slane %v2569_v43, 6 }
 0x5c3   :  { %3549 = vst [vmem:[#allocation1 + $0x1] ss:$9 sm:$0xff] %v2709_v2  ;;  %v2727_v2 = vrot.slane %v2569_v43, 7 }
 0x5c4   :  { %3550 = vst [vmem:[#allocation1 + $0x2] ss:$9 sm:$0xff] %v2710_v26  ;;  %v2571_v26 = vld [vmem:[#allocation2 + $0x130] sm:$0xff] }
 0x5c5   :  { %3551 = vst [vmem:[#allocation1 + $0x3] ss:$9 sm:$0xff] %v2711_v41  ;;  %v2570_v41 = vld [vmem:[#allocation2 + $0x128] sm:$0x1] }
 0x5c6   :  { %3552 = vst [vmem:[#allocation1 + $0x4] ss:$9 sm:$0xff] %v2712_v46  ;;  %v2728_v46 = vrot.slane %v2571_v26, 1 }
 0x5c7   :  { %3553 = vst [vmem:[#allocation1 + $0x5] ss:$9 sm:$0xff] %v2713_v23  ;;  %v2729_v23 = vrot.slane %v2571_v26, 2 }
 0x5c8   :  { %3554 = vst [vmem:[#allocation1 + $0x6] ss:$9 sm:$0xff] %v2566_v20 }
 0x5c9   :  { %3555 = vst [vmem:[#allocation1 + $0x7] ss:$9 sm:$0xff] %v2567_v9  ;;  %v2730_v9 = vrot.slane %v2571_v26, 3 }
 0x5d0   :  { %v11125_v33 = vld [vmem:[#allocation1] sm:$0xff] }
 0x5d1   :  { %3557 = vst [vmem:[#allocation1] ss:$9 sm:$0xff] %v2714_v37  ;;  %v2731_v37 = vrot.slane %v2571_v26, 4 }
 0x5d2   :  { %3558 = vst [vmem:[#allocation1 + $0x1] ss:$9 sm:$0xff] %v2715_v29  ;;  %v2732_v29 = vrot.slane %v2571_v26, 5 }
 0x5d3   :  { %3559 = vst [vmem:[#allocation1 + $0x2] ss:$9 sm:$0xff] %v2716_v31  ;;  %v2733_v31 = vrot.slane %v2571_v26, 6 }
 0x5d4   :  { %3560 = vst [vmem:[#allocation1 + $0x3] ss:$9 sm:$0xff] %v2717_v34  ;;  %v2734_v34 = vrot.slane %v2571_v26, 7 }
 0x5d5   :  { %3561 = vst [vmem:[#allocation1 + $0x4] ss:$9 sm:$0xff] %v2718_v15  ;;  %v2572_v15 = vld [vmem:[#allocation2 + $0x138] sm:$0x1] }
 0x5d6   :  { %3562 = vst [vmem:[#allocation1 + $0x5] ss:$9 sm:$0xff] %v2719_v49 }
 0x5d7   :  { %3563 = vst [vmem:[#allocation1 + $0x6] ss:$9 sm:$0xff] %v2720_v10  ;;  %v2735_v10 = vld [vmem:[#allocation2 + $0x11] sm:$0xff] }
 0x5d8   :  { %3564 = vst [vmem:[#allocation1 + $0x7] ss:$9 sm:$0xff] %v2568_v21  ;;  %v2807_v21 = vrot.slane %v2735_v10, 1 }
 0x5df   :  { %v3565_v32 = vld [vmem:[#allocation1] sm:$0xff] }
 0x5e0   :  { %3621 = vrot.lane.b32.xlu2 %v3565_v32, %s6970_s27  ;;  %3566 = vst [vmem:[#allocation1] ss:$9 sm:$0xff] %v2569_v43  ;;  %v2808_v43 = vrot.slane %v2735_v10, 2  ;;  %v2810_v32 = vrot.slane %v2735_v10, 4 }
 0x5e1   :  { %3567 = vst [vmem:[#allocation1 + $0x1] ss:$9 sm:$0xff] %v2721_v58  ;;  %v2809_v58 = vrot.slane %v2735_v10, 3 }
 0x5e2   :  { %3568 = vst [vmem:[#allocation1 + $0x2] ss:$9 sm:$0xff] %v2722_v19 }
 0x5e3   :  { %3569 = vst [vmem:[#allocation1 + $0x3] ss:$9 sm:$0xff] %v2723_v48  ;;  %v2811_v48 = vrot.slane %v2735_v10, 5 }
 0x5e4   :  { %3570 = vst [vmem:[#allocation1 + $0x4] ss:$9 sm:$0xff] %v2724_v4  ;;  %v2812_v4 = vrot.slane %v2735_v10, 6 }
 0x5e5   :  { %3571 = vst [vmem:[#allocation1 + $0x5] ss:$9 sm:$0xff] %v2725_v12  ;;  %v2813_v12 = vrot.slane %v2735_v10, 7 }
 0x5e6   :  { %3572 = vst [vmem:[#allocation1 + $0x6] ss:$9 sm:$0xff] %v2726_v25  ;;  %v2737_v25 = vld [vmem:[#allocation2 + $0x21] sm:$0xff] }
 0x5e7   :  { %3573 = vst [vmem:[#allocation1 + $0x7] ss:$9 sm:$0xff] %v2727_v2  ;;  %v2736_v2 = vld [vmem:[#allocation2 + $0x19] sm:$0x1] }
 0x5ee   :  { %v3574_v20 = vld [vmem:[#allocation1] sm:$0xff] }
 0x5ef   :  { %3575 = vst [vmem:[#allocation1] ss:$9 sm:$0xff] %v2570_v41  ;;  %3623 = vrot.lane.b32.xlu2 %v3574_v20, %s6970_s27  ;;  %v2818_v20 = vrot.slane %v2737_v25, 5 }
 0x5f0   :  { %3576 = vst [vmem:[#allocation1 + $0x1] ss:$9 sm:$0xff] %v2571_v26  ;;  %v2814_v26 = vrot.slane %v2737_v25, 1 }
 0x5f1   :  { %3577 = vst [vmem:[#allocation1 + $0x2] ss:$9 sm:$0xff] %v2728_v46  ;;  %v2815_v46 = vrot.slane %v2737_v25, 2 }
 0x5f2   :  { %3578 = vst [vmem:[#allocation1 + $0x3] ss:$9 sm:$0xff] %v2729_v23  ;;  %v2817_v23 = vrot.slane %v2737_v25, 4 }
 0x5f3   :  { %3579 = vst [vmem:[#allocation1 + $0x4] ss:$9 sm:$0xff] %v2730_v9  ;;  %v2819_v9 = vrot.slane %v2737_v25, 6 }
 0x5f4   :  { %3580 = vst [vmem:[#allocation1 + $0x5] ss:$9 sm:$0xff] %v2731_v37  ;;  %v2739_v37 = vld [vmem:[#allocation2 + $0x31] sm:$0xff] }
 0x5f5   :  { %3581 = vst [vmem:[#allocation1 + $0x6] ss:$9 sm:$0xff] %v2732_v29  ;;  %v2820_v29 = vrot.slane %v2737_v25, 7 }
 0x5f6   :  { %3582 = vst [vmem:[#allocation1 + $0x7] ss:$9 sm:$0xff] %v2733_v31  ;;  %v2738_v31 = vld [vmem:[#allocation2 + $0x29] sm:$0x1] }
 0x5fd   :  { %v3583_v49 = vld [vmem:[#allocation1] sm:$0xff] }
 0x5fe   :  { %3584 = vst [vmem:[#allocation1] ss:$9 sm:$0xff] %v2734_v34  ;;  %3625 = vrot.lane.b32.xlu2 %v3583_v49, %s6970_s27  ;;  %v2822_v49 = vrot.slane %v2739_v37, 2 }
 0x5ff   :  { %3585 = vst [vmem:[#allocation1 + $0x1] ss:$9 sm:$0xff] %v2572_v15  ;;  %v2821_v15 = vrot.slane %v2739_v37, 1 }
 0x606   :  { %v11130_v19 = vld [vmem:[#allocation1] sm:$0xff]  ;;  %3354 = vrot.lane.b32.xlu2 %v11067_v1, %s6969_s0  ;;  %v2816_v1 = vrot.slane %v2737_v25, 3 }
 0x607   :  { %3650 = vst [vmem:[#allocation1] ss:$9 sm:$0xff] %v2735_v10  ;;  %v2823_v10 = vrot.slane %v2739_v37, 3 }
 0x608   :  { %3652 = vst [vmem:[#allocation1 + $0x1] ss:$9 sm:$0xff] %v2807_v21  ;;  %v2824_v21 = vrot.slane %v2739_v37, 4 }
 0x609   :  { %3654 = vst [vmem:[#allocation1 + $0x2] ss:$9 sm:$0xff] %v2808_v43  ;;  %v2825_v43 = vrot.slane %v2739_v37, 5 }
 0x60a   :  { %3656 = vst [vmem:[#allocation1 + $0x3] ss:$9 sm:$0xff] %v2809_v58  ;;  %v2741_v58 = vld [vmem:[#allocation2 + $0x41] sm:$0xff] }
 0x60b   :  { %3658 = vst [vmem:[#allocation1 + $0x4] ss:$9 sm:$0xff] %v2810_v32  ;;  %v2827_v32 = vrot.slane %v2739_v37, 7 }
 0x60c   :  { %3660 = vst [vmem:[#allocation1 + $0x5] ss:$9 sm:$0xff] %v2811_v48 }
 0x60d   :  { %3662 = vst [vmem:[#allocation1 + $0x6] ss:$9 sm:$0xff] %v2812_v4  ;;  %v2740_v4 = vld [vmem:[#allocation2 + $0x39] sm:$0x1] }
 0x60e   :  { %3664 = vst [vmem:[#allocation1 + $0x7] ss:$9 sm:$0xff] %v2813_v12  ;;  %v2828_v12 = vrot.slane %v2741_v58, 1 }
 0x615   :  { %v3665_v41 = vld [vmem:[#allocation1] sm:$0xff] }
 0x616   :  { %3840 = vrot.lane.b32.xlu1 %v3665_v41, %s6971_s28  ;;  %3666 = vst [vmem:[#allocation1] ss:$9 sm:$0xff] %v2736_v2  ;;  %v2831_v2 = vrot.slane %v2741_v58, 4  ;;  %v2743_v41 = vld [vmem:[#allocation2 + $0x51] sm:$0xff] }
 0x617   :  { %3667 = vst [vmem:[#allocation1 + $0x1] ss:$9 sm:$0xff] %v2737_v25  ;;  %v2830_v25 = vrot.slane %v2741_v58, 3 }
 0x618   :  { %3668 = vst [vmem:[#allocation1 + $0x2] ss:$9 sm:$0xff] %v2814_v26  ;;  %v2833_v26 = vrot.slane %v2741_v58, 6 }
 0x619   :  { %3669 = vst [vmem:[#allocation1 + $0x3] ss:$9 sm:$0xff] %v2815_v46  ;;  %v2834_v46 = vrot.slane %v2741_v58, 7 }
 0x61a   :  { %3670 = vst [vmem:[#allocation1 + $0x4] ss:$9 sm:$0xff] %v2816_v1 }
 0x61b   :  { %3671 = vst [vmem:[#allocation1 + $0x5] ss:$9 sm:$0xff] %v2817_v23  ;;  %v2742_v23 = vld [vmem:[#allocation2 + $0x49] sm:$0x1] }
 0x61c   :  { %3672 = vst [vmem:[#allocation1 + $0x6] ss:$9 sm:$0xff] %v2818_v20  ;;  %v2835_v20 = vrot.slane %v2743_v41, 1 }
 0x61d   :  { %3673 = vst [vmem:[#allocation1 + $0x7] ss:$9 sm:$0xff] %v2819_v9  ;;  %v2837_v9 = vrot.slane %v2743_v41, 3 }
 0x61e   :  { %3597 = vrot.lane.b32.xlu1 %v11100_v51, %s6970_s27  ;;  %v2826_v51 = vrot.slane %v2739_v37, 6 }
 0x624   :  { %v3674_v34 = vld [vmem:[#allocation1] sm:$0xff] }
 0x625   :  { %3842 = vrot.lane.b32.xlu2 %v3674_v34, %s6971_s28  ;;  %3675 = vst [vmem:[#allocation1] ss:$9 sm:$0xff] %v2820_v29  ;;  %v2840_v29 = vrot.slane %v2743_v41, 6  ;;  %v2745_v34 = vld [vmem:[#allocation2 + $0x61] sm:$0xff] }
 0x626   :  { %3676 = vst [vmem:[#allocation1 + $0x1] ss:$9 sm:$0xff] %v2738_v31  ;;  %3599 = vrot.lane.b32.xlu1 %v11102_v53, %s6970_s27  ;;  %v2829_v53 = vrot.slane %v2741_v58, 2 }
 0x627   :  { %3677 = vst [vmem:[#allocation1 + $0x2] ss:$9 sm:$0xff] %v2739_v37  ;;  %v2839_v37 = vrot.slane %v2743_v41, 5 }
 0x628   :  { %3678 = vst [vmem:[#allocation1 + $0x3] ss:$9 sm:$0xff] %v2821_v15  ;;  %v2841_v15 = vrot.slane %v2743_v41, 7 }
 0x629   :  { %3679 = vst [vmem:[#allocation1 + $0x4] ss:$9 sm:$0xff] %v2822_v49  ;;  %v2744_v49 = vld [vmem:[#allocation2 + $0x59] sm:$0x1] }
 0x62a   :  { %3680 = vst [vmem:[#allocation1 + $0x5] ss:$9 sm:$0xff] %v2823_v10  ;;  %v2843_v10 = vrot.slane %v2745_v34, 2 }
 0x62b   :  { %3681 = vst [vmem:[#allocation1 + $0x6] ss:$9 sm:$0xff] %v2824_v21  ;;  %v2844_v21 = vrot.slane %v2745_v34, 3 }
 0x62c   :  { %3682 = vst [vmem:[#allocation1 + $0x7] ss:$9 sm:$0xff] %v2825_v43  ;;  %v2845_v43 = vrot.slane %v2745_v34, 4 }
 0x62e   :  { %3348 = vrot.lane.b32.xlu1 %v11061_v39, %s6969_s0  ;;  %v2832_v39 = vrot.slane %v2741_v58, 5 }
 0x633   :  { %v3683_v48 = vld [vmem:[#allocation1] sm:$0xff] }
 0x634   :  { %3844 = vrot.lane.b32.xlu2 %v3683_v48, %s6971_s28  ;;  %3684 = vst [vmem:[#allocation1] ss:$9 sm:$0xff] %v2826_v51  ;;  %v2846_v51 = vrot.slane %v2745_v34, 5  ;;  %v2747_v48 = vld [vmem:[#allocation2 + $0x71] sm:$0xff] }
 0x635   :  { %3685 = vst [vmem:[#allocation1 + $0x1] ss:$9 sm:$0xff] %v2827_v32  ;;  %v2847_v32 = vrot.slane %v2745_v34, 6 }
 0x636   :  { %3686 = vst [vmem:[#allocation1 + $0x2] ss:$9 sm:$0xff] %v2740_v4  ;;  %3350 = vrot.lane.b32.xlu1 %v11063_v59, %s6969_s0  ;;  %v2836_v59 = vrot.slane %v2743_v41, 2  ;;  %v2848_v4 = vrot.slane %v2745_v34, 7 }
 0x637   :  { %3687 = vst [vmem:[#allocation1 + $0x3] ss:$9 sm:$0xff] %v2741_v58 }
 0x638   :  { %3688 = vst [vmem:[#allocation1 + $0x4] ss:$9 sm:$0xff] %v2828_v12  ;;  %v2746_v12 = vld [vmem:[#allocation2 + $0x69] sm:$0x1] }
 0x639   :  { %3689 = vst [vmem:[#allocation1 + $0x5] ss:$9 sm:$0xff] %v2829_v53  ;;  %v2849_v53 = vrot.slane %v2747_v48, 1 }
 0x63a   :  { %3690 = vst [vmem:[#allocation1 + $0x6] ss:$9 sm:$0xff] %v2830_v25 }
 0x63b   :  { %3691 = vst [vmem:[#allocation1 + $0x7] ss:$9 sm:$0xff] %v2831_v2  ;;  %v2850_v2 = vrot.slane %v2747_v48, 2 }
 0x63e   :  { %3352 = vrot.lane.b32.xlu1 %v11065_v24, %s6969_s0  ;;  %v2838_v24 = vrot.slane %v2743_v41, 4 }
 0x642   :  { %v3692_v1 = vld [vmem:[#allocation1] sm:$0xff] }
 0x643   :  { %3846 = vrot.lane.b32.xlu2 %v3692_v1, %s6971_s28  ;;  %3693 = vst [vmem:[#allocation1] ss:$9 sm:$0xff] %v2832_v39  ;;  %v2851_v39 = vrot.slane %v2747_v48, 3  ;;  %v2855_v1 = vrot.slane %v2747_v48, 7 }
 0x644   :  { %3694 = vst [vmem:[#allocation1 + $0x1] ss:$9 sm:$0xff] %v2833_v26  ;;  %v2852_v26 = vrot.slane %v2747_v48, 4 }
 0x645   :  { %3695 = vst [vmem:[#allocation1 + $0x2] ss:$9 sm:$0xff] %v2834_v46  ;;  %v2854_v46 = vrot.slane %v2747_v48, 6 }
 0x646   :  { %3696 = vst [vmem:[#allocation1 + $0x3] ss:$9 sm:$0xff] %v2742_v23  ;;  %3627 = vrot.lane.b32.xlu1 %v11130_v19, %s6970_s27  ;;  %v2842_v19 = vrot.slane %v2745_v34, 1  ;;  %v2748_v23 = vld [vmem:[#allocation2 + $0x79] sm:$0x1] }
 0x647   :  { %3697 = vst [vmem:[#allocation1 + $0x4] ss:$9 sm:$0xff] %v2743_v41  ;;  %v2853_v41 = vrot.slane %v2747_v48, 5 }
 0x648   :  { %3698 = vst [vmem:[#allocation1 + $0x5] ss:$9 sm:$0xff] %v2835_v20  ;;  %v2749_v20 = vld [vmem:[#allocation2 + $0x81] sm:$0xff] }
 0x649   :  { %3699 = vst [vmem:[#allocation1 + $0x6] ss:$9 sm:$0xff] %v2836_v59  ;;  %v2856_v59 = vrot.slane %v2749_v20, 1 }
 0x64a   :  { %3700 = vst [vmem:[#allocation1 + $0x7] ss:$9 sm:$0xff] %v2837_v9  ;;  %v2857_v9 = vrot.slane %v2749_v20, 2 }
 0x651   :  { %v3701_v31 = vld [vmem:[#allocation1] sm:$0xff] }
 0x652   :  { %3848 = vrot.lane.b32.xlu2 %v3701_v31, %s6971_s28  ;;  %3702 = vst [vmem:[#allocation1] ss:$9 sm:$0xff] %v2838_v24  ;;  %v2858_v24 = vrot.slane %v2749_v20, 3  ;;  %v2860_v31 = vrot.slane %v2749_v20, 5 }
 0x653   :  { %3703 = vst [vmem:[#allocation1 + $0x1] ss:$9 sm:$0xff] %v2839_v37 }
 0x654   :  { %3704 = vst [vmem:[#allocation1 + $0x2] ss:$9 sm:$0xff] %v2840_v29  ;;  %v2859_v29 = vrot.slane %v2749_v20, 4 }
 0x655   :  { %3705 = vst [vmem:[#allocation1 + $0x3] ss:$9 sm:$0xff] %v2841_v15  ;;  %v2862_v15 = vrot.slane %v2749_v20, 7 }
 0x656   :  { %3706 = vst [vmem:[#allocation1 + $0x4] ss:$9 sm:$0xff] %v2744_v49  ;;  %v2750_v49 = vld [vmem:[#allocation2 + $0x89] sm:$0x1] }
 0x657   :  { %3707 = vst [vmem:[#allocation1 + $0x5] ss:$9 sm:$0xff] %v2745_v34  ;;  %v2861_v34 = vrot.slane %v2749_v20, 6 }
 0x658   :  { %3708 = vst [vmem:[#allocation1 + $0x6] ss:$9 sm:$0xff] %v2842_v19  ;;  %v2751_v19 = vld [vmem:[#allocation2 + $0x91] sm:$0xff] }
 0x659   :  { %3709 = vst [vmem:[#allocation1 + $0x7] ss:$9 sm:$0xff] %v2843_v10  ;;  %v2863_v10 = vrot.slane %v2751_v19, 1 }
 0x660   :  { %v3710_v58 = vld [vmem:[#allocation1] sm:$0xff] }
 0x661   :  { %3850 = vrot.lane.b32.xlu2 %v3710_v58, %s6971_s28  ;;  %3711 = vst [vmem:[#allocation1] ss:$9 sm:$0xff] %v2844_v21  ;;  %v2864_v21 = vrot.slane %v2751_v19, 2  ;;  %v2866_v58 = vrot.slane %v2751_v19, 4 }
 0x662   :  { %3712 = vst [vmem:[#allocation1 + $0x1] ss:$9 sm:$0xff] %v2845_v43  ;;  %v2865_v43 = vrot.slane %v2751_v19, 3 }
 0x663   :  { %3713 = vst [vmem:[#allocation1 + $0x2] ss:$9 sm:$0xff] %v2846_v51 }
 0x664   :  { %3714 = vst [vmem:[#allocation1 + $0x3] ss:$9 sm:$0xff] %v2847_v32  ;;  %v2867_v32 = vrot.slane %v2751_v19, 5 }
 0x665   :  { %3715 = vst [vmem:[#allocation1 + $0x4] ss:$9 sm:$0xff] %v2848_v4  ;;  %v2869_v4 = vrot.slane %v2751_v19, 7 }
 0x666   :  { %3716 = vst [vmem:[#allocation1 + $0x5] ss:$9 sm:$0xff] %v2746_v12  ;;  %v2753_v12 = vld [vmem:[#allocation2 + $0xb1] sm:$0xff] }
 0x667   :  { %3717 = vst [vmem:[#allocation1 + $0x6] ss:$9 sm:$0xff] %v2747_v48  ;;  %v2868_v48 = vrot.slane %v2751_v19, 6 }
 0x668   :  { %3718 = vst [vmem:[#allocation1 + $0x7] ss:$9 sm:$0xff] %v2849_v53  ;;  %v2752_v53 = vld [vmem:[#allocation2 + $0x99] sm:$0x1] }
 0x66f   :  { %v3719_v25 = vld [vmem:[#allocation1] sm:$0xff] }
 0x670   :  { %3852 = vrot.lane.b32.xlu2 %v3719_v25, %s6971_s28  ;;  %3720 = vst [vmem:[#allocation1] ss:$9 sm:$0xff] %v2850_v2  ;;  %v2870_v25 = vrot.slane %v2753_v12, 1  ;;  %v2871_v2 = vrot.slane %v2753_v12, 2 }
 0x671   :  { %3721 = vst [vmem:[#allocation1 + $0x1] ss:$9 sm:$0xff] %v2851_v39 }
 0x672   :  { %3722 = vst [vmem:[#allocation1 + $0x2] ss:$9 sm:$0xff] %v2852_v26  ;;  %v2872_v26 = vrot.slane %v2753_v12, 3 }
 0x673   :  { %3723 = vst [vmem:[#allocation1 + $0x3] ss:$9 sm:$0xff] %v2853_v41  ;;  %v2873_v41 = vrot.slane %v2753_v12, 4 }
 0x674   :  { %3724 = vst [vmem:[#allocation1 + $0x4] ss:$9 sm:$0xff] %v2854_v46  ;;  %v2874_v46 = vrot.slane %v2753_v12, 5 }
 0x675   :  { %3725 = vst [vmem:[#allocation1 + $0x5] ss:$9 sm:$0xff] %v2855_v1  ;;  %v2875_v1 = vrot.slane %v2753_v12, 6 }
 0x676   :  { %3726 = vst [vmem:[#allocation1 + $0x6] ss:$9 sm:$0xff] %v2748_v23  ;;  %v2755_v23 = vld [vmem:[#allocation2 + $0xc1] sm:$0xff] }
 0x677   :  { %3727 = vst [vmem:[#allocation1 + $0x7] ss:$9 sm:$0xff] %v2749_v20  ;;  %v2876_v20 = vrot.slane %v2753_v12, 7 }
 0x67e   :  { %v3728_v37 = vld [vmem:[#allocation1] sm:$0xff] }
 0x67f   :  { %3854 = vrot.lane.b32.xlu2 %v3728_v37, %s6971_s28  ;;  %3729 = vst [vmem:[#allocation1] ss:$9 sm:$0xff] %v2856_v59  ;;  %v2754_v59 = vld [vmem:[#allocation2 + $0xb9] sm:$0x1]  ;;  %v2878_v37 = vrot.slane %v2755_v23, 2 }
 0x680   :  { %3730 = vst [vmem:[#allocation1 + $0x1] ss:$9 sm:$0xff] %v2857_v9  ;;  %v2877_v9 = vrot.slane %v2755_v23, 1 }
 0x681   :  { %3731 = vst [vmem:[#allocation1 + $0x2] ss:$9 sm:$0xff] %v2858_v24 }
 0x682   :  { %3732 = vst [vmem:[#allocation1 + $0x3] ss:$9 sm:$0xff] %v2859_v29  ;;  %v2879_v29 = vrot.slane %v2755_v23, 3 }
 0x683   :  { %3733 = vst [vmem:[#allocation1 + $0x4] ss:$9 sm:$0xff] %v2860_v31  ;;  %v2880_v31 = vrot.slane %v2755_v23, 4 }
 0x684   :  { %3734 = vst [vmem:[#allocation1 + $0x5] ss:$9 sm:$0xff] %v2861_v34  ;;  %v2881_v34 = vrot.slane %v2755_v23, 5 }
 0x685   :  { %3735 = vst [vmem:[#allocation1 + $0x6] ss:$9 sm:$0xff] %v2862_v15  ;;  %v2882_v15 = vrot.slane %v2755_v23, 6 }
 0x686   :  { %3736 = vst [vmem:[#allocation1 + $0x7] ss:$9 sm:$0xff] %v2750_v49  ;;  %v2757_v49 = vld [vmem:[#allocation2 + $0xd1] sm:$0xff] }
 0x68d   :  { %v3737_v51 = vld [vmem:[#allocation1] sm:$0xff] }
 0x68e   :  { %3738 = vst [vmem:[#allocation1] ss:$9 sm:$0xff] %v2751_v19  ;;  %3856 = vrot.lane.b32.xlu2 %v3737_v51, %s6971_s28  ;;  %v2883_v19 = vrot.slane %v2755_v23, 7  ;;  %v2885_v51 = vrot.slane %v2757_v49, 2 }
 0x68f   :  { %3739 = vst [vmem:[#allocation1 + $0x1] ss:$9 sm:$0xff] %v2863_v10  ;;  %v2756_v10 = vld [vmem:[#allocation2 + $0xc9] sm:$0x1] }
 0x690   :  { %3740 = vst [vmem:[#allocation1 + $0x2] ss:$9 sm:$0xff] %v2864_v21 }
 0x691   :  { %3741 = vst [vmem:[#allocation1 + $0x3] ss:$9 sm:$0xff] %v2865_v43  ;;  %v2884_v43 = vrot.slane %v2757_v49, 1 }
 0x692   :  { %3742 = vst [vmem:[#allocation1 + $0x4] ss:$9 sm:$0xff] %v2866_v58  ;;  %v2886_v58 = vrot.slane %v2757_v49, 3 }
 0x693   :  { %3743 = vst [vmem:[#allocation1 + $0x5] ss:$9 sm:$0xff] %v2867_v32  ;;  %v2887_v32 = vrot.slane %v2757_v49, 4 }
 0x694   :  { %3744 = vst [vmem:[#allocation1 + $0x6] ss:$9 sm:$0xff] %v2868_v48  ;;  %v2888_v48 = vrot.slane %v2757_v49, 5 }
 0x695   :  { %3745 = vst [vmem:[#allocation1 + $0x7] ss:$9 sm:$0xff] %v2869_v4  ;;  %v2889_v4 = vrot.slane %v2757_v49, 6 }
 0x69c   :  { %v3746_v39 = vld [vmem:[#allocation1] sm:$0xff] }
 0x69d   :  { %3747 = vst [vmem:[#allocation1] ss:$9 sm:$0xff] %v2752_v53  ;;  %3858 = vrot.lane.b32.xlu2 %v3746_v39, %s6971_s28  ;;  %v2890_v53 = vrot.slane %v2757_v49, 7 }
 0x69e   :  { %3748 = vst [vmem:[#allocation1 + $0x1] ss:$9 sm:$0xff] %v2753_v12  ;;  %v2759_v12 = vld [vmem:[#allocation2 + $0xe1] sm:$0xff] }
 0x69f   :  { %3749 = vst [vmem:[#allocation1 + $0x2] ss:$9 sm:$0xff] %v2870_v25  ;;  %v2891_v39 = vrot.slane %v2759_v12, 1 }
 0x6a0   :  { %3750 = vst [vmem:[#allocation1 + $0x3] ss:$9 sm:$0xff] %v2871_v2  ;;  %v2758_v2 = vld [vmem:[#allocation2 + $0xd9] sm:$0x1] }
 0x6a1   :  { %3751 = vst [vmem:[#allocation1 + $0x4] ss:$9 sm:$0xff] %v2872_v26  ;;  %v2892_v26 = vrot.slane %v2759_v12, 2 }
 0x6a2   :  { %3752 = vst [vmem:[#allocation1 + $0x5] ss:$9 sm:$0xff] %v2873_v41  ;;  %v2893_v41 = vrot.slane %v2759_v12, 3 }
 0x6a3   :  { %3753 = vst [vmem:[#allocation1 + $0x6] ss:$9 sm:$0xff] %v2874_v46  ;;  %v2894_v46 = vrot.slane %v2759_v12, 4 }
 0x6a4   :  { %3754 = vst [vmem:[#allocation1 + $0x7] ss:$9 sm:$0xff] %v2875_v1  ;;  %v2895_v1 = vrot.slane %v2759_v12, 5 }
 0x6ab   :  { %v3755_v24 = vld [vmem:[#allocation1] sm:$0xff] }
 0x6ac   :  { %3756 = vst [vmem:[#allocation1] ss:$9 sm:$0xff] %v2876_v20  ;;  %3860 = vrot.lane.b32.xlu2 %v3755_v24, %s6971_s28  ;;  %v2761_v20 = vld [vmem:[#allocation2 + $0xf1] sm:$0xff]  ;;  %v2760_v24 = vld [vmem:[#allocation2 + $0xe9] sm:$0x1] }
 0x6ad   :  { %3757 = vst [vmem:[#allocation1 + $0x1] ss:$9 sm:$0xff] %v2754_v59  ;;  %v2897_v59 = vrot.slane %v2759_v12, 7 }
 0x6ae   :  { %3758 = vst [vmem:[#allocation1 + $0x2] ss:$9 sm:$0xff] %v2755_v23  ;;  %v2896_v23 = vrot.slane %v2759_v12, 6 }
 0x6af   :  { %3759 = vst [vmem:[#allocation1 + $0x3] ss:$9 sm:$0xff] %v2877_v9 }
 0x6b0   :  { %3760 = vst [vmem:[#allocation1 + $0x4] ss:$9 sm:$0xff] %v2878_v37  ;;  %v2898_v37 = vrot.slane %v2761_v20, 1 }
 0x6b1   :  { %3761 = vst [vmem:[#allocation1 + $0x5] ss:$9 sm:$0xff] %v2879_v29  ;;  %v2899_v29 = vrot.slane %v2761_v20, 2 }
 0x6b2   :  { %3762 = vst [vmem:[#allocation1 + $0x6] ss:$9 sm:$0xff] %v2880_v31  ;;  %v2900_v31 = vrot.slane %v2761_v20, 3 }
 0x6b3   :  { %3763 = vst [vmem:[#allocation1 + $0x7] ss:$9 sm:$0xff] %v2881_v34  ;;  %v2901_v34 = vrot.slane %v2761_v20, 4 }
 0x6ba   :  { %v3764_v21 = vld [vmem:[#allocation1] sm:$0xff] }
 0x6bb   :  { %3765 = vst [vmem:[#allocation1] ss:$9 sm:$0xff] %v2882_v15  ;;  %3862 = vrot.lane.b32.xlu2 %v3764_v21, %s6971_s28  ;;  %v2902_v15 = vrot.slane %v2761_v20, 5  ;;  %v2904_v21 = vrot.slane %v2761_v20, 7 }
 0x6bc   :  { %3766 = vst [vmem:[#allocation1 + $0x1] ss:$9 sm:$0xff] %v2883_v19 }
 0x6bd   :  { %3767 = vst [vmem:[#allocation1 + $0x2] ss:$9 sm:$0xff] %v2756_v10  ;;  %v2763_v10 = vld [vmem:[#allocation2 + $0x101] sm:$0xff] }
 0x6be   :  { %3768 = vst [vmem:[#allocation1 + $0x3] ss:$9 sm:$0xff] %v2757_v49  ;;  %v2903_v49 = vrot.slane %v2761_v20, 6 }
 0x6bf   :  { %3769 = vst [vmem:[#allocation1 + $0x4] ss:$9 sm:$0xff] %v2884_v43  ;;  %v3335_v43 = vpop.permute.xlu0 %3334 }
 0x6c0   :  { %3770 = vst [vmem:[#allocation1 + $0x5] ss:$9 sm:$0xff] %v2885_v51  ;;  %v2762_v51 = vld [vmem:[#allocation2 + $0xf9] sm:$0x1] }
 0x6c1   :  { %3771 = vst [vmem:[#allocation1 + $0x6] ss:$9 sm:$0xff] %v2886_v58  ;;  %v11205_v58 = vpop.permute.xlu2 %3589 }
 0x6c2   :  { %3772 = vst [vmem:[#allocation1 + $0x7] ss:$9 sm:$0xff] %v2887_v32  ;;  %v2905_v32 = vrot.slane %v2763_v10, 1 }
 0x6c9   :  { %v3773_v25 = vld [vmem:[#allocation1] sm:$0xff] }
 0x6ca   :  { %3774 = vst [vmem:[#allocation1] ss:$9 sm:$0xff] %v2888_v48  ;;  %3864 = vrot.lane.b32.xlu2 %v3773_v25, %s6971_s28  ;;  %v11207_v48 = vpop.permute.xlu1 %3336  ;;  %v11211_v25 = vpop.permute.xlu2 %3621 }
 0x6cb   :  { %3775 = vst [vmem:[#allocation1 + $0x1] ss:$9 sm:$0xff] %v2889_v4  ;;  %v11209_v4 = vpop.permute.xlu0 %3338 }
 0x6cc   :  { %3776 = vst [vmem:[#allocation1 + $0x2] ss:$9 sm:$0xff] %v2890_v53  ;;  %v2907_v53 = vrot.slane %v2763_v10, 3 }
 0x6cd   :  { %3777 = vst [vmem:[#allocation1 + $0x3] ss:$9 sm:$0xff] %v2758_v2  ;;  %v2908_v2 = vrot.slane %v2763_v10, 4 }
 0x6ce   :  { %3778 = vst [vmem:[#allocation1 + $0x4] ss:$9 sm:$0xff] %v2759_v12  ;;  %v2906_v12 = vrot.slane %v2763_v10, 2 }
 0x6cf   :  { %3779 = vst [vmem:[#allocation1 + $0x5] ss:$9 sm:$0xff] %v2891_v39 }
 0x6d0   :  { %3780 = vst [vmem:[#allocation1 + $0x6] ss:$9 sm:$0xff] %v2892_v26  ;;  %v2909_v26 = vrot.slane %v2763_v10, 5 }
 0x6d1   :  { %3781 = vst [vmem:[#allocation1 + $0x7] ss:$9 sm:$0xff] %v2893_v41 }
 0x6d2   :  { %v11213_v39 = vpop.permute.xlu1 %3591 }
 0x6d8   :  { %v3782_v9 = vld [vmem:[#allocation1] sm:$0xff] }
 0x6d9   :  { %3783 = vst [vmem:[#allocation1] ss:$9 sm:$0xff] %v2894_v46  ;;  %3866 = vrot.lane.b32.xlu2 %v3782_v9, %s6971_s28  ;;  %v2910_v46 = vrot.slane %v2763_v10, 6  ;;  %v11218_v9 = vpop.permute.xlu2 %3623 }
 0x6da   :  { %3784 = vst [vmem:[#allocation1 + $0x1] ss:$9 sm:$0xff] %v2895_v1  ;;  %v2911_v1 = vrot.slane %v2763_v10, 7 }
 0x6db   :  { %3785 = vst [vmem:[#allocation1 + $0x2] ss:$9 sm:$0xff] %v2896_v23  ;;  %v2764_v23 = vld [vmem:[#allocation2 + $0x109] sm:$0x1] }
 0x6dc   :  { %3786 = vst [vmem:[#allocation1 + $0x3] ss:$9 sm:$0xff] %v2897_v59  ;;  %v11216_v59 = vpop.permute.xlu0 %3340 }
 0x6dd   :  { %3787 = vst [vmem:[#allocation1 + $0x4] ss:$9 sm:$0xff] %v2760_v24  ;;  %v11220_v24 = vpop.permute.xlu1 %3593 }
 0x6de   :  { %3788 = vst [vmem:[#allocation1 + $0x5] ss:$9 sm:$0xff] %v2761_v20  ;;  %v2765_v20 = vld [vmem:[#allocation2 + $0x111] sm:$0xff] }
 0x6df   :  { %3789 = vst [vmem:[#allocation1 + $0x6] ss:$9 sm:$0xff] %v2898_v37  ;;  %v2912_v37 = vrot.slane %v2765_v20, 1 }
 0x6e0   :  { %3790 = vst [vmem:[#allocation1 + $0x7] ss:$9 sm:$0xff] %v2899_v29  ;;  %v2913_v29 = vrot.slane %v2765_v20, 2 }
 0x6e7   :  { %v3791_v19 = vld [vmem:[#allocation1] sm:$0xff] }
 0x6e8   :  { %3792 = vst [vmem:[#allocation1] ss:$9 sm:$0xff] %v2900_v31  ;;  %3868 = vrot.lane.b32.xlu2 %v3791_v19, %s6971_s28  ;;  %v2914_v31 = vrot.slane %v2765_v20, 3  ;;  %v11223_v19 = vpop.permute.xlu0 %3342 }
 0x6e9   :  { %3793 = vst [vmem:[#allocation1 + $0x1] ss:$9 sm:$0xff] %v2901_v34  ;;  %v2915_v34 = vrot.slane %v2765_v20, 4 }
 0x6ea   :  { %3794 = vst [vmem:[#allocation1 + $0x2] ss:$9 sm:$0xff] %v2902_v15 }
 0x6eb   :  { %3795 = vst [vmem:[#allocation1 + $0x3] ss:$9 sm:$0xff] %v2903_v49  ;;  %v2916_v49 = vrot.slane %v2765_v20, 5 }
 0x6ec   :  { %3796 = vst [vmem:[#allocation1 + $0x4] ss:$9 sm:$0xff] %v2904_v21  ;;  %v2918_v21 = vrot.slane %v2765_v20, 7 }
 0x6ed   :  { %3797 = vst [vmem:[#allocation1 + $0x5] ss:$9 sm:$0xff] %v2762_v51  ;;  %v11225_v51 = vpop.permute.xlu2 %3625 }
 0x6ee   :  { %3798 = vst [vmem:[#allocation1 + $0x6] ss:$9 sm:$0xff] %v2763_v10  ;;  %v2917_v10 = vrot.slane %v2765_v20, 6 }
 0x6ef   :  { %3799 = vst [vmem:[#allocation1 + $0x7] ss:$9 sm:$0xff] %v2905_v32  ;;  %v2766_v32 = vld [vmem:[#allocation2 + $0x119] sm:$0x1] }
 0x6f6   :  { %v3800_v41 = vld [vmem:[#allocation1] sm:$0xff] }
 0x6f7   :  { %3801 = vst [vmem:[#allocation1] ss:$9 sm:$0xff] %v2906_v12  ;;  %3870 = vrot.lane.b32.xlu2 %v3800_v41, %s6971_s28  ;;  %v11227_v12 = vpop.permute.xlu1 %3595 }
 0x6f8   :  { %3802 = vst [vmem:[#allocation1 + $0x1] ss:$9 sm:$0xff] %v2907_v53  ;;  %v3903_v53 = vsel %vm1691_vm0, %v11010_v38, %v3335_v43 }
 0x6f9   :  { %3803 = vst [vmem:[#allocation1 + $0x2] ss:$9 sm:$0xff] %v2908_v2  ;;  %v2767_v2 = vld [vmem:[#allocation2 + $0x121] sm:$0xff] }
 0x6fa   :  { %3804 = vst [vmem:[#allocation1 + $0x3] ss:$9 sm:$0xff] %v2909_v26  ;;  %v3588_v26 = vpop.permute.xlu0 %3587  ;;  %v2922_v43 = vrot.slane %v2767_v2, 4 }
 0x6fb   :  { %3805 = vst [vmem:[#allocation1 + $0x4] ss:$9 sm:$0xff] %v2910_v46  ;;  %v3925_v41 = vsel %vm3924_vm9, %v3903_v53, %v3588_v26  ;;  %v2919_v46 = vrot.slane %v2767_v2, 1 }
 0x6fc   :  { %3806 = vst [vmem:[#allocation1 + $0x5] ss:$9 sm:$0xff] %v2911_v1  ;;  %v2920_v1 = vrot.slane %v2767_v2, 2 }
 0x6fd   :  { %3807 = vst [vmem:[#allocation1 + $0x6] ss:$9 sm:$0xff] %v2764_v23  ;;  %v3971_v23 = vld [vmem:[%s12496_s1 + $0x8] sm:$0xff] }
 0x6fe   :  { %3808 = vst [vmem:[#allocation1 + $0x7] ss:$9 sm:$0xff] %v2765_v20  ;;  %v11235_v20 = vpop.permute.xlu2 %3354  ;;  %4053 = vmatpush.msra.mxu0 %v3971_v23  ;;  %6858 = vmatpush.msra.mxu3 %v3971_v23 }
 0x6ff   :  { %v3841_v38 = vpop.permute.xlu1 %3840 }
 0x705   :  { %v3809_v15 = vld [vmem:[#allocation1] sm:$0xff] }
 0x706   :  { %3810 = vst [vmem:[#allocation1] ss:$9 sm:$0xff] %v2912_v37  ;;  %3872 = vrot.lane.b32.xlu2 %v3809_v15, %s6971_s28  ;;  %v3970_v37 = vld [vmem:[%s12496_s1] sm:$0xff]  ;;  %v2923_v15 = vrot.slane %v2767_v2, 5  ;;  %v3843_v53 = vpop.permute.xlu2 %3842 }
 0x707   :  { %3811 = vst [vmem:[#allocation1 + $0x1] ss:$9 sm:$0xff] %v2913_v29  ;;  %4054 = vmatpush.msra.mxu0 %v3970_v37  ;;  %6859 = vmatpush.msra.mxu3 %v3970_v37 }
 0x708   :  { %3812 = vst [vmem:[#allocation1 + $0x2] ss:$9 sm:$0xff] %v2914_v31  ;;  %v2921_v31 = vrot.slane %v2767_v2, 3 }
 0x709   :  { %3813 = vst [vmem:[#allocation1 + $0x3] ss:$9 sm:$0xff] %v2915_v34  ;;  %v3947_v34 = vsel %vm3946_vm10, %v3925_v41, %v3841_v38  ;;  %v3345_v41 = vpop.permute.xlu0 %3344  ;;  %v3906_v38 = vsel %vm1691_vm0, %v11016_v28, %v11216_v59  ;;  %v2770_v59 = vld [vmem:[#allocation2 + $0x139] sm:$0x1] }
 0x70a   :  { %3814 = vst [vmem:[#allocation1 + $0x4] ss:$9 sm:$0xff] %v2916_v49  ;;  %v3904_v49 = vsel %vm1691_vm0, %v11012_v13, %v11207_v48  ;;  %6812 = vmatmul.msk.f32.vlgmr.msra.gmra.mxu0 %vm3972_vm11, %v3947_v34  ;;  %v3905_v13 = vsel %vm1691_vm0, %v11014_v47, %v11209_v4  ;;  %v2769_v48 = vld [vmem:[#allocation2 + $0x131] sm:$0xff] }
 0x70b   :  { %3815 = vst [vmem:[#allocation1 + $0x5] ss:$9 sm:$0xff] %v2917_v10  ;;  %v2924_v10 = vrot.slane %v2767_v2, 6  ;;  %v2927_v23 = vrot.slane %v2769_v48, 2  ;;  %v2928_v37 = vrot.slane %v2769_v48, 3  ;;  %v2930_v4 = vrot.slane %v2769_v48, 5 }
 0x70c   :  { %3816 = vst [vmem:[#allocation1 + $0x6] ss:$9 sm:$0xff] %v2918_v21  ;;  %v2925_v21 = vrot.slane %v2767_v2, 7  ;;  %v2932_v28 = vrot.slane %v2769_v48, 7 }
 0x70d   :  { %3817 = vst [vmem:[#allocation1 + $0x7] ss:$9 sm:$0xff] %v2766_v32  ;;  %v3926_v32 = vsel %vm3924_vm9, %v3904_v49, %v11205_v58 }
 0x70e   :  { %v3948_v26 = vsel %vm3946_vm10, %v3926_v32, %v3843_v53 }
 0x711   :  { %v3347_v34 = vpop.permute.xlu0 %3346 }
 0x712   :  { %6813 = vmatmul.msk.f32.gmra.mxu0 %vm3972_vm11, %v3948_v26 }
 0x714   :  { %v3818_v29 = vld [vmem:[#allocation1] sm:$0xff] }
 0x715   :  { %3874 = vrot.lane.b32.xlu1 %v3818_v29, %s6971_s28  ;;  %3819 = vst [vmem:[#allocation1] ss:$9 sm:$0xff] %v2767_v2  ;;  %v2768_v2 = vld [vmem:[#allocation2 + $0x129] sm:$0x1]  ;;  %v3845_v29 = vpop.permute.xlu2 %3844 }
 0x716   :  { %3820 = vst [vmem:[#allocation1 + $0x1] ss:$9 sm:$0xff] %v2919_v46  ;;  %v3927_v46 = vsel %vm3924_vm9, %v3905_v13, %v11213_v39  ;;  %v3928_v39 = vsel %vm3924_vm9, %v3906_v38, %v11220_v24  ;;  %v3598_v13 = vpop.permute.xlu1 %3597 }
 0x717   :  { %3821 = vst [vmem:[#allocation1 + $0x2] ss:$9 sm:$0xff] %v2920_v1  ;;  %v2926_v1 = vrot.slane %v2769_v48, 1  ;;  %v3949_v47 = vsel %vm3946_vm10, %v3927_v46, %v3845_v29 }
 0x718   :  { %3822 = vst [vmem:[#allocation1 + $0x3] ss:$9 sm:$0xff] %v2921_v31  ;;  %v2929_v31 = vrot.slane %v2769_v48, 4 }
 0x719   :  { %3823 = vst [vmem:[#allocation1 + $0x4] ss:$9 sm:$0xff] %v2922_v43  ;;  %v2931_v43 = vrot.slane %v2769_v48, 6  ;;  %v3369_v53 = vpop.permute.xlu0 %3368 }
 0x71a   :  { %3824 = vst [vmem:[#allocation1 + $0x5] ss:$9 sm:$0xff] %v2923_v15  ;;  %6814 = vmatmul.msk.f32.gmra.mxu0 %vm3972_vm11, %v3949_v47 }
 0x71b   :  { %3825 = vst [vmem:[#allocation1 + $0x6] ss:$9 sm:$0xff] %v2924_v10  ;;  %v3907_v10 = vsel %vm1691_vm0, %v11018_v35, %v11223_v19 }
 0x71c   :  { %3826 = vst [vmem:[#allocation1 + $0x7] ss:$9 sm:$0xff] %v2925_v21  ;;  %v3929_v21 = vsel %vm3924_vm9, %v3907_v10, %v11227_v12  ;;  %v3908_v12 = vsel %vm1691_vm0, %v11020_v0, %v3345_v41 }
 0x71d   :  { %v3847_v15 = vpop.permute.xlu2 %3846 }
 0x71e   :  { %v3950_v49 = vsel %vm3946_vm10, %v3928_v39, %v3847_v15  ;;  %v3600_v0 = vpop.permute.xlu1 %3599 }
 0x721   :  { %v3602_v19 = vpop.permute.xlu0 %3601 }
 0x722   :  { %6815 = vmatmul.msk.f32.gmra.mxu0 %vm3972_vm11, %v3950_v49 }
 0x723   :  { %v3827_v58 = vld [vmem:[#allocation1] sm:$0xff] }
 0x724   :  { %3876 = vrot.lane.b32.xlu1 %v3827_v58, %s6971_s28  ;;  %3828 = vst [vmem:[#allocation1] ss:$9 sm:$0xff] %v2768_v2  ;;  %v3930_v2 = vsel %vm3924_vm9, %v3908_v12, %v3598_v13 }
 0x725   :  { %3829 = vst [vmem:[#allocation1 + $0x1] ss:$9 sm:$0xff] %v2769_v48  ;;  %v3849_v24 = vpop.permute.xlu2 %3848 }
 0x726   :  { %3830 = vst [vmem:[#allocation1 + $0x2] ss:$9 sm:$0xff] %v2926_v1  ;;  %v3951_v26 = vsel %vm3946_vm10, %v3929_v21, %v3849_v24  ;;  %v3909_v1 = vsel %vm1691_vm0, %v11022_v63, %v3347_v34  ;;  %v3349_v63 = vpop.permute.xlu1 %3348 }
 0x727   :  { %3831 = vst [vmem:[#allocation1 + $0x3] ss:$9 sm:$0xff] %v2927_v23 }
 0x728   :  { %3832 = vst [vmem:[#allocation1 + $0x4] ss:$9 sm:$0xff] %v2928_v37 }
 0x729   :  { %3833 = vst [vmem:[#allocation1 + $0x5] ss:$9 sm:$0xff] %v2929_v31 }
 0x72a   :  { %3834 = vst [vmem:[#allocation1 + $0x6] ss:$9 sm:$0xff] %v2930_v4  ;;  %6816 = vmatmul.msk.f32.gmra.mxu0 %vm3972_vm11, %v3951_v26 }
 0x72b   :  { %3835 = vst [vmem:[#allocation1 + $0x7] ss:$9 sm:$0xff] %v2931_v43 }
 0x72d   :  { %v3851_v48 = vpop.permute.xlu2 %3850 }
 0x72e   :  { %v3952_v46 = vsel %vm3946_vm10, %v3930_v2, %v3851_v48 }
 0x732   :  { %v3836_v32 = vld [vmem:[#allocation1] sm:$0xff]  ;;  %6817 = vmatmul.msk.f32.gmra.mxu0 %vm3972_vm11, %v3952_v46 }
 0x733   :  { %3878 = vrot.lane.b32.xlu1 %v3836_v32, %s6971_s28  ;;  %3837 = vst [vmem:[#allocation1] ss:$9 sm:$0xff] %v2932_v28 }
 0x734   :  { %3838 = vst [vmem:[#allocation1 + $0x1] ss:$9 sm:$0xff] %v2770_v59 }
 0x73b   :  { %3607 = vrot.lane.b32.xlu1 %v11113_v57, %s6970_s27  ;;  %v3839_v35 = vld [vmem:[#allocation1] sm:$0xff]  ;;  %v3371_v57 = vpop.permute.xlu0 %3370 }
 0x73c   :  { %3880 = vrot.lane.b32.xlu0 %v3839_v35, %s6971_s28  ;;  %v3921_v15 = vsel %vm1691_vm0, %v11046_v52, %v3371_v57 }
 0x743   :  { %3609 = vrot.lane.b32.xlu1 %v11115_v36, %s6970_s27  ;;  %v3931_v36 = vsel %vm3924_vm9, %v3909_v1, %v3600_v0  ;;  %v3604_v58 = vpop.permute.xlu0 %3603 }
 0x744   :  { %3356 = vrot.lane.b32.xlu0 %v11069_v45, %s6969_s0  ;;  %v3853_v45 = vpop.permute.xlu2 %3852 }
 0x745   :  { %v3953_v41 = vsel %vm3946_vm10, %v3931_v36, %v3853_v45 }
 0x746   :  { %6818 = vmatmul.msk.f32.gmra.mxu0 %vm3972_vm11, %v3953_v41 }
 0x74b   :  { %3611 = vrot.lane.b32.xlu1 %v11117_v30, %s6970_s27 }
 0x74c   :  { %3358 = vrot.lane.b32.xlu0 %v11071_v11, %s6969_s0  ;;  %v3855_v30 = vpop.permute.xlu2 %3854  ;;  %v3910_v11 = vsel %vm1691_vm0, %v11024_v27, %v3349_v63 }
 0x74d   :  { %v3932_v23 = vsel %vm3924_vm9, %v3910_v11, %v3602_v19 }
 0x74e   :  { %v3954_v37 = vsel %vm3946_vm10, %v3932_v23, %v3855_v30 }
 0x74f   :  { %6819 = vmatmul.msk.f32.gmra.mxu0 %vm3972_vm11, %v3954_v37 }
 0x753   :  { %3613 = vrot.lane.b32.xlu1 %v11119_v60, %s6970_s27  ;;  %v3351_v60 = vpop.permute.xlu1 %3350 }
 0x754   :  { %3360 = vrot.lane.b32.xlu0 %v11073_v3, %s6969_s0  ;;  %v3857_v29 = vpop.permute.xlu2 %3856  ;;  %v3373_v3 = vpop.permute.xlu0 %3372  ;;  %v3911_v31 = vsel %vm1691_vm0, %v11026_v16, %v3351_v60 }
 0x755   :  { %v3933_v27 = vsel %vm3924_vm9, %v3911_v31, %v3604_v58 }
 0x756   :  { %v3955_v47 = vsel %vm3946_vm10, %v3933_v27, %v3857_v29 }
 0x757   :  { %6820 = vmatmul.msk.f32.gmra.mxu0 %vm3972_vm11, %v3955_v47 }
 0x75b   :  { %3615 = vrot.lane.b32.xlu1 %v11121_v18, %s6970_s27  ;;  %v3353_v18 = vpop.permute.xlu1 %3352 }
 0x75c   :  { %3362 = vrot.lane.b32.xlu0 %v11075_v61, %s6969_s0  ;;  %v3859_v61 = vpop.permute.xlu2 %3858  ;;  %v3606_v4 = vpop.permute.xlu0 %3605  ;;  %v3912_v38 = vsel %vm1691_vm0, %v11028_v62, %v3353_v18 }
 0x75d   :  { %v3934_v16 = vsel %vm3924_vm9, %v3912_v38, %v3606_v4 }
 0x75e   :  { %v3956_v43 = vsel %vm3946_vm10, %v3934_v16, %v3859_v61 }
 0x75f   :  { %6821 = vmatmul.msk.f32.gmra.mxu0 %vm3972_vm11, %v3956_v43 }
 0x763   :  { %3617 = vrot.lane.b32.xlu1 %v11123_v22, %s6970_s27  ;;  %v3628_v22 = vpop.permute.xlu1 %3627 }
 0x764   :  { %3364 = vrot.lane.b32.xlu0 %v11077_v54, %s6969_s0  ;;  %v3920_v54 = vsel %vm1691_vm0, %v11044_v44, %v3369_v53  ;;  %v3861_v28 = vpop.permute.xlu2 %3860  ;;  %v3375_v21 = vpop.permute.xlu0 %3374 }
 0x765   :  { %v3942_v62 = vsel %vm3924_vm9, %v3920_v54, %v11211_v25  ;;  %v3922_v25 = vsel %vm1691_vm0, %v11048_v55, %v3373_v3  ;;  %v3923_v24 = vsel %vm1691_vm0, %v11050_v6, %v3375_v21  ;;  %v3913_v55 = vsel %vm1691_vm0, %v11030_v14, %v11235_v20 }
 0x766   :  { %v3944_v52 = vsel %vm3924_vm9, %v3922_v25, %v11225_v51  ;;  %v3945_v35 = vsel %vm3924_vm9, %v3923_v24, %v3628_v22 }
 0x76b   :  { %3619 = vrot.lane.b32.xlu1 %v11125_v33, %s6970_s27  ;;  %v3943_v33 = vsel %vm3924_vm9, %v3921_v15, %v11218_v9 }
 0x76c   :  { %3366 = vrot.lane.b32.xlu0 %v11079_v42, %s6969_s0  ;;  %v3863_v53 = vpop.permute.xlu2 %3862  ;;  %s6547_s0 = sshll.u32 %s12502_s7, 4  ;;  %s6548_s0 = int_to_ptr.hbm [resolvable:$true] %s6547_s0 }
 0x774   :  { %v3865_v20 = vpop.permute.xlu2 %3864 }
 0x77c   :  { %v3867_v63 = vpop.permute.xlu2 %3866 }
 0x784   :  { %v3869_v29 = vpop.permute.xlu2 %3868 }
 0x787   :  { %v3875_v39 = vpop.permute.xlu1 %3874  ;;  %v4056_v10 = vpop.f32.mrf.mxu0 }
 0x788   :  { %v3964_v34 = vsel %vm3946_vm10, %v3942_v62, %v3875_v39 }
 0x789   :  { %6829 = vmatmul.msk.f32.vlgmr.msra.gmra.mxu3 %vm3972_vm11, %v3964_v34 }
 0x78c   :  { %v3871_v61 = vpop.permute.xlu2 %3870 }
 0x78e   :  { %4152 = vxpose.xlu0.b32.start [1/16] (narrow) %v4056_v10, 8 }
 0x78f   :  { %v4059_v44 = vpop.f32.mrf.mxu0 }
 0x794   :  { %v3873_v34 = vpop.permute.xlu2 %3872 }
 0x796   :  { %v3877_v49 = vpop.permute.xlu1 %3876  ;;  %4153 = vxpose.xlu0.b32.cont [2/16] (narrow) %v4059_v44, 8 }
 0x797   :  { %v3965_v42 = vsel %vm3946_vm10, %v3943_v33, %v3877_v49  ;;  %v4062_v9 = vpop.f32.mrf.mxu0 }
 0x798   :  { %6830 = vmatmul.msk.f32.gmra.mxu3 %vm3972_vm11, %v3965_v42 }
 0x79e   :  { %4154 = vxpose.xlu0.b32.cont [3/16] (narrow) %v4062_v9, 8 }
 0x79f   :  { %v4065_v48 = vpop.f32.mrf.mxu0 }
 0x7a5   :  { %v3879_v59 = vpop.permute.xlu1 %3878 }
 0x7a6   :  { %v3966_v32 = vsel %vm3946_vm10, %v3944_v52, %v3879_v59  ;;  %4155 = vxpose.xlu0.b32.cont [4/16] (narrow) %v4065_v48, 8 }
 0x7a7   :  { %6831 = vmatmul.msk.f32.gmra.mxu3 %vm3972_vm11, %v3966_v32  ;;  %v4068_v57 = vpop.f32.mrf.mxu0 }
 0x7ad   :  { %v3608_v26 = vpop.permute.xlu1 %3607 }
 0x7ae   :  { %v3935_v51 = vsel %vm3924_vm9, %v3913_v55, %v3608_v26  ;;  %v3881_v19 = vpop.permute.xlu0 %3880  ;;  %4156 = vxpose.xlu0.b32.cont [5/16] (narrow) %v4068_v57, 8 }
 0x7af   :  { %v3967_v12 = vsel %vm3946_vm10, %v3945_v35, %v3881_v19  ;;  %v3957_v13 = vsel %vm3946_vm10, %v3935_v51, %v3861_v28  ;;  %v4071_v30 = vpop.f32.mrf.mxu0 }
 0x7b0   :  { %6822 = vmatmul.msk.f32.gmra.mxu0 %vm3972_vm11, %v3957_v13  ;;  %v3969_v6 = vsel %vm3968_vm12, %v3967_v12, 0.0 }
 0x7b1   :  { %6832 = vmatmul.msk.f32.gmra.mxu3 %vm3972_vm11, %v3969_v6 }
 0x7b5   :  { %v3610_v2 = vpop.permute.xlu1 %3609 }
 0x7b6   :  { %v3357_v14 = vpop.permute.xlu0 %3356  ;;  %4157 = vxpose.xlu0.b32.cont [6/16] (narrow) %v4071_v30, 8 }
 0x7b7   :  { %v3914_v46 = vsel %vm1691_vm0, %v11032_v56, %v3357_v14 }
 0x7b8   :  { %v3936_v1 = vsel %vm3924_vm9, %v3914_v46, %v3610_v2  ;;  %v4222_v46 = vlaneseq }
 0x7b9   :  { %v3958_v0 = vsel %vm3946_vm10, %v3936_v1, %v3863_v53  ;;  %4118 = vmatmul.f32.gmra.mxu3 %v12798_v50 }
 0x7ba   :  { %6823 = vmatmul.msk.f32.gmra.mxu0 %vm3972_vm11, %v3958_v0  ;;  %v4223_v57 = vand.u32 127, %v4222_v46 }
 0x7bc   :  { %v11395_v1 = vadd.s32 128, %v4223_v57 }
 0x7bd   :  { %v3612_v45 = vpop.permute.xlu1 %3611 }
 0x7be   :  { %v3359_v36 = vpop.permute.xlu0 %3358  ;;  %14682 = vst [vmem:[#allocation53_spill] sm:$0xff] %v11395_v1  ;;  %vm4226_vm13 = vcmp.lt.s32.totalorder %v11395_v1, 162 }
 0x7bf   :  { %v3915_v41 = vsel %vm1691_vm0, %v11034_v17, %v3359_v36 }
 0x7c0   :  { %v3937_v58 = vsel %vm3924_vm9, %v3915_v41, %v3612_v45 }
 0x7c1   :  { %v3959_v56 = vsel %vm3946_vm10, %v3937_v58, %v3865_v20  ;;  %4121 = vmatmul.f32.gmra.mxu3 %v12798_v50 }
 0x7c2   :  { %6824 = vmatmul.msk.f32.gmra.mxu0 %vm3972_vm11, %v3959_v56 }
 0x7c3   :  { %v4074_v3 = vpop.f32.mrf.mxu0 }
 0x7c4   :  { %4158 = vxpose.xlu0.b32.cont [7/16] (narrow) %v4074_v3, 8 }
 0x7c5   :  { %v3614_v11 = vpop.permute.xlu1 %3613 }
 0x7c6   :  { %v3361_v23 = vpop.permute.xlu0 %3360 }
 0x7c7   :  { %v3916_v37 = vsel %vm1691_vm0, %v11036_v7, %v3361_v23 }
 0x7c8   :  { %v3938_v60 = vsel %vm3924_vm9, %v3916_v37, %v3614_v11  ;;  %v12797_v11 = vmov 0  }
 0x7c9   :  { %v3960_v17 = vsel %vm3946_vm10, %v3938_v60, %v3867_v63  ;;  %4124 = vmatmul.f32.gmra.mxu3 %v12798_v50  ;;  %6872 = vset.pattern.permute.xlu2 %v12797_v11 }
 0x7ca   :  { %6825 = vmatmul.msk.f32.gmra.mxu0 %vm3972_vm11, %v3960_v17 }
 0x7cc   :  { %v4077_v38 = vpop.f32.mrf.mxu0 }
 0x7cd   :  { %v3616_v31 = vpop.permute.xlu1 %3615  ;;  %4159 = vxpose.xlu0.b32.cont [8/16] (narrow) %v4077_v38, 8  ;;  %v4248_v38 = vld [vmem:[%s12498_s3] sm:$0xff]  ;;  %s6974_s3 = smov 24  }
 0x7ce   :  { %v3363_v27 = vpop.permute.xlu0 %3362 }
 0x7cf   :  { %v3917_v47 = vsel %vm1691_vm0, %v11038_v40, %v3363_v27 }
 0x7d0   :  { %v3939_v18 = vsel %vm3924_vm9, %v3917_v47, %v3616_v31  ;;  %v4235_v47 = vld [vmem:[%s12497_s2] sm:$0xff]  ;;  %s6973_s2 = smov 16  }
 0x7d1   :  { %v3961_v7 = vsel %vm3946_vm10, %v3939_v18, %v3869_v29  ;;  %4127 = vmatmul.f32.gmra.mxu3 %v12798_v50 }
 0x7d2   :  { %6826 = vmatmul.msk.f32.gmra.mxu0 %vm3972_vm11, %v3961_v7 }
 0x7d4   :  { %v4080_v39 = vpop.f32.mrf.mxu0 }
 0x7d5   :  { %v3618_v4 = vpop.permute.xlu1 %3617  ;;  %4160 = vxpose.xlu0.b32.cont [9/16] (narrow) %v4080_v39, 8 }
 0x7d6   :  { %v3365_v16 = vpop.permute.xlu0 %3364 }
 0x7d7   :  { %v3918_v43 = vsel %vm1691_vm0, %v11040_v8, %v3365_v16 }
 0x7d8   :  { %v3940_v22 = vsel %vm3924_vm9, %v3918_v43, %v3618_v4 }
 0x7d9   :  { %v3962_v40 = vsel %vm3946_vm10, %v3940_v22, %v3871_v61  ;;  %4130 = vmatmul.f32.gmra.mxu3 %v12798_v50 }
 0x7da   :  { %6827 = vmatmul.msk.f32.gmra.mxu0 %vm3972_vm11, %v3962_v40 }
 0x7dc   :  { %v4083_v33 = vpop.f32.mrf.mxu0 }
 0x7dd   :  { %v3620_v54 = vpop.permute.xlu1 %3619  ;;  %4161 = vxpose.xlu0.b32.cont [10/16] (narrow) %v4083_v33, 8 }
 0x7de   :  { %v3367_v62 = vpop.permute.xlu0 %3366 }
 0x7df   :  { %v3919_v15 = vsel %vm1691_vm0, %v11042_v5, %v3367_v62 }
 0x7e0   :  { %v3941_v49 = vsel %vm3924_vm9, %v3919_v15, %v3620_v54 }
 0x7e1   :  { %v3963_v8 = vsel %vm3946_vm10, %v3941_v49, %v3873_v34  ;;  %4133 = vmatmul.f32.gmra.mxu3 %v12798_v50 }
 0x7e2   :  { %6828 = vmatmul.msk.f32.gmra.mxu0 %vm3972_vm11, %v3963_v8 }
 0x7e9   :  { %4136 = vmatmul.f32.gmra.mxu3 %v12798_v50 }
 0x7f1   :  { %4139 = vmatmul.f32.gmra.mxu3 %v12798_v50 }
 0x7f9   :  { %4142 = vmatmul.f32.gmra.mxu3 %v12798_v50 }
 0x801   :  { %4145 = vmatmul.f32.gmra.mxu3 %v12798_v50 }
 0x809   :  { %4148 = vmatmul.f32.gmra.mxu3 %v12798_v50 }
 0x80c   :  { %v4107_v25 = vpop.f32.mrf.mxu3 }
 0x81b   :  { %v4110_v59 = vpop.f32.mrf.mxu3 }
 0x82a   :  { %v4113_v21 = vpop.f32.mrf.mxu3 }
 0x82d   :  { %v4086_v5 = vpop.f32.mrf.mxu0 }
 0x82e   :  { %4162 = vxpose.xlu0.b32.cont [11/16] (narrow) %v4086_v5, 8 }
 0x834   :  { %v4116_v9 = vpop.f32.mrf.mxu3 }
 0x837   :  { %v4089_v42 = vpop.f32.mrf.mxu0 }
 0x838   :  { %4163 = vxpose.xlu0.b32.cont [12/16] (narrow) %v4089_v42, 8 }
 0x83c   :  { %v4119_v24 = vpop.f32.mrf.mxu3 }
 0x83f   :  { %v4092_v10 = vpop.f32.mrf.mxu0 }
 0x840   :  { %4164 = vxpose.xlu0.b32.cont [13/16] (narrow) %v4092_v10, 8 }
 0x844   :  { %v4122_v53 = vpop.f32.mrf.mxu3 }
 0x847   :  { %v4095_v44 = vpop.f32.mrf.mxu0 }
 0x848   :  { %4165 = vxpose.xlu0.b32.cont [14/16] (narrow) %v4095_v44, 8 }
 0x84c   :  { %v4125_v55 = vpop.f32.mrf.mxu3 }
 0x84f   :  { %v4098_v28 = vpop.f32.mrf.mxu0 }
 0x850   :  { %4166 = vxpose.xlu0.b32.cont [15/16] (narrow) %v4098_v28, 8 }
 0x854   :  { %v4128_v26 = vpop.f32.mrf.mxu3 }
 0x857   :  { %v4101_v52 = vpop.f32.mrf.mxu0 }
 0x858   :  { %4167 = vxpose.xlu0.b32.end [16/16] (narrow) %v4101_v52, 8 }
 0x85c   :  { %v4131_v35 = vpop.f32.mrf.mxu3 }
 0x85f   :  { %v4104_v32 = vpop.f32.mrf.mxu0 }
 0x860   :  { %4184 = vxpose.xlu1.b32.start [1/16] (narrow) %v4104_v32, 8 }
 0x864   :  { %v4134_v51 = vpop.f32.mrf.mxu3 }
 0x868   :  { %4185 = vxpose.xlu1.b32.cont [2/16] (narrow) %v4107_v25, 8 }
 0x86c   :  { %v4137_v19 = vpop.f32.mrf.mxu3 }
 0x870   :  { %4186 = vxpose.xlu1.b32.cont [3/16] (narrow) %v4110_v59, 8 }
 0x874   :  { %v4140_v12 = vpop.f32.mrf.mxu3 }
 0x878   :  { %4187 = vxpose.xlu1.b32.cont [4/16] (narrow) %v4113_v21, 8 }
 0x87c   :  { %v4143_v13 = vpop.f32.mrf.mxu3 }
 0x880   :  { %4188 = vxpose.xlu1.b32.cont [5/16] (narrow) %v4116_v9, 8 }
 0x884   :  { %v4146_v48 = vpop.f32.mrf.mxu3  ;;  %v4168_v2 = vpop.trf.xlu0 }
 0x888   :  { %4189 = vxpose.xlu1.b32.cont [6/16] (narrow) %v4119_v24, 8 }
 0x88c   :  { %v4149_v6 = vpop.f32.mrf.mxu3 }
 0x890   :  { %4190 = vxpose.xlu1.b32.cont [7/16] (narrow) %v4122_v53, 8 }
 0x898   :  { %4191 = vxpose.xlu1.b32.cont [8/16] (narrow) %v4125_v55, 8 }
 0x8a0   :  { %4192 = vxpose.xlu1.b32.cont [9/16] (narrow) %v4128_v26, 8 }
 0x8a8   :  { %4193 = vxpose.xlu1.b32.cont [10/16] (narrow) %v4131_v35, 8 }
 0x8b0   :  { %4194 = vxpose.xlu1.b32.cont [11/16] (narrow) %v4134_v51, 8 }
 0x8b8   :  { %4195 = vxpose.xlu1.b32.cont [12/16] (narrow) %v4137_v19, 8 }
 0x8c0   :  { %4196 = vxpose.xlu1.b32.cont [13/16] (narrow) %v4140_v12, 8 }
 0x8c8   :  { %4197 = vxpose.xlu1.b32.cont [14/16] (narrow) %v4143_v13, 8 }
 0x8d0   :  { %4198 = vxpose.xlu1.b32.cont [15/16] (narrow) %v4146_v48, 8 }
 0x8d8   :  { %4199 = vxpose.xlu1.b32.end [16/16] (narrow) %v4149_v6, 8 }
 0x904   :  { %v4200_v14 = vpop.trf.xlu1 }
 0x905   :  { %v4216_v20 = vadd.f32 %v4200_v14, %v4168_v2 }
 0x907   :  { %4217 = vadd.xlane.f32.xlu2 %v4216_v20 }
 0x97a   :  { %v4218_v0 = vpop.xlane.xlu2 %4217 }
 0x97b   :  { %v4219_v45 = vmul.f32 0.0061728396, %v4218_v0 }
 0x97d   :  { %v4221_v36 = vsub.f32 %v4200_v14, %v4219_v45  ;;  %v4220_v41 = vsub.f32 %v4168_v2, %v4219_v45 }
 0x97f   :  { %v4228_v58 = vsel %vm4226_vm13, %v4221_v36, 0.0  ;;  %v4229_v63 = vmul.f32 %v4220_v41, %v4220_v41 }
 0x980   :  { %v4230_v56 = vmul.f32 %v4228_v58, %v4228_v58 }
 0x982   :  { %v4231_v30 = vadd.f32 %v4230_v56, %v4229_v63 }
 0x984   :  { %4232 = vadd.xlane.f32.xlu2 %v4231_v30 }
 0x9f7   :  { %v4233_v23 = vpop.xlane.xlu2 %4232 }
 0x9f8   :  { %v4234_v37 = vmul.f32 0.0061728396, %v4233_v23 }
 0x9fa   :  { %v4236_v60 = vadd.f32 1e-05, %v4234_v37 }
 0x9fc   :  { %6874 = vrsqrt.f32 %v4236_v60  ;;  %vm4243_vm15 = vweird.f32 %v4236_v60 }
 0xa02   :  { %v6875_v17 = vpop.eup %6874 }
 0xa03   :  { %v4238_v29 = vmul.f32 %v6875_v17, %v4236_v60  ;;  %vm4244_vm14 = vweird.f32 %v6875_v17 }
 0xa04   :  { %vm4245_vm0 = vmor %vm4243_vm15, %vm4244_vm14 }
 0xa05   :  { %v4239_v3 = vmul.f32 %v6875_v17, %v4238_v29 }
 0xa07   :  { %v4240_v31 = vmul.f32 0.5, %v4239_v3 }
 0xa09   :  { %v4241_v27 = vsub.f32 1.5, %v4240_v31 }
 0xa0b   :  { %v4242_v18 = vmul.f32 %v6875_v17, %v4241_v27 }
 0xa0d   :  { %v4246_v7 = vsel %vm4245_vm0, %v6875_v17, %v4242_v18 }
 0xa0e   :  { %v4247_v61 = vmul.f32 %v4246_v7, %v4235_v47 }
 0xa10   :  { %4253 = vperm.xlu2 %6872, %v4247_v61   ;;  %v4249_v4 = vmul.f32 %v4247_v61, %v4219_v45 }
 0xa12   :  { %v4250_v16 = vsub.f32 %v4248_v38, %v4249_v4 }
 0xa18   :  { %4260 = vperm.xlu2 %6872, %v4250_v16  }
 0xa6a   :  { %v4254_v43 = vpop.permute.xlu2 %4253 }
 0xa6b   :  { %v4256_v22 = vmul.f32 %v4254_v43, %v4168_v2  ;;  %v4257_v62 = vmul.f32 %v4254_v43, %v4200_v14 }
 0xa72   :  { %v4261_v40 = vpop.permute.xlu2 %4260 }
 0xa73   :  { %v4263_v54 = vadd.f32 %v4261_v40, %v4256_v22  ;;  %v4264_v34 = vadd.f32 %v4261_v40, %v4257_v62 }
 0xa75   :  { %v4265_v39 = vmax.f32 %v4263_v54, 0.0  ;;  %v4266_v15 = vmax.f32 %v4264_v34, 0.0 }
 0xa77   :  { %4267 = vxpose.xlu2.b32.start.end [1/1] (short) %v4265_v39, 128 }
 0xaf7   :  { %4299 = vxpose.xlu2.b32.start.end [1/1] (short) (narrow) %v4266_v15, 40 }
 0xb10   :  { %v4283_v49 = vpop.trf.xlu2 }
 0xb11   :  { %v4352_v8 = vrot.slane %v4283_v49, 1  ;;  %v4353_v33 = vrot.slane %v4283_v49, 2  ;;  %v4354_v5 = vrot.slane %v4283_v49, 3  ;;  %4538 = vst [vmem:[#allocation1] ss:$9 sm:$0xff] %v4283_v49  ;;  %v4355_v42 = vrot.slane %v4283_v49, 4 }
 0xb12   :  { %v4356_v10 = vrot.slane %v4283_v49, 5  ;;  %v4357_v44 = vrot.slane %v4283_v49, 6  ;;  %v4358_v25 = vrot.slane %v4283_v49, 7 }
 0xb13   :  { %4540 = vst [vmem:[#allocation1 + $0x1] ss:$9 sm:$0xff] %v4352_v8 }
 0xb14   :  { %4542 = vst [vmem:[#allocation1 + $0x2] ss:$9 sm:$0xff] %v4353_v33 }
 0xb15   :  { %4544 = vst [vmem:[#allocation1 + $0x3] ss:$9 sm:$0xff] %v4354_v5 }
 0xb16   :  { %4546 = vst [vmem:[#allocation1 + $0x4] ss:$9 sm:$0xff] %v4355_v42 }
 0xb17   :  { %4548 = vst [vmem:[#allocation1 + $0x5] ss:$9 sm:$0xff] %v4356_v10 }
 0xb18   :  { %4550 = vst [vmem:[#allocation1 + $0x6] ss:$9 sm:$0xff] %v4357_v44  ;;  %v4284_v28 = vpop.trf.xlu2 }
 0xb19   :  { %4552 = vst [vmem:[#allocation1 + $0x7] ss:$9 sm:$0xff] %v4358_v25  ;;  %v4359_v52 = vrot.slane %v4284_v28, 1  ;;  %v4360_v21 = vrot.slane %v4284_v28, 2  ;;  %v4361_v9 = vrot.slane %v4284_v28, 3  ;;  %v4362_v24 = vrot.slane %v4284_v28, 4 }
 0xb1a   :  { %v4363_v53 = vrot.slane %v4284_v28, 5  ;;  %v4364_v55 = vrot.slane %v4284_v28, 6  ;;  %v4365_v26 = vrot.slane %v4284_v28, 7 }
 0xb20   :  { %v11405_v59 = vld [vmem:[#allocation1] sm:$0xff]  ;;  %v4285_v35 = vpop.trf.xlu2 }
 0xb21   :  { %4554 = vst [vmem:[#allocation1] ss:$9 sm:$0xff] %v4284_v28  ;;  %v4366_v51 = vrot.slane %v4285_v35, 1  ;;  %v4367_v12 = vrot.slane %v4285_v35, 2  ;;  %v4368_v13 = vrot.slane %v4285_v35, 3  ;;  %v4369_v6 = vrot.slane %v4285_v35, 4 }
 0xb22   :  { %v4370_v14 = vrot.slane %v4285_v35, 5  ;;  %v4371_v20 = vrot.slane %v4285_v35, 6  ;;  %v4372_v46 = vrot.slane %v4285_v35, 7  ;;  %4780 = vst.msk [vmem:[#allocation3 + $0x11] sm:$0xff] %vm3924_vm9, %v11405_v59 }
 0xb28   :  { %v11407_v32 = vld [vmem:[#allocation1] sm:$0xff]  ;;  %v4286_v2 = vpop.trf.xlu2 }
 0xb29   :  { %4556 = vst [vmem:[#allocation1] ss:$9 sm:$0xff] %v4359_v52  ;;  %v4373_v57 = vrot.slane %v4286_v2, 1  ;;  %v4374_v0 = vrot.slane %v4286_v2, 2  ;;  %v4375_v36 = vrot.slane %v4286_v2, 3  ;;  %v4376_v41 = vrot.slane %v4286_v2, 4 }
 0xb2a   :  { %4557 = vst [vmem:[#allocation1 + $0x1] ss:$9 sm:$0xff] %v4360_v21  ;;  %v4377_v56 = vrot.slane %v4286_v2, 5  ;;  %v4378_v30 = vrot.slane %v4286_v2, 6  ;;  %v4379_v23 = vrot.slane %v4286_v2, 7 }
 0xb2b   :  { %4558 = vst [vmem:[#allocation1 + $0x2] ss:$9 sm:$0xff] %v4361_v9 }
 0xb2c   :  { %4559 = vst [vmem:[#allocation1 + $0x3] ss:$9 sm:$0xff] %v4362_v24 }
 0xb2d   :  { %4560 = vst [vmem:[#allocation1 + $0x4] ss:$9 sm:$0xff] %v4363_v53 }
 0xb2e   :  { %4561 = vst [vmem:[#allocation1 + $0x5] ss:$9 sm:$0xff] %v4364_v55 }
 0xb2f   :  { %4562 = vst [vmem:[#allocation1 + $0x6] ss:$9 sm:$0xff] %v4365_v26 }
 0xb30   :  { %4563 = vst [vmem:[#allocation1 + $0x7] ss:$9 sm:$0xff] %v4285_v35  ;;  %v4287_v63 = vpop.trf.xlu2 }
 0xb31   :  { %v4380_v37 = vrot.slane %v4287_v63, 1  ;;  %v4381_v60 = vrot.slane %v4287_v63, 2  ;;  %v4382_v17 = vrot.slane %v4287_v63, 3  ;;  %v4383_v3 = vrot.slane %v4287_v63, 4  ;;  %4782 = vst.msk [vmem:[#allocation3 + $0x19] sm:$0x1] %vm4781_vm2, %v11407_v32 }
 0xb32   :  { %v4384_v27 = vrot.slane %v4287_v63, 5  ;;  %v4385_v18 = vrot.slane %v4287_v63, 6  ;;  %v4386_v7 = vrot.slane %v4287_v63, 7 }
 0xb37   :  { %v11409_v19 = vld [vmem:[#allocation1] sm:$0xff] }
 0xb38   :  { %4565 = vst [vmem:[#allocation1] ss:$9 sm:$0xff] %v4366_v51  ;;  %v4288_v31 = vpop.trf.xlu2 }
 0xb39   :  { %v4387_v61 = vrot.slane %v4288_v31, 1  ;;  %v4388_v4 = vrot.slane %v4288_v31, 2  ;;  %v4389_v38 = vrot.slane %v4288_v31, 3  ;;  %v4390_v16 = vrot.slane %v4288_v31, 4  ;;  %4783 = vst.msk [vmem:[#allocation3 + $0x21] sm:$0xff] %vm3924_vm9, %v11409_v19 }
 0xb3a   :  { %v4391_v40 = vrot.slane %v4288_v31, 5  ;;  %v4392_v54 = vrot.slane %v4288_v31, 6  ;;  %v4393_v62 = vrot.slane %v4288_v31, 7 }
 0xb3f   :  { %v11411_v48 = vld [vmem:[#allocation1] sm:$0xff] }
 0xb40   :  { %4567 = vst [vmem:[#allocation1] ss:$9 sm:$0xff] %v4367_v12  ;;  %v4289_v22 = vpop.trf.xlu2 }
 0xb41   :  { %4568 = vst [vmem:[#allocation1 + $0x1] ss:$9 sm:$0xff] %v4368_v13  ;;  %v4394_v34 = vrot.slane %v4289_v22, 1  ;;  %v4395_v15 = vrot.slane %v4289_v22, 2  ;;  %v4396_v49 = vrot.slane %v4289_v22, 3  ;;  %v4397_v8 = vrot.slane %v4289_v22, 4 }
 0xb42   :  { %4569 = vst [vmem:[#allocation1 + $0x2] ss:$9 sm:$0xff] %v4369_v6  ;;  %v4398_v33 = vrot.slane %v4289_v22, 5  ;;  %v4399_v10 = vrot.slane %v4289_v22, 6  ;;  %v4400_v44 = vrot.slane %v4289_v22, 7 }
 0xb43   :  { %4570 = vst [vmem:[#allocation1 + $0x3] ss:$9 sm:$0xff] %v4370_v14 }
 0xb44   :  { %4571 = vst [vmem:[#allocation1 + $0x4] ss:$9 sm:$0xff] %v4371_v20 }
 0xb45   :  { %4572 = vst [vmem:[#allocation1 + $0x5] ss:$9 sm:$0xff] %v4372_v46 }
 0xb46   :  { %4573 = vst [vmem:[#allocation1 + $0x6] ss:$9 sm:$0xff] %v4286_v2 }
 0xb47   :  { %4574 = vst [vmem:[#allocation1 + $0x7] ss:$9 sm:$0xff] %v4373_v57 }
 0xb48   :  { %v4290_v42 = vpop.trf.xlu2  ;;  %4784 = vst.msk [vmem:[#allocation3 + $0x29] sm:$0x1] %vm4781_vm2, %v11411_v48 }
 0xb49   :  { %v4401_v28 = vrot.slane %v4290_v42, 1  ;;  %v4402_v52 = vrot.slane %v4290_v42, 2  ;;  %v4403_v21 = vrot.slane %v4290_v42, 3  ;;  %v4404_v9 = vrot.slane %v4290_v42, 4 }
 0xb4a   :  { %v4405_v24 = vrot.slane %v4290_v42, 5  ;;  %v4406_v59 = vrot.slane %v4290_v42, 6  ;;  %v4407_v55 = vrot.slane %v4290_v42, 7 }
 0xb4e   :  { %v11413_v45 = vld [vmem:[#allocation1] sm:$0xff] }
 0xb4f   :  { %4576 = vst [vmem:[#allocation1] ss:$9 sm:$0xff] %v4374_v0 }
 0xb50   :  { %4785 = vst.msk [vmem:[#allocation3 + $0x31] sm:$0xff] %vm3924_vm9, %v11413_v45  ;;  %v4291_v53 = vpop.trf.xlu2 }
 0xb51   :  { %v4408_v26 = vrot.slane %v4291_v53, 1  ;;  %v4409_v51 = vrot.slane %v4291_v53, 2  ;;  %v4410_v19 = vrot.slane %v4291_v53, 3  ;;  %v4411_v12 = vrot.slane %v4291_v53, 4 }
 0xb52   :  { %v4412_v13 = vrot.slane %v4291_v53, 5  ;;  %v4413_v48 = vrot.slane %v4291_v53, 6  ;;  %v4414_v6 = vrot.slane %v4291_v53, 7 }
 0xb56   :  { %v11415_v58 = vld [vmem:[#allocation1] sm:$0xff] }
 0xb57   :  { %4578 = vst [vmem:[#allocation1] ss:$9 sm:$0xff] %v4375_v36 }
 0xb58   :  { %4579 = vst [vmem:[#allocation1 + $0x1] ss:$9 sm:$0xff] %v4376_v41  ;;  %v4292_v14 = vpop.trf.xlu2 }
 0xb59   :  { %4580 = vst [vmem:[#allocation1 + $0x2] ss:$9 sm:$0xff] %v4377_v56  ;;  %v4415_v20 = vrot.slane %v4292_v14, 1  ;;  %v4416_v46 = vrot.slane %v4292_v14, 2  ;;  %v4417_v0 = vrot.slane %v4292_v14, 3  ;;  %v4418_v45 = vrot.slane %v4292_v14, 4 }
 0xb5a   :  { %4581 = vst [vmem:[#allocation1 + $0x3] ss:$9 sm:$0xff] %v4378_v30  ;;  %v4419_v36 = vrot.slane %v4292_v14, 5  ;;  %v4420_v41 = vrot.slane %v4292_v14, 6 }
 0xb5b   :  { %4582 = vst [vmem:[#allocation1 + $0x4] ss:$9 sm:$0xff] %v4379_v23 }
 0xb5c   :  { %4583 = vst [vmem:[#allocation1 + $0x5] ss:$9 sm:$0xff] %v4287_v63 }
 0xb5d   :  { %4584 = vst [vmem:[#allocation1 + $0x6] ss:$9 sm:$0xff] %v4380_v37 }
 0xb5e   :  { %4585 = vst [vmem:[#allocation1 + $0x7] ss:$9 sm:$0xff] %v4381_v60 }
 0xb5f   :  { %4786 = vst.msk [vmem:[#allocation3 + $0x39] sm:$0x1] %vm4781_vm2, %v11415_v58  ;;  %v4421_v58 = vrot.slane %v4292_v14, 7 }
 0xb60   :  { %v4293_v63 = vpop.trf.xlu2 }
 0xb61   :  { %v4422_v30 = vrot.slane %v4293_v63, 1  ;;  %v4423_v23 = vrot.slane %v4293_v63, 2  ;;  %v4424_v60 = vrot.slane %v4293_v63, 3 }
 0xb65   :  { %v11417_v29 = vld [vmem:[#allocation1] sm:$0xff] }
 0xb66   :  { %4587 = vst [vmem:[#allocation1] ss:$9 sm:$0xff] %v4382_v17  ;;  %v4425_v17 = vrot.slane %v4293_v63, 4 }
 0xb67   :  { %4787 = vst.msk [vmem:[#allocation3 + $0x41] sm:$0xff] %vm3924_vm9, %v11417_v29  ;;  %v4426_v29 = vrot.slane %v4293_v63, 5 }
 0xb6d   :  { %v11419_v47 = vld [vmem:[#allocation1] sm:$0xff] }
 0xb6e   :  { %4589 = vst [vmem:[#allocation1] ss:$9 sm:$0xff] %v4383_v3  ;;  %v4427_v3 = vrot.slane %v4293_v63, 6 }
 0xb6f   :  { %4590 = vst [vmem:[#allocation1 + $0x1] ss:$9 sm:$0xff] %v4384_v27  ;;  %v4294_v27 = vpop.trf.xlu2 }
 0xb70   :  { %4591 = vst [vmem:[#allocation1 + $0x2] ss:$9 sm:$0xff] %v4385_v18 }
 0xb71   :  { %4592 = vst [vmem:[#allocation1 + $0x3] ss:$9 sm:$0xff] %v4386_v7  ;;  %v4430_v7 = vrot.slane %v4294_v27, 2 }
 0xb72   :  { %4593 = vst [vmem:[#allocation1 + $0x4] ss:$9 sm:$0xff] %v4288_v31  ;;  %v4428_v31 = vrot.slane %v4293_v63, 7 }
 0xb73   :  { %4594 = vst [vmem:[#allocation1 + $0x5] ss:$9 sm:$0xff] %v4387_v61  ;;  %v4431_v61 = vrot.slane %v4294_v27, 3 }
 0xb74   :  { %4595 = vst [vmem:[#allocation1 + $0x6] ss:$9 sm:$0xff] %v4388_v4 }
 0xb75   :  { %4596 = vst [vmem:[#allocation1 + $0x7] ss:$9 sm:$0xff] %v4389_v38  ;;  %v4432_v38 = vrot.slane %v4294_v27, 4 }
 0xb76   :  { %4788 = vst.msk [vmem:[#allocation3 + $0x49] sm:$0x1] %vm4781_vm2, %v11419_v47  ;;  %v4429_v47 = vrot.slane %v4294_v27, 1 }
 0xb7c   :  { %v11425_v43 = vld [vmem:[#allocation1] sm:$0xff] }
 0xb7d   :  { %4598 = vst [vmem:[#allocation1] ss:$9 sm:$0xff] %v4390_v16  ;;  %v4295_v16 = vpop.trf.xlu2 }
 0xb7e   :  { %4789 = vst.msk [vmem:[#allocation3 + $0x51] sm:$0xff] %vm3924_vm9, %v11425_v43  ;;  %v4433_v43 = vrot.slane %v4294_v27, 5 }
 0xb84   :  { %v4599_v39 = vld [vmem:[#allocation1] sm:$0xff] }
 0xb85   :  { %4600 = vst [vmem:[#allocation1] ss:$9 sm:$0xff] %v4391_v40  ;;  %v4435_v40 = vrot.slane %v4294_v27, 7 }
 0xb86   :  { %4601 = vst [vmem:[#allocation1 + $0x1] ss:$9 sm:$0xff] %v4392_v54  ;;  %v4436_v54 = vrot.slane %v4295_v16, 1 }
 0xb87   :  { %4602 = vst [vmem:[#allocation1 + $0x2] ss:$9 sm:$0xff] %v4393_v62 }
 0xb88   :  { %4603 = vst [vmem:[#allocation1 + $0x3] ss:$9 sm:$0xff] %v4289_v22  ;;  %v4434_v22 = vrot.slane %v4294_v27, 6 }
 0xb89   :  { %4604 = vst [vmem:[#allocation1 + $0x4] ss:$9 sm:$0xff] %v4394_v34  ;;  %v4438_v34 = vrot.slane %v4295_v16, 3 }
 0xb8a   :  { %4605 = vst [vmem:[#allocation1 + $0x5] ss:$9 sm:$0xff] %v4395_v15  ;;  %v4439_v15 = vrot.slane %v4295_v16, 4 }
 0xb8b   :  { %4606 = vst [vmem:[#allocation1 + $0x6] ss:$9 sm:$0xff] %v4396_v49 }
 0xb8c   :  { %4607 = vst [vmem:[#allocation1 + $0x7] ss:$9 sm:$0xff] %v4397_v8  ;;  %v4296_v8 = vpop.trf.xlu2 }
 0xb8d   :  { %4790 = vst.msk [vmem:[#allocation3 + $0x59] sm:$0x1] %vm4781_vm2, %v4599_v39  ;;  %v4437_v39 = vrot.slane %v4295_v16, 2 }
 0xb93   :  { %v4608_v5 = vld [vmem:[#allocation1] sm:$0xff] }
 0xb94   :  { %4609 = vst [vmem:[#allocation1] ss:$9 sm:$0xff] %v4398_v33  ;;  %v4440_v33 = vrot.slane %v4295_v16, 5 }
 0xb95   :  { %4791 = vst.msk [vmem:[#allocation3 + $0x61] sm:$0xff] %vm3924_vm9, %v4608_v5  ;;  %v4441_v5 = vrot.slane %v4295_v16, 6 }
 0xb9b   :  { %v4610_v25 = vld [vmem:[#allocation1] sm:$0xff] }
 0xb9c   :  { %4611 = vst [vmem:[#allocation1] ss:$9 sm:$0xff] %v4399_v10  ;;  %v4443_v10 = vrot.slane %v4296_v8, 1 }
 0xb9d   :  { %4612 = vst [vmem:[#allocation1 + $0x1] ss:$9 sm:$0xff] %v4400_v44  ;;  %v4444_v44 = vrot.slane %v4296_v8, 2 }
 0xb9e   :  { %4613 = vst [vmem:[#allocation1 + $0x2] ss:$9 sm:$0xff] %v4290_v42  ;;  %v4442_v42 = vrot.slane %v4295_v16, 7 }
 0xb9f   :  { %4614 = vst [vmem:[#allocation1 + $0x3] ss:$9 sm:$0xff] %v4401_v28 }
 0xba0   :  { %4615 = vst [vmem:[#allocation1 + $0x4] ss:$9 sm:$0xff] %v4402_v52  ;;  %v4446_v52 = vrot.slane %v4296_v8, 4 }
 0xba1   :  { %4616 = vst [vmem:[#allocation1 + $0x5] ss:$9 sm:$0xff] %v4403_v21  ;;  %v4297_v21 = vpop.trf.xlu2 }
 0xba2   :  { %4617 = vst [vmem:[#allocation1 + $0x6] ss:$9 sm:$0xff] %v4404_v9  ;;  %v4447_v9 = vrot.slane %v4296_v8, 5 }
 0xba3   :  { %4618 = vst [vmem:[#allocation1 + $0x7] ss:$9 sm:$0xff] %v4405_v24 }
 0xba4   :  { %4792 = vst.msk [vmem:[#allocation3 + $0x69] sm:$0x1] %vm4781_vm2, %v4610_v25  ;;  %v4445_v25 = vrot.slane %v4296_v8, 3 }
 0xbaa   :  { %v4619_v32 = vld [vmem:[#allocation1] sm:$0xff] }
 0xbab   :  { %4620 = vst [vmem:[#allocation1] ss:$9 sm:$0xff] %v4406_v59  ;;  %v4448_v59 = vrot.slane %v4296_v8, 6 }
 0xbac   :  { %4793 = vst.msk [vmem:[#allocation3 + $0x71] sm:$0xff] %vm3924_vm9, %v4619_v32  ;;  %v4449_v32 = vrot.slane %v4296_v8, 7 }
 0xbb2   :  { %v4621_v35 = vld [vmem:[#allocation1] sm:$0xff] }
 0xbb3   :  { %4622 = vst [vmem:[#allocation1] ss:$9 sm:$0xff] %v4407_v55  ;;  %v4451_v55 = vrot.slane %v4297_v21, 2 }
 0xbb4   :  { %4623 = vst [vmem:[#allocation1 + $0x1] ss:$9 sm:$0xff] %v4291_v53  ;;  %v4450_v53 = vrot.slane %v4297_v21, 1 }
 0xbb5   :  { %4624 = vst [vmem:[#allocation1 + $0x2] ss:$9 sm:$0xff] %v4408_v26  ;;  %v4452_v26 = vrot.slane %v4297_v21, 3 }
 0xbb6   :  { %4625 = vst [vmem:[#allocation1 + $0x3] ss:$9 sm:$0xff] %v4409_v51 }
 0xbb7   :  { %4626 = vst [vmem:[#allocation1 + $0x4] ss:$9 sm:$0xff] %v4410_v19  ;;  %v4298_v19 = vpop.trf.xlu2 }
 0xbb8   :  { %4627 = vst [vmem:[#allocation1 + $0x5] ss:$9 sm:$0xff] %v4411_v12  ;;  %v4454_v12 = vrot.slane %v4297_v21, 5 }
 0xbb9   :  { %4628 = vst [vmem:[#allocation1 + $0x6] ss:$9 sm:$0xff] %v4412_v13  ;;  %v4455_v13 = vrot.slane %v4297_v21, 6 }
 0xbba   :  { %4629 = vst [vmem:[#allocation1 + $0x7] ss:$9 sm:$0xff] %v4413_v48 }
 0xbbb   :  { %4794 = vst.msk [vmem:[#allocation3 + $0x79] sm:$0x1] %vm4781_vm2, %v4621_v35  ;;  %v4453_v35 = vrot.slane %v4297_v21, 4 }
 0xbc1   :  { %v4630_v2 = vld [vmem:[#allocation1] sm:$0xff] }
 0xbc2   :  { %4631 = vst [vmem:[#allocation1] ss:$9 sm:$0xff] %v4414_v6  ;;  %v4456_v6 = vrot.slane %v4297_v21, 7 }
 0xbc3   :  { %4795 = vst.msk [vmem:[#allocation3 + $0x81] sm:$0xff] %vm3924_vm9, %v4630_v2  ;;  %v4457_v2 = vrot.slane %v4298_v19, 1 }
 0xbc9   :  { %v4632_v57 = vld [vmem:[#allocation1] sm:$0xff] }
 0xbca   :  { %4633 = vst [vmem:[#allocation1] ss:$9 sm:$0xff] %v4292_v14  ;;  %v4458_v14 = vrot.slane %v4298_v19, 2 }
 0xbcb   :  { %4634 = vst [vmem:[#allocation1 + $0x1] ss:$9 sm:$0xff] %v4415_v20  ;;  %v4459_v20 = vrot.slane %v4298_v19, 3 }
 0xbcc   :  { %4635 = vst [vmem:[#allocation1 + $0x2] ss:$9 sm:$0xff] %v4416_v46  ;;  %v4460_v46 = vrot.slane %v4298_v19, 4 }
 0xbcd   :  { %4636 = vst [vmem:[#allocation1 + $0x3] ss:$9 sm:$0xff] %v4417_v0 }
 0xbce   :  { %4637 = vst [vmem:[#allocation1 + $0x4] ss:$9 sm:$0xff] %v4418_v45  ;;  %v4315_v45 = vpop.trf.xlu2 }
 0xbcf   :  { %4638 = vst [vmem:[#allocation1 + $0x5] ss:$9 sm:$0xff] %v4419_v36  ;;  %v4462_v36 = vrot.slane %v4298_v19, 6 }
 0xbd0   :  { %4639 = vst [vmem:[#allocation1 + $0x6] ss:$9 sm:$0xff] %v4420_v41  ;;  %v4463_v41 = vrot.slane %v4298_v19, 7 }
 0xbd1   :  { %4640 = vst [vmem:[#allocation1 + $0x7] ss:$9 sm:$0xff] %v4421_v58 }
 0xbd2   :  { %4796 = vst.msk [vmem:[#allocation3 + $0x89] sm:$0x1] %vm4781_vm2, %v4632_v57  ;;  %v4461_v57 = vrot.slane %v4298_v19, 5 }
 0xbd8   :  { %v4641_v56 = vld [vmem:[#allocation1] sm:$0xff] }
 0xbd9   :  { %4642 = vst [vmem:[#allocation1] ss:$9 sm:$0xff] %v4293_v63  ;;  %v4464_v63 = vrot.slane %v4315_v45, 1 }
 0xbda   :  { %4797 = vst.msk [vmem:[#allocation3 + $0x91] sm:$0xff] %vm3924_vm9, %v4641_v56  ;;  %v4465_v56 = vrot.slane %v4315_v45, 2 }
 0xbe0   :  { %v4643_v37 = vld [vmem:[#allocation1] sm:$0xff] }
 0xbe1   :  { %4644 = vst [vmem:[#allocation1] ss:$9 sm:$0xff] %v4422_v30  ;;  %v4466_v30 = vrot.slane %v4315_v45, 3 }
 0xbe2   :  { %4645 = vst [vmem:[#allocation1 + $0x1] ss:$9 sm:$0xff] %v4423_v23  ;;  %v4467_v23 = vrot.slane %v4315_v45, 4 }
 0xbe3   :  { %4646 = vst [vmem:[#allocation1 + $0x2] ss:$9 sm:$0xff] %v4424_v60  ;;  %v4469_v60 = vrot.slane %v4315_v45, 6 }
 0xbe4   :  { %4647 = vst [vmem:[#allocation1 + $0x3] ss:$9 sm:$0xff] %v4425_v17 }
 0xbe5   :  { %4648 = vst [vmem:[#allocation1 + $0x4] ss:$9 sm:$0xff] %v4426_v29  ;;  %v4316_v29 = vpop.trf.xlu2 }
 0xbe6   :  { %4649 = vst [vmem:[#allocation1 + $0x5] ss:$9 sm:$0xff] %v4427_v3  ;;  %v4470_v3 = vrot.slane %v4315_v45, 7 }
 0xbe7   :  { %4650 = vst [vmem:[#allocation1 + $0x6] ss:$9 sm:$0xff] %v4428_v31  ;;  %v4471_v31 = vrot.slane %v4316_v29, 1 }
 0xbe8   :  { %4651 = vst [vmem:[#allocation1 + $0x7] ss:$9 sm:$0xff] %v4294_v27 }
 0xbe9   :  { %4798 = vst.msk [vmem:[#allocation3 + $0x99] sm:$0x1] %vm4781_vm2, %v4643_v37  ;;  %v4468_v37 = vrot.slane %v4315_v45, 5 }
 0xbef   :  { %v4652_v18 = vld [vmem:[#allocation1] sm:$0xff] }
 0xbf0   :  { %4653 = vst [vmem:[#allocation1] ss:$9 sm:$0xff] %v4429_v47  ;;  %v4472_v47 = vrot.slane %v4316_v29, 2 }
 0xbf1   :  { %4799 = vst.msk [vmem:[#allocation3 + $0xc1] sm:$0xff] %vm3924_vm9, %v4652_v18  ;;  %v4473_v18 = vrot.slane %v4316_v29, 3 }
 0xbf7   :  { %v4654_v4 = vld [vmem:[#allocation1] sm:$0xff] }
 0xbf8   :  { %4655 = vst [vmem:[#allocation1] ss:$9 sm:$0xff] %v4430_v7  ;;  %v4474_v7 = vrot.slane %v4316_v29, 4 }
 0xbf9   :  { %4656 = vst [vmem:[#allocation1 + $0x1] ss:$9 sm:$0xff] %v4431_v61  ;;  %v4475_v61 = vrot.slane %v4316_v29, 5 }
 0xbfa   :  { %4657 = vst [vmem:[#allocation1 + $0x2] ss:$9 sm:$0xff] %v4432_v38  ;;  %v4477_v38 = vrot.slane %v4316_v29, 7 }
 0xbfb   :  { %4658 = vst [vmem:[#allocation1 + $0x3] ss:$9 sm:$0xff] %v4433_v43  ;;  %v4317_v43 = vpop.trf.xlu2 }
 0xbfc   :  { %4659 = vst [vmem:[#allocation1 + $0x4] ss:$9 sm:$0xff] %v4434_v22  ;;  %v4478_v22 = vrot.slane %v4317_v43, 1 }
 0xbfd   :  { %4660 = vst [vmem:[#allocation1 + $0x5] ss:$9 sm:$0xff] %v4435_v40  ;;  %v4479_v40 = vrot.slane %v4317_v43, 2 }
 0xbfe   :  { %4661 = vst [vmem:[#allocation1 + $0x6] ss:$9 sm:$0xff] %v4295_v16 }
 0xbff   :  { %4662 = vst [vmem:[#allocation1 + $0x7] ss:$9 sm:$0xff] %v4436_v54 }
 0xc00   :  { %4800 = vst.msk [vmem:[#allocation3 + $0xc9] sm:$0x1] %vm4781_vm2, %v4654_v4  ;;  %v4476_v4 = vrot.slane %v4316_v29, 6 }
 0xc06   :  { %v4663_v62 = vld [vmem:[#allocation1] sm:$0xff] }
 0xc07   :  { %4664 = vst [vmem:[#allocation1] ss:$9 sm:$0xff] %v4437_v39  ;;  %v4480_v39 = vrot.slane %v4317_v43, 3 }
 0xc08   :  { %4801 = vst.msk [vmem:[#allocation3 + $0xd1] sm:$0xff] %vm3924_vm9, %v4663_v62  ;;  %v4481_v62 = vrot.slane %v4317_v43, 4 }
 0xc0e   :  { %v4665_v49 = vld [vmem:[#allocation1] sm:$0xff] }
 0xc0f   :  { %4666 = vst [vmem:[#allocation1] ss:$9 sm:$0xff] %v4438_v34  ;;  %v4482_v34 = vrot.slane %v4317_v43, 5 }
 0xc10   :  { %4667 = vst [vmem:[#allocation1 + $0x1] ss:$9 sm:$0xff] %v4439_v15  ;;  %v4483_v15 = vrot.slane %v4317_v43, 6 }
 0xc11   :  { %4668 = vst [vmem:[#allocation1 + $0x2] ss:$9 sm:$0xff] %v4440_v33 }
 0xc12   :  { %4669 = vst [vmem:[#allocation1 + $0x3] ss:$9 sm:$0xff] %v4441_v5 }
 0xc13   :  { %4670 = vst [vmem:[#allocation1 + $0x4] ss:$9 sm:$0xff] %v4442_v42 }
 0xc14   :  { %4671 = vst [vmem:[#allocation1 + $0x5] ss:$9 sm:$0xff] %v4296_v8  ;;  %v4318_v8 = vpop.trf.xlu2 }
 0xc15   :  { %4672 = vst [vmem:[#allocation1 + $0x6] ss:$9 sm:$0xff] %v4443_v10  ;;  %v4485_v5 = vrot.slane %v4318_v8, 1  ;;  %v4486_v42 = vrot.slane %v4318_v8, 2 }
 0xc16   :  { %4673 = vst [vmem:[#allocation1 + $0x7] ss:$9 sm:$0xff] %v4444_v44  ;;  %v4487_v44 = vrot.slane %v4318_v8, 3 }
 0xc17   :  { %4802 = vst.msk [vmem:[#allocation3 + $0xd9] sm:$0x1] %vm4781_vm2, %v4665_v49  ;;  %v4484_v49 = vrot.slane %v4317_v43, 7 }
 0xc1d   :  { %v4674_v28 = vld [vmem:[#allocation1] sm:$0xff] }
 0xc1e   :  { %4675 = vst [vmem:[#allocation1] ss:$9 sm:$0xff] %v4445_v25  ;;  %v4488_v25 = vrot.slane %v4318_v8, 4 }
 0xc1f   :  { %4803 = vst.msk [vmem:[#allocation3 + $0xe1] sm:$0xff] %vm3924_vm9, %v4674_v28  ;;  %v4489_v28 = vrot.slane %v4318_v8, 5 }
 0xc25   :  { %v4676_v24 = vld [vmem:[#allocation1] sm:$0xff] }
 0xc26   :  { %4677 = vst [vmem:[#allocation1] ss:$9 sm:$0xff] %v4446_v52  ;;  %v4490_v52 = vrot.slane %v4318_v8, 6 }
 0xc27   :  { %4678 = vst [vmem:[#allocation1 + $0x1] ss:$9 sm:$0xff] %v4447_v9  ;;  %v4319_v9 = vpop.trf.xlu2 }
 0xc28   :  { %4679 = vst [vmem:[#allocation1 + $0x2] ss:$9 sm:$0xff] %v4448_v59  ;;  %v11510_v59 = vld [vmem:[#allocation3 + $0x10] sm:$0xff] }
 0xc29   :  { %4680 = vst [vmem:[#allocation1 + $0x3] ss:$9 sm:$0xff] %v4449_v32 }
 0xc2a   :  { %4681 = vst [vmem:[#allocation1 + $0x4] ss:$9 sm:$0xff] %v4297_v21  ;;  %v4491_v21 = vrot.slane %v4318_v8, 7 }
 0xc2b   :  { %4682 = vst [vmem:[#allocation1 + $0x5] ss:$9 sm:$0xff] %v4450_v53  ;;  %v12845_v53 = vrot.slane %v11510_v59, 2 }
 0xc2c   :  { %4683 = vst [vmem:[#allocation1 + $0x6] ss:$9 sm:$0xff] %v4451_v55  ;;  %v4817_v55 = vld [vmem:[#allocation3] sm:$0xff] }
 0xc2d   :  { %4684 = vst [vmem:[#allocation1 + $0x7] ss:$9 sm:$0xff] %v4452_v26  ;;  %v12844_v26 = vrot.slane %v11510_v59, 4 }
 0xc2e   :  { %4804 = vst.msk [vmem:[#allocation3 + $0xe9] sm:$0x1] %vm4781_vm2, %v4676_v24  ;;  %v4492_v24 = vrot.slane %v4319_v9, 1 }
 0xc34   :  { %v4685_v51 = vld [vmem:[#allocation1] sm:$0xff] }
 0xc35   :  { %4686 = vst [vmem:[#allocation1] ss:$9 sm:$0xff] %v4453_v35  ;;  %v4897_v35 = vrot.slane %v4817_v55, 2 }
 0xc36   :  { %4805 = vst.msk [vmem:[#allocation3 + $0xf1] sm:$0xff] %vm3924_vm9, %v4685_v51  ;;  %v4898_v51 = vrot.slane %v4817_v55, 4 }
 0xc3c   :  { %v4687_v48 = vld [vmem:[#allocation1] sm:$0xff] }
 0xc3d   :  { %4688 = vst [vmem:[#allocation1] ss:$9 sm:$0xff] %v4454_v12 }
 0xc3e   :  { %4689 = vst [vmem:[#allocation1 + $0x1] ss:$9 sm:$0xff] %v4455_v13  ;;  %v11521_v13 = vld [vmem:[#allocation3 + $0x20] sm:$0xff] }
 0xc3f   :  { %4690 = vst [vmem:[#allocation1 + $0x2] ss:$9 sm:$0xff] %v4456_v6 }
 0xc40   :  { %4691 = vst [vmem:[#allocation1 + $0x3] ss:$9 sm:$0xff] %v4298_v19  ;;  %v4899_v19 = vrot.slane %v4817_v55, 6 }
 0xc41   :  { %4692 = vst [vmem:[#allocation1 + $0x4] ss:$9 sm:$0xff] %v4457_v2  ;;  %v4820_v2 = vld [vmem:[#allocation3 + $0x18] sm:$0x3] }
 0xc42   :  { %4693 = vst [vmem:[#allocation1 + $0x5] ss:$9 sm:$0xff] %v4458_v14  ;;  %v12828_v14 = vrot.slane %v11521_v13, 2 }
 0xc43   :  { %4694 = vst [vmem:[#allocation1 + $0x6] ss:$9 sm:$0xff] %v4459_v20  ;;  %v11532_v20 = vld [vmem:[#allocation3 + $0x30] sm:$0xff] }
 0xc44   :  { %4695 = vst [vmem:[#allocation1 + $0x7] ss:$9 sm:$0xff] %v4460_v46  ;;  %v12838_v46 = vrot.slane %v11532_v20, 2 }
 0xc45   :  { %4806 = vst.msk [vmem:[#allocation3 + $0xf9] sm:$0x1] %vm4781_vm2, %v4687_v48  ;;  %v12842_v48 = vrot.slane %v11510_v59, 6 }
 0xc4b   :  { %v4696_v0 = vld [vmem:[#allocation1] sm:$0xff] }
 0xc4c   :  { %4697 = vst [vmem:[#allocation1] ss:$9 sm:$0xff] %v4461_v57  ;;  %v12818_v57 = vrot.slane %v11532_v20, 4 }
 0xc4d   :  { %4807 = vst.msk [vmem:[#allocation3 + $0x101] sm:$0xff] %vm3924_vm9, %v4696_v0 }
 0xc53   :  { %v4698_v58 = vld [vmem:[#allocation1] sm:$0xff] }
 0xc54   :  { %4699 = vst [vmem:[#allocation1] ss:$9 sm:$0xff] %v4462_v36  ;;  %v4824_v36 = vld [vmem:[#allocation3 + $0x38] sm:$0x3] }
 0xc55   :  { %4700 = vst [vmem:[#allocation1 + $0x1] ss:$9 sm:$0xff] %v4463_v41  ;;  %v11545_v41 = vld [vmem:[#allocation3 + $0x50] sm:$0xff] }
 0xc56   :  { %4701 = vst [vmem:[#allocation1 + $0x2] ss:$9 sm:$0xff] %v4315_v45  ;;  %v12817_v45 = vrot.slane %v11532_v20, 6 }
 0xc57   :  { %4702 = vst [vmem:[#allocation1 + $0x3] ss:$9 sm:$0xff] %v4464_v63 }
 0xc58   :  { %4703 = vst [vmem:[#allocation1 + $0x4] ss:$9 sm:$0xff] %v4465_v56  ;;  %v4912_v56 = vrot.slane %v11545_v41, 2 }
 0xc59   :  { %4704 = vst [vmem:[#allocation1 + $0x5] ss:$9 sm:$0xff] %v4466_v30  ;;  %v4913_v30 = vrot.slane %v11545_v41, 4 }
 0xc5a   :  { %4705 = vst [vmem:[#allocation1 + $0x6] ss:$9 sm:$0xff] %v4467_v23  ;;  %v11552_v23 = vld [vmem:[#allocation3 + $0x60] sm:$0xff] }
 0xc5b   :  { %4706 = vst [vmem:[#allocation1 + $0x7] ss:$9 sm:$0xff] %v4468_v37  ;;  %v12831_v37 = vrot.slane %v11552_v23, 4 }
 0xc5c   :  { %4808 = vst.msk [vmem:[#allocation3 + $0x109] sm:$0x1] %vm4781_vm2, %v4698_v58  ;;  %v4826_v58 = vld [vmem:[#allocation3 + $0x48] sm:$0x3] }
 0xc62   :  { %v4707_v17 = vld [vmem:[#allocation1] sm:$0xff] }
 0xc63   :  { %4708 = vst [vmem:[#allocation1] ss:$9 sm:$0xff] %v4469_v60  ;;  %v12813_v60 = vrot.slane %v11552_v23, 6 }
 0xc64   :  { %4809 = vst.msk [vmem:[#allocation3 + $0x111] sm:$0xff] %vm3924_vm9, %v4707_v17 }
 0xc6a   :  { %v4709_v27 = vld [vmem:[#allocation1] sm:$0xff] }
 0xc6b   :  { %4710 = vst [vmem:[#allocation1] ss:$9 sm:$0xff] %v4470_v3  ;;  %v11562_v3 = vld [vmem:[#allocation3 + $0x70] sm:$0xff] }
 0xc6c   :  { %4711 = vst [vmem:[#allocation1 + $0x1] ss:$9 sm:$0xff] %v4316_v29  ;;  %v4830_v29 = vld [vmem:[#allocation3 + $0x68] sm:$0x3] }
 0xc6d   :  { %4712 = vst [vmem:[#allocation1 + $0x2] ss:$9 sm:$0xff] %v4471_v31  ;;  %v11565_v31 = vld [vmem:[#allocation3 + $0x80] sm:$0xff] }
 0xc6e   :  { %4713 = vst [vmem:[#allocation1 + $0x3] ss:$9 sm:$0xff] %v4472_v47 }
 0xc6f   :  { %4714 = vst [vmem:[#allocation1 + $0x4] ss:$9 sm:$0xff] %v4473_v18  ;;  %v12809_v18 = vrot.slane %v11565_v31, 4 }
 0xc70   :  { %4715 = vst [vmem:[#allocation1 + $0x5] ss:$9 sm:$0xff] %v4474_v7  ;;  %v12808_v7 = vrot.slane %v11565_v31, 6 }
 0xc71   :  { %4716 = vst [vmem:[#allocation1 + $0x6] ss:$9 sm:$0xff] %v4475_v61  ;;  %v11579_v61 = vld [vmem:[#allocation3 + $0x90] sm:$0xff] }
 0xc72   :  { %4717 = vst [vmem:[#allocation1 + $0x7] ss:$9 sm:$0xff] %v4476_v4  ;;  %v11581_v4 = vld [vmem:[#allocation3 + $0xb0] sm:$0xff] }
 0xc73   :  { %4810 = vst.msk [vmem:[#allocation3 + $0x119] sm:$0x1] %vm4781_vm2, %v4709_v27  ;;  %v12810_v27 = vrot.slane %v11565_v31, 2 }
 0xc79   :  { %v4718_v16 = vld [vmem:[#allocation1] sm:$0xff] }
 0xc7a   :  { %4719 = vst [vmem:[#allocation1] ss:$9 sm:$0xff] %v4477_v38  ;;  %v12822_v38 = vrot.slane %v11579_v61, 6 }
 0xc7b   :  { %4811 = vst.msk [vmem:[#allocation3 + $0x121] sm:$0xff] %vm3924_vm9, %v4718_v16  ;;  %v4927_v16 = vrot.slane %v11581_v4, 2 }
 0xc81   :  { %v4720_v54 = vld [vmem:[#allocation1] sm:$0xff] }
 0xc82   :  { %4721 = vst [vmem:[#allocation1] ss:$9 sm:$0xff] %v4317_v43 }
 0xc83   :  { %4722 = vst [vmem:[#allocation1 + $0x1] ss:$9 sm:$0xff] %v4478_v22  ;;  %v4836_v22 = vld [vmem:[#allocation3 + $0x98] sm:$0x3] }
 0xc84   :  { %4723 = vst [vmem:[#allocation1 + $0x2] ss:$9 sm:$0xff] %v4479_v40  ;;  %v4818_v40 = vld [vmem:[#allocation3 + $0x8] sm:$0x3] }
 0xc85   :  { %4724 = vst [vmem:[#allocation1 + $0x3] ss:$9 sm:$0xff] %v4480_v39 }
 0xc86   :  { %4725 = vst [vmem:[#allocation1 + $0x4] ss:$9 sm:$0xff] %v4481_v62 }
 0xc87   :  { %4726 = vst [vmem:[#allocation1 + $0x5] ss:$9 sm:$0xff] %v4482_v34 }
 0xc88   :  { %4727 = vst [vmem:[#allocation1 + $0x6] ss:$9 sm:$0xff] %v4483_v15 }
 0xc89   :  { %4728 = vst [vmem:[#allocation1 + $0x7] ss:$9 sm:$0xff] %v4484_v49 }
 0xc8a   :  { %4812 = vst.msk [vmem:[#allocation3 + $0x129] sm:$0x1] %vm4781_vm2, %v4720_v54  ;;  %v11590_v54 = vld [vmem:[#allocation3 + $0xc0] sm:$0xff] }
 0xc8b   :  { %v12816_v39 = vrot.slane %v11590_v54, 2  ;;  %v12805_v62 = vrot.slane %v11590_v54, 4  ;;  %v12804_v15 = vrot.slane %v11590_v54, 6 }
 0xc90   :  { %v4729_v33 = vld [vmem:[#allocation1] sm:$0xff] }
 0xc91   :  { %4730 = vst [vmem:[#allocation1] ss:$9 sm:$0xff] %v4318_v8  ;;  %v4840_v8 = vld [vmem:[#allocation3 + $0xc8] sm:$0x3] }
 0xc92   :  { %4813 = vst.msk [vmem:[#allocation3 + $0x131] sm:$0xff] %vm3924_vm9, %v4729_v33  ;;  %v12826_v33 = vrot.slane %v11521_v13, 4 }
 0xc98   :  { %v4731_v10 = vld [vmem:[#allocation1] sm:$0xff] }
 0xc99   :  { %4732 = vst [vmem:[#allocation1] ss:$9 sm:$0xff] %v4485_v5  ;;  %v12841_v5 = vrot.slane %v11521_v13, 6 }
 0xc9a   :  { %4733 = vst [vmem:[#allocation1 + $0x1] ss:$9 sm:$0xff] %v4486_v42  ;;  %v4822_v42 = vld [vmem:[#allocation3 + $0x28] sm:$0x3] }
 0xc9b   :  { %4734 = vst [vmem:[#allocation1 + $0x2] ss:$9 sm:$0xff] %v4487_v44  ;;  %v4842_v44 = vld [vmem:[#allocation3 + $0xd8] sm:$0x3] }
 0xc9c   :  { %4735 = vst [vmem:[#allocation1 + $0x3] ss:$9 sm:$0xff] %v4488_v25 }
 0xc9d   :  { %4736 = vst [vmem:[#allocation1 + $0x4] ss:$9 sm:$0xff] %v4489_v28 }
 0xc9e   :  { %4737 = vst [vmem:[#allocation1 + $0x5] ss:$9 sm:$0xff] %v4490_v52  ;;  %v11617_v52 = vld [vmem:[#allocation3 + $0x40] sm:$0xff] }
 0xc9f   :  { %4738 = vst [vmem:[#allocation1 + $0x6] ss:$9 sm:$0xff] %v4491_v21 }
 0xca0   :  { %4739 = vst [vmem:[#allocation1 + $0x7] ss:$9 sm:$0xff] %v4319_v9  ;;  %v12837_v9 = vrot.slane %v11617_v52, 2 }
 0xca1   :  { %4814 = vst.msk [vmem:[#allocation3 + $0x139] sm:$0x1] %vm4781_vm2, %v4731_v10  ;;  %v11612_v10 = vld [vmem:[#allocation3 + $0xe0] sm:$0xff] }
 0xca2   :  { %v4936_v28 = vrot.slane %v11612_v10, 2  ;;  %v4937_v21 = vrot.slane %v11612_v10, 4 }
 0xca7   :  { %v4740_v32 = vld [vmem:[#allocation1] sm:$0xff] }
 0xca8   :  { %4741 = vst [vmem:[#allocation1] ss:$9 sm:$0xff] %v4492_v24 }
 0xca9   :  { %4815 = vst.msk [vmem:[#allocation3 + $0x141] sm:$0xff] %vm3924_vm9, %v4740_v32  ;;  %v12836_v32 = vrot.slane %v11617_v52, 4 }
 0xcaa   :  { %5387 = vst [vmem:[#allocation1 + $0x21] ss:$4 sm:$0xff] %v11510_v59 }
 0xcab   :  { %5389 = vst [vmem:[#allocation1 + $0x22] ss:$4 sm:$0xff] %v12845_v53 }
 0xcac   :  { %5391 = vst [vmem:[#allocation1 + $0x23] ss:$4 sm:$0xff] %v12844_v26 }
 0xcad   :  { %5385 = vst [vmem:[#allocation1 + $0x20] ss:$4 sm:$0xff] %v4818_v40 }
 0xcaf   :  { %v4742_v12 = vld [vmem:[#allocation1] sm:$0xff] }
 0xcb0   :  { %5377 = vst [vmem:[#allocation1] ss:$4 sm:$0xff] %v4817_v55  ;;  %v12835_v55 = vrot.slane %v11617_v52, 6 }
 0xcb1   :  { %5379 = vst [vmem:[#allocation1 + $0x1] ss:$4 sm:$0xff] %v4897_v35  ;;  %v11629_v35 = vld [vmem:[#allocation3 + $0xf0] sm:$0xff] }
 0xcb2   :  { %5381 = vst [vmem:[#allocation1 + $0x2] ss:$4 sm:$0xff] %v4898_v51  ;;  %v12811_v51 = vrot.slane %v11629_v35, 4 }
 0xcb3   :  { %5383 = vst [vmem:[#allocation1 + $0x3] ss:$4 sm:$0xff] %v4899_v19  ;;  %v12803_v19 = vrot.slane %v11629_v35, 6 }
 0xcb4   :  { %4816 = vst.msk [vmem:[#allocation3 + $0x149] sm:$0x1] %vm4781_vm2, %v4742_v12  ;;  %v11601_v49 = vld.sshfl [vmem:[#allocation1 + $0x20] sm:$0xff pattern:$0x73625140] }
 0xcb5   :  { %5398 = vst [vmem:[#allocation1 + $0x20] ss:$4 sm:$0xff] %v12826_v33 }
 0xcb6   :  { %5399 = vst [vmem:[#allocation1 + $0x21] ss:$4 sm:$0xff] %v12841_v5  ;;  %v11805_v5 = vld [vmem:[#allocation3 + $0xb1] sm:$0xff] }
 0xcb7   :  { %5400 = vst [vmem:[#allocation1 + $0x22] ss:$4 sm:$0xff] %v4822_v42  ;;  %v12812_v42 = vrot.slane %v11562_v3, 2 }
 0xcb8   :  { %5401 = vst [vmem:[#allocation1 + $0x23] ss:$4 sm:$0xff] %v11532_v20 }
 0xcba   :  { %v11524_v6 = vld.sshfl [vmem:[#allocation1] sm:$0xff pattern:$0x73625140] }
 0xcbb   :  { %5394 = vst [vmem:[#allocation1] ss:$4 sm:$0xff] %v12842_v48  ;;  %v4962_v48 = vld [vmem:[#allocation3 + $0x29] sm:$0x3] }
 0xcbc   :  { %5395 = vst [vmem:[#allocation1 + $0x1] ss:$4 sm:$0xff] %v4820_v2  ;;  %v4846_v2 = vld [vmem:[#allocation3 + $0xf8] sm:$0x3] }
 0xcbd   :  { %5396 = vst [vmem:[#allocation1 + $0x2] ss:$4 sm:$0xff] %v11521_v13 }
 0xcbe   :  { %5397 = vst [vmem:[#allocation1 + $0x3] ss:$4 sm:$0xff] %v12828_v14  ;;  %v4848_v14 = vld [vmem:[#allocation3 + $0x108] sm:$0x3] }
 0xcbf   :  { %v11622_v24 = vld.sshfl [vmem:[#allocation1 + $0x20] sm:$0xff pattern:$0x73625140] }
 0xcc0   :  { %14689 = vst [vmem:[#allocation56_spill] sm:$0xff] %v11622_v24  ;;  %v5108_v24 = vld [vmem:[#allocation3 + $0x68] sm:$0x3] }
 0xcc1   :  { %5408 = vst [vmem:[#allocation1 + $0x20] ss:$4 sm:$0xff] %v11617_v52 }
 0xcc2   :  { %5409 = vst [vmem:[#allocation1 + $0x21] ss:$4 sm:$0xff] %v12837_v9  ;;  %v4958_v9 = vld [vmem:[#allocation3 + $0x9] sm:$0x3] }
 0xcc3   :  { %5410 = vst [vmem:[#allocation1 + $0x22] ss:$4 sm:$0xff] %v12836_v32 }
 0xcc4   :  { %5411 = vst [vmem:[#allocation1 + $0x23] ss:$4 sm:$0xff] %v12835_v55 }
 0xcc5   :  { %v11536_v0 = vld.sshfl [vmem:[#allocation1] sm:$0xff pattern:$0x73625140] }
 0xcc6   :  { %5404 = vst [vmem:[#allocation1] ss:$4 sm:$0xff] %v12838_v46 }
 0xcc7   :  { %5405 = vst [vmem:[#allocation1 + $0x1] ss:$4 sm:$0xff] %v12818_v57  ;;  %v11720_v57 = vld [vmem:[#allocation3 + $0xd0] sm:$0xff] }
 0xcc8   :  { %5406 = vst [vmem:[#allocation1 + $0x2] ss:$4 sm:$0xff] %v12817_v45 }
 0xcc9   :  { %5407 = vst [vmem:[#allocation1 + $0x3] ss:$4 sm:$0xff] %v4824_v36  ;;  %v11643_v36 = vld [vmem:[#allocation3 + $0x100] sm:$0xff] }
 0xcd0   :  { %v11547_v63 = vld.sshfl [vmem:[#allocation1] sm:$0xff pattern:$0x73625140] }
 0xcd1   :  { %14683 = vst [vmem:[#allocation54_spill] sm:$0xff] %v11547_v63 }
 0xcd2   :  { %5414 = vst [vmem:[#allocation1] ss:$4 sm:$0xff] %v4826_v58  ;;  %v4914_v58 = vrot.slane %v11545_v41, 6 }
 0xcd3   :  { %5415 = vst [vmem:[#allocation1 + $0x1] ss:$4 sm:$0xff] %v11545_v41 }
 0xcd4   :  { %5416 = vst [vmem:[#allocation1 + $0x2] ss:$4 sm:$0xff] %v4912_v56  ;;  %v11647_v56 = vld.sshfl [vmem:[#allocation1 + $0x20] sm:$0xff pattern:$0x73625140] }
 0xcd5   :  { %5417 = vst [vmem:[#allocation1 + $0x3] ss:$4 sm:$0xff] %v4913_v30  ;;  %v4828_v30 = vld [vmem:[#allocation3 + $0x58] sm:$0x3] }
 0xcd6   :  { %14690 = vst [vmem:[#allocation57_spill] sm:$0xff] %v11647_v56 }
 0xcd7   :  { %5418 = vst [vmem:[#allocation1 + $0x20] ss:$4 sm:$0xff] %v4914_v58  ;;  %v4832_v58 = vld [vmem:[#allocation3 + $0x78] sm:$0x3] }
 0xcd8   :  { %5419 = vst [vmem:[#allocation1 + $0x21] ss:$4 sm:$0xff] %v4828_v30  ;;  %v11680_v30 = vld [vmem:[#allocation3 + $0x130] sm:$0xff] }
 0xcd9   :  { %5420 = vst [vmem:[#allocation1 + $0x22] ss:$4 sm:$0xff] %v11552_v23 }
 0xcdc   :  { %v11556_v17 = vld.sshfl [vmem:[#allocation1] sm:$0xff pattern:$0x73625140] }
 0xcdd   :  { %14684 = vst [vmem:[#allocation220_spill] sm:$0xff] %v11556_v17 }
 0xcde   :  { %5424 = vst [vmem:[#allocation1] ss:$4 sm:$0xff] %v12831_v37  ;;  %v12839_v37 = vrot.slane %v11680_v30, 4 }
 0xcdf   :  { %5425 = vst [vmem:[#allocation1 + $0x1] ss:$4 sm:$0xff] %v12813_v60  ;;  %v4957_v60 = vld [vmem:[#allocation3 + $0x1] sm:$0xff] }
 0xce0   :  { %5426 = vst [vmem:[#allocation1 + $0x2] ss:$4 sm:$0xff] %v4830_v29  ;;  %v12833_v29 = vrot.slane %v11552_v23, 2 }
 0xce1   :  { %5427 = vst [vmem:[#allocation1 + $0x3] ss:$4 sm:$0xff] %v11562_v3 }
 0xce2   :  { %5421 = vst [vmem:[#allocation1 + $0x23] ss:$4 sm:$0xff] %v12833_v29 }
 0xce8   :  { %v11568_v47 = vld.sshfl [vmem:[#allocation1] sm:$0xff pattern:$0x73625140] }
 0xce9   :  { %14685 = vst [vmem:[#allocation222_spill] sm:$0xff] %v11568_v47  ;;  %v11891_v47 = vld [vmem:[#allocation3 + $0x141] sm:$0xff] }
 0xcea   :  { %5434 = vst [vmem:[#allocation1] ss:$4 sm:$0xff] %v11565_v31 }
 0xceb   :  { %5435 = vst [vmem:[#allocation1 + $0x1] ss:$4 sm:$0xff] %v12810_v27  ;;  %v4929_v27 = vrot.slane %v11581_v4, 6 }
 0xcec   :  { %5436 = vst [vmem:[#allocation1 + $0x2] ss:$4 sm:$0xff] %v12809_v18  ;;  %v4856_v18 = vld [vmem:[#allocation3 + $0x148] sm:$0x3] }
 0xced   :  { %5437 = vst [vmem:[#allocation1 + $0x3] ss:$4 sm:$0xff] %v12808_v7  ;;  %v4928_v7 = vrot.slane %v11581_v4, 4 }
 0xcf4   :  { %v11585_v43 = vld.sshfl [vmem:[#allocation1] sm:$0xff pattern:$0x73625140] }
 0xcf5   :  { %14686 = vst [vmem:[#allocation49_spill] sm:$0xff] %v11585_v43  ;;  %v4974_v43 = vld [vmem:[#allocation3 + $0x89] sm:$0x3] }
 0xcf6   :  { %5444 = vst [vmem:[#allocation1] ss:$4 sm:$0xff] %v12822_v38  ;;  %v4844_v38 = vld [vmem:[#allocation3 + $0xe8] sm:$0x3] }
 0xcf7   :  { %5445 = vst [vmem:[#allocation1 + $0x1] ss:$4 sm:$0xff] %v4836_v22 }
 0xcf8   :  { %5446 = vst [vmem:[#allocation1 + $0x2] ss:$4 sm:$0xff] %v11581_v4 }
 0xcf9   :  { %5447 = vst [vmem:[#allocation1 + $0x3] ss:$4 sm:$0xff] %v4927_v16  ;;  %v11651_v16 = vld [vmem:[#allocation3 + $0x110] sm:$0xff] }
 0xcfa   :  { %v12802_v22 = vrot.slane %v11651_v16, 2  ;;  %v12801_v41 = vrot.slane %v11651_v16, 4 }
 0xd00   :  { %v11594_v34 = vld.sshfl [vmem:[#allocation1] sm:$0xff pattern:$0x73625140] }
 0xd01   :  { %14687 = vst [vmem:[#allocation55_spill] sm:$0xff] %v11594_v34  ;;  %v4989_v34 = vld [vmem:[#allocation3 + $0x111] sm:$0xff] }
 0xd02   :  { %5454 = vst [vmem:[#allocation1] ss:$4 sm:$0xff] %v12816_v39  ;;  %v5039_v39 = vrot.slane %v4957_v60, 6 }
 0xd03   :  { %5455 = vst [vmem:[#allocation1 + $0x1] ss:$4 sm:$0xff] %v12805_v62  ;;  %v12824_v62 = vrot.slane %v11579_v61, 4 }
 0xd04   :  { %5456 = vst [vmem:[#allocation1 + $0x2] ss:$4 sm:$0xff] %v12804_v15  ;;  %v11694_v15 = vld [vmem:[#allocation3 + $0x140] sm:$0xff] }
 0xd05   :  { %5457 = vst [vmem:[#allocation1 + $0x3] ss:$4 sm:$0xff] %v4840_v8  ;;  %v12800_v8 = vrot.slane %v11651_v16, 6 }
 0xd0c   :  { %v11614_v25 = vld.sshfl [vmem:[#allocation1] sm:$0xff pattern:$0x73625140] }
 0xd0d   :  { %14688 = vst [vmem:[#allocation50_spill] sm:$0xff] %v11614_v25  ;;  %v11850_v25 = vld [vmem:[#allocation3 + $0xf1] sm:$0xff] }
 0xd0e   :  { %5464 = vst [vmem:[#allocation1] ss:$4 sm:$0xff] %v4842_v44  ;;  %v12830_v44 = vrot.slane %v11562_v3, 4 }
 0xd0f   :  { %5465 = vst [vmem:[#allocation1 + $0x1] ss:$4 sm:$0xff] %v11612_v10 }
 0xd10   :  { %5466 = vst [vmem:[#allocation1 + $0x2] ss:$4 sm:$0xff] %v4936_v28  ;;  %v11669_v28 = vld.sshfl [vmem:[#allocation1 + $0x20] sm:$0xff pattern:$0x73625140] }
 0xd11   :  { %5467 = vst [vmem:[#allocation1 + $0x3] ss:$4 sm:$0xff] %v4937_v21  ;;  %v12829_v21 = vrot.slane %v11562_v3, 6 }
 0xd12   :  { %14691 = vst [vmem:[#allocation225_spill] sm:$0xff] %v11669_v28  ;;  %v5096_v28 = vrot.slane %v11891_v47, 6 }
 0xd13   :  { %5428 = vst [vmem:[#allocation1 + $0x20] ss:$4 sm:$0xff] %v12812_v42 }
 0xd14   :  { %5429 = vst [vmem:[#allocation1 + $0x21] ss:$4 sm:$0xff] %v12830_v44  ;;  %v11784_v44 = vld [vmem:[#allocation3 + $0x71] sm:$0xff] }
 0xd15   :  { %5430 = vst [vmem:[#allocation1 + $0x22] ss:$4 sm:$0xff] %v12829_v21  ;;  %v11762_v21 = vld [vmem:[#allocation3 + $0x51] sm:$0xff] }
 0xd16   :  { %5431 = vst [vmem:[#allocation1 + $0x23] ss:$4 sm:$0xff] %v4832_v58 }
 0xd18   :  { %v11637_v12 = vld.sshfl [vmem:[#allocation1] sm:$0xff pattern:$0x73625140] }
 0xd19   :  { %5474 = vst [vmem:[#allocation1] ss:$4 sm:$0xff] %v12811_v51  ;;  %v4838_v51 = vld [vmem:[#allocation3 + $0xb8] sm:$0x3] }
 0xd1a   :  { %5475 = vst [vmem:[#allocation1 + $0x1] ss:$4 sm:$0xff] %v12803_v19  ;;  %v12825_v19 = vrot.slane %v11579_v61, 2 }
 0xd1b   :  { %5476 = vst [vmem:[#allocation1 + $0x2] ss:$4 sm:$0xff] %v4846_v2  ;;  %v11674_v2 = vld [vmem:[#allocation3 + $0x120] sm:$0xff] }
 0xd1c   :  { %5477 = vst [vmem:[#allocation1 + $0x3] ss:$4 sm:$0xff] %v11643_v36  ;;  %v12807_v11 = vrot.slane %v11674_v2, 6 }
 0xd1d   :  { %v11691_v58 = vld.sshfl [vmem:[#allocation1 + $0x20] sm:$0xff pattern:$0x73625140] }
 0xd1e   :  { %14693 = vst [vmem:[#allocation59_spill] sm:$0xff] %v11691_v58 }
 0xd1f   :  { %5439 = vst [vmem:[#allocation1 + $0x21] ss:$4 sm:$0xff] %v11579_v61 }
 0xd20   :  { %5440 = vst [vmem:[#allocation1 + $0x22] ss:$4 sm:$0xff] %v12825_v19  ;;  %v4943_v19 = vrot.slane %v11643_v36, 4 }
 0xd21   :  { %5441 = vst [vmem:[#allocation1 + $0x23] ss:$4 sm:$0xff] %v12824_v62  ;;  %v12827_v62 = vrot.slane %v11629_v35, 2 }
 0xd23   :  { %v11656_v40 = vld.sshfl [vmem:[#allocation1] sm:$0xff pattern:$0x73625140] }
 0xd24   :  { %5484 = vst [vmem:[#allocation1] ss:$4 sm:$0xff] %v11651_v16 }
 0xd25   :  { %5485 = vst [vmem:[#allocation1 + $0x1] ss:$4 sm:$0xff] %v12802_v22  ;;  %v4834_v22 = vld [vmem:[#allocation3 + $0x88] sm:$0x3] }
 0xd26   :  { %5486 = vst [vmem:[#allocation1 + $0x2] ss:$4 sm:$0xff] %v12801_v41  ;;  %v12806_v41 = vrot.slane %v11680_v30, 2 }
 0xd27   :  { %5487 = vst [vmem:[#allocation1 + $0x3] ss:$4 sm:$0xff] %v12800_v8  ;;  %v4852_v8 = vld [vmem:[#allocation3 + $0x128] sm:$0x3] }
 0xd28   :  { %5438 = vst [vmem:[#allocation1 + $0x20] ss:$4 sm:$0xff] %v4834_v22  ;;  %v12819_v22 = vrot.slane %v11694_v15, 6 }
 0xd2e   :  { %v11683_v50 = vld.sshfl [vmem:[#allocation1] sm:$0xff pattern:$0x73625140] }
 0xd2f   :  { %14692 = vst [vmem:[#allocation64_spill] sm:$0xff] %v11683_v50  ;;  %v11715_v42 = vld.sshfl [vmem:[#allocation1 + $0x20] sm:$0xff pattern:$0x73625140] }
 0xd30   :  { %5494 = vst [vmem:[#allocation1] ss:$4 sm:$0xff] %v12807_v11 }
 0xd31   :  { %5495 = vst [vmem:[#allocation1 + $0x1] ss:$4 sm:$0xff] %v4852_v8  ;;  %v12814_v8 = vrot.slane %v11694_v15, 2 }
 0xd32   :  { %5496 = vst [vmem:[#allocation1 + $0x2] ss:$4 sm:$0xff] %v11680_v30 }
 0xd33   :  { %5497 = vst [vmem:[#allocation1 + $0x3] ss:$4 sm:$0xff] %v12806_v41  ;;  %v12815_v41 = vrot.slane %v11694_v15, 4 }
 0xd34   :  { %14695 = vst [vmem:[#allocation66_spill] sm:$0xff] %v11715_v42  ;;  %v5087_v42 = vrot.slane %v4989_v34, 6 }
 0xd35   :  { %5448 = vst [vmem:[#allocation1 + $0x20] ss:$4 sm:$0xff] %v4928_v7  ;;  %v11727_v7 = vld [vmem:[#allocation3 + $0x11] sm:$0xff] }
 0xd36   :  { %5449 = vst [vmem:[#allocation1 + $0x21] ss:$4 sm:$0xff] %v4929_v27  ;;  %v12821_v27 = vrot.slane %v11720_v57, 4 }
 0xd37   :  { %5450 = vst [vmem:[#allocation1 + $0x22] ss:$4 sm:$0xff] %v4838_v51  ;;  %v12823_v51 = vrot.slane %v11720_v57, 6 }
 0xd38   :  { %5451 = vst [vmem:[#allocation1 + $0x23] ss:$4 sm:$0xff] %v11590_v54 }
 0xd3a   :  { %v11704_v11 = vld.sshfl [vmem:[#allocation1] sm:$0xff pattern:$0x73625140] }
 0xd3b   :  { %14694 = vst [vmem:[#allocation65_spill] sm:$0xff] %v11704_v11 }
 0xd3c   :  { %5504 = vst [vmem:[#allocation1] ss:$4 sm:$0xff] %v12814_v8  ;;  %v5037_v8 = vrot.slane %v4957_v60, 2 }
 0xd3d   :  { %5505 = vst [vmem:[#allocation1 + $0x1] ss:$4 sm:$0xff] %v12815_v41  ;;  %v5038_v41 = vrot.slane %v4957_v60, 4 }
 0xd3e   :  { %5506 = vst [vmem:[#allocation1 + $0x2] ss:$4 sm:$0xff] %v12819_v22 }
 0xd3f   :  { %5507 = vst [vmem:[#allocation1 + $0x3] ss:$4 sm:$0xff] %v4856_v18  ;;  %v12820_v18 = vrot.slane %v11720_v57, 2  ;;  %v11723_v4 = vld.sshfl [vmem:[#allocation1 + $0x20] sm:$0xff pattern:$0x73625140] }
 0xd40   :  { %14697 = vst [vmem:[#allocation226_spill] sm:$0xff] %v11723_v4  ;;  %v5081_v4 = vrot.slane %v11850_v25, 6 }
 0xd41   :  { %5458 = vst [vmem:[#allocation1 + $0x20] ss:$4 sm:$0xff] %v11720_v57 }
 0xd42   :  { %5459 = vst [vmem:[#allocation1 + $0x21] ss:$4 sm:$0xff] %v12820_v18  ;;  %v4938_v18 = vrot.slane %v11612_v10, 6 }
 0xd43   :  { %5460 = vst [vmem:[#allocation1 + $0x22] ss:$4 sm:$0xff] %v12821_v27 }
 0xd44   :  { %5461 = vst [vmem:[#allocation1 + $0x23] ss:$4 sm:$0xff] %v12823_v51  ;;  %v11746_v51 = vld [vmem:[#allocation3 + $0x31] sm:$0xff] }
 0xd45   :  { %v5048_v10 = vrot.slane %v11746_v51, 6 }
 0xd46   :  { %v11718_v45 = vld.sshfl [vmem:[#allocation1] sm:$0xff pattern:$0x73625140] }
 0xd47   :  { %14696 = vst [vmem:[#allocation224_spill] sm:$0xff] %v11718_v45 }
 0xd48   :  { %5534 = vst [vmem:[#allocation1] ss:$4 sm:$0xff] %v4957_v60  ;;  %v11736_v60 = vld [vmem:[#allocation3 + $0x21] sm:$0xff] }
 0xd49   :  { %5536 = vst [vmem:[#allocation1 + $0x1] ss:$4 sm:$0xff] %v5037_v8  ;;  %v4960_v8 = vld [vmem:[#allocation3 + $0x19] sm:$0x3]  ;;  %v5043_v22 = vrot.slane %v11736_v60, 2 }
 0xd4a   :  { %5538 = vst [vmem:[#allocation1 + $0x2] ss:$4 sm:$0xff] %v5038_v41 }
 0xd4b   :  { %5540 = vst [vmem:[#allocation1 + $0x3] ss:$4 sm:$0xff] %v5039_v39  ;;  %v5042_v39 = vrot.slane %v11727_v7, 6  ;;  %v11744_v27 = vld.sshfl [vmem:[#allocation1 + $0x20] sm:$0xff pattern:$0x73625140] }
 0xd4c   :  { %14698 = vst [vmem:[#allocation61_spill] sm:$0xff] %v11744_v27  ;;  %v4968_v27 = vld [vmem:[#allocation3 + $0x59] sm:$0x3] }
 0xd4d   :  { %5468 = vst [vmem:[#allocation1 + $0x20] ss:$4 sm:$0xff] %v4938_v18  ;;  %v4964_v18 = vld [vmem:[#allocation3 + $0x39] sm:$0x3] }
 0xd4e   :  { %5469 = vst [vmem:[#allocation1 + $0x21] ss:$4 sm:$0xff] %v4844_v38  ;;  %v4942_v38 = vrot.slane %v11643_v36, 2 }
 0xd4f   :  { %5470 = vst [vmem:[#allocation1 + $0x22] ss:$4 sm:$0xff] %v11629_v35 }
 0xd50   :  { %5471 = vst [vmem:[#allocation1 + $0x23] ss:$4 sm:$0xff] %v12827_v62  ;;  %v4944_v62 = vrot.slane %v11643_v36, 6  ;;  %v4850_v36 = vld [vmem:[#allocation3 + $0x118] sm:$0x3] }
 0xd52   :  { %v11739_v41 = vld.sshfl [vmem:[#allocation1] sm:$0xff pattern:$0x73625140] }
 0xd53   :  { %5551 = vst [vmem:[#allocation1] ss:$4 sm:$0xff] %v5042_v39  ;;  %v5046_v39 = vrot.slane %v11746_v51, 2 }
 0xd54   :  { %5552 = vst [vmem:[#allocation1 + $0x1] ss:$4 sm:$0xff] %v4960_v8 }
 0xd55   :  { %5553 = vst [vmem:[#allocation1 + $0x2] ss:$4 sm:$0xff] %v11736_v60 }
 0xd56   :  { %5554 = vst [vmem:[#allocation1 + $0x3] ss:$4 sm:$0xff] %v5043_v22  ;;  %v5047_v22 = vrot.slane %v11746_v51, 4 }
 0xd57   :  { %v11759_v33 = vld.sshfl [vmem:[#allocation1 + $0x20] sm:$0xff pattern:$0x73625140] }
 0xd58   :  { %5478 = vst [vmem:[#allocation1 + $0x20] ss:$4 sm:$0xff] %v4942_v38 }
 0xd59   :  { %5479 = vst [vmem:[#allocation1 + $0x21] ss:$4 sm:$0xff] %v4943_v19  ;;  %v11772_v19 = vld [vmem:[#allocation3 + $0x61] sm:$0xff] }
 0xd5a   :  { %5480 = vst [vmem:[#allocation1 + $0x22] ss:$4 sm:$0xff] %v4944_v62  ;;  %v12832_v62 = vrot.slane %v11674_v2, 2 }
 0xd5b   :  { %5481 = vst [vmem:[#allocation1 + $0x23] ss:$4 sm:$0xff] %v4848_v14  ;;  %v12834_v14 = vrot.slane %v11674_v2, 4 }
 0xd5d   :  { %v11754_v8 = vld.sshfl [vmem:[#allocation1] sm:$0xff pattern:$0x73625140] }
 0xd5e   :  { %5561 = vst [vmem:[#allocation1] ss:$4 sm:$0xff] %v5046_v39  ;;  %v4966_v39 = vld [vmem:[#allocation3 + $0x49] sm:$0x3] }
 0xd5f   :  { %5562 = vst [vmem:[#allocation1 + $0x1] ss:$4 sm:$0xff] %v5047_v22 }
 0xd60   :  { %5563 = vst [vmem:[#allocation1 + $0x2] ss:$4 sm:$0xff] %v5048_v10  ;;  %v5052_v10 = vrot.slane %v11762_v21, 2 }
 0xd61   :  { %5564 = vst [vmem:[#allocation1 + $0x3] ss:$4 sm:$0xff] %v4964_v18  ;;  %v5053_v18 = vrot.slane %v11762_v21, 4 }
 0xd62   :  { %v11769_v38 = vld.sshfl [vmem:[#allocation1 + $0x20] sm:$0xff pattern:$0x73625140] }
 0xd63   :  { %5488 = vst [vmem:[#allocation1 + $0x20] ss:$4 sm:$0xff] %v4850_v36  ;;  %v4970_v36 = vld [vmem:[#allocation3 + $0x69] sm:$0x3] }
 0xd64   :  { %5489 = vst [vmem:[#allocation1 + $0x21] ss:$4 sm:$0xff] %v11674_v2 }
 0xd65   :  { %5490 = vst [vmem:[#allocation1 + $0x22] ss:$4 sm:$0xff] %v12832_v62  ;;  %v12840_v62 = vrot.slane %v11680_v30, 6 }
 0xd66   :  { %5491 = vst [vmem:[#allocation1 + $0x23] ss:$4 sm:$0xff] %v12834_v14  ;;  %v4854_v14 = vld [vmem:[#allocation3 + $0x138] sm:$0x3] }
 0xd68   :  { %v11764_v22 = vld.sshfl [vmem:[#allocation1] sm:$0xff pattern:$0x73625140] }
 0xd69   :  { %5571 = vst [vmem:[#allocation1] ss:$4 sm:$0xff] %v4966_v39  ;;  %v5056_v39 = vrot.slane %v11772_v19, 4 }
 0xd6a   :  { %5572 = vst [vmem:[#allocation1 + $0x1] ss:$4 sm:$0xff] %v11762_v21 }
 0xd6b   :  { %5573 = vst [vmem:[#allocation1 + $0x2] ss:$4 sm:$0xff] %v5052_v10  ;;  %v5057_v10 = vrot.slane %v11772_v19, 6 }
 0xd6c   :  { %5574 = vst [vmem:[#allocation1 + $0x3] ss:$4 sm:$0xff] %v5053_v18 }
 0xd6d   :  { %v11789_v29 = vld.sshfl [vmem:[#allocation1 + $0x20] sm:$0xff pattern:$0x73625140] }
 0xd6e   :  { %14699 = vst [vmem:[#allocation67_spill] sm:$0xff] %v11789_v29 }
 0xd6f   :  { %5498 = vst [vmem:[#allocation1 + $0x20] ss:$4 sm:$0xff] %v12839_v37  ;;  %v5040_v37 = vrot.slane %v11727_v7, 2 }
 0xd70   :  { %5499 = vst [vmem:[#allocation1 + $0x21] ss:$4 sm:$0xff] %v12840_v62  ;;  %v11801_v62 = vld [vmem:[#allocation3 + $0x91] sm:$0xff] }
 0xd71   :  { %5500 = vst [vmem:[#allocation1 + $0x22] ss:$4 sm:$0xff] %v4854_v14  ;;  %v5041_v14 = vrot.slane %v11727_v7, 4 }
 0xd72   :  { %5501 = vst [vmem:[#allocation1 + $0x23] ss:$4 sm:$0xff] %v11694_v15 }
 0xd73   :  { %v11782_v18 = vld.sshfl [vmem:[#allocation1] sm:$0xff pattern:$0x73625140] }
 0xd74   :  { %5581 = vst [vmem:[#allocation1] ss:$4 sm:$0xff] %v5056_v39  ;;  %v4973_v39 = vld [vmem:[#allocation3 + $0x81] sm:$0xff] }
 0xd75   :  { %5582 = vst [vmem:[#allocation1 + $0x1] ss:$4 sm:$0xff] %v5057_v10  ;;  %v5061_v10 = vrot.slane %v4973_v39, 2  ;;  %v5062_v55 = vrot.slane %v4973_v39, 4  ;;  %v5063_v32 = vrot.slane %v4973_v39, 6 }
 0xd76   :  { %5583 = vst [vmem:[#allocation1 + $0x2] ss:$4 sm:$0xff] %v4970_v36 }
 0xd77   :  { %5584 = vst [vmem:[#allocation1 + $0x3] ss:$4 sm:$0xff] %v11784_v44 }
 0xd79   :  { %v11798_v46 = vld.sshfl [vmem:[#allocation1 + $0x20] sm:$0xff pattern:$0x73625140] }
 0xd7a   :  { %14700 = vst [vmem:[#allocation62_spill] sm:$0xff] %v11798_v46 }
 0xd7b   :  { %5542 = vst [vmem:[#allocation1 + $0x20] ss:$4 sm:$0xff] %v4958_v9  ;;  %v5044_v9 = vrot.slane %v11736_v60, 4 }
 0xd7c   :  { %5544 = vst [vmem:[#allocation1 + $0x21] ss:$4 sm:$0xff] %v11727_v7 }
 0xd7d   :  { %5546 = vst [vmem:[#allocation1 + $0x22] ss:$4 sm:$0xff] %v5040_v37  ;;  %v5045_v37 = vrot.slane %v11736_v60, 6  ;;  %v11826_v60 = vld [vmem:[#allocation3 + $0x41] sm:$0xff] }
 0xd7e   :  { %v11796_v36 = vld.sshfl [vmem:[#allocation1] sm:$0xff pattern:$0x73625140]  ;;  %5548 = vst [vmem:[#allocation1 + $0x23] ss:$4 sm:$0xff] %v5041_v14  ;;  %v11818_v14 = vld [vmem:[#allocation3 + $0xc1] sm:$0xff] }
 0xd7f   :  { %5591 = vst [vmem:[#allocation1] ss:$4 sm:$0xff] %v4973_v39  ;;  %v12843_v39 = vrot.slane %v11801_v62, 6  ;;  %v12849_v53 = vrot.slane %v11826_v60, 6 }
 0xd80   :  { %5592 = vst [vmem:[#allocation1 + $0x1] ss:$4 sm:$0xff] %v5061_v10  ;;  %v4976_v10 = vld [vmem:[#allocation3 + $0x99] sm:$0x3] }
 0xd81   :  { %5593 = vst [vmem:[#allocation1 + $0x2] ss:$4 sm:$0xff] %v5062_v55  ;;  %v5067_v55 = vrot.slane %v11805_v5, 2 }
 0xd82   :  { %5594 = vst [vmem:[#allocation1 + $0x3] ss:$4 sm:$0xff] %v5063_v32 }
 0xd85   :  { %v11816_v7 = vld.sshfl [vmem:[#allocation1 + $0x20] sm:$0xff pattern:$0x73625140] }
 0xd86   :  { %5555 = vst [vmem:[#allocation1 + $0x20] ss:$4 sm:$0xff] %v5044_v9  ;;  %v4980_v9 = vld [vmem:[#allocation3 + $0xc9] sm:$0x3] }
 0xd87   :  { %5556 = vst [vmem:[#allocation1 + $0x21] ss:$4 sm:$0xff] %v5045_v37  ;;  %v12847_v37 = vrot.slane %v11826_v60, 2 }
 0xd88   :  { %5557 = vst [vmem:[#allocation1 + $0x22] ss:$4 sm:$0xff] %v4962_v48 }
 0xd89   :  { %v11809_v32 = vld.sshfl [vmem:[#allocation1] sm:$0xff pattern:$0x73625140]  ;;  %5558 = vst [vmem:[#allocation1 + $0x23] ss:$4 sm:$0xff] %v11746_v51  ;;  %v12848_v51 = vrot.slane %v11826_v60, 4 }
 0xd8a   :  { %5601 = vst [vmem:[#allocation1] ss:$4 sm:$0xff] %v12843_v39  ;;  %v5070_v39 = vrot.slane %v11818_v14, 2 }
 0xd8b   :  { %5602 = vst [vmem:[#allocation1 + $0x1] ss:$4 sm:$0xff] %v4976_v10  ;;  %v5071_v10 = vrot.slane %v11818_v14, 4 }
 0xd8c   :  { %5603 = vst [vmem:[#allocation1 + $0x2] ss:$4 sm:$0xff] %v11805_v5 }
 0xd8d   :  { %5604 = vst [vmem:[#allocation1 + $0x3] ss:$4 sm:$0xff] %v5067_v55  ;;  %v5072_v55 = vrot.slane %v11818_v14, 6 }
 0xd90   :  { %v11829_v48 = vld.sshfl [vmem:[#allocation1 + $0x20] sm:$0xff pattern:$0x73625140] }
 0xd91   :  { %5565 = vst [vmem:[#allocation1 + $0x20] ss:$4 sm:$0xff] %v11826_v60 }
 0xd92   :  { %5566 = vst [vmem:[#allocation1 + $0x21] ss:$4 sm:$0xff] %v12847_v37  ;;  %v5054_v37 = vrot.slane %v11762_v21, 6  ;;  %v11857_v21 = vld [vmem:[#allocation3 + $0x101] sm:$0xff] }
 0xd93   :  { %5567 = vst [vmem:[#allocation1 + $0x22] ss:$4 sm:$0xff] %v12848_v51 }
 0xd94   :  { %v11823_v26 = vld.sshfl [vmem:[#allocation1] sm:$0xff pattern:$0x73625140]  ;;  %5568 = vst [vmem:[#allocation1 + $0x23] ss:$4 sm:$0xff] %v12849_v53  ;;  %v5055_v53 = vrot.slane %v11772_v19, 2 }
 0xd95   :  { %5611 = vst [vmem:[#allocation1] ss:$4 sm:$0xff] %v5070_v39  ;;  %v11838_v39 = vld [vmem:[#allocation3 + $0xe1] sm:$0xff] }
 0xd96   :  { %5612 = vst [vmem:[#allocation1 + $0x1] ss:$4 sm:$0xff] %v5071_v10  ;;  %v4982_v10 = vld [vmem:[#allocation3 + $0xd9] sm:$0x3]  ;;  %v5077_v1 = vrot.slane %v11838_v39, 4 }
 0xd97   :  { %5613 = vst [vmem:[#allocation1 + $0x2] ss:$4 sm:$0xff] %v5072_v55 }
 0xd98   :  { %5614 = vst [vmem:[#allocation1 + $0x3] ss:$4 sm:$0xff] %v4980_v9  ;;  %v5076_v9 = vrot.slane %v11838_v39, 2 }
 0xd9b   :  { %v11848_v51 = vld.sshfl [vmem:[#allocation1 + $0x20] sm:$0xff pattern:$0x73625140] }
 0xd9c   :  { %5575 = vst [vmem:[#allocation1 + $0x20] ss:$4 sm:$0xff] %v5054_v37  ;;  %v5060_v37 = vrot.slane %v11784_v44, 6 }
 0xd9d   :  { %5576 = vst [vmem:[#allocation1 + $0x21] ss:$4 sm:$0xff] %v4968_v27  ;;  %v5058_v27 = vrot.slane %v11784_v44, 2 }
 0xd9e   :  { %5577 = vst [vmem:[#allocation1 + $0x22] ss:$4 sm:$0xff] %v11772_v19  ;;  %v5059_v19 = vrot.slane %v11784_v44, 4  ;;  %v12851_v44 = vrot.slane %v11801_v62, 2 }
 0xd9f   :  { %v11842_v55 = vld.sshfl [vmem:[#allocation1] sm:$0xff pattern:$0x73625140]  ;;  %5578 = vst [vmem:[#allocation1 + $0x23] ss:$4 sm:$0xff] %v5055_v53 }
 0xda0   :  { %5621 = vst [vmem:[#allocation1] ss:$4 sm:$0xff] %v4982_v10  ;;  %v5080_v10 = vrot.slane %v11850_v25, 4 }
 0xda1   :  { %5622 = vst [vmem:[#allocation1 + $0x1] ss:$4 sm:$0xff] %v11838_v39 }
 0xda2   :  { %5623 = vst [vmem:[#allocation1 + $0x2] ss:$4 sm:$0xff] %v5076_v9 }
 0xda3   :  { %5624 = vst [vmem:[#allocation1 + $0x3] ss:$4 sm:$0xff] %v5077_v1  ;;  %v4986_v1 = vld [vmem:[#allocation3 + $0xf9] sm:$0x3] }
 0xda6   :  { %v11862_v53 = vld.sshfl [vmem:[#allocation1 + $0x20] sm:$0xff pattern:$0x73625140] }
 0xda7   :  { %5585 = vst [vmem:[#allocation1 + $0x20] ss:$4 sm:$0xff] %v5058_v27  ;;  %v11870_v27 = vld [vmem:[#allocation3 + $0x121] sm:$0xff] }
 0xda8   :  { %5586 = vst [vmem:[#allocation1 + $0x21] ss:$4 sm:$0xff] %v5059_v19  ;;  %v12850_v19 = vrot.slane %v11801_v62, 4 }
 0xda9   :  { %5587 = vst [vmem:[#allocation1 + $0x22] ss:$4 sm:$0xff] %v5060_v37 }
 0xdaa   :  { %v5629_v9 = vld.sshfl [vmem:[#allocation1] sm:$0xff pattern:$0x73625140] }
 0xdab   :  { %5698 = vrot.lane.b32.xlu0 %v5629_v9, %s6970_s27  ;;  %5631 = vst [vmem:[#allocation1] ss:$4 sm:$0xff] %v5080_v10  ;;  %v4972_v9 = vld [vmem:[#allocation3 + $0x79] sm:$0x3] }
 0xdac   :  { %5632 = vst [vmem:[#allocation1 + $0x1] ss:$4 sm:$0xff] %v5081_v4  ;;  %v5085_v4 = vrot.slane %v4989_v34, 2 }
 0xdad   :  { %5633 = vst [vmem:[#allocation1 + $0x2] ss:$4 sm:$0xff] %v4986_v1  ;;  %v5086_v1 = vrot.slane %v4989_v34, 4 }
 0xdae   :  { %5634 = vst [vmem:[#allocation1 + $0x3] ss:$4 sm:$0xff] %v11857_v21 }
 0xdaf   :  { %5588 = vst [vmem:[#allocation1 + $0x23] ss:$4 sm:$0xff] %v4972_v9  ;;  %v4992_v9 = vld [vmem:[#allocation3 + $0x129] sm:$0x3] }
 0xdb5   :  { %v11865_v10 = vld.sshfl [vmem:[#allocation1] sm:$0xff pattern:$0x73625140] }
 0xdb6   :  { %5641 = vst [vmem:[#allocation1] ss:$4 sm:$0xff] %v4989_v34  ;;  %v11867_v58 = vld.sshfl [vmem:[#allocation1 + $0x20] sm:$0xff pattern:$0x73625140] }
 0xdb7   :  { %5642 = vst [vmem:[#allocation1 + $0x1] ss:$4 sm:$0xff] %v5085_v4  ;;  %v11878_v34 = vld [vmem:[#allocation3 + $0x131] sm:$0xff]  ;;  %v5068_v4 = vrot.slane %v11805_v5, 4 }
 0xdb8   :  { %5643 = vst [vmem:[#allocation1 + $0x2] ss:$4 sm:$0xff] %v5086_v1  ;;  %v5069_v1 = vrot.slane %v11805_v5, 6  ;;  %v11899_v5 = vld [vmem:[#allocation3 + $0xd1] sm:$0xff] }
 0xdb9   :  { %5644 = vst [vmem:[#allocation1 + $0x3] ss:$4 sm:$0xff] %v5087_v42  ;;  %v12852_v42 = vrot.slane %v11870_v27, 6 }
 0xdba   :  { %5595 = vst [vmem:[#allocation1 + $0x20] ss:$4 sm:$0xff] %v4974_v43  ;;  %v5091_v43 = vrot.slane %v11878_v34, 2 }
 0xdbb   :  { %5596 = vst [vmem:[#allocation1 + $0x21] ss:$4 sm:$0xff] %v11801_v62 }
 0xdbc   :  { %5597 = vst [vmem:[#allocation1 + $0x22] ss:$4 sm:$0xff] %v12851_v44 }
 0xdbd   :  { %5598 = vst [vmem:[#allocation1 + $0x23] ss:$4 sm:$0xff] %v12850_v19  ;;  %v4978_v19 = vld [vmem:[#allocation3 + $0xb9] sm:$0x3] }
 0xdc0   :  { %v11881_v37 = vld.sshfl [vmem:[#allocation1] sm:$0xff pattern:$0x73625140] }
 0xdc1   :  { %5651 = vst [vmem:[#allocation1] ss:$4 sm:$0xff] %v12852_v42  ;;  %v5094_v42 = vrot.slane %v11891_v47, 2 }
 0xdc2   :  { %5652 = vst [vmem:[#allocation1 + $0x1] ss:$4 sm:$0xff] %v4992_v9  ;;  %v5095_v9 = vrot.slane %v11891_v47, 4 }
 0xdc3   :  { %5653 = vst [vmem:[#allocation1 + $0x2] ss:$4 sm:$0xff] %v11878_v34 }
 0xdc4   :  { %5654 = vst [vmem:[#allocation1 + $0x3] ss:$4 sm:$0xff] %v5091_v43  ;;  %v11889_v44 = vld.sshfl [vmem:[#allocation1 + $0x20] sm:$0xff pattern:$0x73625140] }
 0xdc5   :  { %5605 = vst [vmem:[#allocation1 + $0x20] ss:$4 sm:$0xff] %v5068_v4  ;;  %v4996_v43 = vld [vmem:[#allocation3 + $0x149] sm:$0x3]  ;;  %v12853_v4 = vrot.slane %v11899_v5, 2 }
 0xdc6   :  { %5606 = vst [vmem:[#allocation1 + $0x21] ss:$4 sm:$0xff] %v5069_v1  ;;  %v12855_v1 = vrot.slane %v11899_v5, 6 }
 0xdc7   :  { %5607 = vst [vmem:[#allocation1 + $0x22] ss:$4 sm:$0xff] %v4978_v19 }
 0xdc8   :  { %5608 = vst [vmem:[#allocation1 + $0x23] ss:$4 sm:$0xff] %v11818_v14  ;;  %v12854_v14 = vrot.slane %v11899_v5, 4 }
 0xdcb   :  { %v11896_v45 = vld.sshfl [vmem:[#allocation1] sm:$0xff pattern:$0x73625140] }
 0xdcc   :  { %5661 = vst [vmem:[#allocation1] ss:$4 sm:$0xff] %v5094_v42  ;;  %v14701_v42 = vrot.slane %v11510_v59, 2 }
 0xdcd   :  { %5662 = vst [vmem:[#allocation1 + $0x1] ss:$4 sm:$0xff] %v5095_v9  ;;  %v14702_v9 = vrot.slane %v11510_v59, 4 }
 0xdce   :  { %5663 = vst [vmem:[#allocation1 + $0x2] ss:$4 sm:$0xff] %v5096_v28 }
 0xdcf   :  { %5664 = vst [vmem:[#allocation1 + $0x3] ss:$4 sm:$0xff] %v4996_v43  ;;  %v11902_v19 = vld.sshfl [vmem:[#allocation1 + $0x20] sm:$0xff pattern:$0x73625140]  ;;  %v14703_v43 = vrot.slane %v11510_v59, 6 }
 0xdd0   :  { %5615 = vst [vmem:[#allocation1 + $0x20] ss:$4 sm:$0xff] %v11899_v5 }
 0xdd1   :  { %5616 = vst [vmem:[#allocation1 + $0x21] ss:$4 sm:$0xff] %v12853_v4  ;;  %v5078_v4 = vrot.slane %v11838_v39, 6  ;;  %v14705_v39 = vrot.slane %v11532_v20, 2 }
 0xdd2   :  { %5617 = vst [vmem:[#allocation1 + $0x22] ss:$4 sm:$0xff] %v12854_v14  ;;  %v4984_v14 = vld [vmem:[#allocation3 + $0xe9] sm:$0x3] }
 0xdd3   :  { %5618 = vst [vmem:[#allocation1 + $0x23] ss:$4 sm:$0xff] %v12855_v1  ;;  %v5079_v1 = vrot.slane %v11850_v25, 2 }
 0xdd6   :  { %v11913_v28 = vld.sshfl [vmem:[#allocation1] sm:$0xff pattern:$0x73625140] }
 0xdd7   :  { %5741 = vst [vmem:[#allocation1] ss:$4 sm:$0xff] %v11510_v59  ;;  %v14704_v59 = vrot.slane %v11521_v13, 6 }
 0xdd8   :  { %5743 = vst [vmem:[#allocation1 + $0x1] ss:$4 sm:$0xff] %v14701_v42  ;;  %v5100_v42 = vld [vmem:[#allocation3 + $0x28] sm:$0x3] }
 0xdd9   :  { %5745 = vst [vmem:[#allocation1 + $0x2] ss:$4 sm:$0xff] %v14702_v9 }
 0xdda   :  { %5747 = vst [vmem:[#allocation1 + $0x3] ss:$4 sm:$0xff] %v14703_v43  ;;  %v11923_v46 = vld.sshfl [vmem:[#allocation1 + $0x20] sm:$0xff pattern:$0x73625140]  ;;  %v14706_v43 = vrot.slane %v11617_v52, 2 }
 0xddb   :  { %5625 = vst [vmem:[#allocation1 + $0x20] ss:$4 sm:$0xff] %v5078_v4  ;;  %v5082_v4 = vrot.slane %v11857_v21, 2 }
 0xddc   :  { %5626 = vst [vmem:[#allocation1 + $0x21] ss:$4 sm:$0xff] %v4984_v14  ;;  %v5083_v14 = vrot.slane %v11857_v21, 4 }
 0xddd   :  { %5627 = vst [vmem:[#allocation1 + $0x22] ss:$4 sm:$0xff] %v11850_v25 }
 0xdde   :  { %5628 = vst [vmem:[#allocation1 + $0x23] ss:$4 sm:$0xff] %v5079_v1  ;;  %v5084_v1 = vrot.slane %v11857_v21, 6  ;;  %v12857_v21 = vrot.slane %v11870_v27, 2 }
 0xde1   :  { %v5756_v11 = vld.sshfl [vmem:[#allocation1] sm:$0xff pattern:$0x73625140] }
 0xde2   :  { %5873 = vrot.lane.b32.xlu0 %v5756_v11, %s6973_s2  ;;  %5758 = vst [vmem:[#allocation1] ss:$4 sm:$0xff] %v14704_v59  ;;  %v4988_v11 = vld [vmem:[#allocation3 + $0x109] sm:$0x3] }
 0xde3   :  { %5759 = vst [vmem:[#allocation1 + $0x1] ss:$4 sm:$0xff] %v5100_v42  ;;  %v14707_v42 = vrot.slane %v11617_v52, 4  ;;  %v5104_v59 = vld [vmem:[#allocation3 + $0x48] sm:$0x3] }
 0xde4   :  { %5760 = vst [vmem:[#allocation1 + $0x2] ss:$4 sm:$0xff] %v11532_v20 }
 0xde5   :  { %5761 = vst [vmem:[#allocation1 + $0x3] ss:$4 sm:$0xff] %v14705_v39  ;;  %v11935_v25 = vld.sshfl [vmem:[#allocation1 + $0x20] sm:$0xff pattern:$0x73625140]  ;;  %v14708_v39 = vrot.slane %v11617_v52, 6 }
 0xde6   :  { %5635 = vst [vmem:[#allocation1 + $0x20] ss:$4 sm:$0xff] %v5082_v4  ;;  %v4990_v4 = vld [vmem:[#allocation3 + $0x119] sm:$0x3] }
 0xde7   :  { %5636 = vst [vmem:[#allocation1 + $0x21] ss:$4 sm:$0xff] %v5083_v14  ;;  %v12856_v14 = vrot.slane %v11870_v27, 4 }
 0xde8   :  { %5637 = vst [vmem:[#allocation1 + $0x22] ss:$4 sm:$0xff] %v5084_v1  ;;  %v5106_v1 = vld [vmem:[#allocation3 + $0x58] sm:$0x3] }
 0xde9   :  { %5638 = vst [vmem:[#allocation1 + $0x23] ss:$4 sm:$0xff] %v4988_v11 }
 0xdec   :  { %v11938_v9 = vld.sshfl [vmem:[#allocation1] sm:$0xff pattern:$0x73625140] }
 0xded   :  { %5768 = vst [vmem:[#allocation1] ss:$4 sm:$0xff] %v14706_v43  ;;  %v14709_v43 = vrot.slane %v11552_v23, 2 }
 0xdee   :  { %5769 = vst [vmem:[#allocation1 + $0x1] ss:$4 sm:$0xff] %v14707_v42  ;;  %v14710_v42 = vrot.slane %v11552_v23, 4 }
 0xdef   :  { %5770 = vst [vmem:[#allocation1 + $0x2] ss:$4 sm:$0xff] %v14708_v39  ;;  %v5093_v39 = vrot.slane %v11878_v34, 6 }
 0xdf0   :  { %5771 = vst [vmem:[#allocation1 + $0x3] ss:$4 sm:$0xff] %v5104_v59  ;;  %v11946_v17 = vld.sshfl [vmem:[#allocation1 + $0x20] sm:$0xff pattern:$0x73625140]  ;;  %v5092_v59 = vrot.slane %v11878_v34, 4 }
 0xdf1   :  { %5646 = vst [vmem:[#allocation1 + $0x21] ss:$4 sm:$0xff] %v11870_v27  ;;  %v5098_v34 = vld [vmem:[#allocation3 + $0x18] sm:$0x3] }
 0xdf2   :  { %5645 = vst [vmem:[#allocation1 + $0x20] ss:$4 sm:$0xff] %v4990_v4 }
 0xdf3   :  { %5647 = vst [vmem:[#allocation1 + $0x22] ss:$4 sm:$0xff] %v12857_v21  ;;  %v14711_v21 = vrot.slane %v11562_v3, 4 }
 0xdf4   :  { %5648 = vst [vmem:[#allocation1 + $0x23] ss:$4 sm:$0xff] %v12856_v14  ;;  %v4994_v14 = vld [vmem:[#allocation3 + $0x139] sm:$0x3] }
 0xdf7   :  { %v11955_v11 = vld.sshfl [vmem:[#allocation1] sm:$0xff pattern:$0x73625140] }
 0xdf8   :  { %5778 = vst [vmem:[#allocation1] ss:$4 sm:$0xff] %v5106_v1 }
 0xdf9   :  { %5779 = vst [vmem:[#allocation1 + $0x1] ss:$4 sm:$0xff] %v11552_v23 }
 0xdfa   :  { %5780 = vst [vmem:[#allocation1 + $0x2] ss:$4 sm:$0xff] %v14709_v43  ;;  %v5110_v43 = vld [vmem:[#allocation3 + $0x78] sm:$0x3] }
 0xdfb   :  { %5781 = vst [vmem:[#allocation1 + $0x3] ss:$4 sm:$0xff] %v14710_v42  ;;  %v11964_v4 = vld.sshfl [vmem:[#allocation1 + $0x20] sm:$0xff pattern:$0x73625140]  ;;  %v14712_v42 = vrot.slane %v11562_v3, 6 }
 0xdfc   :  { %5655 = vst [vmem:[#allocation1 + $0x20] ss:$4 sm:$0xff] %v5092_v59  ;;  %v14715_v59 = vrot.slane %v11579_v61, 2 }
 0xdfd   :  { %5656 = vst [vmem:[#allocation1 + $0x21] ss:$4 sm:$0xff] %v5093_v39  ;;  %v14716_v39 = vrot.slane %v11579_v61, 4 }
 0xdfe   :  { %5657 = vst [vmem:[#allocation1 + $0x22] ss:$4 sm:$0xff] %v4994_v14  ;;  %v14714_v14 = vrot.slane %v11521_v13, 4 }
 0xdff   :  { %5658 = vst [vmem:[#allocation1 + $0x23] ss:$4 sm:$0xff] %v11891_v47  ;;  %v14713_v47 = vrot.slane %v11521_v13, 2 }
 0xe02   :  { %v11967_v1 = vld.sshfl [vmem:[#allocation1] sm:$0xff pattern:$0x73625140] }
 0xe03   :  { %5788 = vst [vmem:[#allocation1] ss:$4 sm:$0xff] %v14711_v21 }
 0xe04   :  { %5789 = vst [vmem:[#allocation1 + $0x1] ss:$4 sm:$0xff] %v14712_v42 }
 0xe05   :  { %5790 = vst [vmem:[#allocation1 + $0x2] ss:$4 sm:$0xff] %v5110_v43  ;;  %v14717_v43 = vrot.slane %v11579_v61, 6 }
 0xe06   :  { %5791 = vst [vmem:[#allocation1 + $0x3] ss:$4 sm:$0xff] %v11565_v31  ;;  %v11974_v29 = vld.sshfl [vmem:[#allocation1 + $0x20] sm:$0xff pattern:$0x73625140] }
 0xe07   :  { %5749 = vst [vmem:[#allocation1 + $0x20] ss:$4 sm:$0xff] %v5098_v34  ;;  %v14718_v34 = vrot.slane %v11532_v20, 4 }
 0xe08   :  { %5751 = vst [vmem:[#allocation1 + $0x21] ss:$4 sm:$0xff] %v11521_v13  ;;  %v11994_v13 = vld [vmem:[#allocation3 + $0xa0] sm:$0xff] }
 0xe09   :  { %5753 = vst [vmem:[#allocation1 + $0x22] ss:$4 sm:$0xff] %v14713_v47  ;;  %v5102_v47 = vld [vmem:[#allocation3 + $0x38] sm:$0x3]  ;;  %v5206_v50 = vrot.slane %v11994_v13, 6 }
 0xe0a   :  { %5755 = vst [vmem:[#allocation1 + $0x23] ss:$4 sm:$0xff] %v14714_v14  ;;  %v14719_v14 = vrot.slane %v11532_v20, 6 }
 0xe0d   :  { %v11981_v21 = vld.sshfl [vmem:[#allocation1] sm:$0xff pattern:$0x73625140] }
 0xe0e   :  { %5798 = vst [vmem:[#allocation1] ss:$4 sm:$0xff] %v11579_v61  ;;  %v5105_v61 = vld [vmem:[#allocation3 + $0x50] sm:$0xff] }
 0xe0f   :  { %5799 = vst [vmem:[#allocation1 + $0x1] ss:$4 sm:$0xff] %v14715_v59  ;;  %v5116_v59 = vld [vmem:[#allocation3 + $0xa8] sm:$0x3]  ;;  %v5190_v20 = vrot.slane %v5105_v61, 4 }
 0xe10   :  { %5800 = vst [vmem:[#allocation1 + $0x2] ss:$4 sm:$0xff] %v14716_v39 }
 0xe11   :  { %5801 = vst [vmem:[#allocation1 + $0x3] ss:$4 sm:$0xff] %v14717_v43  ;;  %v11990_v42 = vld.sshfl [vmem:[#allocation1 + $0x20] sm:$0xff pattern:$0x73625140]  ;;  %v14720_v43 = vrot.slane %v11590_v54, 2 }
 0xe12   :  { %5762 = vst [vmem:[#allocation1 + $0x20] ss:$4 sm:$0xff] %v14718_v34  ;;  %v5189_v34 = vrot.slane %v5105_v61, 2 }
 0xe13   :  { %5763 = vst [vmem:[#allocation1 + $0x21] ss:$4 sm:$0xff] %v14719_v14  ;;  %v5191_v14 = vrot.slane %v5105_v61, 6 }
 0xe14   :  { %5764 = vst [vmem:[#allocation1 + $0x22] ss:$4 sm:$0xff] %v5102_v47  ;;  %v14722_v47 = vrot.slane %v11720_v57, 4 }
 0xe15   :  { %5765 = vst [vmem:[#allocation1 + $0x23] ss:$4 sm:$0xff] %v11617_v52 }
 0xe18   :  { %v12000_v39 = vld.sshfl [vmem:[#allocation1] sm:$0xff pattern:$0x73625140] }
 0xe19   :  { %5808 = vst [vmem:[#allocation1] ss:$4 sm:$0xff] %v5206_v50  ;;  %v14721_v50 = vrot.slane %v11720_v57, 2 }
 0xe1a   :  { %5809 = vst [vmem:[#allocation1 + $0x1] ss:$4 sm:$0xff] %v5116_v59  ;;  %v5120_v59 = vld [vmem:[#allocation3 + $0xd8] sm:$0x3] }
 0xe1b   :  { %5810 = vst [vmem:[#allocation1 + $0x2] ss:$4 sm:$0xff] %v11590_v54 }
 0xe1c   :  { %5811 = vst [vmem:[#allocation1 + $0x3] ss:$4 sm:$0xff] %v14720_v43  ;;  %v12005_v56 = vld.sshfl [vmem:[#allocation1 + $0x20] sm:$0xff pattern:$0x73625140]  ;;  %v14723_v43 = vrot.slane %v11720_v57, 6 }
 0xe1d   :  { %5772 = vst [vmem:[#allocation1 + $0x20] ss:$4 sm:$0xff] %v5105_v61  ;;  %v14724_v61 = vrot.slane %v11552_v23, 6 }
 0xe1e   :  { %5773 = vst [vmem:[#allocation1 + $0x21] ss:$4 sm:$0xff] %v5189_v34  ;;  %v14725_v34 = vrot.slane %v11562_v3, 2 }
 0xe1f   :  { %5774 = vst [vmem:[#allocation1 + $0x22] ss:$4 sm:$0xff] %v5190_v20  ;;  %v5122_v20 = vld [vmem:[#allocation3 + $0xe8] sm:$0x3] }
 0xe20   :  { %5775 = vst [vmem:[#allocation1 + $0x23] ss:$4 sm:$0xff] %v5191_v14 }
 0xe23   :  { %v12007_v52 = vld.sshfl [vmem:[#allocation1] sm:$0xff pattern:$0x73625140] }
 0xe24   :  { %5818 = vst [vmem:[#allocation1] ss:$4 sm:$0xff] %v14721_v50  ;;  %v14727_v50 = vrot.slane %v11629_v35, 2 }
 0xe25   :  { %5819 = vst [vmem:[#allocation1 + $0x1] ss:$4 sm:$0xff] %v14722_v47  ;;  %v14728_v47 = vrot.slane %v11629_v35, 4 }
 0xe26   :  { %5820 = vst [vmem:[#allocation1 + $0x2] ss:$4 sm:$0xff] %v14723_v43  ;;  %v14731_v43 = vrot.slane %v11565_v31, 6 }
 0xe27   :  { %5821 = vst [vmem:[#allocation1 + $0x3] ss:$4 sm:$0xff] %v5120_v59  ;;  %v12015_v63 = vld.sshfl [vmem:[#allocation1 + $0x20] sm:$0xff pattern:$0x73625140] }
 0xe28   :  { %5782 = vst [vmem:[#allocation1 + $0x20] ss:$4 sm:$0xff] %v14724_v61  ;;  %v5112_v59 = vld [vmem:[#allocation3 + $0x88] sm:$0x3]  ;;  %v5125_v61 = vld [vmem:[#allocation3 + $0x100] sm:$0xff] }
 0xe29   :  { %5783 = vst [vmem:[#allocation1 + $0x21] ss:$4 sm:$0xff] %v5108_v24  ;;  %v14729_v24 = vrot.slane %v11565_v31, 2 }
 0xe2a   :  { %5784 = vst [vmem:[#allocation1 + $0x22] ss:$4 sm:$0xff] %v11562_v3  ;;  %v14730_v3 = vrot.slane %v11565_v31, 4 }
 0xe2b   :  { %5785 = vst [vmem:[#allocation1 + $0x23] ss:$4 sm:$0xff] %v14725_v34 }
 0xe2e   :  { %v12022_v14 = vld.sshfl [vmem:[#allocation1] sm:$0xff pattern:$0x73625140] }
 0xe2f   :  { %14726 = vst [vmem:[#allocation68_spill] sm:$0xff] %v12022_v14  ;;  %v5205_v14 = vrot.slane %v11994_v13, 4 }
 0xe30   :  { %5828 = vst [vmem:[#allocation1] ss:$4 sm:$0xff] %v5122_v20  ;;  %v5126_v20 = vld [vmem:[#allocation3 + $0x108] sm:$0x3] }
 0xe31   :  { %5829 = vst [vmem:[#allocation1 + $0x1] ss:$4 sm:$0xff] %v11629_v35 }
 0xe32   :  { %5830 = vst [vmem:[#allocation1 + $0x2] ss:$4 sm:$0xff] %v14727_v50  ;;  %v12029_v23 = vld.sshfl [vmem:[#allocation1 + $0x20] sm:$0xff pattern:$0x73625140]  ;;  %v5220_v50 = vrot.slane %v5125_v61, 4 }
 0xe33   :  { %5831 = vst [vmem:[#allocation1 + $0x3] ss:$4 sm:$0xff] %v14728_v47  ;;  %v5221_v47 = vrot.slane %v5125_v61, 6 }
 0xe34   :  { %5792 = vst [vmem:[#allocation1 + $0x20] ss:$4 sm:$0xff] %v14729_v24  ;;  %v5204_v24 = vrot.slane %v11994_v13, 2 }
 0xe35   :  { %5793 = vst [vmem:[#allocation1 + $0x21] ss:$4 sm:$0xff] %v14730_v3  ;;  %v5114_v3 = vld [vmem:[#allocation3 + $0x98] sm:$0x3] }
 0xe36   :  { %5794 = vst [vmem:[#allocation1 + $0x22] ss:$4 sm:$0xff] %v14731_v43  ;;  %v14732_v43 = vrot.slane %v11590_v54, 4 }
 0xe37   :  { %5795 = vst [vmem:[#allocation1 + $0x23] ss:$4 sm:$0xff] %v5112_v59 }
 0xe3a   :  { %v5836_v34 = vld.sshfl [vmem:[#allocation1] sm:$0xff pattern:$0x73625140] }
 0xe3b   :  { %5905 = vrot.lane.b32.xlu1 %v5836_v34, %s6973_s2  ;;  %5841 = vst [vmem:[#allocation1 + $0x3] ss:$4 sm:$0xff] %v11651_v16  ;;  %v5118_v34 = vld [vmem:[#allocation3 + $0xc8] sm:$0x3] }
 0xe3c   :  { %5840 = vst [vmem:[#allocation1 + $0x2] ss:$4 sm:$0xff] %v5126_v20  ;;  %v14733_v20 = vrot.slane %v11590_v54, 6  ;;  %v14735_v54 = vrot.slane %v11674_v2, 4 }
 0xe3d   :  { %5838 = vst [vmem:[#allocation1] ss:$4 sm:$0xff] %v5220_v50 }
 0xe3e   :  { %5839 = vst [vmem:[#allocation1 + $0x1] ss:$4 sm:$0xff] %v5221_v47  ;;  %v12041_v31 = vld.sshfl [vmem:[#allocation1 + $0x20] sm:$0xff pattern:$0x73625140] }
 0xe3f   :  { %5802 = vst [vmem:[#allocation1 + $0x20] ss:$4 sm:$0xff] %v5114_v3  ;;  %v14736_v3 = vrot.slane %v11674_v2, 6 }
 0xe40   :  { %5803 = vst [vmem:[#allocation1 + $0x21] ss:$4 sm:$0xff] %v11994_v13  ;;  %v5121_v13 = vld [vmem:[#allocation3 + $0xe0] sm:$0xff] }
 0xe41   :  { %5804 = vst [vmem:[#allocation1 + $0x22] ss:$4 sm:$0xff] %v5204_v24  ;;  %v5213_v50 = vrot.slane %v5121_v13, 2  ;;  %v14734_v24 = vrot.slane %v11674_v2, 2 }
 0xe42   :  { %5805 = vst [vmem:[#allocation1 + $0x23] ss:$4 sm:$0xff] %v5205_v14  ;;  %v5215_v14 = vrot.slane %v5121_v13, 6 }
 0xe43   :  { %5666 = vrot.lane.b32.xlu1 %v11739_v41, %s6970_s27  ;;  %v5214_v41 = vrot.slane %v5121_v13, 4 }
 0xe49   :  { %v12046_v59 = vld.sshfl [vmem:[#allocation1 + $0x20] sm:$0xff pattern:$0x73625140] }
 0xe4a   :  { %5812 = vst [vmem:[#allocation1 + $0x20] ss:$4 sm:$0xff] %v14732_v43  ;;  %v5124_v43 = vld [vmem:[#allocation3 + $0xf8] sm:$0x3] }
 0xe4b   :  { %5700 = vrot.lane.b32.xlu1 %v11935_v25, %s6970_s27  ;;  %5813 = vst [vmem:[#allocation1 + $0x21] ss:$4 sm:$0xff] %v14733_v20  ;;  %v5846_v25 = vld.sshfl [vmem:[#allocation1] sm:$0xff pattern:$0x73625140]  ;;  %v5219_v20 = vrot.slane %v5125_v61, 2 }
 0xe4c   :  { %5814 = vst [vmem:[#allocation1 + $0x22] ss:$4 sm:$0xff] %v5118_v34  ;;  %v14737_v34 = vrot.slane %v11629_v35, 6  ;;  %v14740_v35 = vrot.slane %v11651_v16, 2 }
 0xe4d   :  { %5815 = vst [vmem:[#allocation1 + $0x23] ss:$4 sm:$0xff] %v11720_v57 }
 0xe4e   :  { %5848 = vst [vmem:[#allocation1] ss:$4 sm:$0xff] %v11674_v2  ;;  %v14739_v2 = vrot.slane %v11694_v15, 2 }
 0xe4f   :  { %5849 = vst [vmem:[#allocation1 + $0x1] ss:$4 sm:$0xff] %v14734_v24  ;;  %v5135_v24 = vld [vmem:[#allocation3 + $0x150] sm:$0xff] }
 0xe50   :  { %5850 = vst [vmem:[#allocation1 + $0x2] ss:$4 sm:$0xff] %v14735_v54  ;;  %v5128_v54 = vld [vmem:[#allocation3 + $0x118] sm:$0x3] }
 0xe51   :  { %5851 = vst [vmem:[#allocation1 + $0x3] ss:$4 sm:$0xff] %v14736_v3  ;;  %v14742_v3 = vrot.slane %v11651_v16, 6 }
 0xe54   :  { %v12055_v47 = vld.sshfl [vmem:[#allocation1 + $0x20] sm:$0xff pattern:$0x73625140] }
 0xe55   :  { %5822 = vst [vmem:[#allocation1 + $0x20] ss:$4 sm:$0xff] %v5121_v13 }
 0xe56   :  { %5823 = vst [vmem:[#allocation1 + $0x21] ss:$4 sm:$0xff] %v5213_v50  ;;  %v5132_v50 = vld [vmem:[#allocation3 + $0x138] sm:$0x3] }
 0xe57   :  { %5824 = vst [vmem:[#allocation1 + $0x22] ss:$4 sm:$0xff] %v5214_v41  ;;  %v14738_v41 = vrot.slane %v11680_v30, 6 }
 0xe58   :  { %5825 = vst [vmem:[#allocation1 + $0x23] ss:$4 sm:$0xff] %v5215_v14  ;;  %v12068_v13 = vld.sshfl [vmem:[#allocation1] sm:$0xff pattern:$0x73625140] }
 0xe59   :  { %5858 = vst [vmem:[#allocation1] ss:$4 sm:$0xff] %v14738_v41  ;;  %v5136_v41 = vld [vmem:[#allocation3 + $0x158] sm:$0x3] }
 0xe5a   :  { %5859 = vst [vmem:[#allocation1 + $0x1] ss:$4 sm:$0xff] %v5132_v50 }
 0xe5b   :  { %5860 = vst [vmem:[#allocation1 + $0x2] ss:$4 sm:$0xff] %v11694_v15 }
 0xe5c   :  { %5861 = vst [vmem:[#allocation1 + $0x3] ss:$4 sm:$0xff] %v14739_v2  ;;  %v5130_v2 = vld [vmem:[#allocation3 + $0x128] sm:$0x3] }
 0xe5f   :  { %v12062_v57 = vld.sshfl [vmem:[#allocation1 + $0x20] sm:$0xff pattern:$0x73625140] }
 0xe60   :  { %5832 = vst [vmem:[#allocation1 + $0x20] ss:$4 sm:$0xff] %v14737_v34  ;;  %v5235_v34 = vrot.slane %v5135_v24, 4 }
 0xe61   :  { %5833 = vst [vmem:[#allocation1 + $0x21] ss:$4 sm:$0xff] %v5124_v43  ;;  %v5234_v43 = vrot.slane %v5135_v24, 2 }
 0xe62   :  { %5834 = vst [vmem:[#allocation1 + $0x22] ss:$4 sm:$0xff] %v5125_v61  ;;  %v14741_v61 = vrot.slane %v11651_v16, 4  ;;  %v14743_v16 = vrot.slane %v11680_v30, 2 }
 0xe63   :  { %5835 = vst [vmem:[#allocation1 + $0x23] ss:$4 sm:$0xff] %v5219_v20  ;;  %v5236_v20 = vrot.slane %v5135_v24, 6  ;;  %v12082_v50 = vld.sshfl [vmem:[#allocation1] sm:$0xff pattern:$0x73625140] }
 0xe64   :  { %5868 = vst [vmem:[#allocation1] ss:$4 sm:$0xff] %v5234_v43 }
 0xe65   :  { %5869 = vst [vmem:[#allocation1 + $0x1] ss:$4 sm:$0xff] %v5235_v34 }
 0xe66   :  { %5870 = vst [vmem:[#allocation1 + $0x2] ss:$4 sm:$0xff] %v5236_v20  ;;  %v14745_v20 = vrot.slane %v11694_v15, 4 }
 0xe67   :  { %5871 = vst [vmem:[#allocation1 + $0x3] ss:$4 sm:$0xff] %v5136_v41  ;;  %v5134_v41 = vld [vmem:[#allocation3 + $0x148] sm:$0x3] }
 0xe6a   :  { %v5837_v14 = vld.sshfl [vmem:[#allocation1 + $0x20] sm:$0xff pattern:$0x73625140] }
 0xe6b   :  { %5907 = vrot.lane.b32.xlu1 %v5837_v14, %s6973_s2  ;;  %5842 = vst [vmem:[#allocation1 + $0x20] ss:$4 sm:$0xff] %v14740_v35  ;;  %v5237_v35 = vld [vmem:[#allocation3 + $0x11] sm:$0xff] }
 0xe6c   :  { %5843 = vst [vmem:[#allocation1 + $0x21] ss:$4 sm:$0xff] %v14741_v61  ;;  %v14744_v61 = vrot.slane %v11680_v30, 4  ;;  %v5319_v43 = vrot.slane %v5237_v35, 6 }
 0xe6d   :  { %5844 = vst [vmem:[#allocation1 + $0x22] ss:$4 sm:$0xff] %v14742_v3  ;;  %v5318_v3 = vrot.slane %v5237_v35, 4 }
 0xe6e   :  { %5845 = vst [vmem:[#allocation1 + $0x23] ss:$4 sm:$0xff] %v5128_v54  ;;  %v5317_v54 = vrot.slane %v5237_v35, 2 }
 0xe73   :  { %5668 = vrot.lane.b32.xlu1 %v11816_v7, %s6970_s27  ;;  %v12093_v7 = vld.sshfl [vmem:[#allocation1] sm:$0xff pattern:$0x73625140] }
 0xe74   :  { %5948 = vst [vmem:[#allocation1] ss:$4 sm:$0xff] %v5237_v35 }
 0xe75   :  { %v5847_v14 = vld.sshfl [vmem:[#allocation1 + $0x20] sm:$0xff pattern:$0x73625140]  ;;  %5950 = vst [vmem:[#allocation1 + $0x1] ss:$4 sm:$0xff] %v5317_v54 }
 0xe76   :  { %5853 = vst [vmem:[#allocation1 + $0x21] ss:$4 sm:$0xff] %v11680_v30  ;;  %v14746_v30 = vrot.slane %v11694_v15, 6 }
 0xe77   :  { %5852 = vst [vmem:[#allocation1 + $0x20] ss:$4 sm:$0xff] %v5130_v2  ;;  %v5241_v2 = vld [vmem:[#allocation3 + $0x31] sm:$0xff] }
 0xe78   :  { %5854 = vst [vmem:[#allocation1 + $0x22] ss:$4 sm:$0xff] %v14743_v16  ;;  %v5240_v16 = vld [vmem:[#allocation3 + $0x29] sm:$0x3]  ;;  %v5323_v54 = vrot.slane %v5241_v2, 2 }
 0xe79   :  { %5855 = vst [vmem:[#allocation1 + $0x23] ss:$4 sm:$0xff] %v14744_v61 }
 0xe7a   :  { %5952 = vst [vmem:[#allocation1 + $0x2] ss:$4 sm:$0xff] %v5318_v3  ;;  %v5238_v3 = vld [vmem:[#allocation3 + $0x19] sm:$0x3] }
 0xe7b   :  { %5702 = vrot.lane.b32.xlu1 %v11865_v10, %s6970_s27  ;;  %5954 = vst [vmem:[#allocation1 + $0x3] ss:$4 sm:$0xff] %v5319_v43  ;;  %v5239_v10 = vld [vmem:[#allocation3 + $0x21] sm:$0xff]  ;;  %v5324_v43 = vrot.slane %v5241_v2, 4 }
 0xe7c   :  { %v5322_v61 = vrot.slane %v5239_v10, 6 }
 0xe80   :  { %v12095_v34 = vld.sshfl [vmem:[#allocation1 + $0x20] sm:$0xff pattern:$0x73625140] }
 0xe81   :  { %5862 = vst [vmem:[#allocation1 + $0x20] ss:$4 sm:$0xff] %v14745_v20  ;;  %v5325_v20 = vrot.slane %v5241_v2, 6 }
 0xe82   :  { %5863 = vst [vmem:[#allocation1 + $0x21] ss:$4 sm:$0xff] %v14746_v30  ;;  %v5963_v35 = vld.sshfl [vmem:[#allocation1] sm:$0xff pattern:$0x73625140] }
 0xe83   :  { %5909 = vrot.lane.b32.xlu1 %v5846_v25, %s6973_s2  ;;  %5864 = vst [vmem:[#allocation1 + $0x22] ss:$4 sm:$0xff] %v5134_v41  ;;  %6080 = vrot.lane.b32.xlu0 %v5963_v35, %s6974_s3  ;;  %v5320_v25 = vrot.slane %v5239_v10, 2  ;;  %v5242_v30 = vld [vmem:[#allocation3 + $0x39] sm:$0x3] }
 0xe84   :  { %5865 = vst [vmem:[#allocation1 + $0x23] ss:$4 sm:$0xff] %v5135_v24  ;;  %v5321_v24 = vrot.slane %v5239_v10, 4 }
 0xe85   :  { %5966 = vst [vmem:[#allocation1 + $0x1] ss:$4 sm:$0xff] %v5240_v16 }
 0xe86   :  { %5965 = vst [vmem:[#allocation1] ss:$4 sm:$0xff] %v5322_v61 }
 0xe87   :  { %5967 = vst [vmem:[#allocation1 + $0x2] ss:$4 sm:$0xff] %v5241_v2  ;;  %v5249_v2 = vld [vmem:[#allocation3 + $0x71] sm:$0xff] }
 0xe88   :  { %5968 = vst [vmem:[#allocation1 + $0x3] ss:$4 sm:$0xff] %v5323_v54 }
 0xe8b   :  { %5670 = vrot.lane.b32.xlu1 %v11754_v8, %s6970_s27  ;;  %v12105_v15 = vld.sshfl [vmem:[#allocation1 + $0x20] sm:$0xff pattern:$0x73625140] }
 0xe8c   :  { %5956 = vst [vmem:[#allocation1 + $0x20] ss:$4 sm:$0xff] %v5238_v3  ;;  %v5245_v8 = vld [vmem:[#allocation3 + $0x51] sm:$0xff]  ;;  %v5248_v3 = vld [vmem:[#allocation3 + $0x69] sm:$0x3] }
 0xe8d   :  { %5958 = vst [vmem:[#allocation1 + $0x21] ss:$4 sm:$0xff] %v5239_v10  ;;  %v5329_v16 = vrot.slane %v5245_v8, 2  ;;  %v5330_v35 = vrot.slane %v5245_v8, 4  ;;  %v5331_v61 = vrot.slane %v5245_v8, 6 }
 0xe8e   :  { %5960 = vst [vmem:[#allocation1 + $0x22] ss:$4 sm:$0xff] %v5320_v25  ;;  %v5335_v25 = vrot.slane %v5249_v2, 2 }
 0xe8f   :  { %5962 = vst [vmem:[#allocation1 + $0x23] ss:$4 sm:$0xff] %v5321_v24  ;;  %v5251_v24 = vld [vmem:[#allocation3 + $0x81] sm:$0xff] }
 0xe93   :  { %5704 = vrot.lane.b32.xlu1 %v11946_v17, %s6970_s27  ;;  %v5247_v17 = vld [vmem:[#allocation3 + $0x61] sm:$0xff] }
 0xe94   :  { %v5334_v54 = vrot.slane %v5247_v17, 6 }
 0xe96   :  { %v12109_v41 = vld.sshfl [vmem:[#allocation1 + $0x20] sm:$0xff pattern:$0x73625140] }
 0xe97   :  { %5969 = vst [vmem:[#allocation1 + $0x20] ss:$4 sm:$0xff] %v5324_v43  ;;  %v5338_v43 = vrot.slane %v5251_v24, 2 }
 0xe98   :  { %5970 = vst [vmem:[#allocation1 + $0x21] ss:$4 sm:$0xff] %v5325_v20  ;;  %v14747_v20 = vrot.slane %v11826_v60, 2 }
 0xe99   :  { %5971 = vst [vmem:[#allocation1 + $0x22] ss:$4 sm:$0xff] %v5242_v30  ;;  %v5339_v30 = vrot.slane %v5251_v24, 4 }
 0xe9a   :  { %5972 = vst [vmem:[#allocation1 + $0x23] ss:$4 sm:$0xff] %v11826_v60 }
 0xe9b   :  { %5911 = vrot.lane.b32.xlu1 %v5847_v14, %s6973_s2 }
 0xea1   :  { %v12113_v10 = vld.sshfl [vmem:[#allocation1 + $0x20] sm:$0xff pattern:$0x73625140] }
 0xea2   :  { %5979 = vst [vmem:[#allocation1 + $0x20] ss:$4 sm:$0xff] %v5245_v8  ;;  %v14748_v8 = vrot.slane %v11826_v60, 4 }
 0xea3   :  { %5980 = vst [vmem:[#allocation1 + $0x21] ss:$4 sm:$0xff] %v5329_v16  ;;  %5672 = vrot.lane.b32.xlu1 %v11829_v48, %s6970_s27  ;;  %v12123_v48 = vld.sshfl [vmem:[#allocation1] sm:$0xff pattern:$0x73625140]  ;;  %v5340_v16 = vrot.slane %v5251_v24, 6 }
 0xea4   :  { %5981 = vst [vmem:[#allocation1 + $0x22] ss:$4 sm:$0xff] %v5330_v35  ;;  %v5252_v35 = vld [vmem:[#allocation3 + $0x89] sm:$0x3] }
 0xea5   :  { %5982 = vst [vmem:[#allocation1 + $0x23] ss:$4 sm:$0xff] %v5331_v61  ;;  %v14749_v61 = vrot.slane %v11826_v60, 6  ;;  %v5246_v60 = vld [vmem:[#allocation3 + $0x59] sm:$0x3] }
 0xea6   :  { %5975 = vst [vmem:[#allocation1] ss:$4 sm:$0xff] %v14747_v20 }
 0xea7   :  { %5976 = vst [vmem:[#allocation1 + $0x1] ss:$4 sm:$0xff] %v14748_v8  ;;  %v5333_v8 = vrot.slane %v5247_v17, 4 }
 0xea8   :  { %5977 = vst [vmem:[#allocation1 + $0x2] ss:$4 sm:$0xff] %v14749_v61  ;;  %v5258_v61 = vld [vmem:[#allocation3 + $0xc9] sm:$0x3] }
 0xeab   :  { %5706 = vrot.lane.b32.xlu1 %v11881_v37, %s6970_s27 }
 0xeac   :  { %v12119_v14 = vld.sshfl [vmem:[#allocation1 + $0x20] sm:$0xff pattern:$0x73625140] }
 0xead   :  { %5989 = vst [vmem:[#allocation1 + $0x20] ss:$4 sm:$0xff] %v5334_v54  ;;  %v12135_v54 = vld [vmem:[#allocation3 + $0xa1] sm:$0xff] }
 0xeae   :  { %5990 = vst [vmem:[#allocation1 + $0x21] ss:$4 sm:$0xff] %v5248_v3  ;;  %v5344_v3 = vrot.slane %v12135_v54, 2  ;;  %v5345_v20 = vrot.slane %v12135_v54, 4 }
 0xeaf   :  { %5991 = vst [vmem:[#allocation1 + $0x22] ss:$4 sm:$0xff] %v5249_v2 }
 0xeb0   :  { %5992 = vst [vmem:[#allocation1 + $0x23] ss:$4 sm:$0xff] %v5335_v25  ;;  %v5254_v25 = vld [vmem:[#allocation3 + $0x99] sm:$0x3] }
 0xeb3   :  { %5913 = vrot.lane.b32.xlu1 %v12068_v13, %s6973_s2  ;;  %v5244_v13 = vld [vmem:[#allocation3 + $0x49] sm:$0x3] }
 0xeb4   :  { %5978 = vst [vmem:[#allocation1 + $0x3] ss:$4 sm:$0xff] %v5244_v13 }
 0xeb7   :  { %v12127_v37 = vld.sshfl [vmem:[#allocation1 + $0x20] sm:$0xff pattern:$0x73625140] }
 0xeb8   :  { %5999 = vst [vmem:[#allocation1 + $0x20] ss:$4 sm:$0xff] %v5338_v43 }
 0xeb9   :  { %6000 = vst [vmem:[#allocation1 + $0x21] ss:$4 sm:$0xff] %v5339_v30  ;;  %v5332_v30 = vrot.slane %v5247_v17, 2 }
 0xeba   :  { %6001 = vst [vmem:[#allocation1 + $0x22] ss:$4 sm:$0xff] %v5340_v16  ;;  %v5257_v16 = vld [vmem:[#allocation3 + $0xc1] sm:$0xff] }
 0xebb   :  { %6002 = vst [vmem:[#allocation1 + $0x23] ss:$4 sm:$0xff] %v5252_v35  ;;  %5674 = vrot.lane.b32.xlu1 %v11764_v22, %s6970_s27  ;;  %v12144_v22 = vld.sshfl [vmem:[#allocation1] sm:$0xff pattern:$0x73625140]  ;;  %v5348_v35 = vrot.slane %v5257_v16, 4 }
 0xebc   :  { %5985 = vst [vmem:[#allocation1] ss:$4 sm:$0xff] %v5246_v60  ;;  %v5349_v13 = vrot.slane %v5257_v16, 6 }
 0xebd   :  { %5986 = vst [vmem:[#allocation1 + $0x1] ss:$4 sm:$0xff] %v5247_v17  ;;  %v5250_v17 = vld [vmem:[#allocation3 + $0x79] sm:$0x3] }
 0xebe   :  { %5987 = vst [vmem:[#allocation1 + $0x2] ss:$4 sm:$0xff] %v5332_v30 }
 0xebf   :  { %5988 = vst [vmem:[#allocation1 + $0x3] ss:$4 sm:$0xff] %v5333_v8 }
 0xec2   :  { %v12139_v43 = vld.sshfl [vmem:[#allocation1 + $0x20] sm:$0xff pattern:$0x73625140] }
 0xec3   :  { %6009 = vst [vmem:[#allocation1 + $0x20] ss:$4 sm:$0xff] %v5254_v25  ;;  %5708 = vrot.lane.b32.xlu1 %v11964_v4, %s6970_s27  ;;  %v5337_v25 = vrot.slane %v5249_v2, 6 }
 0xec4   :  { %6010 = vst [vmem:[#allocation1 + $0x21] ss:$4 sm:$0xff] %v12135_v54 }
 0xec5   :  { %6011 = vst [vmem:[#allocation1 + $0x22] ss:$4 sm:$0xff] %v5344_v3  ;;  %v5336_v3 = vrot.slane %v5249_v2, 4 }
 0xec6   :  { %6012 = vst [vmem:[#allocation1 + $0x23] ss:$4 sm:$0xff] %v5345_v20  ;;  %v5993_v20 = vld.sshfl [vmem:[#allocation1] sm:$0xff pattern:$0x73625140] }
 0xec7   :  { %5995 = vst [vmem:[#allocation1] ss:$4 sm:$0xff] %v5336_v3  ;;  %v12166_v3 = vld [vmem:[#allocation3 + $0x101] sm:$0xff] }
 0xec8   :  { %5996 = vst [vmem:[#allocation1 + $0x1] ss:$4 sm:$0xff] %v5337_v25 }
 0xec9   :  { %5997 = vst [vmem:[#allocation1 + $0x2] ss:$4 sm:$0xff] %v5250_v17 }
 0xeca   :  { %5998 = vst [vmem:[#allocation1 + $0x3] ss:$4 sm:$0xff] %v5251_v24  ;;  %v5263_v24 = vld [vmem:[#allocation3 + $0xf1] sm:$0xff] }
 0xecb   :  { %5915 = vrot.lane.b32.xlu1 %v12095_v34, %s6973_s2  ;;  %v5261_v34 = vld [vmem:[#allocation3 + $0xe1] sm:$0xff]  ;;  %v5358_v25 = vrot.slane %v5263_v24, 6 }
 0xecc   :  { %v5353_v60 = vrot.slane %v5261_v34, 2  ;;  %v5354_v8 = vrot.slane %v5261_v34, 4 }
 0xecd   :  { %v12148_v4 = vld.sshfl [vmem:[#allocation1 + $0x20] sm:$0xff pattern:$0x73625140] }
 0xece   :  { %6019 = vst [vmem:[#allocation1 + $0x20] ss:$4 sm:$0xff] %v5348_v35  ;;  %v5355_v35 = vrot.slane %v5261_v34, 6 }
 0xecf   :  { %6020 = vst [vmem:[#allocation1 + $0x21] ss:$4 sm:$0xff] %v5349_v13  ;;  %v14751_v13 = vrot.slane %v11801_v62, 4 }
 0xed0   :  { %6021 = vst [vmem:[#allocation1 + $0x22] ss:$4 sm:$0xff] %v5258_v61  ;;  %v14752_v61 = vrot.slane %v11801_v62, 6 }
 0xed1   :  { %6022 = vst [vmem:[#allocation1 + $0x23] ss:$4 sm:$0xff] %v11899_v5  ;;  %v12157_v2 = vld.sshfl [vmem:[#allocation1] sm:$0xff pattern:$0x73625140] }
 0xed2   :  { %6005 = vst [vmem:[#allocation1] ss:$4 sm:$0xff] %v11801_v62 }
 0xed3   :  { %5676 = vrot.lane.b32.xlu1 %v11848_v51, %s6970_s27  ;;  %v14750_v51 = vrot.slane %v11801_v62, 2  ;;  %6007 = vst [vmem:[#allocation1 + $0x2] ss:$4 sm:$0xff] %v14751_v13 }
 0xed4   :  { %6008 = vst [vmem:[#allocation1 + $0x3] ss:$4 sm:$0xff] %v14752_v61 }
 0xed5   :  { %6006 = vst [vmem:[#allocation1 + $0x1] ss:$4 sm:$0xff] %v14750_v51  ;;  %v12177_v51 = vld [vmem:[#allocation3 + $0x111] sm:$0xff] }
 0xed6   :  { %v5363_v13 = vrot.slane %v12177_v51, 4  ;;  %v5364_v61 = vrot.slane %v12177_v51, 6 }
 0xed8   :  { %v12153_v30 = vld.sshfl [vmem:[#allocation1 + $0x20] sm:$0xff pattern:$0x73625140] }
 0xed9   :  { %6029 = vst [vmem:[#allocation1 + $0x20] ss:$4 sm:$0xff] %v5261_v34  ;;  %v5346_v34 = vrot.slane %v12135_v54, 6 }
 0xeda   :  { %6030 = vst [vmem:[#allocation1 + $0x21] ss:$4 sm:$0xff] %v5353_v60  ;;  %v5359_v60 = vrot.slane %v12166_v3, 2 }
 0xedb   :  { %6031 = vst [vmem:[#allocation1 + $0x22] ss:$4 sm:$0xff] %v5354_v8  ;;  %6090 = vrot.lane.b32.xlu1 %v12119_v14, %s6974_s3  ;;  %v5264_v14 = vld [vmem:[#allocation3 + $0xf9] sm:$0x3]  ;;  %v5256_v8 = vld [vmem:[#allocation3 + $0xa9] sm:$0x3] }
 0xedc   :  { %6032 = vst [vmem:[#allocation1 + $0x23] ss:$4 sm:$0xff] %v5355_v35  ;;  %v12175_v62 = vld.sshfl [vmem:[#allocation1] sm:$0xff pattern:$0x73625140]  ;;  %v5347_v35 = vrot.slane %v5257_v16, 2 }
 0xedd   :  { %6015 = vst [vmem:[#allocation1] ss:$4 sm:$0xff] %v5346_v34  ;;  %v5260_v34 = vld [vmem:[#allocation3 + $0xd9] sm:$0x3] }
 0xede   :  { %6016 = vst [vmem:[#allocation1 + $0x1] ss:$4 sm:$0xff] %v5256_v8  ;;  %v12196_v8 = vld [vmem:[#allocation3 + $0x131] sm:$0xff] }
 0xedf   :  { %6017 = vst [vmem:[#allocation1 + $0x2] ss:$4 sm:$0xff] %v5257_v16  ;;  %v14753_v16 = vrot.slane %v11899_v5, 2 }
 0xee0   :  { %6018 = vst [vmem:[#allocation1 + $0x3] ss:$4 sm:$0xff] %v5347_v35  ;;  %v12198_v35 = vpop.permute.xlu1 %5905 }
 0xee3   :  { %v12168_v17 = vld.sshfl [vmem:[#allocation1 + $0x20] sm:$0xff pattern:$0x73625140]  ;;  %5678 = vrot.lane.b32.xlu1 %v11782_v18, %s6970_s27  ;;  %v5362_v18 = vrot.slane %v12177_v51, 2 }
 0xee4   :  { %6039 = vst [vmem:[#allocation1 + $0x20] ss:$4 sm:$0xff] %v5358_v25  ;;  %v5268_v25 = vld [vmem:[#allocation3 + $0x119] sm:$0x3] }
 0xee5   :  { %6040 = vst [vmem:[#allocation1 + $0x21] ss:$4 sm:$0xff] %v5264_v14 }
 0xee6   :  { %6041 = vst [vmem:[#allocation1 + $0x22] ss:$4 sm:$0xff] %v12166_v3 }
 0xee7   :  { %6042 = vst [vmem:[#allocation1 + $0x23] ss:$4 sm:$0xff] %v5359_v60  ;;  %v12184_v14 = vld.sshfl [vmem:[#allocation1] sm:$0xff pattern:$0x73625140]  ;;  %v14755_v60 = vrot.slane %v11899_v5, 6 }
 0xee8   :  { %6025 = vst [vmem:[#allocation1] ss:$4 sm:$0xff] %v14753_v16  ;;  %v5667_v16 = vpop.permute.xlu1 %5666 }
 0xee9   :  { %6027 = vst [vmem:[#allocation1 + $0x2] ss:$4 sm:$0xff] %v14755_v60 }
 0xeea   :  { %6028 = vst [vmem:[#allocation1 + $0x3] ss:$4 sm:$0xff] %v5260_v34 }
 0xeeb   :  { %6092 = vrot.lane.b32.xlu1 %v5993_v20, %s6974_s3  ;;  %v14754_v20 = vrot.slane %v11899_v5, 4  ;;  %v5262_v5 = vld [vmem:[#allocation3 + $0xe9] sm:$0x3] }
 0xeed   :  { %6026 = vst [vmem:[#allocation1 + $0x1] ss:$4 sm:$0xff] %v14754_v20  ;;  %v12209_v20 = vld [vmem:[#allocation3 + $0x141] sm:$0xff] }
 0xeee   :  { %v6044_v54 = vld.sshfl [vmem:[#allocation1 + $0x20] sm:$0xff pattern:$0x73625140]  ;;  %v5372_v34 = vrot.slane %v12209_v20, 4  ;;  %v5373_v60 = vrot.slane %v12209_v20, 6 }
 0xeef   :  { %6114 = vrot.lane.b32.xlu0 %v6044_v54, %s6974_s3  ;;  %6049 = vst [vmem:[#allocation1 + $0x20] ss:$4 sm:$0xff] %v5362_v18  ;;  %v5270_v18 = vld [vmem:[#allocation3 + $0x129] sm:$0x3] }
 0xef0   :  { %6050 = vst [vmem:[#allocation1 + $0x21] ss:$4 sm:$0xff] %v5363_v13  ;;  %v5368_v13 = vrot.slane %v12196_v8, 2 }
 0xef1   :  { %6051 = vst [vmem:[#allocation1 + $0x22] ss:$4 sm:$0xff] %v5364_v61 }
 0xef2   :  { %6052 = vst [vmem:[#allocation1 + $0x23] ss:$4 sm:$0xff] %v5268_v25  ;;  %v5357_v25 = vrot.slane %v5263_v24, 4 }
 0xef3   :  { %5680 = vrot.lane.b32.xlu1 %v11862_v53, %s6970_s27  ;;  %v5369_v53 = vrot.slane %v12196_v8, 4 }
 0xef4   :  { %v12205_v61 = vld.sshfl [vmem:[#allocation1] sm:$0xff pattern:$0x73625140] }
 0xef5   :  { %6035 = vst [vmem:[#allocation1] ss:$4 sm:$0xff] %v5262_v5  ;;  %v5266_v5 = vld [vmem:[#allocation3 + $0x109] sm:$0x3] }
 0xef6   :  { %6036 = vst [vmem:[#allocation1 + $0x1] ss:$4 sm:$0xff] %v5263_v24 }
 0xef7   :  { %5875 = vrot.lane.b32.xlu0 %v11990_v42, %s6973_s2  ;;  %v5356_v42 = vrot.slane %v5263_v24, 2  ;;  %6038 = vst [vmem:[#allocation1 + $0x3] ss:$4 sm:$0xff] %v5357_v25  ;;  %v12222_v24 = vpop.permute.xlu1 %5700 }
 0xef9   :  { %v6054_v54 = vld.sshfl [vmem:[#allocation1 + $0x20] sm:$0xff pattern:$0x73625140]  ;;  %6037 = vst [vmem:[#allocation1 + $0x2] ss:$4 sm:$0xff] %v5356_v42 }
 0xefa   :  { %6059 = vst [vmem:[#allocation1 + $0x20] ss:$4 sm:$0xff] %v5270_v18  ;;  %v12217_v18 = vld [vmem:[#allocation3 + $0x151] sm:$0xff] }
 0xefb   :  { %6060 = vst [vmem:[#allocation1 + $0x21] ss:$4 sm:$0xff] %v12196_v8  ;;  %6094 = vrot.lane.b32.xlu1 %v12127_v37, %s6974_s3 }
 0xefc   :  { %6061 = vst [vmem:[#allocation1 + $0x22] ss:$4 sm:$0xff] %v5368_v13  ;;  %v5274_v13 = vld [vmem:[#allocation3 + $0x149] sm:$0x3] }
 0xefd   :  { %6062 = vst [vmem:[#allocation1 + $0x23] ss:$4 sm:$0xff] %v5369_v53  ;;  %v5361_v53 = vrot.slane %v12166_v3, 6 }
 0xeff   :  { %6082 = vrot.lane.b32.xlu0 %v12109_v41, %s6974_s3  ;;  %v5360_v41 = vrot.slane %v12166_v3, 4  ;;  %v12234_v3 = vpop.permute.xlu1 %5907 }
 0xf03   :  { %5682 = vrot.lane.b32.xlu1 %v11796_v36, %s6970_s27  ;;  %v6043_v36 = vld.sshfl [vmem:[#allocation1] sm:$0xff pattern:$0x73625140] }
 0xf04   :  { %v12214_v37 = vld.sshfl [vmem:[#allocation1 + $0x20] sm:$0xff pattern:$0x73625140]  ;;  %6112 = vrot.lane.b32.xlu2 %v6043_v36, %s6974_s3  ;;  %6045 = vst [vmem:[#allocation1] ss:$4 sm:$0xff] %v5360_v41 }
 0xf05   :  { %6069 = vst [vmem:[#allocation1 + $0x20] ss:$4 sm:$0xff] %v5372_v34  ;;  %v6233_v34 = vld [vmem:[%s12499_s4 + $0x10] sm:$0xff]  ;;  %v6231_v36 = vld [vmem:[%s12499_s4] sm:$0xff] }
 0xf06   :  { %6070 = vst [vmem:[#allocation1 + $0x21] ss:$4 sm:$0xff] %v5373_v60  ;;  %v5370_v60 = vrot.slane %v12196_v8, 6 }
 0xf07   :  { %5877 = vrot.lane.b32.xlu0 %v11938_v9, %s6973_s2  ;;  %6071 = vst [vmem:[#allocation1 + $0x22] ss:$4 sm:$0xff] %v5274_v13  ;;  %v12230_v9 = vpop.permute.xlu0 %5698  ;;  %v5272_v13 = vld [vmem:[#allocation3 + $0x139] sm:$0x3] }
 0xf08   :  { %6072 = vst [vmem:[#allocation1 + $0x23] ss:$4 sm:$0xff] %v12217_v18 }
 0xf09   :  { %6046 = vst [vmem:[#allocation1 + $0x1] ss:$4 sm:$0xff] %v5361_v53 }
 0xf0a   :  { %6047 = vst [vmem:[#allocation1 + $0x2] ss:$4 sm:$0xff] %v5266_v5  ;;  %v5375_v5 = vrot.slane %v12217_v18, 4 }
 0xf0b   :  { %5684 = vrot.lane.b32.xlu1 %v11867_v58, %s6970_s27  ;;  %6048 = vst [vmem:[#allocation1 + $0x3] ss:$4 sm:$0xff] %v12177_v51  ;;  %v14756_v58 = vrot.slane %v11870_v27, 2  ;;  %v14757_v51 = vrot.slane %v11870_v27, 4 }
 0xf0c   :  { %5710 = vrot.lane.b32.xlu2 %v11896_v45, %s6970_s27  ;;  %v12250_v45 = vpop.permute.xlu1 %5668 }
 0xf0f   :  { %6084 = vrot.lane.b32.xlu0 %v12123_v48, %s6974_s3  ;;  %v5874_v25 = vpop.permute.xlu0 %5873  ;;  %v14758_v48 = vrot.slane %v11870_v27, 6 }
 0xf12   :  { %v12238_v42 = vld.sshfl [vmem:[#allocation1] sm:$0xff pattern:$0x73625140] }
 0xf13   :  { %5686 = vrot.lane.b32.xlu1 %v11809_v32, %s6970_s27  ;;  %6055 = vst [vmem:[#allocation1] ss:$4 sm:$0xff] %v11870_v27  ;;  %v6234_v32 = vld [vmem:[%s12499_s4 + $0x18] sm:$0xff]  ;;  %v6232_v27 = vld [vmem:[%s12499_s4 + $0x8] sm:$0xff] }
 0xf14   :  { %6056 = vst [vmem:[#allocation1 + $0x1] ss:$4 sm:$0xff] %v14756_v58  ;;  %6325 = vmatpush.msra.mxu1 %v6234_v32  ;;  %6860 = vmatpush.msra.mxu2 %v6234_v32 }
 0xf15   :  { %6057 = vst [vmem:[#allocation1 + $0x2] ss:$4 sm:$0xff] %v14757_v51  ;;  %5712 = vrot.lane.b32.xlu2 %v11974_v29, %s6970_s27  ;;  %v5703_v29 = vpop.permute.xlu1 %5702 }
 0xf16   :  { %6058 = vst [vmem:[#allocation1 + $0x3] ss:$4 sm:$0xff] %v14758_v48  ;;  %6326 = vmatpush.msra.mxu1 %v6233_v34  ;;  %6861 = vmatpush.msra.mxu2 %v6233_v34  ;;  %v6173_v58 = vsel %vm3924_vm9, %v11656_v40, %v5703_v29 }
 0xf17   :  { %6118 = vrot.lane.b32.xlu0 %v6054_v54, %s6974_s3  ;;  %v6155_v54 = vsel %vm3924_vm9, %v11524_v6, %v5667_v16  ;;  %v6081_v53 = vpop.permute.xlu0 %6080  ;;  %v5371_v6 = vrot.slane %v12209_v20, 2  ;;  %v6074_v16 = vld.sshfl [vmem:[#allocation1 + $0x20] sm:$0xff pattern:$0x73625140] }
 0xf18   :  { %6327 = vmatpush.msra.mxu1 %v6232_v27  ;;  %6862 = vmatpush.msra.mxu2 %v6232_v27 }
 0xf1a   :  { %6328 = vmatpush.msra.mxu1 %v6231_v36  ;;  %6863 = vmatpush.msra.mxu2 %v6231_v36 }
 0xf1b   :  { %5688 = vrot.lane.b32.xlu1 %v11889_v44, %s6970_s27  ;;  %v6180_v44 = vsel %vm3972_vm11, %v6155_v54, %v5874_v25  ;;  %v5376_v25 = vrot.slane %v12217_v18, 6 }
 0xf1c   :  { %v6206_v8 = vsel %vm6205_vm3, %v6180_v44, %v6081_v53  ;;  %v14761_v44 = vld [vmem:[#allocation68_spill] sm:$0xff] }
 0xf1d   :  { %v6063_v41 = vld.sshfl [vmem:[#allocation1] sm:$0xff pattern:$0x73625140]  ;;  %6126 = vrot.lane.b32.xlu2 %v6074_v16, %s6974_s3  ;;  %6833 = vmatmul.msk.f32.vlgmr.msra.gmra.mxu1 %vm6235_vm4, %v6206_v8  ;;  %v5910_v51 = vpop.permute.xlu1 %5909 }
 0xf1e   :  { %6065 = vst [vmem:[#allocation1] ss:$4 sm:$0xff] %v5370_v60 }
 0xf1f   :  { %5879 = vrot.lane.b32.xlu0 %v12005_v56, %s6973_s2  ;;  %6066 = vst [vmem:[#allocation1 + $0x1] ss:$4 sm:$0xff] %v5272_v13  ;;  %v5374_v56 = vrot.slane %v12217_v18, 2 }
 0xf20   :  { %6067 = vst [vmem:[#allocation1 + $0x2] ss:$4 sm:$0xff] %v12209_v20  ;;  %v12289_v20 = vsel %vm3972_vm11, %v6173_v58, %v5910_v51 }
 0xf21   :  { %6068 = vst [vmem:[#allocation1 + $0x3] ss:$4 sm:$0xff] %v5371_v6 }
 0xf23   :  { %5690 = vrot.lane.b32.xlu1 %v11823_v26, %s6970_s27  ;;  %v5276_v26 = vld [vmem:[#allocation3 + $0x159] sm:$0x3] }
 0xf25   :  { %v5671_v40 = vpop.permute.xlu1 %5670 }
 0xf27   :  { %6086 = vrot.lane.b32.xlu0 %v12113_v10, %s6974_s3 }
 0xf28   :  { %v6073_v48 = vld.sshfl [vmem:[#allocation1] sm:$0xff pattern:$0x73625140] }
 0xf29   :  { %6124 = vrot.lane.b32.xlu2 %v6073_v48, %s6974_s3  ;;  %6075 = vst [vmem:[#allocation1] ss:$4 sm:$0xff] %v5374_v56 }
 0xf2a   :  { %6076 = vst [vmem:[#allocation1 + $0x1] ss:$4 sm:$0xff] %v5375_v5 }
 0xf2b   :  { %5692 = vrot.lane.b32.xlu1 %v11902_v19, %s6970_s27  ;;  %6077 = vst [vmem:[#allocation1 + $0x2] ss:$4 sm:$0xff] %v5376_v25 }
 0xf2c   :  { %6078 = vst [vmem:[#allocation1 + $0x3] ss:$4 sm:$0xff] %v5276_v26 }
 0xf2d   :  { %v5705_v18 = vpop.permute.xlu1 %5704 }
 0xf2e   :  { %v6174_v19 = vsel %vm3924_vm9, %v11769_v38, %v5705_v18 }
 0xf2f   :  { %5881 = vrot.lane.b32.xlu0 %v11955_v11, %s6973_s2 }
 0xf31   :  { %5714 = vrot.lane.b32.xlu2 %v11913_v28, %s6970_s27 }
 0xf33   :  { %5694 = vrot.lane.b32.xlu1 %v11842_v55, %s6970_s27  ;;  %v6079_v10 = vld.sshfl [vmem:[#allocation1] sm:$0xff pattern:$0x73625140] }
 0xf35   :  { %v5912_v28 = vpop.permute.xlu1 %5911 }
 0xf36   :  { %v6199_v11 = vsel %vm3972_vm11, %v6174_v19, %v5912_v28 }
 0xf37   :  { %6088 = vrot.lane.b32.xlu0 %v12144_v22, %s6974_s3  ;;  %v6172_v22 = vsel %vm3924_vm9, %v11759_v33, %v12222_v24 }
 0xf39   :  { %6128 = vrot.lane.b32.xlu2 %v6079_v10, %s6974_s3  ;;  %v14763_v10 = vld [vmem:[#allocation64_spill] sm:$0xff] }
 0xf3b   :  { %5696 = vrot.lane.b32.xlu1 %v11923_v46, %s6970_s27 }
 0xf3f   :  { %6122 = vrot.lane.b32.xlu0 %v12214_v37, %s6974_s3 }
 0xf41   :  { %6096 = vrot.lane.b32.xlu2 %v12157_v2, %s6974_s3  ;;  %v5673_v2 = vpop.permute.xlu1 %5672 }
 0xf47   :  { %5883 = vrot.lane.b32.xlu0 %v12015_v63, %s6973_s2  ;;  %v6171_v63 = vsel %vm3924_vm9, %v11637_v12, %v12230_v9  ;;  %v6197_v12 = vsel %vm3972_vm11, %v6172_v22, %v12234_v3 }
 0xf48   :  { %v6196_v38 = vsel %vm3972_vm11, %v6171_v63, %v12198_v35 }
 0xf49   :  { %6098 = vrot.lane.b32.xlu2 %v12139_v43, %s6974_s3 }
 0xf4f   :  { %6116 = vrot.lane.b32.xlu0 %v12238_v42, %s6974_s3 }
 0xf51   :  { %6100 = vrot.lane.b32.xlu2 %v12175_v62, %s6974_s3 }
 0xf57   :  { %5917 = vrot.lane.b32.xlu0 %v12082_v50, %s6973_s2 }
 0xf59   :  { %6102 = vrot.lane.b32.xlu2 %v12148_v4, %s6974_s3 }
 0xf5e   :  { %v6113_v55 = vpop.permute.xlu2 %6112 }
 0xf5f   :  { %6120 = vrot.lane.b32.xlu0 %v6063_v41, %s6974_s3  ;;  %v6222_v43 = vsel %vm6205_vm3, %v6196_v38, %v6113_v55  ;;  %v14765_v55 = vld [vmem:[#allocation220_spill] sm:$0xff] }
 0xf60   :  { %6849 = vmatmul.msk.f32.vlgmr.msra.gmra.mxu2 %vm6235_vm4, %v6222_v43 }
 0xf61   :  { %v6115_v46 = vpop.permute.xlu0 %6114  ;;  %6104 = vrot.lane.b32.xlu2 %v12184_v14, %s6974_s3 }
 0xf62   :  { %v6223_v4 = vsel %vm6205_vm3, %v6197_v12, %v6115_v46 }
 0xf67   :  { %5885 = vrot.lane.b32.xlu0 %v11967_v1, %s6973_s2  ;;  %v6156_v1 = vsel %vm3924_vm9, %v11601_v49, %v12250_v45  ;;  %v6157_v49 = vsel %vm3924_vm9, %v11536_v0, %v5671_v40  ;;  %v14759_v0 = vld [vmem:[#allocation56_spill] sm:$0xff] }
 0xf68   :  { %6850 = vmatmul.msk.f32.gmra.mxu2 %vm6235_vm4, %v6223_v4  ;;  %v6158_v3 = vsel %vm3924_vm9, %v14759_v0, %v5673_v2 }
 0xf69   :  { %v5876_v50 = vpop.permute.xlu0 %5875  ;;  %6106 = vrot.lane.b32.xlu2 %v12153_v30, %s6974_s3 }
 0xf6a   :  { %v6181_v33 = vsel %vm3972_vm11, %v6156_v1, %v5876_v50  ;;  %v14766_v1 = vld [vmem:[#allocation65_spill] sm:$0xff] }
 0xf6f   :  { %5919 = vrot.lane.b32.xlu0 %v12105_v15, %s6973_s2  ;;  %v5707_v15 = vpop.permute.xlu1 %5706 }
 0xf70   :  { %v6175_v18 = vsel %vm3924_vm9, %v14763_v10, %v5707_v15 }
 0xf71   :  { %v6083_v62 = vpop.permute.xlu0 %6082  ;;  %6108 = vrot.lane.b32.xlu2 %v12205_v61, %s6974_s3 }
 0xf72   :  { %v6207_v30 = vsel %vm6205_vm3, %v6181_v33, %v6083_v62 }
 0xf73   :  { %6834 = vmatmul.msk.f32.gmra.mxu1 %vm6235_vm4, %v6207_v30 }
 0xf77   :  { %5887 = vrot.lane.b32.xlu0 %v12029_v23, %s6973_s2  ;;  %v5914_v24 = vpop.permute.xlu1 %5913 }
 0xf78   :  { %v6200_v19 = vsel %vm3972_vm11, %v6175_v18, %v5914_v24 }
 0xf79   :  { %v5878_v14 = vpop.permute.xlu0 %5877  ;;  %6110 = vrot.lane.b32.xlu2 %v12168_v17, %s6974_s3 }
 0xf7a   :  { %v6182_v35 = vsel %vm3972_vm11, %v6157_v49, %v5878_v14  ;;  %v14767_v49 = vld [vmem:[#allocation62_spill] sm:$0xff] }
 0xf7f   :  { %5921 = vrot.lane.b32.xlu0 %v12093_v7, %s6973_s2  ;;  %v5675_v9 = vpop.permute.xlu1 %5674 }
 0xf81   :  { %v6085_v37 = vpop.permute.xlu0 %6084 }
 0xf82   :  { %v6208_v61 = vsel %vm6205_vm3, %v6182_v35, %v6085_v37 }
 0xf83   :  { %6835 = vmatmul.msk.f32.gmra.mxu1 %vm6235_vm4, %v6208_v61 }
 0xf87   :  { %5889 = vrot.lane.b32.xlu0 %v11981_v21, %s6973_s2  ;;  %v5709_v42 = vpop.permute.xlu1 %5708 }
 0xf89   :  { %v6119_v23 = vpop.permute.xlu0 %6118 }
 0xf8a   :  { %v6225_v17 = vsel %vm6205_vm3, %v6199_v11, %v6119_v23  ;;  %v14768_v23 = vld [vmem:[#allocation225_spill] sm:$0xff] }
 0xf8f   :  { %5891 = vrot.lane.b32.xlu0 %v12041_v31, %s6973_s2  ;;  %v5916_v27 = vpop.permute.xlu1 %5915 }
 0xf91   :  { %v5880_v7 = vpop.permute.xlu0 %5879 }
 0xf92   :  { %v6183_v45 = vsel %vm3972_vm11, %v6158_v3, %v5880_v7 }
 0xf97   :  { %5893 = vrot.lane.b32.xlu0 %v12000_v39, %s6973_s2  ;;  %v14760_v39 = vld [vmem:[#allocation54_spill] sm:$0xff]  ;;  %v5677_v29 = vpop.permute.xlu1 %5676 }
 0xf98   :  { %v6159_v54 = vsel %vm3924_vm9, %v14760_v39, %v5675_v9 }
 0xf99   :  { %v6087_v32 = vpop.permute.xlu0 %6086 }
 0xf9a   :  { %v6209_v21 = vsel %vm6205_vm3, %v6183_v45, %v6087_v32  ;;  %v6330_v34 = vpop.f32.mrf.mxu1 }
 0xf9b   :  { %6836 = vmatmul.msk.f32.gmra.mxu1 %vm6235_vm4, %v6209_v21  ;;  %6426 = vxpose.xlu1.b32.start [1/16] (narrow) %v6330_v34, 8  ;;  %v14769_v21 = vld [vmem:[#allocation224_spill] sm:$0xff] }
 0xf9f   :  { %5895 = vrot.lane.b32.xlu0 %v12046_v59, %s6973_s2  ;;  %v5711_v59 = vpop.permute.xlu2 %5710  ;;  %v6091_v36 = vpop.permute.xlu1 %6090 }
 0xfa0   :  { %v6177_v2 = vsel %vm3924_vm9, %v14766_v1, %v5711_v59  ;;  %v14776_v1 = vld [vmem:[#allocation226_spill] sm:$0xff] }
 0xfa1   :  { %v5882_v31 = vpop.permute.xlu0 %5881 }
 0xfa2   :  { %v6184_v60 = vsel %vm3972_vm11, %v6159_v54, %v5882_v31 }
 0xfa7   :  { %5897 = vrot.lane.b32.xlu0 %v12007_v52, %s6973_s2  ;;  %v14762_v52 = vld [vmem:[#allocation57_spill] sm:$0xff]  ;;  %v5713_v8 = vpop.permute.xlu2 %5712 }
 0xfa8   :  { %v6160_v6 = vsel %vm3924_vm9, %v14762_v52, %v5677_v29  ;;  %v6178_v35 = vsel %vm3924_vm9, %v14767_v49, %v5713_v8 }
 0xfa9   :  { %v6089_v13 = vpop.permute.xlu0 %6088 }
 0xfaa   :  { %v6210_v41 = vsel %vm6205_vm3, %v6184_v60, %v6089_v13  ;;  %v14770_v13 = vld [vmem:[#allocation222_spill] sm:$0xff] }
 0xfab   :  { %6837 = vmatmul.msk.f32.gmra.mxu1 %vm6235_vm4, %v6210_v41 }
 0xfaf   :  { %5899 = vrot.lane.b32.xlu0 %v12055_v47, %s6973_s2  ;;  %v5679_v47 = vpop.permute.xlu1 %5678  ;;  %v6127_v25 = vpop.permute.xlu2 %6126 }
 0xfb0   :  { %v6161_v43 = vsel %vm3924_vm9, %v14765_v55, %v5679_v47 }
 0xfb1   :  { %v6123_v53 = vpop.permute.xlu0 %6122 }
 0xfb7   :  { %5901 = vrot.lane.b32.xlu0 %v14761_v44, %s6973_s2  ;;  %v6093_v26 = vpop.permute.xlu1 %6092  ;;  %v6125_v40 = vpop.permute.xlu2 %6124  ;;  %v14771_v44 = vmov 0.0  }
 0xfb9   :  { %v5884_v16 = vpop.permute.xlu0 %5883 }
 0xfba   :  { %v6185_v56 = vsel %vm3972_vm11, %v6160_v6, %v5884_v16  ;;  %v14772_v16 = vld [vmem:[#allocation59_spill] sm:$0xff] }
 0xfbb   :  { %v6211_v5 = vsel %vm6205_vm3, %v6185_v56, %v6091_v36 }
 0xfbc   :  { %6838 = vmatmul.msk.f32.gmra.mxu1 %vm6235_vm4, %v6211_v5 }
 0xfbf   :  { %5903 = vrot.lane.b32.xlu0 %v12062_v57, %s6973_s2  ;;  %v5681_v11 = vpop.permute.xlu1 %5680  ;;  %v5715_v63 = vpop.permute.xlu2 %5714 }
 0xfc0   :  { %v6179_v34 = vsel %vm3924_vm9, %v14769_v21, %v5715_v63 }
 0xfc1   :  { %v6117_v58 = vpop.permute.xlu0 %6116 }
 0xfc2   :  { %v6224_v51 = vsel %vm6205_vm3, %v12289_v20, %v6117_v58  ;;  %v14764_v20 = vld [vmem:[#allocation67_spill] sm:$0xff] }
 0xfc3   :  { %6851 = vmatmul.msk.f32.gmra.mxu2 %vm6235_vm4, %v6224_v51  ;;  %v6176_v46 = vsel %vm3924_vm9, %v14764_v20, %v5709_v42  ;;  %v14773_v51 = vld [vmem:[#allocation49_spill] sm:$0xff] }
 0xfc4   :  { %v6201_v38 = vsel %vm3972_vm11, %v6176_v46, %v5916_v27 }
 0xfc5   :  { %v6227_v12 = vsel %vm6205_vm3, %v6201_v38, %v6123_v53  ;;  %v14775_v38 = vld [vmem:[#allocation55_spill] sm:$0xff] }
 0xfc7   :  { %v6095_v33 = vpop.permute.xlu1 %6094  ;;  %v6129_v14 = vpop.permute.xlu2 %6128 }
 0xfc9   :  { %v5918_v48 = vpop.permute.xlu0 %5917 }
 0xfca   :  { %v6202_v62 = vsel %vm3972_vm11, %v6177_v2, %v5918_v48 }
 0xfcb   :  { %6852 = vmatmul.msk.f32.gmra.mxu2 %vm6235_vm4, %v6225_v17  ;;  %v6228_v15 = vsel %vm6205_vm3, %v6202_v62, %v6125_v40  ;;  %v6162_v17 = vsel %vm3924_vm9, %v14768_v23, %v5681_v11 }
 0xfcf   :  { %v5683_v61 = vpop.permute.xlu1 %5682  ;;  %v6097_v42 = vpop.permute.xlu2 %6096 }
 0xfd0   :  { %v6163_v41 = vsel %vm3924_vm9, %v14770_v13, %v5683_v61 }
 0xfd1   :  { %v6121_v28 = vpop.permute.xlu0 %6120 }
 0xfd2   :  { %v6226_v57 = vsel %vm6205_vm3, %v6200_v19, %v6121_v28  ;;  %v14774_v19 = vld [vmem:[#allocation66_spill] sm:$0xff] }
 0xfd3   :  { %6853 = vmatmul.msk.f32.gmra.mxu2 %vm6235_vm4, %v6226_v57 }
 0xfd7   :  { %v5685_v27 = vpop.permute.xlu1 %5684  ;;  %v6099_v60 = vpop.permute.xlu2 %6098 }
 0xfd8   :  { %v6164_v8 = vsel %vm3924_vm9, %v14772_v16, %v5685_v27 }
 0xfd9   :  { %v5886_v50 = vpop.permute.xlu0 %5885 }
 0xfda   :  { %v6186_v22 = vsel %vm3972_vm11, %v6161_v43, %v5886_v50 }
 0xfdb   :  { %6854 = vmatmul.msk.f32.gmra.mxu2 %vm6235_vm4, %v6227_v12  ;;  %v6212_v4 = vsel %vm6205_vm3, %v6186_v22, %v6093_v26 }
 0xfdc   :  { %6839 = vmatmul.msk.f32.gmra.mxu1 %vm6235_vm4, %v6212_v4 }
 0xfdf   :  { %v5687_v36 = vpop.permute.xlu1 %5686  ;;  %v6101_v52 = vpop.permute.xlu2 %6100 }
 0xfe1   :  { %v5920_v30 = vpop.permute.xlu0 %5919 }
 0xfe2   :  { %v6203_v37 = vsel %vm3972_vm11, %v6178_v35, %v5920_v30  ;;  %v14777_v35 = vld [vmem:[#allocation50_spill] sm:$0xff] }
 0xfe3   :  { %6855 = vmatmul.msk.f32.gmra.mxu2 %vm6235_vm4, %v6228_v15  ;;  %v6378_v24 = vpop.f32.mrf.mxu2  ;;  %v6229_v0 = vsel %vm6205_vm3, %v6203_v37, %v6127_v25  ;;  %v6165_v25 = vsel %vm3924_vm9, %v14773_v51, %v5687_v36 }
 0xfe4   :  { %6458 = vxpose.xlu0.b32.start [1/16] (narrow) %v6378_v24, 8 }
 0xfe7   :  { %v5689_v58 = vpop.permute.xlu1 %5688  ;;  %v6103_v26 = vpop.permute.xlu2 %6102 }
 0xfe8   :  { %v6166_v28 = vsel %vm3924_vm9, %v14774_v19, %v5689_v58 }
 0xfe9   :  { %v5888_v9 = vpop.permute.xlu0 %5887 }
 0xfea   :  { %v6187_v7 = vsel %vm3972_vm11, %v6162_v17, %v5888_v9  ;;  %v14778_v9 = vld [vmem:[#allocation61_spill] sm:$0xff] }
 0xfeb   :  { %6856 = vmatmul.msk.f32.gmra.mxu2 %vm6235_vm4, %v6229_v0  ;;  %v6213_v3 = vsel %vm6205_vm3, %v6187_v7, %v6095_v33  ;;  %v6381_v32 = vpop.f32.mrf.mxu2 }
 0xfec   :  { %6840 = vmatmul.msk.f32.gmra.mxu1 %vm6235_vm4, %v6213_v3  ;;  %6459 = vxpose.xlu0.b32.cont [2/16] (narrow) %v6381_v32, 8 }
 0xfef   :  { %v5691_v18 = vpop.permute.xlu1 %5690  ;;  %v6105_v46 = vpop.permute.xlu2 %6104 }
 0xff0   :  { %v6333_v45 = vpop.f32.mrf.mxu1  ;;  %v6167_v55 = vsel %vm3924_vm9, %v14775_v38, %v5691_v18 }
 0xff1   :  { %6427 = vxpose.xlu1.b32.cont [2/16] (narrow) %v6333_v45, 8  ;;  %v5922_v31 = vpop.permute.xlu0 %5921 }
 0xff2   :  { %v6204_v39 = vsel %vm3972_vm11, %v6179_v34, %v5922_v31 }
 0xff3   :  { %v6230_v54 = vsel %vm6205_vm3, %v6204_v39, %v6129_v14 }
 0xff4   :  { %6857 = vmatmul.msk.f32.gmra.mxu2 %vm6235_vm4, %v6230_v54 }
 0xff7   :  { %v5693_v50 = vpop.permute.xlu1 %5692  ;;  %v6107_v4 = vpop.permute.xlu2 %6106 }
 0xff8   :  { %v6168_v2 = vsel %vm3924_vm9, %v14776_v1, %v5693_v50 }
 0xff9   :  { %v5890_v29 = vpop.permute.xlu0 %5889 }
 0xffa   :  { %v6188_v59 = vsel %vm3972_vm11, %v6163_v41, %v5890_v29 }
 0xffb   :  { %v6214_v53 = vsel %vm6205_vm3, %v6188_v59, %v6097_v42 }
 0xffc   :  { %6841 = vmatmul.msk.f32.gmra.mxu1 %vm6235_vm4, %v6214_v53  ;;  %6404 = vmatmul.f32.gmra.mxu2 %v14771_v44 }
 0xfff   :  { %v5695_v14 = vpop.permute.xlu1 %5694  ;;  %v6109_v15 = vpop.permute.xlu2 %6108 }
0x1000   :  { %v6336_v6 = vpop.f32.mrf.mxu1  ;;  %v6169_v37 = vsel %vm3924_vm9, %v14777_v35, %v5695_v14 }
0x1001   :  { %6428 = vxpose.xlu1.b32.cont [3/16] (narrow) %v6336_v6, 8  ;;  %v5892_v56 = vpop.permute.xlu0 %5891 }
0x1002   :  { %v6189_v5 = vsel %vm3972_vm11, %v6164_v8, %v5892_v56 }
0x1003   :  { %v6215_v47 = vsel %vm6205_vm3, %v6189_v5, %v6099_v60 }
0x1004   :  { %6842 = vmatmul.msk.f32.gmra.mxu1 %vm6235_vm4, %v6215_v47  ;;  %6407 = vmatmul.f32.gmra.mxu2 %v14771_v44 }
0x1007   :  { %v5697_v17 = vpop.permute.xlu1 %5696  ;;  %v6111_v3 = vpop.permute.xlu2 %6110 }
0x1008   :  { %v6170_v7 = vsel %vm3924_vm9, %v14778_v9, %v5697_v17 }
0x1009   :  { %v5894_v48 = vpop.permute.xlu0 %5893 }
0x100a   :  { %v6190_v40 = vsel %vm3972_vm11, %v6165_v25, %v5894_v48 }
0x100b   :  { %v6216_v10 = vsel %vm6205_vm3, %v6190_v40, %v6101_v52 }
0x100c   :  { %6843 = vmatmul.msk.f32.gmra.mxu1 %vm6235_vm4, %v6216_v10  ;;  %6410 = vmatmul.f32.gmra.mxu2 %v14771_v44  ;;  %v14779_v10 = vmov 0  }
0x1011   :  { %v5896_v57 = vpop.permute.xlu0 %5895 }
0x1012   :  { %v6191_v11 = vsel %vm3972_vm11, %v6166_v28, %v5896_v57  ;;  %v14780_v28 = vld [vmem:[#allocation53_spill] sm:$0xff] }
0x1013   :  { %v6217_v20 = vsel %vm6205_vm3, %v6191_v11, %v6103_v26  ;;  %vm6497_vm5 = vcmp.lt.s32.totalorder %v14780_v28, 200 }
0x1014   :  { %6844 = vmatmul.msk.f32.gmra.mxu1 %vm6235_vm4, %v6217_v20  ;;  %6413 = vmatmul.f32.gmra.mxu2 %v14771_v44 }
0x1018   :  { %v6339_v63 = vpop.f32.mrf.mxu1 }
0x1019   :  { %6429 = vxpose.xlu1.b32.cont [4/16] (narrow) %v6339_v63, 8  ;;  %v5898_v43 = vpop.permute.xlu0 %5897 }
0x101a   :  { %v6192_v22 = vsel %vm3972_vm11, %v6167_v55, %v5898_v43 }
0x101b   :  { %v6218_v12 = vsel %vm6205_vm3, %v6192_v22, %v6105_v46 }
0x101c   :  { %6845 = vmatmul.msk.f32.gmra.mxu1 %vm6235_vm4, %v6218_v12  ;;  %6416 = vmatmul.f32.gmra.mxu2 %v14771_v44 }
0x1021   :  { %v5900_v33 = vpop.permute.xlu0 %5899 }
0x1022   :  { %v6193_v62 = vsel %vm3972_vm11, %v6168_v2, %v5900_v33 }
0x1023   :  { %v6219_v30 = vsel %vm6205_vm3, %v6193_v62, %v6107_v4  ;;  %v6506_v62 = vld [vmem:[%s12500_s5] sm:$0xff] }
0x1024   :  { %6846 = vmatmul.msk.f32.gmra.mxu1 %vm6235_vm4, %v6219_v30  ;;  %6419 = vmatmul.f32.gmra.mxu2 %v14771_v44 }
0x1028   :  { %v6342_v49 = vpop.f32.mrf.mxu1 }
0x1029   :  { %6430 = vxpose.xlu1.b32.cont [5/16] (narrow) %v6342_v49, 8  ;;  %v5902_v61 = vpop.permute.xlu0 %5901  ;;  %v6519_v49 = vld [vmem:[%s12501_s6] sm:$0xff] }
0x102a   :  { %v6194_v24 = vsel %vm3972_vm11, %v6169_v37, %v5902_v61 }
0x102b   :  { %v6220_v23 = vsel %vm6205_vm3, %v6194_v24, %v6109_v15 }
0x102c   :  { %6847 = vmatmul.msk.f32.gmra.mxu1 %vm6235_vm4, %v6220_v23  ;;  %6422 = vmatmul.f32.gmra.mxu2 %v14771_v44 }
0x1031   :  { %v5904_v0 = vpop.permute.xlu0 %5903 }
0x1032   :  { %v6195_v42 = vsel %vm3972_vm11, %v6170_v7, %v5904_v0 }
0x1033   :  { %v6221_v45 = vsel %vm6205_vm3, %v6195_v42, %v6111_v3 }
0x1034   :  { %6848 = vmatmul.msk.f32.gmra.mxu1 %vm6235_vm4, %v6221_v45 }
0x1039   :  { %v6345_v32 = vpop.f32.mrf.mxu1 }
0x103a   :  { %6431 = vxpose.xlu1.b32.cont [6/16] (narrow) %v6345_v32, 8 }
0x1046   :  { %v6384_v21 = vpop.f32.mrf.mxu2 }
0x1047   :  { %6460 = vxpose.xlu0.b32.cont [3/16] (narrow) %v6384_v21, 8 }
0x104e   :  { %v6387_v34 = vpop.f32.mrf.mxu2 }
0x104f   :  { %6461 = vxpose.xlu0.b32.cont [4/16] (narrow) %v6387_v34, 8 }
0x1056   :  { %v6390_v31 = vpop.f32.mrf.mxu2 }
0x1057   :  { %6462 = vxpose.xlu0.b32.cont [5/16] (narrow) %v6390_v31, 8 }
0x1059   :  { %v6348_v27 = vpop.f32.mrf.mxu1 }
0x105a   :  { %6432 = vxpose.xlu1.b32.cont [7/16] (narrow) %v6348_v27, 8 }
0x105e   :  { %v6393_v39 = vpop.f32.mrf.mxu2 }
0x105f   :  { %6463 = vxpose.xlu0.b32.cont [6/16] (narrow) %v6393_v39, 8 }
0x1066   :  { %v6396_v54 = vpop.f32.mrf.mxu2 }
0x1067   :  { %6464 = vxpose.xlu0.b32.cont [7/16] (narrow) %v6396_v54, 8 }
0x1069   :  { %v6351_v60 = vpop.f32.mrf.mxu1 }
0x106a   :  { %6433 = vxpose.xlu1.b32.cont [8/16] (narrow) %v6351_v60, 8 }
0x106e   :  { %v6399_v13 = vpop.f32.mrf.mxu2 }
0x106f   :  { %6465 = vxpose.xlu0.b32.cont [8/16] (narrow) %v6399_v13, 8 }
0x1077   :  { %v6402_v41 = vpop.f32.mrf.mxu2 }
0x1078   :  { %6466 = vxpose.xlu0.b32.cont [9/16] (narrow) %v6402_v41, 8 }
0x1079   :  { %v6354_v29 = vpop.f32.mrf.mxu1 }
0x107a   :  { %6434 = vxpose.xlu1.b32.cont [9/16] (narrow) %v6354_v29, 8 }
0x107f   :  { %v6405_v59 = vpop.f32.mrf.mxu2 }
0x1080   :  { %6467 = vxpose.xlu0.b32.cont [10/16] (narrow) %v6405_v59, 8 }
0x1081   :  { %v6357_v53 = vpop.f32.mrf.mxu1 }
0x1082   :  { %6435 = vxpose.xlu1.b32.cont [10/16] (narrow) %v6357_v53, 8 }
0x1087   :  { %v6408_v36 = vpop.f32.mrf.mxu2 }
0x1088   :  { %6468 = vxpose.xlu0.b32.cont [11/16] (narrow) %v6408_v36, 8 }
0x1089   :  { %v6360_v44 = vpop.f32.mrf.mxu1 }
0x108a   :  { %6436 = vxpose.xlu1.b32.cont [11/16] (narrow) %v6360_v44, 8 }
0x108f   :  { %v6411_v52 = vpop.f32.mrf.mxu2 }
0x1090   :  { %6469 = vxpose.xlu0.b32.cont [12/16] (narrow) %v6411_v52, 8 }
0x1091   :  { %v6363_v6 = vpop.f32.mrf.mxu1 }
0x1092   :  { %6437 = vxpose.xlu1.b32.cont [12/16] (narrow) %v6363_v6, 8 }
0x1097   :  { %v6414_v16 = vpop.f32.mrf.mxu2 }
0x1098   :  { %6470 = vxpose.xlu0.b32.cont [13/16] (narrow) %v6414_v16, 8 }
0x1099   :  { %v6366_v8 = vpop.f32.mrf.mxu1 }
0x109a   :  { %6438 = vxpose.xlu1.b32.cont [13/16] (narrow) %v6366_v8, 8 }
0x109f   :  { %v6417_v56 = vpop.f32.mrf.mxu2 }
0x10a0   :  { %6471 = vxpose.xlu0.b32.cont [14/16] (narrow) %v6417_v56, 8 }
0x10a1   :  { %v6369_v5 = vpop.f32.mrf.mxu1 }
0x10a2   :  { %6439 = vxpose.xlu1.b32.cont [14/16] (narrow) %v6369_v5, 8 }
0x10a7   :  { %v6420_v47 = vpop.f32.mrf.mxu2 }
0x10a8   :  { %6472 = vxpose.xlu0.b32.cont [15/16] (narrow) %v6420_v47, 8 }
0x10a9   :  { %v6372_v58 = vpop.f32.mrf.mxu1 }
0x10aa   :  { %6440 = vxpose.xlu1.b32.cont [15/16] (narrow) %v6372_v58, 8 }
0x10af   :  { %v6423_v51 = vpop.f32.mrf.mxu2 }
0x10b0   :  { %6473 = vxpose.xlu0.b32.end [16/16] (narrow) %v6423_v51, 8 }
0x10b1   :  { %v6375_v25 = vpop.f32.mrf.mxu1 }
0x10b2   :  { %6441 = vxpose.xlu1.b32.end [16/16] (narrow) %v6375_v25, 8 }
0x10dc   :  { %v6474_v48 = vpop.trf.xlu0 }
0x10de   :  { %v6442_v26 = vpop.trf.xlu1 }
0x10df   :  { %v6490_v40 = vadd.f32 %v6474_v48, %v6442_v26 }
0x10e1   :  { %6491 = vadd.xlane.f32.xlu2 %v6490_v40 }
0x1117   :  { %6873 = vset.pattern.permute.xlu0 %v14779_v10 }
0x1154   :  { %v6492_v18 = vpop.xlane.xlu2 %6491 }
0x1155   :  { %v6493_v19 = vmul.f32 0.005, %v6492_v18 }
0x1157   :  { %v6494_v57 = vsub.f32 %v6442_v26, %v6493_v19  ;;  %v6495_v11 = vsub.f32 %v6474_v48, %v6493_v19 }
0x1159   :  { %v6500_v20 = vmul.f32 %v6494_v57, %v6494_v57  ;;  %v6499_v46 = vsel %vm6497_vm5, %v6495_v11, 0.0 }
0x115a   :  { %v6501_v63 = vmul.f32 %v6499_v46, %v6499_v46 }
0x115c   :  { %v6502_v38 = vadd.f32 %v6501_v63, %v6500_v20 }
0x115e   :  { %6503 = vadd.xlane.f32.xlu2 %v6502_v38 }
0x11d1   :  { %v6504_v55 = vpop.xlane.xlu2 %6503 }
0x11d2   :  { %v6505_v43 = vmul.f32 0.005, %v6504_v55 }
0x11d4   :  { %v6507_v50 = vadd.f32 1e-05, %v6505_v43 }
0x11d6   :  { %6876 = vrsqrt.f32 %v6507_v50  ;;  %vm6514_vm7 = vweird.f32 %v6507_v50 }
0x11dc   :  { %v6877_v22 = vpop.eup %6876 }
0x11dd   :  { %v6509_v12 = vmul.f32 %v6877_v22, %v6507_v50  ;;  %vm6515_vm6 = vweird.f32 %v6877_v22 }
0x11de   :  { %vm6516_vm8 = vmor %vm6514_vm7, %vm6515_vm6 }
0x11df   :  { %v6510_v4 = vmul.f32 %v6877_v22, %v6509_v12 }
0x11e1   :  { %v6511_v1 = vmul.f32 0.5, %v6510_v4 }
0x11e3   :  { %v6512_v2 = vsub.f32 1.5, %v6511_v1 }
0x11e5   :  { %v6513_v33 = vmul.f32 %v6877_v22, %v6512_v2 }
0x11e7   :  { %v6517_v30 = vsel %vm6516_vm8, %v6877_v22, %v6513_v33 }
0x11e8   :  { %v6518_v14 = vmul.f32 %v6517_v30, %v6506_v62 }
0x11ea   :  { %6524 = vperm.xlu2 %6872, %v6518_v14   ;;  %v6520_v15 = vmul.f32 %v6518_v14, %v6493_v19 }
0x11ec   :  { %v6521_v35 = vsub.f32 %v6519_v49, %v6520_v15 }
0x11f2   :  { %6531 = vperm.xlu2 %6872, %v6521_v35  }
0x1244   :  { %v6525_v37 = vpop.permute.xlu2 %6524 }
0x1245   :  { %v6527_v61 = vmul.f32 %v6525_v37, %v6442_v26  ;;  %v6528_v24 = vmul.f32 %v6525_v37, %v6474_v48 }
0x124c   :  { %v6532_v23 = vpop.permute.xlu2 %6531 }
0x124d   :  { %v6534_v17 = vadd.f32 %v6532_v23, %v6527_v61  ;;  %v6535_v9 = vadd.f32 %v6532_v23, %v6528_v24 }
0x124f   :  { %v6536_v7 = vmax.f32 %v6534_v17, 0.0  ;;  %v6537_v0 = vmax.f32 %v6535_v9, 0.0 }
0x1251   :  { %6538 = vst [vmem:[#allocation4] sm:$0xff] %v6536_v7 }
0x1252   :  { %6539 = vst [vmem:[#allocation4 + $0x8] sm:$0xff] %v6537_v0 }
0x1253   :  { %6550 = dma.vmem_to_hbm [thread:$0]  %s6546_s25, 256, %s6548_s0, [#allocation5]  }
0x1254   :  { %6966 = dma.done.wait [#allocation5], 256  }
0x1255   :  { %6967 = vsyncadd [#allocation5], 4294967040 }
0x1256   :  { %6555 = vsyncpa [#allocation5], 1 }

</bundles_post_ra>
